<compile_context>
chip_gen: v7x
topology: tpu7x:2x2x1
jax: 0.10.0
libtpu: 0.0.40
codegen_flags: <defaults>
</compile_context>

<pallas_src>
import functools

import jax
import jax.numpy as jnp
from jax import lax
from jax.experimental import pallas as pl
from jax.experimental.pallas import tpu as pltpu

LANE = 128      # channel padding target (TPU lane width)
COL_OFF = 8     # sublane-aligned column offset of the image inside the padded scratch


# ----------------------------------------------------------------------------
# Fused backbone kernel: all conv3x3+bias+ReLU layers for one batch element.
# Grid = (N,); everything else (layers, taps) is unrolled inside the body.
# ----------------------------------------------------------------------------
def _backbone_kernel(x_ref, w_ref, b_ref, *refs,
                     H, W, cpad, n_layers, extract_at, n_out):
    out_refs = refs[:n_out]
    pad_ref = refs[n_out]   # VMEM scratch (H+2, W+2*COL_OFF, cpad) f32, zero border

    # Zero the padded scratch (border must be zero; done every step so the
    # kernel is correct under megacore grid splitting), then drop the input
    # image into the interior at a sublane-aligned column offset.
    pad_ref[...] = jnp.zeros_like(pad_ref)
    pad_ref[pl.ds(1, H), pl.ds(COL_OFF, W), :] = x_ref[0]

    out_k = 0
    for li in range(n_layers):
        # 3x3 conv as 9 shifted (H*W, cpad) x (cpad, cpad) MXU matmuls,
        # unrolled in one grid step, accumulated in f32.
        acc = jnp.zeros((H * W, cpad), jnp.float32)
        for t in range(9):
            dy, dx = divmod(t, 3)
            patch = pad_ref[pl.ds(dy, H), pl.ds(COL_OFF - 1 + dx, W), :]
            patch = patch.reshape(H * W, cpad).astype(jnp.bfloat16)
            acc = acc + jnp.dot(patch, w_ref[li, t],
                                preferred_element_type=jnp.float32)

        # f32 epilogue: bias + ReLU.
        y = jnp.maximum(acc + b_ref[li], 0.0)                 # (H*W, cpad) f32

        if li in extract_at:
            out_refs[out_k][...] = y.reshape(1, H * W, cpad)  # lane-dense store
            out_k += 1

        if li < n_layers - 1:
            # keep activation resident in VMEM for the next layer
            pad_ref[pl.ds(1, H), pl.ds(COL_OFF, W), :] = y.reshape(H, W, cpad)


def fused_backbone_pallas(x_nhwc, layers, extract_at):
    """Runs all conv blocks in one pallas_call.

    x_nhwc: (N, H, W, Cin) f32.  layers: flat list of {"w_taps": (9,ci,co),
    "b": (co,)}.  extract_at: flat layer indices whose activations are
    returned (as NCHW, real channel count)."""
    N, H, W, Cin = x_nhwc.shape
    L = len(layers)
    n_out = len(extract_at)
    cpad = LANE

    # Channel-pad input and pack all layers' weights/biases into lane-dense,
    # zero-padded slabs (padded channels stay exactly zero through the net).
    xp = jnp.zeros((N, H, W, cpad), jnp.float32).at[..., :Cin].set(x_nhwc)
    w = jnp.zeros((L, 9, cpad, cpad), jnp.bfloat16)
    b = jnp.zeros((L, 1, cpad), jnp.float32)
    for i, p in enumerate(layers):
        ci, co = p["w_taps"].shape[1], p["w_taps"].shape[2]
        w = w.at[i, :, :ci, :co].set(p["w_taps"].astype(jnp.bfloat16))
        b = b.at[i, 0, :co].set(p["b"])

    kernel = functools.partial(
        _backbone_kernel, H=H, W=W, cpad=cpad, n_layers=L,
        extract_at=tuple(extract_at), n_out=n_out)

    out_shapes = tuple(
        jax.ShapeDtypeStruct((N, H * W, cpad), jnp.float32)
        for _ in range(n_out))

    outs = pl.pallas_call(
        kernel,
        out_shape=out_shapes,
        grid_spec=pltpu.PrefetchScalarGridSpec(
            num_scalar_prefetch=0,
            grid=(N,),
            in_specs=[
                pl.BlockSpec((1, H, W, cpad), lambda n: (n, 0, 0, 0)),
                pl.BlockSpec((L, 9, cpad, cpad), lambda n: (0, 0, 0, 0)),
                pl.BlockSpec((L, 1, cpad), lambda n: (0, 0, 0)),
            ],
            out_specs=tuple(
                pl.BlockSpec((1, H * W, cpad), lambda n: (n, 0, 0))
                for _ in range(n_out)),
            scratch_shapes=[
                pltpu.VMEM((H + 2, W + 2 * COL_OFF, cpad), jnp.float32)],
        ),
        compiler_params=pltpu.CompilerParams(
            dimension_semantics=("parallel",)),
    )(xp, w, b)

    results = []
    for o, li in zip(outs, extract_at):
        co = layers[li]["w_taps"].shape[2]
        r = o.reshape(N, H, W, cpad)[..., :co]            # drop lane padding
        results.append(jnp.transpose(r, (0, 3, 1, 2)))    # NHWC -> NCHW
    return results


# ----------------------------------------------------------------------------
# Deterministic synthetic "submodule": conv stem + layer1/layer2 of conv blocks
# (mirrors the structure the PyTorch FeatureExtractor iterates over).
# ----------------------------------------------------------------------------
def _init_conv(key, cin, cout):
    kw, kb = jax.random.split(key)
    wgt = jax.random.normal(kw, (3, 3, cin, cout), jnp.float32) * (1.0 / (3.0 * cin) ** 0.5)
    bias = jax.random.normal(kb, (cout,), jnp.float32) * 0.01
    return {"w_taps": wgt.reshape(9, cin, cout), "w_hwio": wgt, "b": bias}


def build_submodule(key):
    keys = jax.random.split(key, 5)
    return [
        ("conv1", {"_": _init_conv(keys[0], 4, 8)}),
        ("layer1", {"0": _init_conv(keys[1], 8, 8),
                    "1": _init_conv(keys[2], 8, 8)}),
        ("layer2", {"0": _init_conv(keys[3], 8, 16),
                    "1": _init_conv(keys[4], 16, 16)}),
    ]


def feature_extractor_forward(submodule, extracted_layers, x_nchw):
    """Mirrors FeatureExtractor.forward (NCHW in/out like PyTorch); all conv
    blocks run in ONE fused Pallas kernel."""
    layers, extract_at = [], []
    for name, module1 in submodule:
        if "layer" in name:
            for block_name, cnn_block in module1.items():
                layers.append(cnn_block)
                if block_name in extracted_layers:
                    extract_at.append(len(layers) - 1)
                # embed()  -- interactive IPython hook, skipped (see TODO above)
        else:
            for _, block in module1.items():
                layers.append(block)
    if not extract_at:
        return []
    x_nhwc = jnp.transpose(x_nchw, (0, 2, 3, 1))
    return fused_backbone_pallas(x_nhwc, layers, extract_at)


# ----------------------------------------------------------------------------
# Pure-JAX reference (same bf16 operand rounding, f32 accumulation/epilogue).
# ----------------------------------------------------------------------------
def feature_extractor_reference(submodule, extracted_layers, x_nchw):
    def apply(x, p):
        xb = x.astype(jnp.bfloat16).astype(jnp.float32)
        wb = p["w_hwio"].astype(jnp.bfloat16).astype(jnp.float32)
        y = lax.conv_general_dilated(
            xb, wb, window_strides=(1, 1), padding="SAME",
            dimension_numbers=("NHWC", "HWIO", "NHWC"))
        return jnp.maximum(y + p["b"], 0.0)

    x = jnp.transpose(x_nchw, (0, 2, 3, 1))
    outputs = []
    for name, module1 in submodule:
        if "layer" in name:
            for block_name, cnn_block in module1.items():
                x = apply(x, cnn_block)
                if block_name in extracted_layers:
                    outputs.append(jnp.transpose(x, (0, 3, 1, 2)))
        else:
            for _, block in module1.items():
                x = apply(x, block)
    return outputs


if __name__ == "__main__":
    key = jax.random.PRNGKey(0)
    k_in, k_params = jax.random.split(key)

    # Small shapes: batch=2, channels=4, spatial=16x16 (NCHW, like PyTorch).
    x = jax.random.normal(k_in, (2, 4, 16, 16), jnp.float32)

    submodule = build_submodule(k_params)
    extracted_layers = ["1"]   # grab the last block of layer1 and of layer2

    outs = feature_extractor_forward(submodule, extracted_layers, x)
    outs = [jax.block_until_ready(o) for o in outs]

    refs = feature_extractor_reference(submodule, extracted_layers, x)
    assert len(outs) == len(refs), (len(outs), len(refs))
    for o, r in zip(outs, refs):
        assert o.shape == r.shape, (o.shape, r.shape)
        max_diff = float(jnp.max(jnp.abs(o - r)))
        assert jnp.allclose(o, r, atol=1e-2, rtol=1e-2), f"mismatch: {max_diff}"

    print("KERNEL_OK")
</pallas_src>

<mosaic_0001>
module attributes {stable_mosaic.version = 11 : i64} {
  func.func @_backbone_kernel(%arg0: i32, %arg1: memref<1x16x16x128xf32, #tpu.memory_space<vmem>>, %arg2: memref<5x9x128x128xbf16, #tpu.memory_space<vmem>>, %arg3: memref<5x1x128xf32, #tpu.memory_space<vmem>>, %arg4: memref<1x256x128xf32, #tpu.memory_space<vmem>>, %arg5: memref<1x256x128xf32, #tpu.memory_space<vmem>>, %arg6: memref<18x32x128xf32, #tpu.memory_space<vmem>>) attributes {dimension_semantics = [#tpu.dimension_semantics<parallel>], iteration_bounds = array<i64: 2>, scalar_prefetch = 0 : i64, scratch_operands = 1 : i64, tpu.core_type = #tpu.core_type<tc>, window_params = [{transform_indices = @transform_0, window_bounds = array<i64: 1, 16, 16, 128>}, {pipeline_mode = #tpu.pipeline_mode<synchronous>, transform_indices = @transform_1, window_bounds = array<i64: 5, 9, 128, 128>}, {pipeline_mode = #tpu.pipeline_mode<synchronous>, transform_indices = @transform_2, window_bounds = array<i64: 5, 1, 128>}, {transform_indices = @transform_3, window_bounds = array<i64: 1, 256, 128>}, {transform_indices = @transform_4, window_bounds = array<i64: 1, 256, 128>}]} {
    %cst = arith.constant 0.000000e+00 : f32
    %0 = vector.broadcast %cst : f32 to vector<18x32x128xf32>
    %c0 = arith.constant 0 : index
    %c0_0 = arith.constant 0 : index
    %c0_1 = arith.constant 0 : index
    %1 = vector.load %arg6[%c0, %c0_0, %c0_1] : memref<18x32x128xf32, #tpu.memory_space<vmem>>, vector<18x32x128xf32>
    tpu.vector_store %arg6[%c0, %c0_0, %c0_1], %0 {strides = array<i32>} : memref<18x32x128xf32, #tpu.memory_space<vmem>>, vector<18x32x128xf32>,
    %c0_2 = arith.constant 0 : index
    %c0_3 = arith.constant 0 : index
    %c0_4 = arith.constant 0 : index
    %c0_5 = arith.constant 0 : index
    %2 = vector.load %arg1[%c0_2, %c0_3, %c0_4, %c0_5] : memref<1x16x16x128xf32, #tpu.memory_space<vmem>>, vector<1x16x16x128xf32>
    %3 = vector.shape_cast %2 : vector<1x16x16x128xf32> to vector<16x16x128xf32>
    %c1 = arith.constant 1 : index
    %c8 = arith.constant 8 : index
    %c0_6 = arith.constant 0 : index
    %4 = vector.load %arg6[%c1, %c8, %c0_6] : memref<18x32x128xf32, #tpu.memory_space<vmem>>, vector<16x16x128xf32>
    tpu.vector_store %arg6[%c1, %c8, %c0_6], %3 {strides = array<i32>} : memref<18x32x128xf32, #tpu.memory_space<vmem>>, vector<16x16x128xf32>,
    %cst_7 = arith.constant 0.000000e+00 : f32
    %5 = vector.broadcast %cst_7 : f32 to vector<256x128xf32>
    %c0_8 = arith.constant 0 : index
    %c7 = arith.constant 7 : index
    %c0_9 = arith.constant 0 : index
    %6 = vector.load %arg6[%c0_8, %c7, %c0_9] : memref<18x32x128xf32, #tpu.memory_space<vmem>>, vector<16x16x128xf32>
    %7 = vector.shape_cast %6 : vector<16x16x128xf32> to vector<256x128xf32>
    %8 = arith.truncf %7 : vector<256x128xf32> to vector<256x128xbf16>
    %c0_10 = arith.constant 0 : index
    %c0_11 = arith.constant 0 : index
    %c0_12 = arith.constant 0 : index
    %c0_13 = arith.constant 0 : index
    %9 = vector.load %arg2[%c0_10, %c0_11, %c0_12, %c0_13] : memref<5x9x128x128xbf16, #tpu.memory_space<vmem>>, vector<1x1x128x128xbf16>
    %10 = vector.shape_cast %9 : vector<1x1x128x128xbf16> to vector<128x128xbf16>
    %cst_14 = arith.constant dense<0.000000e+00> : vector<256x128xf32>
    %11 = tpu.matmul %8, %10, %cst_14 {dimension_numbers = #tpu.dot_dimension_numbers<[1], [0], [0], [1], [0, 0, 1, 1], [], []>} : vector<256x128xbf16>, vector<128x128xbf16>, vector<256x128xf32> -> vector<256x128xf32>
    %12 = arith.addf %5, %11 : vector<256x128xf32>
    %c0_15 = arith.constant 0 : index
    %c8_16 = arith.constant 8 : index
    %c0_17 = arith.constant 0 : index
    %13 = vector.load %arg6[%c0_15, %c8_16, %c0_17] : memref<18x32x128xf32, #tpu.memory_space<vmem>>, vector<16x16x128xf32>
    %14 = vector.shape_cast %13 : vector<16x16x128xf32> to vector<256x128xf32>
    %15 = arith.truncf %14 : vector<256x128xf32> to vector<256x128xbf16>
    %c0_18 = arith.constant 0 : index
    %c1_19 = arith.constant 1 : index
    %c0_20 = arith.constant 0 : index
    %c0_21 = arith.constant 0 : index
    %16 = vector.load %arg2[%c0_18, %c1_19, %c0_20, %c0_21] : memref<5x9x128x128xbf16, #tpu.memory_space<vmem>>, vector<1x1x128x128xbf16>
    %17 = vector.shape_cast %16 : vector<1x1x128x128xbf16> to vector<128x128xbf16>
    %cst_22 = arith.constant dense<0.000000e+00> : vector<256x128xf32>
    %18 = tpu.matmul %15, %17, %cst_22 {dimension_numbers = #tpu.dot_dimension_numbers<[1], [0], [0], [1], [0, 0, 1, 1], [], []>} : vector<256x128xbf16>, vector<128x128xbf16>, vector<256x128xf32> -> vector<256x128xf32>
    %19 = arith.addf %12, %18 : vector<256x128xf32>
    %c0_23 = arith.constant 0 : index
    %c9 = arith.constant 9 : index
    %c0_24 = arith.constant 0 : index
    %20 = vector.load %arg6[%c0_23, %c9, %c0_24] : memref<18x32x128xf32, #tpu.memory_space<vmem>>, vector<16x16x128xf32>
    %21 = vector.shape_cast %20 : vector<16x16x128xf32> to vector<256x128xf32>
    %22 = arith.truncf %21 : vector<256x128xf32> to vector<256x128xbf16>
    %c0_25 = arith.constant 0 : index
    %c2 = arith.constant 2 : index
    %c0_26 = arith.constant 0 : index
    %c0_27 = arith.constant 0 : index
    %23 = vector.load %arg2[%c0_25, %c2, %c0_26, %c0_27] : memref<5x9x128x128xbf16, #tpu.memory_space<vmem>>, vector<1x1x128x128xbf16>
    %24 = vector.shape_cast %23 : vector<1x1x128x128xbf16> to vector<128x128xbf16>
    %cst_28 = arith.constant dense<0.000000e+00> : vector<256x128xf32>
    %25 = tpu.matmul %22, %24, %cst_28 {dimension_numbers = #tpu.dot_dimension_numbers<[1], [0], [0], [1], [0, 0, 1, 1], [], []>} : vector<256x128xbf16>, vector<128x128xbf16>, vector<256x128xf32> -> vector<256x128xf32>
    %26 = arith.addf %19, %25 : vector<256x128xf32>
    %c1_29 = arith.constant 1 : index
    %c7_30 = arith.constant 7 : index
    %c0_31 = arith.constant 0 : index
    %27 = vector.load %arg6[%c1_29, %c7_30, %c0_31] : memref<18x32x128xf32, #tpu.memory_space<vmem>>, vector<16x16x128xf32>
    %28 = vector.shape_cast %27 : vector<16x16x128xf32> to vector<256x128xf32>
    %29 = arith.truncf %28 : vector<256x128xf32> to vector<256x128xbf16>
    %c0_32 = arith.constant 0 : index
    %c3 = arith.constant 3 : index
    %c0_33 = arith.constant 0 : index
    %c0_34 = arith.constant 0 : index
    %30 = vector.load %arg2[%c0_32, %c3, %c0_33, %c0_34] : memref<5x9x128x128xbf16, #tpu.memory_space<vmem>>, vector<1x1x128x128xbf16>
    %31 = vector.shape_cast %30 : vector<1x1x128x128xbf16> to vector<128x128xbf16>
    %cst_35 = arith.constant dense<0.000000e+00> : vector<256x128xf32>
    %32 = tpu.matmul %29, %31, %cst_35 {dimension_numbers = #tpu.dot_dimension_numbers<[1], [0], [0], [1], [0, 0, 1, 1], [], []>} : vector<256x128xbf16>, vector<128x128xbf16>, vector<256x128xf32> -> vector<256x128xf32>
    %33 = arith.addf %26, %32 : vector<256x128xf32>
    %c1_36 = arith.constant 1 : index
    %c8_37 = arith.constant 8 : index
    %c0_38 = arith.constant 0 : index
    %34 = vector.load %arg6[%c1_36, %c8_37, %c0_38] : memref<18x32x128xf32, #tpu.memory_space<vmem>>, vector<16x16x128xf32>
    %35 = vector.shape_cast %34 : vector<16x16x128xf32> to vector<256x128xf32>
    %36 = arith.truncf %35 : vector<256x128xf32> to vector<256x128xbf16>
    %c0_39 = arith.constant 0 : index
    %c4 = arith.constant 4 : index
    %c0_40 = arith.constant 0 : index
    %c0_41 = arith.constant 0 : index
    %37 = vector.load %arg2[%c0_39, %c4, %c0_40, %c0_41] : memref<5x9x128x128xbf16, #tpu.memory_space<vmem>>, vector<1x1x128x128xbf16>
    %38 = vector.shape_cast %37 : vector<1x1x128x128xbf16> to vector<128x128xbf16>
    %cst_42 = arith.constant dense<0.000000e+00> : vector<256x128xf32>
    %39 = tpu.matmul %36, %38, %cst_42 {dimension_numbers = #tpu.dot_dimension_numbers<[1], [0], [0], [1], [0, 0, 1, 1], [], []>} : vector<256x128xbf16>, vector<128x128xbf16>, vector<256x128xf32> -> vector<256x128xf32>
    %40 = arith.addf %33, %39 : vector<256x128xf32>
    %c1_43 = arith.constant 1 : index
    %c9_44 = arith.constant 9 : index
    %c0_45 = arith.constant 0 : index
    %41 = vector.load %arg6[%c1_43, %c9_44, %c0_45] : memref<18x32x128xf32, #tpu.memory_space<vmem>>, vector<16x16x128xf32>
    %42 = vector.shape_cast %41 : vector<16x16x128xf32> to vector<256x128xf32>
    %43 = arith.truncf %42 : vector<256x128xf32> to vector<256x128xbf16>
    %c0_46 = arith.constant 0 : index
    %c5 = arith.constant 5 : index
    %c0_47 = arith.constant 0 : index
    %c0_48 = arith.constant 0 : index
    %44 = vector.load %arg2[%c0_46, %c5, %c0_47, %c0_48] : memref<5x9x128x128xbf16, #tpu.memory_space<vmem>>, vector<1x1x128x128xbf16>
    %45 = vector.shape_cast %44 : vector<1x1x128x128xbf16> to vector<128x128xbf16>
    %cst_49 = arith.constant dense<0.000000e+00> : vector<256x128xf32>
    %46 = tpu.matmul %43, %45, %cst_49 {dimension_numbers = #tpu.dot_dimension_numbers<[1], [0], [0], [1], [0, 0, 1, 1], [], []>} : vector<256x128xbf16>, vector<128x128xbf16>, vector<256x128xf32> -> vector<256x128xf32>
    %47 = arith.addf %40, %46 : vector<256x128xf32>
    %c2_50 = arith.constant 2 : index
    %c7_51 = arith.constant 7 : index
    %c0_52 = arith.constant 0 : index
    %48 = vector.load %arg6[%c2_50, %c7_51, %c0_52] : memref<18x32x128xf32, #tpu.memory_space<vmem>>, vector<16x16x128xf32>
    %49 = vector.shape_cast %48 : vector<16x16x128xf32> to vector<256x128xf32>
    %50 = arith.truncf %49 : vector<256x128xf32> to vector<256x128xbf16>
    %c0_53 = arith.constant 0 : index
    %c6 = arith.constant 6 : index
    %c0_54 = arith.constant 0 : index
    %c0_55 = arith.constant 0 : index
    %51 = vector.load %arg2[%c0_53, %c6, %c0_54, %c0_55] : memref<5x9x128x128xbf16, #tpu.memory_space<vmem>>, vector<1x1x128x128xbf16>
    %52 = vector.shape_cast %51 : vector<1x1x128x128xbf16> to vector<128x128xbf16>
    %cst_56 = arith.constant dense<0.000000e+00> : vector<256x128xf32>
    %53 = tpu.matmul %50, %52, %cst_56 {dimension_numbers = #tpu.dot_dimension_numbers<[1], [0], [0], [1], [0, 0, 1, 1], [], []>} : vector<256x128xbf16>, vector<128x128xbf16>, vector<256x128xf32> -> vector<256x128xf32>
    %54 = arith.addf %47, %53 : vector<256x128xf32>
    %c2_57 = arith.constant 2 : index
    %c8_58 = arith.constant 8 : index
    %c0_59 = arith.constant 0 : index
    %55 = vector.load %arg6[%c2_57, %c8_58, %c0_59] : memref<18x32x128xf32, #tpu.memory_space<vmem>>, vector<16x16x128xf32>
    %56 = vector.shape_cast %55 : vector<16x16x128xf32> to vector<256x128xf32>
    %57 = arith.truncf %56 : vector<256x128xf32> to vector<256x128xbf16>
    %c0_60 = arith.constant 0 : index
    %c7_61 = arith.constant 7 : index
    %c0_62 = arith.constant 0 : index
    %c0_63 = arith.constant 0 : index
    %58 = vector.load %arg2[%c0_60, %c7_61, %c0_62, %c0_63] : memref<5x9x128x128xbf16, #tpu.memory_space<vmem>>, vector<1x1x128x128xbf16>
    %59 = vector.shape_cast %58 : vector<1x1x128x128xbf16> to vector<128x128xbf16>
    %cst_64 = arith.constant dense<0.000000e+00> : vector<256x128xf32>
    %60 = tpu.matmul %57, %59, %cst_64 {dimension_numbers = #tpu.dot_dimension_numbers<[1], [0], [0], [1], [0, 0, 1, 1], [], []>} : vector<256x128xbf16>, vector<128x128xbf16>, vector<256x128xf32> -> vector<256x128xf32>
    %61 = arith.addf %54, %60 : vector<256x128xf32>
    %c2_65 = arith.constant 2 : index
    %c9_66 = arith.constant 9 : index
    %c0_67 = arith.constant 0 : index
    %62 = vector.load %arg6[%c2_65, %c9_66, %c0_67] : memref<18x32x128xf32, #tpu.memory_space<vmem>>, vector<16x16x128xf32>
    %63 = vector.shape_cast %62 : vector<16x16x128xf32> to vector<256x128xf32>
    %64 = arith.truncf %63 : vector<256x128xf32> to vector<256x128xbf16>
    %c0_68 = arith.constant 0 : index
    %c8_69 = arith.constant 8 : index
    %c0_70 = arith.constant 0 : index
    %c0_71 = arith.constant 0 : index
    %65 = vector.load %arg2[%c0_68, %c8_69, %c0_70, %c0_71] : memref<5x9x128x128xbf16, #tpu.memory_space<vmem>>, vector<1x1x128x128xbf16>
    %66 = vector.shape_cast %65 : vector<1x1x128x128xbf16> to vector<128x128xbf16>
    %cst_72 = arith.constant dense<0.000000e+00> : vector<256x128xf32>
    %67 = tpu.matmul %64, %66, %cst_72 {dimension_numbers = #tpu.dot_dimension_numbers<[1], [0], [0], [1], [0, 0, 1, 1], [], []>} : vector<256x128xbf16>, vector<128x128xbf16>, vector<256x128xf32> -> vector<256x128xf32>
    %68 = arith.addf %61, %67 : vector<256x128xf32>
    %c0_73 = arith.constant 0 : index
    %c0_74 = arith.constant 0 : index
    %c0_75 = arith.constant 0 : index
    %69 = vector.load %arg3[%c0_73, %c0_74, %c0_75] : memref<5x1x128xf32, #tpu.memory_space<vmem>>, vector<1x1x128xf32>
    %70 = vector.shape_cast %69 : vector<1x1x128xf32> to vector<1x128xf32>
    %71 = vector.broadcast %70 : vector<1x128xf32> to vector<256x128xf32>
    %72 = arith.addf %68, %71 : vector<256x128xf32>
    %cst_76 = arith.constant 0.000000e+00 : f32
    %73 = vector.broadcast %cst_76 : f32 to vector<256x128xf32>
    %74 = arith.maximumf %72, %73 : vector<256x128xf32>
    %75 = vector.shape_cast %74 : vector<256x128xf32> to vector<16x16x128xf32>
    %c1_77 = arith.constant 1 : index
    %c8_78 = arith.constant 8 : index
    %c0_79 = arith.constant 0 : index
    %76 = vector.load %arg6[%c1_77, %c8_78, %c0_79] : memref<18x32x128xf32, #tpu.memory_space<vmem>>, vector<16x16x128xf32>
    tpu.vector_store %arg6[%c1_77, %c8_78, %c0_79], %75 {strides = array<i32>} : memref<18x32x128xf32, #tpu.memory_space<vmem>>, vector<16x16x128xf32>,
    %cst_80 = arith.constant 0.000000e+00 : f32
    %77 = vector.broadcast %cst_80 : f32 to vector<256x128xf32>
    %c0_81 = arith.constant 0 : index
    %c7_82 = arith.constant 7 : index
    %c0_83 = arith.constant 0 : index
    %78 = vector.load %arg6[%c0_81, %c7_82, %c0_83] : memref<18x32x128xf32, #tpu.memory_space<vmem>>, vector<16x16x128xf32>
    %79 = vector.shape_cast %78 : vector<16x16x128xf32> to vector<256x128xf32>
    %80 = arith.truncf %79 : vector<256x128xf32> to vector<256x128xbf16>
    %c1_84 = arith.constant 1 : index
    %c0_85 = arith.constant 0 : index
    %c0_86 = arith.constant 0 : index
    %c0_87 = arith.constant 0 : index
    %81 = vector.load %arg2[%c1_84, %c0_85, %c0_86, %c0_87] : memref<5x9x128x128xbf16, #tpu.memory_space<vmem>>, vector<1x1x128x128xbf16>
    %82 = vector.shape_cast %81 : vector<1x1x128x128xbf16> to vector<128x128xbf16>
    %cst_88 = arith.constant dense<0.000000e+00> : vector<256x128xf32>
    %83 = tpu.matmul %80, %82, %cst_88 {dimension_numbers = #tpu.dot_dimension_numbers<[1], [0], [0], [1], [0, 0, 1, 1], [], []>} : vector<256x128xbf16>, vector<128x128xbf16>, vector<256x128xf32> -> vector<256x128xf32>
    %84 = arith.addf %77, %83 : vector<256x128xf32>
    %c0_89 = arith.constant 0 : index
    %c8_90 = arith.constant 8 : index
    %c0_91 = arith.constant 0 : index
    %85 = vector.load %arg6[%c0_89, %c8_90, %c0_91] : memref<18x32x128xf32, #tpu.memory_space<vmem>>, vector<16x16x128xf32>
    %86 = vector.shape_cast %85 : vector<16x16x128xf32> to vector<256x128xf32>
    %87 = arith.truncf %86 : vector<256x128xf32> to vector<256x128xbf16>
    %c1_92 = arith.constant 1 : index
    %c1_93 = arith.constant 1 : index
    %c0_94 = arith.constant 0 : index
    %c0_95 = arith.constant 0 : index
    %88 = vector.load %arg2[%c1_92, %c1_93, %c0_94, %c0_95] : memref<5x9x128x128xbf16, #tpu.memory_space<vmem>>, vector<1x1x128x128xbf16>
    %89 = vector.shape_cast %88 : vector<1x1x128x128xbf16> to vector<128x128xbf16>
    %cst_96 = arith.constant dense<0.000000e+00> : vector<256x128xf32>
    %90 = tpu.matmul %87, %89, %cst_96 {dimension_numbers = #tpu.dot_dimension_numbers<[1], [0], [0], [1], [0, 0, 1, 1], [], []>} : vector<256x128xbf16>, vector<128x128xbf16>, vector<256x128xf32> -> vector<256x128xf32>
    %91 = arith.addf %84, %90 : vector<256x128xf32>
    %c0_97 = arith.constant 0 : index
    %c9_98 = arith.constant 9 : index
    %c0_99 = arith.constant 0 : index
    %92 = vector.load %arg6[%c0_97, %c9_98, %c0_99] : memref<18x32x128xf32, #tpu.memory_space<vmem>>, vector<16x16x128xf32>
    %93 = vector.shape_cast %92 : vector<16x16x128xf32> to vector<256x128xf32>
    %94 = arith.truncf %93 : vector<256x128xf32> to vector<256x128xbf16>
    %c1_100 = arith.constant 1 : index
    %c2_101 = arith.constant 2 : index
    %c0_102 = arith.constant 0 : index
    %c0_103 = arith.constant 0 : index
    %95 = vector.load %arg2[%c1_100, %c2_101, %c0_102, %c0_103] : memref<5x9x128x128xbf16, #tpu.memory_space<vmem>>, vector<1x1x128x128xbf16>
    %96 = vector.shape_cast %95 : vector<1x1x128x128xbf16> to vector<128x128xbf16>
    %cst_104 = arith.constant dense<0.000000e+00> : vector<256x128xf32>
    %97 = tpu.matmul %94, %96, %cst_104 {dimension_numbers = #tpu.dot_dimension_numbers<[1], [0], [0], [1], [0, 0, 1, 1], [], []>} : vector<256x128xbf16>, vector<128x128xbf16>, vector<256x128xf32> -> vector<256x128xf32>
    %98 = arith.addf %91, %97 : vector<256x128xf32>
    %c1_105 = arith.constant 1 : index
    %c7_106 = arith.constant 7 : index
    %c0_107 = arith.constant 0 : index
    %99 = vector.load %arg6[%c1_105, %c7_106, %c0_107] : memref<18x32x128xf32, #tpu.memory_space<vmem>>, vector<16x16x128xf32>
    %100 = vector.shape_cast %99 : vector<16x16x128xf32> to vector<256x128xf32>
    %101 = arith.truncf %100 : vector<256x128xf32> to vector<256x128xbf16>
    %c1_108 = arith.constant 1 : index
    %c3_109 = arith.constant 3 : index
    %c0_110 = arith.constant 0 : index
    %c0_111 = arith.constant 0 : index
    %102 = vector.load %arg2[%c1_108, %c3_109, %c0_110, %c0_111] : memref<5x9x128x128xbf16, #tpu.memory_space<vmem>>, vector<1x1x128x128xbf16>
    %103 = vector.shape_cast %102 : vector<1x1x128x128xbf16> to vector<128x128xbf16>
    %cst_112 = arith.constant dense<0.000000e+00> : vector<256x128xf32>
    %104 = tpu.matmul %101, %103, %cst_112 {dimension_numbers = #tpu.dot_dimension_numbers<[1], [0], [0], [1], [0, 0, 1, 1], [], []>} : vector<256x128xbf16>, vector<128x128xbf16>, vector<256x128xf32> -> vector<256x128xf32>
    %105 = arith.addf %98, %104 : vector<256x128xf32>
    %c1_113 = arith.constant 1 : index
    %c8_114 = arith.constant 8 : index
    %c0_115 = arith.constant 0 : index
    %106 = vector.load %arg6[%c1_113, %c8_114, %c0_115] : memref<18x32x128xf32, #tpu.memory_space<vmem>>, vector<16x16x128xf32>
    %107 = vector.shape_cast %106 : vector<16x16x128xf32> to vector<256x128xf32>
    %108 = arith.truncf %107 : vector<256x128xf32> to vector<256x128xbf16>
    %c1_116 = arith.constant 1 : index
    %c4_117 = arith.constant 4 : index
    %c0_118 = arith.constant 0 : index
    %c0_119 = arith.constant 0 : index
    %109 = vector.load %arg2[%c1_116, %c4_117, %c0_118, %c0_119] : memref<5x9x128x128xbf16, #tpu.memory_space<vmem>>, vector<1x1x128x128xbf16>
    %110 = vector.shape_cast %109 : vector<1x1x128x128xbf16> to vector<128x128xbf16>
    %cst_120 = arith.constant dense<0.000000e+00> : vector<256x128xf32>
    %111 = tpu.matmul %108, %110, %cst_120 {dimension_numbers = #tpu.dot_dimension_numbers<[1], [0], [0], [1], [0, 0, 1, 1], [], []>} : vector<256x128xbf16>, vector<128x128xbf16>, vector<256x128xf32> -> vector<256x128xf32>
    %112 = arith.addf %105, %111 : vector<256x128xf32>
    %c1_121 = arith.constant 1 : index
    %c9_122 = arith.constant 9 : index
    %c0_123 = arith.constant 0 : index
    %113 = vector.load %arg6[%c1_121, %c9_122, %c0_123] : memref<18x32x128xf32, #tpu.memory_space<vmem>>, vector<16x16x128xf32>
    %114 = vector.shape_cast %113 : vector<16x16x128xf32> to vector<256x128xf32>
    %115 = arith.truncf %114 : vector<256x128xf32> to vector<256x128xbf16>
    %c1_124 = arith.constant 1 : index
    %c5_125 = arith.constant 5 : index
    %c0_126 = arith.constant 0 : index
    %c0_127 = arith.constant 0 : index
    %116 = vector.load %arg2[%c1_124, %c5_125, %c0_126, %c0_127] : memref<5x9x128x128xbf16, #tpu.memory_space<vmem>>, vector<1x1x128x128xbf16>
    %117 = vector.shape_cast %116 : vector<1x1x128x128xbf16> to vector<128x128xbf16>
    %cst_128 = arith.constant dense<0.000000e+00> : vector<256x128xf32>
    %118 = tpu.matmul %115, %117, %cst_128 {dimension_numbers = #tpu.dot_dimension_numbers<[1], [0], [0], [1], [0, 0, 1, 1], [], []>} : vector<256x128xbf16>, vector<128x128xbf16>, vector<256x128xf32> -> vector<256x128xf32>
    %119 = arith.addf %112, %118 : vector<256x128xf32>
    %c2_129 = arith.constant 2 : index
    %c7_130 = arith.constant 7 : index
    %c0_131 = arith.constant 0 : index
    %120 = vector.load %arg6[%c2_129, %c7_130, %c0_131] : memref<18x32x128xf32, #tpu.memory_space<vmem>>, vector<16x16x128xf32>
    %121 = vector.shape_cast %120 : vector<16x16x128xf32> to vector<256x128xf32>
    %122 = arith.truncf %121 : vector<256x128xf32> to vector<256x128xbf16>
    %c1_132 = arith.constant 1 : index
    %c6_133 = arith.constant 6 : index
    %c0_134 = arith.constant 0 : index
    %c0_135 = arith.constant 0 : index
    %123 = vector.load %arg2[%c1_132, %c6_133, %c0_134, %c0_135] : memref<5x9x128x128xbf16, #tpu.memory_space<vmem>>, vector<1x1x128x128xbf16>
    %124 = vector.shape_cast %123 : vector<1x1x128x128xbf16> to vector<128x128xbf16>
    %cst_136 = arith.constant dense<0.000000e+00> : vector<256x128xf32>
    %125 = tpu.matmul %122, %124, %cst_136 {dimension_numbers = #tpu.dot_dimension_numbers<[1], [0], [0], [1], [0, 0, 1, 1], [], []>} : vector<256x128xbf16>, vector<128x128xbf16>, vector<256x128xf32> -> vector<256x128xf32>
    %126 = arith.addf %119, %125 : vector<256x128xf32>
    %c2_137 = arith.constant 2 : index
    %c8_138 = arith.constant 8 : index
    %c0_139 = arith.constant 0 : index
    %127 = vector.load %arg6[%c2_137, %c8_138, %c0_139] : memref<18x32x128xf32, #tpu.memory_space<vmem>>, vector<16x16x128xf32>
    %128 = vector.shape_cast %127 : vector<16x16x128xf32> to vector<256x128xf32>
    %129 = arith.truncf %128 : vector<256x128xf32> to vector<256x128xbf16>
    %c1_140 = arith.constant 1 : index
    %c7_141 = arith.constant 7 : index
    %c0_142 = arith.constant 0 : index
    %c0_143 = arith.constant 0 : index
    %130 = vector.load %arg2[%c1_140, %c7_141, %c0_142, %c0_143] : memref<5x9x128x128xbf16, #tpu.memory_space<vmem>>, vector<1x1x128x128xbf16>
    %131 = vector.shape_cast %130 : vector<1x1x128x128xbf16> to vector<128x128xbf16>
    %cst_144 = arith.constant dense<0.000000e+00> : vector<256x128xf32>
    %132 = tpu.matmul %129, %131, %cst_144 {dimension_numbers = #tpu.dot_dimension_numbers<[1], [0], [0], [1], [0, 0, 1, 1], [], []>} : vector<256x128xbf16>, vector<128x128xbf16>, vector<256x128xf32> -> vector<256x128xf32>
    %133 = arith.addf %126, %132 : vector<256x128xf32>
    %c2_145 = arith.constant 2 : index
    %c9_146 = arith.constant 9 : index
    %c0_147 = arith.constant 0 : index
    %134 = vector.load %arg6[%c2_145, %c9_146, %c0_147] : memref<18x32x128xf32, #tpu.memory_space<vmem>>, vector<16x16x128xf32>
    %135 = vector.shape_cast %134 : vector<16x16x128xf32> to vector<256x128xf32>
    %136 = arith.truncf %135 : vector<256x128xf32> to vector<256x128xbf16>
    %c1_148 = arith.constant 1 : index
    %c8_149 = arith.constant 8 : index
    %c0_150 = arith.constant 0 : index
    %c0_151 = arith.constant 0 : index
    %137 = vector.load %arg2[%c1_148, %c8_149, %c0_150, %c0_151] : memref<5x9x128x128xbf16, #tpu.memory_space<vmem>>, vector<1x1x128x128xbf16>
    %138 = vector.shape_cast %137 : vector<1x1x128x128xbf16> to vector<128x128xbf16>
    %cst_152 = arith.constant dense<0.000000e+00> : vector<256x128xf32>
    %139 = tpu.matmul %136, %138, %cst_152 {dimension_numbers = #tpu.dot_dimension_numbers<[1], [0], [0], [1], [0, 0, 1, 1], [], []>} : vector<256x128xbf16>, vector<128x128xbf16>, vector<256x128xf32> -> vector<256x128xf32>
    %140 = arith.addf %133, %139 : vector<256x128xf32>
    %c1_153 = arith.constant 1 : index
    %c0_154 = arith.constant 0 : index
    %c0_155 = arith.constant 0 : index
    %141 = vector.load %arg3[%c1_153, %c0_154, %c0_155] : memref<5x1x128xf32, #tpu.memory_space<vmem>>, vector<1x1x128xf32>
    %142 = vector.shape_cast %141 : vector<1x1x128xf32> to vector<1x128xf32>
    %143 = vector.broadcast %142 : vector<1x128xf32> to vector<256x128xf32>
    %144 = arith.addf %140, %143 : vector<256x128xf32>
    %cst_156 = arith.constant 0.000000e+00 : f32
    %145 = vector.broadcast %cst_156 : f32 to vector<256x128xf32>
    %146 = arith.maximumf %144, %145 : vector<256x128xf32>
    %147 = vector.shape_cast %146 : vector<256x128xf32> to vector<16x16x128xf32>
    %c1_157 = arith.constant 1 : index
    %c8_158 = arith.constant 8 : index
    %c0_159 = arith.constant 0 : index
    %148 = vector.load %arg6[%c1_157, %c8_158, %c0_159] : memref<18x32x128xf32, #tpu.memory_space<vmem>>, vector<16x16x128xf32>
    tpu.vector_store %arg6[%c1_157, %c8_158, %c0_159], %147 {strides = array<i32>} : memref<18x32x128xf32, #tpu.memory_space<vmem>>, vector<16x16x128xf32>,
    %cst_160 = arith.constant 0.000000e+00 : f32
    %149 = vector.broadcast %cst_160 : f32 to vector<256x128xf32>
    %c0_161 = arith.constant 0 : index
    %c7_162 = arith.constant 7 : index
    %c0_163 = arith.constant 0 : index
    %150 = vector.load %arg6[%c0_161, %c7_162, %c0_163] : memref<18x32x128xf32, #tpu.memory_space<vmem>>, vector<16x16x128xf32>
    %151 = vector.shape_cast %150 : vector<16x16x128xf32> to vector<256x128xf32>
    %152 = arith.truncf %151 : vector<256x128xf32> to vector<256x128xbf16>
    %c2_164 = arith.constant 2 : index
    %c0_165 = arith.constant 0 : index
    %c0_166 = arith.constant 0 : index
    %c0_167 = arith.constant 0 : index
    %153 = vector.load %arg2[%c2_164, %c0_165, %c0_166, %c0_167] : memref<5x9x128x128xbf16, #tpu.memory_space<vmem>>, vector<1x1x128x128xbf16>
    %154 = vector.shape_cast %153 : vector<1x1x128x128xbf16> to vector<128x128xbf16>
    %cst_168 = arith.constant dense<0.000000e+00> : vector<256x128xf32>
    %155 = tpu.matmul %152, %154, %cst_168 {dimension_numbers = #tpu.dot_dimension_numbers<[1], [0], [0], [1], [0, 0, 1, 1], [], []>} : vector<256x128xbf16>, vector<128x128xbf16>, vector<256x128xf32> -> vector<256x128xf32>
    %156 = arith.addf %149, %155 : vector<256x128xf32>
    %c0_169 = arith.constant 0 : index
    %c8_170 = arith.constant 8 : index
    %c0_171 = arith.constant 0 : index
    %157 = vector.load %arg6[%c0_169, %c8_170, %c0_171] : memref<18x32x128xf32, #tpu.memory_space<vmem>>, vector<16x16x128xf32>
    %158 = vector.shape_cast %157 : vector<16x16x128xf32> to vector<256x128xf32>
    %159 = arith.truncf %158 : vector<256x128xf32> to vector<256x128xbf16>
    %c2_172 = arith.constant 2 : index
    %c1_173 = arith.constant 1 : index
    %c0_174 = arith.constant 0 : index
    %c0_175 = arith.constant 0 : index
    %160 = vector.load %arg2[%c2_172, %c1_173, %c0_174, %c0_175] : memref<5x9x128x128xbf16, #tpu.memory_space<vmem>>, vector<1x1x128x128xbf16>
    %161 = vector.shape_cast %160 : vector<1x1x128x128xbf16> to vector<128x128xbf16>
    %cst_176 = arith.constant dense<0.000000e+00> : vector<256x128xf32>
    %162 = tpu.matmul %159, %161, %cst_176 {dimension_numbers = #tpu.dot_dimension_numbers<[1], [0], [0], [1], [0, 0, 1, 1], [], []>} : vector<256x128xbf16>, vector<128x128xbf16>, vector<256x128xf32> -> vector<256x128xf32>
    %163 = arith.addf %156, %162 : vector<256x128xf32>
    %c0_177 = arith.constant 0 : index
    %c9_178 = arith.constant 9 : index
    %c0_179 = arith.constant 0 : index
    %164 = vector.load %arg6[%c0_177, %c9_178, %c0_179] : memref<18x32x128xf32, #tpu.memory_space<vmem>>, vector<16x16x128xf32>
    %165 = vector.shape_cast %164 : vector<16x16x128xf32> to vector<256x128xf32>
    %166 = arith.truncf %165 : vector<256x128xf32> to vector<256x128xbf16>
    %c2_180 = arith.constant 2 : index
    %c2_181 = arith.constant 2 : index
    %c0_182 = arith.constant 0 : index
    %c0_183 = arith.constant 0 : index
    %167 = vector.load %arg2[%c2_180, %c2_181, %c0_182, %c0_183] : memref<5x9x128x128xbf16, #tpu.memory_space<vmem>>, vector<1x1x128x128xbf16>
    %168 = vector.shape_cast %167 : vector<1x1x128x128xbf16> to vector<128x128xbf16>
    %cst_184 = arith.constant dense<0.000000e+00> : vector<256x128xf32>
    %169 = tpu.matmul %166, %168, %cst_184 {dimension_numbers = #tpu.dot_dimension_numbers<[1], [0], [0], [1], [0, 0, 1, 1], [], []>} : vector<256x128xbf16>, vector<128x128xbf16>, vector<256x128xf32> -> vector<256x128xf32>
    %170 = arith.addf %163, %169 : vector<256x128xf32>
    %c1_185 = arith.constant 1 : index
    %c7_186 = arith.constant 7 : index
    %c0_187 = arith.constant 0 : index
    %171 = vector.load %arg6[%c1_185, %c7_186, %c0_187] : memref<18x32x128xf32, #tpu.memory_space<vmem>>, vector<16x16x128xf32>
    %172 = vector.shape_cast %171 : vector<16x16x128xf32> to vector<256x128xf32>
    %173 = arith.truncf %172 : vector<256x128xf32> to vector<256x128xbf16>
    %c2_188 = arith.constant 2 : index
    %c3_189 = arith.constant 3 : index
    %c0_190 = arith.constant 0 : index
    %c0_191 = arith.constant 0 : index
    %174 = vector.load %arg2[%c2_188, %c3_189, %c0_190, %c0_191] : memref<5x9x128x128xbf16, #tpu.memory_space<vmem>>, vector<1x1x128x128xbf16>
    %175 = vector.shape_cast %174 : vector<1x1x128x128xbf16> to vector<128x128xbf16>
    %cst_192 = arith.constant dense<0.000000e+00> : vector<256x128xf32>
    %176 = tpu.matmul %173, %175, %cst_192 {dimension_numbers = #tpu.dot_dimension_numbers<[1], [0], [0], [1], [0, 0, 1, 1], [], []>} : vector<256x128xbf16>, vector<128x128xbf16>, vector<256x128xf32> -> vector<256x128xf32>
    %177 = arith.addf %170, %176 : vector<256x128xf32>
    %c1_193 = arith.constant 1 : index
    %c8_194 = arith.constant 8 : index
    %c0_195 = arith.constant 0 : index
    %178 = vector.load %arg6[%c1_193, %c8_194, %c0_195] : memref<18x32x128xf32, #tpu.memory_space<vmem>>, vector<16x16x128xf32>
    %179 = vector.shape_cast %178 : vector<16x16x128xf32> to vector<256x128xf32>
    %180 = arith.truncf %179 : vector<256x128xf32> to vector<256x128xbf16>
    %c2_196 = arith.constant 2 : index
    %c4_197 = arith.constant 4 : index
    %c0_198 = arith.constant 0 : index
    %c0_199 = arith.constant 0 : index
    %181 = vector.load %arg2[%c2_196, %c4_197, %c0_198, %c0_199] : memref<5x9x128x128xbf16, #tpu.memory_space<vmem>>, vector<1x1x128x128xbf16>
    %182 = vector.shape_cast %181 : vector<1x1x128x128xbf16> to vector<128x128xbf16>
    %cst_200 = arith.constant dense<0.000000e+00> : vector<256x128xf32>
    %183 = tpu.matmul %180, %182, %cst_200 {dimension_numbers = #tpu.dot_dimension_numbers<[1], [0], [0], [1], [0, 0, 1, 1], [], []>} : vector<256x128xbf16>, vector<128x128xbf16>, vector<256x128xf32> -> vector<256x128xf32>
    %184 = arith.addf %177, %183 : vector<256x128xf32>
    %c1_201 = arith.constant 1 : index
    %c9_202 = arith.constant 9 : index
    %c0_203 = arith.constant 0 : index
    %185 = vector.load %arg6[%c1_201, %c9_202, %c0_203] : memref<18x32x128xf32, #tpu.memory_space<vmem>>, vector<16x16x128xf32>
    %186 = vector.shape_cast %185 : vector<16x16x128xf32> to vector<256x128xf32>
    %187 = arith.truncf %186 : vector<256x128xf32> to vector<256x128xbf16>
    %c2_204 = arith.constant 2 : index
    %c5_205 = arith.constant 5 : index
    %c0_206 = arith.constant 0 : index
    %c0_207 = arith.constant 0 : index
    %188 = vector.load %arg2[%c2_204, %c5_205, %c0_206, %c0_207] : memref<5x9x128x128xbf16, #tpu.memory_space<vmem>>, vector<1x1x128x128xbf16>
    %189 = vector.shape_cast %188 : vector<1x1x128x128xbf16> to vector<128x128xbf16>
    %cst_208 = arith.constant dense<0.000000e+00> : vector<256x128xf32>
    %190 = tpu.matmul %187, %189, %cst_208 {dimension_numbers = #tpu.dot_dimension_numbers<[1], [0], [0], [1], [0, 0, 1, 1], [], []>} : vector<256x128xbf16>, vector<128x128xbf16>, vector<256x128xf32> -> vector<256x128xf32>
    %191 = arith.addf %184, %190 : vector<256x128xf32>
    %c2_209 = arith.constant 2 : index
    %c7_210 = arith.constant 7 : index
    %c0_211 = arith.constant 0 : index
    %192 = vector.load %arg6[%c2_209, %c7_210, %c0_211] : memref<18x32x128xf32, #tpu.memory_space<vmem>>, vector<16x16x128xf32>
    %193 = vector.shape_cast %192 : vector<16x16x128xf32> to vector<256x128xf32>
    %194 = arith.truncf %193 : vector<256x128xf32> to vector<256x128xbf16>
    %c2_212 = arith.constant 2 : index
    %c6_213 = arith.constant 6 : index
    %c0_214 = arith.constant 0 : index
    %c0_215 = arith.constant 0 : index
    %195 = vector.load %arg2[%c2_212, %c6_213, %c0_214, %c0_215] : memref<5x9x128x128xbf16, #tpu.memory_space<vmem>>, vector<1x1x128x128xbf16>
    %196 = vector.shape_cast %195 : vector<1x1x128x128xbf16> to vector<128x128xbf16>
    %cst_216 = arith.constant dense<0.000000e+00> : vector<256x128xf32>
    %197 = tpu.matmul %194, %196, %cst_216 {dimension_numbers = #tpu.dot_dimension_numbers<[1], [0], [0], [1], [0, 0, 1, 1], [], []>} : vector<256x128xbf16>, vector<128x128xbf16>, vector<256x128xf32> -> vector<256x128xf32>
    %198 = arith.addf %191, %197 : vector<256x128xf32>
    %c2_217 = arith.constant 2 : index
    %c8_218 = arith.constant 8 : index
    %c0_219 = arith.constant 0 : index
    %199 = vector.load %arg6[%c2_217, %c8_218, %c0_219] : memref<18x32x128xf32, #tpu.memory_space<vmem>>, vector<16x16x128xf32>
    %200 = vector.shape_cast %199 : vector<16x16x128xf32> to vector<256x128xf32>
    %201 = arith.truncf %200 : vector<256x128xf32> to vector<256x128xbf16>
    %c2_220 = arith.constant 2 : index
    %c7_221 = arith.constant 7 : index
    %c0_222 = arith.constant 0 : index
    %c0_223 = arith.constant 0 : index
    %202 = vector.load %arg2[%c2_220, %c7_221, %c0_222, %c0_223] : memref<5x9x128x128xbf16, #tpu.memory_space<vmem>>, vector<1x1x128x128xbf16>
    %203 = vector.shape_cast %202 : vector<1x1x128x128xbf16> to vector<128x128xbf16>
    %cst_224 = arith.constant dense<0.000000e+00> : vector<256x128xf32>
    %204 = tpu.matmul %201, %203, %cst_224 {dimension_numbers = #tpu.dot_dimension_numbers<[1], [0], [0], [1], [0, 0, 1, 1], [], []>} : vector<256x128xbf16>, vector<128x128xbf16>, vector<256x128xf32> -> vector<256x128xf32>
    %205 = arith.addf %198, %204 : vector<256x128xf32>
    %c2_225 = arith.constant 2 : index
    %c9_226 = arith.constant 9 : index
    %c0_227 = arith.constant 0 : index
    %206 = vector.load %arg6[%c2_225, %c9_226, %c0_227] : memref<18x32x128xf32, #tpu.memory_space<vmem>>, vector<16x16x128xf32>
    %207 = vector.shape_cast %206 : vector<16x16x128xf32> to vector<256x128xf32>
    %208 = arith.truncf %207 : vector<256x128xf32> to vector<256x128xbf16>
    %c2_228 = arith.constant 2 : index
    %c8_229 = arith.constant 8 : index
    %c0_230 = arith.constant 0 : index
    %c0_231 = arith.constant 0 : index
    %209 = vector.load %arg2[%c2_228, %c8_229, %c0_230, %c0_231] : memref<5x9x128x128xbf16, #tpu.memory_space<vmem>>, vector<1x1x128x128xbf16>
    %210 = vector.shape_cast %209 : vector<1x1x128x128xbf16> to vector<128x128xbf16>
    %cst_232 = arith.constant dense<0.000000e+00> : vector<256x128xf32>
    %211 = tpu.matmul %208, %210, %cst_232 {dimension_numbers = #tpu.dot_dimension_numbers<[1], [0], [0], [1], [0, 0, 1, 1], [], []>} : vector<256x128xbf16>, vector<128x128xbf16>, vector<256x128xf32> -> vector<256x128xf32>
    %212 = arith.addf %205, %211 : vector<256x128xf32>
    %c2_233 = arith.constant 2 : index
    %c0_234 = arith.constant 0 : index
    %c0_235 = arith.constant 0 : index
    %213 = vector.load %arg3[%c2_233, %c0_234, %c0_235] : memref<5x1x128xf32, #tpu.memory_space<vmem>>, vector<1x1x128xf32>
    %214 = vector.shape_cast %213 : vector<1x1x128xf32> to vector<1x128xf32>
    %215 = vector.broadcast %214 : vector<1x128xf32> to vector<256x128xf32>
    %216 = arith.addf %212, %215 : vector<256x128xf32>
    %cst_236 = arith.constant 0.000000e+00 : f32
    %217 = vector.broadcast %cst_236 : f32 to vector<256x128xf32>
    %218 = arith.maximumf %216, %217 : vector<256x128xf32>
    %219 = vector.shape_cast %218 : vector<256x128xf32> to vector<1x256x128xf32>
    %c0_237 = arith.constant 0 : index
    %c0_238 = arith.constant 0 : index
    %c0_239 = arith.constant 0 : index
    %220 = vector.load %arg4[%c0_237, %c0_238, %c0_239] : memref<1x256x128xf32, #tpu.memory_space<vmem>>, vector<1x256x128xf32>
    tpu.vector_store %arg4[%c0_237, %c0_238, %c0_239], %219 {strides = array<i32>} : memref<1x256x128xf32, #tpu.memory_space<vmem>>, vector<1x256x128xf32>,
    %221 = vector.shape_cast %218 : vector<256x128xf32> to vector<16x16x128xf32>
    %c1_240 = arith.constant 1 : index
    %c8_241 = arith.constant 8 : index
    %c0_242 = arith.constant 0 : index
    %222 = vector.load %arg6[%c1_240, %c8_241, %c0_242] : memref<18x32x128xf32, #tpu.memory_space<vmem>>, vector<16x16x128xf32>
    tpu.vector_store %arg6[%c1_240, %c8_241, %c0_242], %221 {strides = array<i32>} : memref<18x32x128xf32, #tpu.memory_space<vmem>>, vector<16x16x128xf32>,
    %cst_243 = arith.constant 0.000000e+00 : f32
    %223 = vector.broadcast %cst_243 : f32 to vector<256x128xf32>
    %c0_244 = arith.constant 0 : index
    %c7_245 = arith.constant 7 : index
    %c0_246 = arith.constant 0 : index
    %224 = vector.load %arg6[%c0_244, %c7_245, %c0_246] : memref<18x32x128xf32, #tpu.memory_space<vmem>>, vector<16x16x128xf32>
    %225 = vector.shape_cast %224 : vector<16x16x128xf32> to vector<256x128xf32>
    %226 = arith.truncf %225 : vector<256x128xf32> to vector<256x128xbf16>
    %c3_247 = arith.constant 3 : index
    %c0_248 = arith.constant 0 : index
    %c0_249 = arith.constant 0 : index
    %c0_250 = arith.constant 0 : index
    %227 = vector.load %arg2[%c3_247, %c0_248, %c0_249, %c0_250] : memref<5x9x128x128xbf16, #tpu.memory_space<vmem>>, vector<1x1x128x128xbf16>
    %228 = vector.shape_cast %227 : vector<1x1x128x128xbf16> to vector<128x128xbf16>
    %cst_251 = arith.constant dense<0.000000e+00> : vector<256x128xf32>
    %229 = tpu.matmul %226, %228, %cst_251 {dimension_numbers = #tpu.dot_dimension_numbers<[1], [0], [0], [1], [0, 0, 1, 1], [], []>} : vector<256x128xbf16>, vector<128x128xbf16>, vector<256x128xf32> -> vector<256x128xf32>
    %230 = arith.addf %223, %229 : vector<256x128xf32>
    %c0_252 = arith.constant 0 : index
    %c8_253 = arith.constant 8 : index
    %c0_254 = arith.constant 0 : index
    %231 = vector.load %arg6[%c0_252, %c8_253, %c0_254] : memref<18x32x128xf32, #tpu.memory_space<vmem>>, vector<16x16x128xf32>
    %232 = vector.shape_cast %231 : vector<16x16x128xf32> to vector<256x128xf32>
    %233 = arith.truncf %232 : vector<256x128xf32> to vector<256x128xbf16>
    %c3_255 = arith.constant 3 : index
    %c1_256 = arith.constant 1 : index
    %c0_257 = arith.constant 0 : index
    %c0_258 = arith.constant 0 : index
    %234 = vector.load %arg2[%c3_255, %c1_256, %c0_257, %c0_258] : memref<5x9x128x128xbf16, #tpu.memory_space<vmem>>, vector<1x1x128x128xbf16>
    %235 = vector.shape_cast %234 : vector<1x1x128x128xbf16> to vector<128x128xbf16>
    %cst_259 = arith.constant dense<0.000000e+00> : vector<256x128xf32>
    %236 = tpu.matmul %233, %235, %cst_259 {dimension_numbers = #tpu.dot_dimension_numbers<[1], [0], [0], [1], [0, 0, 1, 1], [], []>} : vector<256x128xbf16>, vector<128x128xbf16>, vector<256x128xf32> -> vector<256x128xf32>
    %237 = arith.addf %230, %236 : vector<256x128xf32>
    %c0_260 = arith.constant 0 : index
    %c9_261 = arith.constant 9 : index
    %c0_262 = arith.constant 0 : index
    %238 = vector.load %arg6[%c0_260, %c9_261, %c0_262] : memref<18x32x128xf32, #tpu.memory_space<vmem>>, vector<16x16x128xf32>
    %239 = vector.shape_cast %238 : vector<16x16x128xf32> to vector<256x128xf32>
    %240 = arith.truncf %239 : vector<256x128xf32> to vector<256x128xbf16>
    %c3_263 = arith.constant 3 : index
    %c2_264 = arith.constant 2 : index
    %c0_265 = arith.constant 0 : index
    %c0_266 = arith.constant 0 : index
    %241 = vector.load %arg2[%c3_263, %c2_264, %c0_265, %c0_266] : memref<5x9x128x128xbf16, #tpu.memory_space<vmem>>, vector<1x1x128x128xbf16>
    %242 = vector.shape_cast %241 : vector<1x1x128x128xbf16> to vector<128x128xbf16>
    %cst_267 = arith.constant dense<0.000000e+00> : vector<256x128xf32>
    %243 = tpu.matmul %240, %242, %cst_267 {dimension_numbers = #tpu.dot_dimension_numbers<[1], [0], [0], [1], [0, 0, 1, 1], [], []>} : vector<256x128xbf16>, vector<128x128xbf16>, vector<256x128xf32> -> vector<256x128xf32>
    %244 = arith.addf %237, %243 : vector<256x128xf32>
    %c1_268 = arith.constant 1 : index
    %c7_269 = arith.constant 7 : index
    %c0_270 = arith.constant 0 : index
    %245 = vector.load %arg6[%c1_268, %c7_269, %c0_270] : memref<18x32x128xf32, #tpu.memory_space<vmem>>, vector<16x16x128xf32>
    %246 = vector.shape_cast %245 : vector<16x16x128xf32> to vector<256x128xf32>
    %247 = arith.truncf %246 : vector<256x128xf32> to vector<256x128xbf16>
    %c3_271 = arith.constant 3 : index
    %c3_272 = arith.constant 3 : index
    %c0_273 = arith.constant 0 : index
    %c0_274 = arith.constant 0 : index
    %248 = vector.load %arg2[%c3_271, %c3_272, %c0_273, %c0_274] : memref<5x9x128x128xbf16, #tpu.memory_space<vmem>>, vector<1x1x128x128xbf16>
    %249 = vector.shape_cast %248 : vector<1x1x128x128xbf16> to vector<128x128xbf16>
    %cst_275 = arith.constant dense<0.000000e+00> : vector<256x128xf32>
    %250 = tpu.matmul %247, %249, %cst_275 {dimension_numbers = #tpu.dot_dimension_numbers<[1], [0], [0], [1], [0, 0, 1, 1], [], []>} : vector<256x128xbf16>, vector<128x128xbf16>, vector<256x128xf32> -> vector<256x128xf32>
    %251 = arith.addf %244, %250 : vector<256x128xf32>
    %c1_276 = arith.constant 1 : index
    %c8_277 = arith.constant 8 : index
    %c0_278 = arith.constant 0 : index
    %252 = vector.load %arg6[%c1_276, %c8_277, %c0_278] : memref<18x32x128xf32, #tpu.memory_space<vmem>>, vector<16x16x128xf32>
    %253 = vector.shape_cast %252 : vector<16x16x128xf32> to vector<256x128xf32>
    %254 = arith.truncf %253 : vector<256x128xf32> to vector<256x128xbf16>
    %c3_279 = arith.constant 3 : index
    %c4_280 = arith.constant 4 : index
    %c0_281 = arith.constant 0 : index
    %c0_282 = arith.constant 0 : index
    %255 = vector.load %arg2[%c3_279, %c4_280, %c0_281, %c0_282] : memref<5x9x128x128xbf16, #tpu.memory_space<vmem>>, vector<1x1x128x128xbf16>
    %256 = vector.shape_cast %255 : vector<1x1x128x128xbf16> to vector<128x128xbf16>
    %cst_283 = arith.constant dense<0.000000e+00> : vector<256x128xf32>
    %257 = tpu.matmul %254, %256, %cst_283 {dimension_numbers = #tpu.dot_dimension_numbers<[1], [0], [0], [1], [0, 0, 1, 1], [], []>} : vector<256x128xbf16>, vector<128x128xbf16>, vector<256x128xf32> -> vector<256x128xf32>
    %258 = arith.addf %251, %257 : vector<256x128xf32>
    %c1_284 = arith.constant 1 : index
    %c9_285 = arith.constant 9 : index
    %c0_286 = arith.constant 0 : index
    %259 = vector.load %arg6[%c1_284, %c9_285, %c0_286] : memref<18x32x128xf32, #tpu.memory_space<vmem>>, vector<16x16x128xf32>
    %260 = vector.shape_cast %259 : vector<16x16x128xf32> to vector<256x128xf32>
    %261 = arith.truncf %260 : vector<256x128xf32> to vector<256x128xbf16>
    %c3_287 = arith.constant 3 : index
    %c5_288 = arith.constant 5 : index
    %c0_289 = arith.constant 0 : index
    %c0_290 = arith.constant 0 : index
    %262 = vector.load %arg2[%c3_287, %c5_288, %c0_289, %c0_290] : memref<5x9x128x128xbf16, #tpu.memory_space<vmem>>, vector<1x1x128x128xbf16>
    %263 = vector.shape_cast %262 : vector<1x1x128x128xbf16> to vector<128x128xbf16>
    %cst_291 = arith.constant dense<0.000000e+00> : vector<256x128xf32>
    %264 = tpu.matmul %261, %263, %cst_291 {dimension_numbers = #tpu.dot_dimension_numbers<[1], [0], [0], [1], [0, 0, 1, 1], [], []>} : vector<256x128xbf16>, vector<128x128xbf16>, vector<256x128xf32> -> vector<256x128xf32>
    %265 = arith.addf %258, %264 : vector<256x128xf32>
    %c2_292 = arith.constant 2 : index
    %c7_293 = arith.constant 7 : index
    %c0_294 = arith.constant 0 : index
    %266 = vector.load %arg6[%c2_292, %c7_293, %c0_294] : memref<18x32x128xf32, #tpu.memory_space<vmem>>, vector<16x16x128xf32>
    %267 = vector.shape_cast %266 : vector<16x16x128xf32> to vector<256x128xf32>
    %268 = arith.truncf %267 : vector<256x128xf32> to vector<256x128xbf16>
    %c3_295 = arith.constant 3 : index
    %c6_296 = arith.constant 6 : index
    %c0_297 = arith.constant 0 : index
    %c0_298 = arith.constant 0 : index
    %269 = vector.load %arg2[%c3_295, %c6_296, %c0_297, %c0_298] : memref<5x9x128x128xbf16, #tpu.memory_space<vmem>>, vector<1x1x128x128xbf16>
    %270 = vector.shape_cast %269 : vector<1x1x128x128xbf16> to vector<128x128xbf16>
    %cst_299 = arith.constant dense<0.000000e+00> : vector<256x128xf32>
    %271 = tpu.matmul %268, %270, %cst_299 {dimension_numbers = #tpu.dot_dimension_numbers<[1], [0], [0], [1], [0, 0, 1, 1], [], []>} : vector<256x128xbf16>, vector<128x128xbf16>, vector<256x128xf32> -> vector<256x128xf32>
    %272 = arith.addf %265, %271 : vector<256x128xf32>
    %c2_300 = arith.constant 2 : index
    %c8_301 = arith.constant 8 : index
    %c0_302 = arith.constant 0 : index
    %273 = vector.load %arg6[%c2_300, %c8_301, %c0_302] : memref<18x32x128xf32, #tpu.memory_space<vmem>>, vector<16x16x128xf32>
    %274 = vector.shape_cast %273 : vector<16x16x128xf32> to vector<256x128xf32>
    %275 = arith.truncf %274 : vector<256x128xf32> to vector<256x128xbf16>
    %c3_303 = arith.constant 3 : index
    %c7_304 = arith.constant 7 : index
    %c0_305 = arith.constant 0 : index
    %c0_306 = arith.constant 0 : index
    %276 = vector.load %arg2[%c3_303, %c7_304, %c0_305, %c0_306] : memref<5x9x128x128xbf16, #tpu.memory_space<vmem>>, vector<1x1x128x128xbf16>
    %277 = vector.shape_cast %276 : vector<1x1x128x128xbf16> to vector<128x128xbf16>
    %cst_307 = arith.constant dense<0.000000e+00> : vector<256x128xf32>
    %278 = tpu.matmul %275, %277, %cst_307 {dimension_numbers = #tpu.dot_dimension_numbers<[1], [0], [0], [1], [0, 0, 1, 1], [], []>} : vector<256x128xbf16>, vector<128x128xbf16>, vector<256x128xf32> -> vector<256x128xf32>
    %279 = arith.addf %272, %278 : vector<256x128xf32>
    %c2_308 = arith.constant 2 : index
    %c9_309 = arith.constant 9 : index
    %c0_310 = arith.constant 0 : index
    %280 = vector.load %arg6[%c2_308, %c9_309, %c0_310] : memref<18x32x128xf32, #tpu.memory_space<vmem>>, vector<16x16x128xf32>
    %281 = vector.shape_cast %280 : vector<16x16x128xf32> to vector<256x128xf32>
    %282 = arith.truncf %281 : vector<256x128xf32> to vector<256x128xbf16>
    %c3_311 = arith.constant 3 : index
    %c8_312 = arith.constant 8 : index
    %c0_313 = arith.constant 0 : index
    %c0_314 = arith.constant 0 : index
    %283 = vector.load %arg2[%c3_311, %c8_312, %c0_313, %c0_314] : memref<5x9x128x128xbf16, #tpu.memory_space<vmem>>, vector<1x1x128x128xbf16>
    %284 = vector.shape_cast %283 : vector<1x1x128x128xbf16> to vector<128x128xbf16>
    %cst_315 = arith.constant dense<0.000000e+00> : vector<256x128xf32>
    %285 = tpu.matmul %282, %284, %cst_315 {dimension_numbers = #tpu.dot_dimension_numbers<[1], [0], [0], [1], [0, 0, 1, 1], [], []>} : vector<256x128xbf16>, vector<128x128xbf16>, vector<256x128xf32> -> vector<256x128xf32>
    %286 = arith.addf %279, %285 : vector<256x128xf32>
    %c3_316 = arith.constant 3 : index
    %c0_317 = arith.constant 0 : index
    %c0_318 = arith.constant 0 : index
    %287 = vector.load %arg3[%c3_316, %c0_317, %c0_318] : memref<5x1x128xf32, #tpu.memory_space<vmem>>, vector<1x1x128xf32>
    %288 = vector.shape_cast %287 : vector<1x1x128xf32> to vector<1x128xf32>
    %289 = vector.broadcast %288 : vector<1x128xf32> to vector<256x128xf32>
    %290 = arith.addf %286, %289 : vector<256x128xf32>
    %cst_319 = arith.constant 0.000000e+00 : f32
    %291 = vector.broadcast %cst_319 : f32 to vector<256x128xf32>
    %292 = arith.maximumf %290, %291 : vector<256x128xf32>
    %293 = vector.shape_cast %292 : vector<256x128xf32> to vector<16x16x128xf32>
    %c1_320 = arith.constant 1 : index
    %c8_321 = arith.constant 8 : index
    %c0_322 = arith.constant 0 : index
    %294 = vector.load %arg6[%c1_320, %c8_321, %c0_322] : memref<18x32x128xf32, #tpu.memory_space<vmem>>, vector<16x16x128xf32>
    tpu.vector_store %arg6[%c1_320, %c8_321, %c0_322], %293 {strides = array<i32>} : memref<18x32x128xf32, #tpu.memory_space<vmem>>, vector<16x16x128xf32>,
    %cst_323 = arith.constant 0.000000e+00 : f32
    %295 = vector.broadcast %cst_323 : f32 to vector<256x128xf32>
    %c0_324 = arith.constant 0 : index
    %c7_325 = arith.constant 7 : index
    %c0_326 = arith.constant 0 : index
    %296 = vector.load %arg6[%c0_324, %c7_325, %c0_326] : memref<18x32x128xf32, #tpu.memory_space<vmem>>, vector<16x16x128xf32>
    %297 = vector.shape_cast %296 : vector<16x16x128xf32> to vector<256x128xf32>
    %298 = arith.truncf %297 : vector<256x128xf32> to vector<256x128xbf16>
    %c4_327 = arith.constant 4 : index
    %c0_328 = arith.constant 0 : index
    %c0_329 = arith.constant 0 : index
    %c0_330 = arith.constant 0 : index
    %299 = vector.load %arg2[%c4_327, %c0_328, %c0_329, %c0_330] : memref<5x9x128x128xbf16, #tpu.memory_space<vmem>>, vector<1x1x128x128xbf16>
    %300 = vector.shape_cast %299 : vector<1x1x128x128xbf16> to vector<128x128xbf16>
    %cst_331 = arith.constant dense<0.000000e+00> : vector<256x128xf32>
    %301 = tpu.matmul %298, %300, %cst_331 {dimension_numbers = #tpu.dot_dimension_numbers<[1], [0], [0], [1], [0, 0, 1, 1], [], []>} : vector<256x128xbf16>, vector<128x128xbf16>, vector<256x128xf32> -> vector<256x128xf32>
    %302 = arith.addf %295, %301 : vector<256x128xf32>
    %c0_332 = arith.constant 0 : index
    %c8_333 = arith.constant 8 : index
    %c0_334 = arith.constant 0 : index
    %303 = vector.load %arg6[%c0_332, %c8_333, %c0_334] : memref<18x32x128xf32, #tpu.memory_space<vmem>>, vector<16x16x128xf32>
    %304 = vector.shape_cast %303 : vector<16x16x128xf32> to vector<256x128xf32>
    %305 = arith.truncf %304 : vector<256x128xf32> to vector<256x128xbf16>
    %c4_335 = arith.constant 4 : index
    %c1_336 = arith.constant 1 : index
    %c0_337 = arith.constant 0 : index
    %c0_338 = arith.constant 0 : index
    %306 = vector.load %arg2[%c4_335, %c1_336, %c0_337, %c0_338] : memref<5x9x128x128xbf16, #tpu.memory_space<vmem>>, vector<1x1x128x128xbf16>
    %307 = vector.shape_cast %306 : vector<1x1x128x128xbf16> to vector<128x128xbf16>
    %cst_339 = arith.constant dense<0.000000e+00> : vector<256x128xf32>
    %308 = tpu.matmul %305, %307, %cst_339 {dimension_numbers = #tpu.dot_dimension_numbers<[1], [0], [0], [1], [0, 0, 1, 1], [], []>} : vector<256x128xbf16>, vector<128x128xbf16>, vector<256x128xf32> -> vector<256x128xf32>
    %309 = arith.addf %302, %308 : vector<256x128xf32>
    %c0_340 = arith.constant 0 : index
    %c9_341 = arith.constant 9 : index
    %c0_342 = arith.constant 0 : index
    %310 = vector.load %arg6[%c0_340, %c9_341, %c0_342] : memref<18x32x128xf32, #tpu.memory_space<vmem>>, vector<16x16x128xf32>
    %311 = vector.shape_cast %310 : vector<16x16x128xf32> to vector<256x128xf32>
    %312 = arith.truncf %311 : vector<256x128xf32> to vector<256x128xbf16>
    %c4_343 = arith.constant 4 : index
    %c2_344 = arith.constant 2 : index
    %c0_345 = arith.constant 0 : index
    %c0_346 = arith.constant 0 : index
    %313 = vector.load %arg2[%c4_343, %c2_344, %c0_345, %c0_346] : memref<5x9x128x128xbf16, #tpu.memory_space<vmem>>, vector<1x1x128x128xbf16>
    %314 = vector.shape_cast %313 : vector<1x1x128x128xbf16> to vector<128x128xbf16>
    %cst_347 = arith.constant dense<0.000000e+00> : vector<256x128xf32>
    %315 = tpu.matmul %312, %314, %cst_347 {dimension_numbers = #tpu.dot_dimension_numbers<[1], [0], [0], [1], [0, 0, 1, 1], [], []>} : vector<256x128xbf16>, vector<128x128xbf16>, vector<256x128xf32> -> vector<256x128xf32>
    %316 = arith.addf %309, %315 : vector<256x128xf32>
    %c1_348 = arith.constant 1 : index
    %c7_349 = arith.constant 7 : index
    %c0_350 = arith.constant 0 : index
    %317 = vector.load %arg6[%c1_348, %c7_349, %c0_350] : memref<18x32x128xf32, #tpu.memory_space<vmem>>, vector<16x16x128xf32>
    %318 = vector.shape_cast %317 : vector<16x16x128xf32> to vector<256x128xf32>
    %319 = arith.truncf %318 : vector<256x128xf32> to vector<256x128xbf16>
    %c4_351 = arith.constant 4 : index
    %c3_352 = arith.constant 3 : index
    %c0_353 = arith.constant 0 : index
    %c0_354 = arith.constant 0 : index
    %320 = vector.load %arg2[%c4_351, %c3_352, %c0_353, %c0_354] : memref<5x9x128x128xbf16, #tpu.memory_space<vmem>>, vector<1x1x128x128xbf16>
    %321 = vector.shape_cast %320 : vector<1x1x128x128xbf16> to vector<128x128xbf16>
    %cst_355 = arith.constant dense<0.000000e+00> : vector<256x128xf32>
    %322 = tpu.matmul %319, %321, %cst_355 {dimension_numbers = #tpu.dot_dimension_numbers<[1], [0], [0], [1], [0, 0, 1, 1], [], []>} : vector<256x128xbf16>, vector<128x128xbf16>, vector<256x128xf32> -> vector<256x128xf32>
    %323 = arith.addf %316, %322 : vector<256x128xf32>
    %c1_356 = arith.constant 1 : index
    %c8_357 = arith.constant 8 : index
    %c0_358 = arith.constant 0 : index
    %324 = vector.load %arg6[%c1_356, %c8_357, %c0_358] : memref<18x32x128xf32, #tpu.memory_space<vmem>>, vector<16x16x128xf32>
    %325 = vector.shape_cast %324 : vector<16x16x128xf32> to vector<256x128xf32>
    %326 = arith.truncf %325 : vector<256x128xf32> to vector<256x128xbf16>
    %c4_359 = arith.constant 4 : index
    %c4_360 = arith.constant 4 : index
    %c0_361 = arith.constant 0 : index
    %c0_362 = arith.constant 0 : index
    %327 = vector.load %arg2[%c4_359, %c4_360, %c0_361, %c0_362] : memref<5x9x128x128xbf16, #tpu.memory_space<vmem>>, vector<1x1x128x128xbf16>
    %328 = vector.shape_cast %327 : vector<1x1x128x128xbf16> to vector<128x128xbf16>
    %cst_363 = arith.constant dense<0.000000e+00> : vector<256x128xf32>
    %329 = tpu.matmul %326, %328, %cst_363 {dimension_numbers = #tpu.dot_dimension_numbers<[1], [0], [0], [1], [0, 0, 1, 1], [], []>} : vector<256x128xbf16>, vector<128x128xbf16>, vector<256x128xf32> -> vector<256x128xf32>
    %330 = arith.addf %323, %329 : vector<256x128xf32>
    %c1_364 = arith.constant 1 : index
    %c9_365 = arith.constant 9 : index
    %c0_366 = arith.constant 0 : index
    %331 = vector.load %arg6[%c1_364, %c9_365, %c0_366] : memref<18x32x128xf32, #tpu.memory_space<vmem>>, vector<16x16x128xf32>
    %332 = vector.shape_cast %331 : vector<16x16x128xf32> to vector<256x128xf32>
    %333 = arith.truncf %332 : vector<256x128xf32> to vector<256x128xbf16>
    %c4_367 = arith.constant 4 : index
    %c5_368 = arith.constant 5 : index
    %c0_369 = arith.constant 0 : index
    %c0_370 = arith.constant 0 : index
    %334 = vector.load %arg2[%c4_367, %c5_368, %c0_369, %c0_370] : memref<5x9x128x128xbf16, #tpu.memory_space<vmem>>, vector<1x1x128x128xbf16>
    %335 = vector.shape_cast %334 : vector<1x1x128x128xbf16> to vector<128x128xbf16>
    %cst_371 = arith.constant dense<0.000000e+00> : vector<256x128xf32>
    %336 = tpu.matmul %333, %335, %cst_371 {dimension_numbers = #tpu.dot_dimension_numbers<[1], [0], [0], [1], [0, 0, 1, 1], [], []>} : vector<256x128xbf16>, vector<128x128xbf16>, vector<256x128xf32> -> vector<256x128xf32>
    %337 = arith.addf %330, %336 : vector<256x128xf32>
    %c2_372 = arith.constant 2 : index
    %c7_373 = arith.constant 7 : index
    %c0_374 = arith.constant 0 : index
    %338 = vector.load %arg6[%c2_372, %c7_373, %c0_374] : memref<18x32x128xf32, #tpu.memory_space<vmem>>, vector<16x16x128xf32>
    %339 = vector.shape_cast %338 : vector<16x16x128xf32> to vector<256x128xf32>
    %340 = arith.truncf %339 : vector<256x128xf32> to vector<256x128xbf16>
    %c4_375 = arith.constant 4 : index
    %c6_376 = arith.constant 6 : index
    %c0_377 = arith.constant 0 : index
    %c0_378 = arith.constant 0 : index
    %341 = vector.load %arg2[%c4_375, %c6_376, %c0_377, %c0_378] : memref<5x9x128x128xbf16, #tpu.memory_space<vmem>>, vector<1x1x128x128xbf16>
    %342 = vector.shape_cast %341 : vector<1x1x128x128xbf16> to vector<128x128xbf16>
    %cst_379 = arith.constant dense<0.000000e+00> : vector<256x128xf32>
    %343 = tpu.matmul %340, %342, %cst_379 {dimension_numbers = #tpu.dot_dimension_numbers<[1], [0], [0], [1], [0, 0, 1, 1], [], []>} : vector<256x128xbf16>, vector<128x128xbf16>, vector<256x128xf32> -> vector<256x128xf32>
    %344 = arith.addf %337, %343 : vector<256x128xf32>
    %c2_380 = arith.constant 2 : index
    %c8_381 = arith.constant 8 : index
    %c0_382 = arith.constant 0 : index
    %345 = vector.load %arg6[%c2_380, %c8_381, %c0_382] : memref<18x32x128xf32, #tpu.memory_space<vmem>>, vector<16x16x128xf32>
    %346 = vector.shape_cast %345 : vector<16x16x128xf32> to vector<256x128xf32>
    %347 = arith.truncf %346 : vector<256x128xf32> to vector<256x128xbf16>
    %c4_383 = arith.constant 4 : index
    %c7_384 = arith.constant 7 : index
    %c0_385 = arith.constant 0 : index
    %c0_386 = arith.constant 0 : index
    %348 = vector.load %arg2[%c4_383, %c7_384, %c0_385, %c0_386] : memref<5x9x128x128xbf16, #tpu.memory_space<vmem>>, vector<1x1x128x128xbf16>
    %349 = vector.shape_cast %348 : vector<1x1x128x128xbf16> to vector<128x128xbf16>
    %cst_387 = arith.constant dense<0.000000e+00> : vector<256x128xf32>
    %350 = tpu.matmul %347, %349, %cst_387 {dimension_numbers = #tpu.dot_dimension_numbers<[1], [0], [0], [1], [0, 0, 1, 1], [], []>} : vector<256x128xbf16>, vector<128x128xbf16>, vector<256x128xf32> -> vector<256x128xf32>
    %351 = arith.addf %344, %350 : vector<256x128xf32>
    %c2_388 = arith.constant 2 : index
    %c9_389 = arith.constant 9 : index
    %c0_390 = arith.constant 0 : index
    %352 = vector.load %arg6[%c2_388, %c9_389, %c0_390] : memref<18x32x128xf32, #tpu.memory_space<vmem>>, vector<16x16x128xf32>
    %353 = vector.shape_cast %352 : vector<16x16x128xf32> to vector<256x128xf32>
    %354 = arith.truncf %353 : vector<256x128xf32> to vector<256x128xbf16>
    %c4_391 = arith.constant 4 : index
    %c8_392 = arith.constant 8 : index
    %c0_393 = arith.constant 0 : index
    %c0_394 = arith.constant 0 : index
    %355 = vector.load %arg2[%c4_391, %c8_392, %c0_393, %c0_394] : memref<5x9x128x128xbf16, #tpu.memory_space<vmem>>, vector<1x1x128x128xbf16>
    %356 = vector.shape_cast %355 : vector<1x1x128x128xbf16> to vector<128x128xbf16>
    %cst_395 = arith.constant dense<0.000000e+00> : vector<256x128xf32>
    %357 = tpu.matmul %354, %356, %cst_395 {dimension_numbers = #tpu.dot_dimension_numbers<[1], [0], [0], [1], [0, 0, 1, 1], [], []>} : vector<256x128xbf16>, vector<128x128xbf16>, vector<256x128xf32> -> vector<256x128xf32>
    %358 = arith.addf %351, %357 : vector<256x128xf32>
    %c4_396 = arith.constant 4 : index
    %c0_397 = arith.constant 0 : index
    %c0_398 = arith.constant 0 : index
    %359 = vector.load %arg3[%c4_396, %c0_397, %c0_398] : memref<5x1x128xf32, #tpu.memory_space<vmem>>, vector<1x1x128xf32>
    %360 = vector.shape_cast %359 : vector<1x1x128xf32> to vector<1x128xf32>
    %361 = vector.broadcast %360 : vector<1x128xf32> to vector<256x128xf32>
    %362 = arith.addf %358, %361 : vector<256x128xf32>
    %cst_399 = arith.constant 0.000000e+00 : f32
    %363 = vector.broadcast %cst_399 : f32 to vector<256x128xf32>
    %364 = arith.maximumf %362, %363 : vector<256x128xf32>
    %365 = vector.shape_cast %364 : vector<256x128xf32> to vector<1x256x128xf32>
    %c0_400 = arith.constant 0 : index
    %c0_401 = arith.constant 0 : index
    %c0_402 = arith.constant 0 : index
    %366 = vector.load %arg5[%c0_400, %c0_401, %c0_402] : memref<1x256x128xf32, #tpu.memory_space<vmem>>, vector<1x256x128xf32>
    tpu.vector_store %arg5[%c0_400, %c0_401, %c0_402], %365 {strides = array<i32>} : memref<1x256x128xf32, #tpu.memory_space<vmem>>, vector<1x256x128xf32>,
    return
  }
  func.func @transform_0(%arg0: i32) -> (i32, i32, i32, i32) {
    %c0_i32 = arith.constant 0 : i32
    %c0_i32_0 = arith.constant 0 : i32
    %c0_i32_1 = arith.constant 0 : i32
    %c0_i32_2 = arith.constant 0 : i32
    return %arg0, %c0_i32, %c0_i32_0, %c0_i32_1 : i32, i32, i32, i32
  }
  func.func @transform_1(%arg0: i32) -> (i32, i32, i32, i32) {
    %c0_i32 = arith.constant 0 : i32
    %c0_i32_0 = arith.constant 0 : i32
    %c0_i32_1 = arith.constant 0 : i32
    %c0_i32_2 = arith.constant 0 : i32
    %c0_i32_3 = arith.constant 0 : i32
    return %c0_i32, %c0_i32_0, %c0_i32_1, %c0_i32_2 : i32, i32, i32, i32
  }
  func.func @transform_2(%arg0: i32) -> (i32, i32, i32) {
    %c0_i32 = arith.constant 0 : i32
    %c0_i32_0 = arith.constant 0 : i32
    %c0_i32_1 = arith.constant 0 : i32
    %c0_i32_2 = arith.constant 0 : i32
    return %c0_i32, %c0_i32_0, %c0_i32_1 : i32, i32, i32
  }
  func.func @transform_3(%arg0: i32) -> (i32, i32, i32) {
    %c0_i32 = arith.constant 0 : i32
    %c0_i32_0 = arith.constant 0 : i32
    %c0_i32_1 = arith.constant 0 : i32
    return %arg0, %c0_i32, %c0_i32_0 : i32, i32, i32
  }
  func.func @transform_4(%arg0: i32) -> (i32, i32, i32) {
    %c0_i32 = arith.constant 0 : i32
    %c0_i32_0 = arith.constant 0 : i32
    %c0_i32_1 = arith.constant 0 : i32
    return %arg0, %c0_i32, %c0_i32_0 : i32, i32, i32
  }
}

</mosaic_0001>

<bundles_post_ra>
// kernel: tpu_custom_call.1
= control target key start
LH: loop header
LB: loop body
LE: loop exit
PB: predicated region body
PF: predicated region fallthrough
CT: control target
= control target key end

     0   :  { %10 = vsyncpa [#allocation4], 0  ;;  %s21897_s0 = inlined_call_operand.hbm [shape: f32[2,16,16,128], index: 0, kind: input, shape index: {}]   ;;  %s21898_s1 = inlined_call_operand.hbm [shape: bf16[5,9,128,128], index: 1, kind: input, shape index: {}]   ;;  %s21899_s2 = inlined_call_operand.hbm [shape: f32[5,1,128], index: 2, kind: input, shape index: {}]   ;;  %s21900_s3 = inlined_call_operand.hbm [shape: f32[2,256,128], index: 3, kind: output, shape index: {0}]   ;;  %s21901_s4 = inlined_call_operand.hbm [shape: f32[2,256,128], index: 4, kind: output, shape index: {1}]  }
   0x1   :  { %12 = vsyncpa [#allocation4 + $0x1], 0 }
   0x2   :  { %13 = vsyncpa [#allocation7], 0 }
   0x3   :  { %14 = vsyncpa [#allocation5], 0 }
   0x4   :  { %16 = vsyncpa [#allocation5 + $0x1], 0 }
   0x5   :  { %17 = vsyncpa [#allocation11], 0 }
   0x6   :  { %19 = vsyncpa [#allocation11 + $0x1], 0  ;;  %s20164_s15 = smov 0   ;;  %s20166_s16 = smov 0  }
   0x7   :  { %s20168_s17 = smov 0   ;;  %s20170_s18 = smov 0  }
   0x8 LB: > { %s20185_s19 = sadd.s32 4294967295, %s20122_s18   ;;  %s14554_s20 = sadd.s32 4294967294, %s20122_s18   ;;  %s20122_s18 = sphi %s20170_s18, %s21921_s18   ;;  %s20118_s17 = sphi %s20168_s17, %s21920_s17   ;;  %s20114_s16 = sphi %s20166_s16, %s21919_s16   ;;  %s20110_s15 = sphi %s20164_s15, %s21918_s15  }
   0x9   : > { %p45_p0 = scmp.ne.s32.totalorder %s20114_s16, %s20110_s15  ;;  %p21902_p1 = scmp.eq.s32.totalorder %s20185_s19, 0 }
   0xa   : > { %p117_p3 = scmp.eq.s32.totalorder %s14554_s20, 1  ;;  %p14555_p5 = scmp.ge.s32.totalorder %s20122_s18, 1 }
   0xb   : > { %p20194_p4 = por %p21902_p1, %p45_p0  ;;  %p150_p7 = scmp.lt.s32.totalorder %s20122_s18, 3 }
   0xc   : > { %p20199_p6 = por %p117_p3, %p45_p0  ;;  %s20124_s24 = smov [#allocation6]  }
   0xd   : > { %s21905_s21 = scalar_select %p20194_p4, 1, 0 }
   0xe   : > { %s21906_s22 = scalar_select %p20199_p6, 1, 0 }
   0xf   : > { %p20204_p8 = pnand %p14555_p5, %p150_p7  ;;  %s162_s25 = sshll.u32 %s20124_s24, 4  ;;  %s20208_s25 = int_to_ptr.vmem [resolvable:$true] %s162_s25 }
  0x10   : > { %s20125_s27 = smov [#allocation8]   ;;  %s19934_s5 = scalar_lea.hbm %s21898_s1, 46080 }
  0x11   : > { %p19494_p9 = pneg %p20204_p8  ;;  %s175_s28 = sshll.u32 %s20125_s27, 4  ;;  %s20219_s28 = int_to_ptr.vmem [resolvable:$true] %s175_s28 }
  0x12   : > { %p19935_p12 = scmp.ne.s32.totalorder %s21898_s1, %s19934_s5  ;;  %p19941_p5 = scmp.lt.u32.totalorder %s19934_s5, %s21898_s1 }
  0x13   : > { %p20215_p11 = pnand %p19494_p9, %p21902_p1 }
  0x15   : > { %p19936_p13 = pneg %p20215_p11 }
  0x17   : > { %p19937_p0 = pnand %p19936_p13, %p19935_p12 }
  0x19   : > { %p19938_p3 = pneg %p19937_p0 }
  0x1b   : > { %p19943_p7 = pnand %p19941_p5, %p19938_p3 }
  0x1d   : > { %19946 = shalt.err (!%p19943_p7)
}
  0x1e   : > { %s19947_s10 = scalar_lea.vmem %s20208_s25, 46080  ;;  %p19955_p2 = scmp.lt.s32.totalorder %s20208_s25, %s20208_s25 }
  0x1f   : > { %p19948_p9 = scmp.ne.s32.totalorder %s20208_s25, %s19947_s10  ;;  %p19956_p12 = scmp.lt.s32.totalorder %s19947_s10, %s19947_s10 }
  0x21   : > { %p19950_p10 = pnand %p19948_p9, %p19936_p13  ;;  %p19957_p0 = por %p19956_p12, %p19955_p2 }
  0x23   : > { %p19951_p1 = pneg %p19950_p10 }
  0x25   : > { %p19958_p6 = pnand %p19957_p0, %p19951_p1 }
  0x27   : > { %19961 = shalt.err (!%p19958_p6)
}
  0x28   : > { %s20126_s11 = smov 64   ;;  %s20127_s12 = smov 4  }
  0x29   : > { %19497 = dma.hbm_to_vmem [thread:$0]  (!%p20215_p11), %s21898_s1, 46080, %s20208_s25, [#allocation7], %s20126_s11, %s20126_s11, %s20127_s12  }
  0x2a   : > { %s19962_s27 = scalar_lea.hbm %s21899_s2, 80 }
  0x2b   : > { %p19963_p2 = scmp.ne.s32.totalorder %s21899_s2, %s19962_s27  ;;  %p19969_p10 = scmp.lt.u32.totalorder %s19962_s27, %s21899_s2 }
  0x2d   : > { %p19965_p1 = pnand %p19963_p2, %p19936_p13 }
  0x2f   : > { %p19966_p6 = pneg %p19965_p1 }
  0x31   : > { %p19971_p3 = pnand %p19969_p10, %p19966_p6 }
  0x33   : > { %19974 = shalt.err (!%p19971_p3)
}
  0x34   : > { %s19975_s25 = scalar_lea.vmem %s20219_s28, 80  ;;  %s19982_s7 = scalar_lea.vmem %s20219_s28, 96 }
  0x35   : > { %p19976_p5 = scmp.ne.s32.totalorder %s20219_s28, %s19975_s25  ;;  %p19983_p12 = scmp.lt.s32.totalorder %s20219_s28, %s20219_s28 }
  0x36   : > { %p19984_p0 = scmp.lt.s32.totalorder %s19982_s7, %s19975_s25 }
  0x37   : > { %p19978_p7 = pnand %p19976_p5, %p19936_p13 }
  0x38   : > { %p19985_p2 = por %p19984_p0, %p19983_p12 }
  0x39   : > { %p19979_p9 = pneg %p19978_p7 }
  0x3b   : > { %p19986_p1 = pnand %p19985_p2, %p19979_p9 }
  0x3d   : > { %19989 = shalt.err (!%p19986_p1)
}
  0x3e   : > { %s20128_s8 = smov 16   ;;  %s20129_s9 = smov 1  }
  0x3f   : > { %19500 = dma.hbm_to_vmem [thread:$0]  (!%p20215_p11), %s21899_s2, 80, %s20219_s28, [#allocation7], %s20128_s8, %s20128_s8, %s20129_s9  }
  0x40   : > { %s20275_s12 = sadd.s32 1, %s20122_s18   ;;  %s32_s14 = sadd.s32 1, %s20118_s17 }
  0x41   : > { %s29_s13 = ssub.s32 %s20122_s18, %s20275_s12  ;;  %p39_p6 = scmp.ne.s32.totalorder %s20118_s17, %s20114_s16 }
  0x42   : > { %p30_p13 = scmp.eq.s32.totalorder %s29_s13, 0  ;;  %p40_p10 = scmp.eq.s32.totalorder %s20122_s18, 0 }
  0x43   : > { %p21909_p5 = scmp.eq.s32.totalorder %s20185_s19, 1  ;;  %p19514_p9 = scmp.lt.s32.totalorder %s20122_s18, 2 }
  0x44   : > { %s20284_s20 = scalar_select %p30_p13, %s20118_s17, %s32_s14  }
  0x45   : > { %p41_p3 = por %p40_p10, %p39_p6  ;;  %p20288_p7 = por %p21909_p5, %p39_p6 }
  0x46   : > { %s189_s26 = sand.u32 1, %s20118_s17   ;;  %s14941_s28 = sshll.u32 %s20122_s18, 12 }
  0x47   : > { %s21910_s24 = scalar_select %p20288_p7, 1, 0 }
  0x48   : > { %s14559_s27 = sshll.u32 %s189_s26, 8  ;;  %s20298_s5 = scalar_lea.hbm %s21897_s0, %s14941_s28 }
  0x49   : > { %s193_s6 = scalar_lea.vmem [#allocation3], %s14559_s27  ;;  %p20302_p11 = pnand %p19514_p9, %p41_p3 }
  0x4a   : > { %s200_s25 = sshll.u32 %s193_s6, 4  ;;  %s20306_s8 = scalar_lea.sflag [#allocation4], %s189_s26  ;;  %s20300_s25 = int_to_ptr.vmem [resolvable:$true] %s200_s25 }
  0x4b   : > { %s19990_s9 = scalar_lea.hbm %s20298_s5, 4096  ;;  %p19992_p0 = pneg %p20302_p11 }
  0x4c   : > { %p19991_p12 = scmp.ne.s32.totalorder %s20298_s5, %s19990_s9  ;;  %s19995_s13 = scalar_lea.hbm %s21897_s0, 8192 }
  0x4d   : > { %p19996_p13 = scmp.lt.u32.totalorder %s20298_s5, %s21897_s0  ;;  %p19997_p6 = scmp.lt.u32.totalorder %s19995_s13, %s19990_s9 }
  0x4e   : > { %p19993_p2 = pnand %p19992_p0, %p19991_p12  ;;  %p19999_p3 = scmp.lt.u32.totalorder %s19990_s9, %s20298_s5 }
  0x4f   : > { %p19998_p10 = por %p19997_p6, %p19996_p13 }
  0x50   : > { %p19994_p1 = pneg %p19993_p2 }
  0x51   : > { %p20000_p5 = por %p19999_p3, %p19998_p10 }
  0x53   : > { %p20001_p9 = pnand %p20000_p5, %p19994_p1 }
  0x55   : > { %20004 = shalt.err (!%p20001_p9)
}
  0x56   : > { %s20005_s26 = scalar_lea.vmem %s20300_s25, 4096  ;;  %s20130_s28 = smov [#allocation3]  }
  0x57   : > { %p20006_p12 = scmp.ne.s32.totalorder %s20300_s25, %s20005_s26  ;;  %s20010_s29 = sshll.u32 %s20130_s28, 4  ;;  %s20011_s29 = int_to_ptr.vmem [resolvable:$false] %s20010_s29 }
  0x58   : > { %s20012_s30 = scalar_lea.vmem %s20011_s29, 8192  ;;  %p20013_p4 = scmp.lt.s32.totalorder %s20300_s25, %s20011_s29 }
  0x59   : > { %p20008_p2 = pnand %p20006_p12, %p19992_p0  ;;  %p20014_p13 = scmp.lt.s32.totalorder %s20012_s30, %s20005_s26 }
  0x5b   : > { %p20009_p7 = pneg %p20008_p2  ;;  %p20015_p6 = por %p20014_p13, %p20013_p4 }
  0x5d   : > { %p20016_p10 = pnand %p20015_p6, %p20009_p7 }
  0x5f   : > { %20019 = shalt.err (!%p20016_p10)
}
  0x60   : > { %s20131_s6 = smov 128   ;;  %s20132_s9 = smov 8  }
  0x61   : > { %19504 = dma.hbm_to_vmem [thread:$0]  (!%p20302_p11), %s20298_s5, 4096, %s20300_s25, %s20306_s8, %s20131_s6, %s20131_s6, %s20132_s9  }
  0x62   : > { %212 = sbr.rel (%p20204_p8) target bundleno = 3590 (0xe06), region = 32  ;;  %s20337_s10 = sand.u32 (!%p20204_p8), 1, %s20114_s16  }
  0x63   : > { %s20340_s11 = sshll.u32 (!%p20204_p8), %s20337_s10, 8  ;;  %s215_s13 = scalar_lea.sflag (!%p20204_p8), [#allocation4], %s20337_s10 }
  0x64   : > { %s20344_s14 = scalar_lea.vmem (!%p20204_p8), [#allocation3], %s20340_s11  ;;  %p21912_p4 = scmp.ne.s32.totalorder (!%p20204_p8), %s21905_s21, 0 }
  0x69   : > { %20093 = dma.done.wait (%p21912_p4), %s215_s13, 4096  }
  0x6a   : > { %20095 = vsyncadd (%p21912_p4), %s215_s13, 4294963200  ;;  %p21913_p7 = scmp.eq.s32.totalorder %s20185_s19, 0 }
  0x6c   : > { %20097 = dma.done.wait (%p21913_p7), [#allocation7], 46160   ;;  %p21914_p8 = pmov %p21913_p7 }
  0x6d   : > { %v20133_v0 = vmov 0.0   ;;  %v20134_v1 = vmov 0.0|0.0   ;;  %v19561_v2 = vld [vmem:[#allocation6 + $0x40] sm:$0xff]   ;;  %v19563_v4 = vld [vmem:[#allocation6 + $0x48] sm:$0xff]   ;;  %v19565_v6 = vld [vmem:[#allocation6 + $0x50] sm:$0xff]   ;;  %s21193_s21 = scalar_lea.vmem [#allocation9], %s20340_s11 }
  0x6e   : > { %20099 = vsyncadd (%p21914_p8), [#allocation7], 4294921136  ;;  %258 = vst [vmem:[#allocation2 + $0x8] sm:$0xff] %v20133_v0  ;;  %16040 = vmatprep.mubr.bf16.mxu1 %v20134_v1  ;;  %v19562_v3 = vld [vmem:[#allocation6 + $0x100] sm:$0xff]   ;;  %16024 = vmatprep.subr.bf16.mxu1 %v19561_v2  ;;  %v19564_v5 = vld [vmem:[#allocation6 + $0x108] sm:$0xff]   ;;  %s14942_s23 = sshll.u32 %s20185_s19, 12 }
  0x6f   : > { %259 = vst [vmem:[#allocation2 + $0x10] sm:$0xff] %v20133_v0  ;;  %257 = vst [vmem:[#allocation2] sm:$0xff] %v20133_v0  ;;  %16216 = vmatprep.subr.bf16.mxu0 %v19562_v3  ;;  %16025 = vmatpush3.bf16.msra.mxu1 %v19561_v2  ;;  %v19566_v7 = vld [vmem:[#allocation6 + $0x110] sm:$0xff]   ;;  %v19567_v8 = vld [vmem:[#allocation6 + $0x58] sm:$0xff]   ;;  %s21741_s7 = scalar_lea.hbm %s21900_s3, %s14942_s23  ;;  %s14414_s8 = sshll.u32 %s21193_s21, 4  ;;  %s21744_s8 = int_to_ptr.vmem [resolvable:$true] %s14414_s8 }
  0x70   : > { %260 = vst [vmem:[#allocation2 + $0x18] sm:$0xff] %v20133_v0  ;;  %261 = vst [vmem:[#allocation2 + $0x20] sm:$0xff] %v20133_v0  ;;  %16217 = vmatpush3.bf16.msra.mxu0 %v19562_v3  ;;  %16026 = vmatprep.subr.bf16.mxu1 %v19563_v4  ;;  %v19568_v9 = vld [vmem:[#allocation6 + $0x118] sm:$0xff]   ;;  %v19569_v10 = vld [vmem:[#allocation6 + $0x60] sm:$0xff]   ;;  %s14396_s27 = scalar_lea.sflag [#allocation5], %s20337_s10  ;;  %s20020_s26 = scalar_lea.vmem %s21744_s8, 4096 }
  0x71   : > { %264 = vst [vmem:[#allocation2 + $0x38] sm:$0xff] %v20133_v0  ;;  %265 = vst [vmem:[#allocation2 + $0x40] sm:$0xff] %v20133_v0  ;;  %16218 = vmatprep.subr.bf16.mxu0 %v19564_v5  ;;  %v19570_v11 = vld [vmem:[#allocation6 + $0x120] sm:$0xff]   ;;  %v19571_v12 = vld [vmem:[#allocation6 + $0x68] sm:$0xff]   ;;  %p20021_p11 = scmp.ne.s32.totalorder %s21744_s8, %s20020_s26  ;;  %p21915_p0 = scmp.ne.s32.totalorder %s21910_s24, 0 }
  0x72   : > { %268 = vst [vmem:[#allocation2 + $0x58] sm:$0xff] %v20133_v0  ;;  %269 = vst [vmem:[#allocation2 + $0x60] sm:$0xff] %v20133_v0  ;;  %v329_v13 = vld [vmem:[%s20344_s14] sm:$0xff]  ;;  %v330_v14 = vld [vmem:[%s20344_s14 + $0x8] sm:$0xff]  ;;  %s20135_s28 = smov [#allocation9]  }
  0x73   : > { %272 = vst [vmem:[#allocation2 + $0x78] sm:$0xff] %v20133_v0  ;;  %273 = vst [vmem:[#allocation2 + $0x80] sm:$0xff] %v20133_v0  ;;  %16027 = vmatpush3.bf16.msra.mxu1 %v19563_v4  ;;  %v19572_v15 = vld [vmem:[#allocation6 + $0x128] sm:$0xff]   ;;  %v1585_v16 = vpack.c.bf16 %v330_v14, %v329_v13  ;;  %v331_v17 = vld [vmem:[%s20344_s14 + $0x10] sm:$0xff]  ;;  %p20022_p1 = pnand %p20021_p11, %p21915_p0  ;;  %s20024_s29 = sshll.u32 %s20135_s28, 4  ;;  %s20025_s29 = int_to_ptr.vmem [resolvable:$false] %s20024_s29 }
  0x74   : > { %276 = vst [vmem:[#allocation2 + $0x98] sm:$0xff] %v20133_v0  ;;  %277 = vst [vmem:[#allocation2 + $0xa0] sm:$0xff] %v20133_v0  ;;  %16219 = vmatpush3.bf16.msra.mxu0 %v19564_v5  ;;  %16028 = vmatprep.subr.bf16.mxu1 %v19565_v6  ;;  %v332_v18 = vld [vmem:[%s20344_s14 + $0x18] sm:$0xff]  ;;  %v19573_v19 = vld [vmem:[#allocation6 + $0x70] sm:$0xff]   ;;  %s20026_s30 = scalar_lea.vmem %s20025_s29, 8192  ;;  %p20027_p5 = scmp.lt.s32.totalorder %s21744_s8, %s20025_s29 }
  0x75   : > { %280 = vst [vmem:[#allocation2 + $0xb8] sm:$0xff] %v20133_v0  ;;  %281 = vst [vmem:[#allocation2 + $0xc0] sm:$0xff] %v20133_v0  ;;  %16220 = vmatprep.subr.bf16.mxu0 %v19566_v7  ;;  %16232 = vmatprep.mubr.bf16.mxu0 %v1585_v16  ;;  %v333_v20 = vld [vmem:[%s20344_s14 + $0x20] sm:$0xff]  ;;  %v334_v21 = vld [vmem:[%s20344_s14 + $0x28] sm:$0xff]  ;;  %v1586_v36 = vpack.c.bf16 %v332_v18, %v331_v17  ;;  %p20023_p3 = pneg %p20022_p1  ;;  %p20028_p9 = scmp.lt.s32.totalorder %s20026_s30, %s20020_s26 }
  0x76   : > { %284 = vst [vmem:[#allocation2 + $0xd8] sm:$0xff] %v20133_v0  ;;  %285 = vst [vmem:[#allocation2 + $0xe0] sm:$0xff] %v20133_v0  ;;  %v19574_v22 = vld [vmem:[#allocation6 + $0x130] sm:$0xff]   ;;  %v336_v24 = vld [vmem:[%s20344_s14 + $0x38] sm:$0xff]  ;;  %v1587_v39 = vpack.c.bf16 %v334_v21, %v333_v20 }
  0x77   : > { %288 = vst [vmem:[#allocation2 + $0xf8] sm:$0xff] %v20133_v0  ;;  %289 = vst [vmem:[#allocation2 + $0x100] sm:$0xff] %v20133_v0  ;;  %16029 = vmatpush3.bf16.msra.mxu1 %v19565_v6  ;;  %v335_v23 = vld [vmem:[%s20344_s14 + $0x30] sm:$0xff]  ;;  %v19575_v25 = vld [vmem:[#allocation6 + $0x78] sm:$0xff]   ;;  %p20029_p12 = por %p20028_p9, %p20027_p5 }
  0x78   : > { %292 = vst [vmem:[#allocation2 + $0x118] sm:$0xff] %v20133_v0  ;;  %293 = vst [vmem:[#allocation2 + $0x120] sm:$0xff] %v20133_v0  ;;  %16221 = vmatpush3.bf16.msra.mxu0 %v19566_v7  ;;  %16030 = vmatprep.subr.bf16.mxu1 %v19567_v8  ;;  %v19576_v26 = vld [vmem:[#allocation6 + $0x138] sm:$0xff]   ;;  %v337_v27 = vld [vmem:[%s20344_s14 + $0x40] sm:$0xff]  ;;  %v1588_v48 = vpack.c.bf16 %v336_v24, %v335_v23 }
  0x79   : > { %296 = vst [vmem:[#allocation2 + $0x138] sm:$0xff] %v20133_v0  ;;  %297 = vst [vmem:[#allocation2 + $0x140] sm:$0xff] %v20133_v0  ;;  %16222 = vmatprep.subr.bf16.mxu0 %v19568_v9  ;;  %v338_v28 = vld [vmem:[%s20344_s14 + $0x48] sm:$0xff]  ;;  %v20365_v29 = vld [vmem:[%s20344_s14 + $0x50] sm:$0xff]  ;;  %p20030_p2 = pnand %p20029_p12, %p20023_p3 }
  0x7a   : > { %300 = vst [vmem:[#allocation2 + $0x158] sm:$0xff] %v20133_v0  ;;  %301 = vst [vmem:[#allocation2 + $0x160] sm:$0xff] %v20133_v0  ;;  %v20368_v30 = vld [vmem:[%s20344_s14 + $0x58] sm:$0xff]  ;;  %v19577_v31 = vld [vmem:[#allocation6] sm:$0xff]   ;;  %v1589_v50 = vpack.c.bf16 %v338_v28, %v337_v27 }
  0x7b   : > { %304 = vst [vmem:[#allocation2 + $0x178] sm:$0xff] %v20133_v0  ;;  %305 = vst [vmem:[#allocation2 + $0x180] sm:$0xff] %v20133_v0  ;;  %16031 = vmatpush3.bf16.msra.mxu1 %v19567_v8  ;;  %v19578_v32 = vld [vmem:[#allocation6 + $0x140] sm:$0xff]   ;;  %v20376_v34 = vld [vmem:[%s20344_s14 + $0x68] sm:$0xff]  ;;  %v1590_v60 = vpack.c.bf16 %v20368_v30, %v20365_v29 }
  0x7c   : > { %308 = vst [vmem:[#allocation2 + $0x198] sm:$0xff] %v20133_v0  ;;  %309 = vst [vmem:[#allocation2 + $0x1a0] sm:$0xff] %v20133_v0  ;;  %16223 = vmatpush3.bf16.msra.mxu0 %v19568_v9  ;;  %16032 = vmatprep.subr.bf16.mxu1 %v19569_v10  ;;  %v20373_v33 = vld [vmem:[%s20344_s14 + $0x60] sm:$0xff]  ;;  %v20381_v35 = vld [vmem:[%s20344_s14 + $0x70] sm:$0xff] }
  0x7d   : > { %312 = vst [vmem:[#allocation2 + $0x1b8] sm:$0xff] %v20133_v0  ;;  %313 = vst [vmem:[#allocation2 + $0x1c0] sm:$0xff] %v20133_v0  ;;  %16224 = vmatprep.subr.bf16.mxu0 %v19570_v11  ;;  %v20384_v37 = vld [vmem:[%s20344_s14 + $0x78] sm:$0xff]  ;;  %v19579_v38 = vld [vmem:[#allocation6 + $0x148] sm:$0xff]   ;;  %v1591_v62 = vpack.c.bf16 %v20376_v34, %v20373_v33 }
  0x7e   : > { %316 = vst [vmem:[#allocation2 + $0x1d8] sm:$0xff] %v20133_v0  ;;  %317 = vst [vmem:[#allocation2 + $0x1e0] sm:$0xff] %v20133_v0  ;;  %v19580_v40 = vld [vmem:[#allocation6 + $0x8] sm:$0xff]   ;;  %v20389_v41 = vld [vmem:[%s20344_s14 + $0x80] sm:$0xff]  ;;  %v1592_v7 = vpack.c.bf16 %v20384_v37, %v20381_v35 }
  0x7f   : > { %320 = vst [vmem:[#allocation2 + $0x1f8] sm:$0xff] %v20133_v0  ;;  %321 = vst [vmem:[#allocation2 + $0x200] sm:$0xff] %v20133_v0  ;;  %16033 = vmatpush3.bf16.msra.mxu1 %v19569_v10  ;;  %v20392_v42 = vld [vmem:[%s20344_s14 + $0x88] sm:$0xff]  ;;  %v19583_v43 = vld [vmem:[#allocation6 + $0x10] sm:$0xff]  }
  0x80   : > { %324 = vst [vmem:[#allocation2 + $0x218] sm:$0xff] %v20133_v0  ;;  %325 = vst [vmem:[#allocation2 + $0x220] sm:$0xff] %v20133_v0  ;;  %16225 = vmatpush3.bf16.msra.mxu0 %v19570_v11  ;;  %16034 = vmatprep.subr.bf16.mxu1 %v19571_v12  ;;  %v19581_v44 = vld [vmem:[#allocation6 + $0x150] sm:$0xff]   ;;  %v20400_v46 = vld [vmem:[%s20344_s14 + $0x98] sm:$0xff] }
  0x81   : > { %326 = vst [vmem:[#allocation2 + $0x228] sm:$0xff] %v20133_v0  ;;  %327 = vst [vmem:[#allocation2 + $0x230] sm:$0xff] %v20133_v0  ;;  %16226 = vmatprep.subr.bf16.mxu0 %v19572_v15  ;;  %v20397_v45 = vld [vmem:[%s20344_s14 + $0x90] sm:$0xff]  ;;  %v20405_v47 = vld [vmem:[%s20344_s14 + $0xa0] sm:$0xff] }
  0x82   : > { %328 = vst [vmem:[#allocation2 + $0x238] sm:$0xff] %v20133_v0  ;;  %362 = vst [vmem:[#allocation2 + $0x28] sm:$0xff] %v329_v13  ;;  %v20408_v49 = vld [vmem:[%s20344_s14 + $0xa8] sm:$0xff]  ;;  %v19582_v51 = vld [vmem:[#allocation6 + $0x158] sm:$0xff]  }
  0x83   : > { %363 = vst [vmem:[#allocation2 + $0x30] sm:$0xff] %v330_v14  ;;  %364 = vst [vmem:[#allocation2 + $0x48] sm:$0xff] %v331_v17  ;;  %16035 = vmatpush3.bf16.msra.mxu1 %v19571_v12  ;;  %v19586_v52 = vld [vmem:[#allocation6 + $0x18] sm:$0xff]   ;;  %v20413_v53 = vld [vmem:[%s20344_s14 + $0xb0] sm:$0xff] }
  0x84   : > { %365 = vst [vmem:[#allocation2 + $0x50] sm:$0xff] %v332_v18  ;;  %366 = vst [vmem:[#allocation2 + $0x68] sm:$0xff] %v333_v20  ;;  %16227 = vmatpush3.bf16.msra.mxu0 %v19572_v15  ;;  %16036 = vmatprep.subr.bf16.mxu1 %v19573_v19  ;;  %v20416_v54 = vld [vmem:[%s20344_s14 + $0xb8] sm:$0xff]  ;;  %v20421_v55 = vld [vmem:[%s20344_s14 + $0xc0] sm:$0xff] }
  0x85   : > { %367 = vst [vmem:[#allocation2 + $0x70] sm:$0xff] %v334_v21  ;;  %368 = vst [vmem:[#allocation2 + $0x88] sm:$0xff] %v335_v23  ;;  %16228 = vmatprep.subr.bf16.mxu0 %v19574_v22  ;;  %v20424_v56 = vld [vmem:[%s20344_s14 + $0xc8] sm:$0xff]  ;;  %v19584_v57 = vld [vmem:[#allocation6 + $0x160] sm:$0xff]  }
  0x86   : > { %369 = vst [vmem:[#allocation2 + $0x90] sm:$0xff] %v336_v24  ;;  %370 = vst [vmem:[#allocation2 + $0xa8] sm:$0xff] %v337_v27  ;;  %v19589_v58 = vld [vmem:[#allocation6 + $0x20] sm:$0xff]   ;;  %v20429_v59 = vld [vmem:[%s20344_s14 + $0xd0] sm:$0xff] }
  0x87   : > { %371 = vst [vmem:[#allocation2 + $0xb0] sm:$0xff] %v338_v28  ;;  %16037 = vmatpush3.bf16.msra.mxu1 %v19573_v19  ;;  %372 = vst [vmem:[#allocation2 + $0xc8] sm:$0xff] %v20365_v29  ;;  %v20434_v61 = vld [vmem:[%s20344_s14 + $0xd8] sm:$0xff]  ;;  %v20441_v63 = vld [vmem:[%s20344_s14 + $0xe0] sm:$0xff]  ;;  %v500_v19 = vpack.c.bf16 %v20400_v46, %v20397_v45  ;;  %v501_v29 = vpack.c.bf16 %v20408_v49, %v20405_v47 }
  0x88   : > { %373 = vst [vmem:[#allocation2 + $0xd0] sm:$0xff] %v20368_v30  ;;  %16229 = vmatpush3.bf16.msra.mxu0 %v19574_v22  ;;  %16038 = vmatprep.subr.bf16.mxu1 %v19575_v25  ;;  %374 = vst [vmem:[#allocation2 + $0xe8] sm:$0xff] %v20373_v33  ;;  %v20444_v0 = vld [vmem:[%s20344_s14 + $0xe8] sm:$0xff]  ;;  %v19587_v3 = vld [vmem:[#allocation6 + $0x170] sm:$0xff]  }
  0x89   : > { %16230 = vmatprep.subr.bf16.mxu0 %v19576_v26  ;;  %375 = vst [vmem:[#allocation2 + $0xf0] sm:$0xff] %v20376_v34  ;;  %376 = vst [vmem:[#allocation2 + $0x108] sm:$0xff] %v20381_v35  ;;  %v19585_v1 = vld [vmem:[#allocation6 + $0x168] sm:$0xff]   ;;  %v19593_v6 = vld [vmem:[#allocation6 + $0x30] sm:$0xff]  }
  0x8a   : > { %377 = vst [vmem:[#allocation2 + $0x110] sm:$0xff] %v20384_v37  ;;  %378 = vst [vmem:[#allocation2 + $0x128] sm:$0xff] %v20389_v41  ;;  %v19591_v2 = vld [vmem:[#allocation6 + $0x28] sm:$0xff]   ;;  %v1860_v5 = vld [vmem:[#allocation2 + $0x31] sm:$0xff] }
  0x8b   : > { %16039 = vmatpush3.bf16.msra.mxu1 %v19575_v25  ;;  %379 = vst [vmem:[#allocation2 + $0x130] sm:$0xff] %v20392_v42  ;;  %380 = vst [vmem:[#allocation2 + $0x148] sm:$0xff] %v20397_v45  ;;  %v1859_v4 = vld [vmem:[#allocation2 + $0x29] sm:$0xff]  ;;  %v19588_v9 = vld [vmem:[#allocation6 + $0x178] sm:$0xff]  }
  0x8c   : > { %16231 = vmatpush3.bf16.msra.mxu0 %v19576_v26  ;;  %16072 = vmatprep.subr.bf16.mxu1 %v19577_v31  ;;  %381 = vst [vmem:[#allocation2 + $0x150] sm:$0xff] %v20400_v46  ;;  %382 = vst [vmem:[#allocation2 + $0x168] sm:$0xff] %v20405_v47  ;;  %v20450_v8 = vpack.c.bf16 %v1860_v5, %v1859_v4  ;;  %v19595_v10 = vld [vmem:[#allocation6 + $0x38] sm:$0xff]   ;;  %v1861_v11 = vld [vmem:[#allocation2 + $0x49] sm:$0xff] }
  0x8d   : > { %16264 = vmatprep.subr.bf16.mxu0 %v19578_v32  ;;  %383 = vst [vmem:[#allocation2 + $0x170] sm:$0xff] %v20408_v49  ;;  %384 = vst [vmem:[#allocation2 + $0x188] sm:$0xff] %v20413_v53  ;;  %v1862_v12 = vld [vmem:[#allocation2 + $0x51] sm:$0xff]  ;;  %v19590_v13 = vld [vmem:[#allocation6 + $0x180] sm:$0xff]  }
  0x8e   : > { %16041 = vmatmul.mubr.bf16.vlgmr.msra.gmra.mrb[0].mxu1 %v1585_v16  ;;  %385 = vst [vmem:[#allocation2 + $0x190] sm:$0xff] %v20416_v54  ;;  %386 = vst [vmem:[#allocation2 + $0x1a8] sm:$0xff] %v20421_v55  ;;  %v1863_v14 = vld [vmem:[#allocation2 + $0x69] sm:$0xff]  ;;  %v1864_v15 = vld [vmem:[#allocation2 + $0x71] sm:$0xff]  ;;  %v499_v16 = vpack.c.bf16 %v20392_v42, %v20389_v41  ;;  %v20457_v18 = vpack.c.bf16 %v1862_v12, %v1861_v11  ;;  %v20492_v41 = vpack.c.bf16 %v20434_v61, %v20429_v59 }
  0x8f   : > { %16233 = vmatmul.mubr.bf16.vlgmr.msra.gmra.mrb[0].mxu0 %v1586_v36  ;;  %16073 = vmatpush3.bf16.msra.mxu1 %v19577_v31  ;;  %387 = vst [vmem:[#allocation2 + $0x1b0] sm:$0xff] %v20424_v56  ;;  %388 = vst [vmem:[#allocation2 + $0x1c8] sm:$0xff] %v20429_v59  ;;  %v20455_v17 = vld [vmem:[#allocation6 + $0x80] sm:$0xff]   ;;  %v20461_v20 = vpack.c.bf16 %v1864_v15, %v1863_v14  ;;  %v19592_v21 = vld [vmem:[#allocation6 + $0x188] sm:$0xff]   ;;  %v502_v31 = vpack.c.bf16 %v20416_v54, %v20413_v53 }
  0x90   : > { %16265 = vmatpush3.bf16.msra.mxu0 %v19578_v32  ;;  %16044 = vmatprep.mubr.bf16.mxu1 %v1586_v36  ;;  %389 = vst [vmem:[#allocation2 + $0x1d0] sm:$0xff] %v20434_v61  ;;  %390 = vst [vmem:[#allocation2 + $0x1e8] sm:$0xff] %v20441_v63  ;;  %v1865_v22 = vld [vmem:[#allocation2 + $0x89] sm:$0xff]  ;;  %v1866_v23 = vld [vmem:[#allocation2 + $0x91] sm:$0xff] }
  0x91   : > { %16266 = vmatprep.subr.bf16.mxu0 %v19579_v38  ;;  %16236 = vmatprep.mubr.bf16.mxu0 %v1587_v39  ;;  %391 = vst [vmem:[#allocation2 + $0x1f0] sm:$0xff] %v20444_v0  ;;  %v1867_v24 = vld [vmem:[#allocation2 + $0xa9] sm:$0xff]  ;;  %v1868_v25 = vld [vmem:[#allocation2 + $0xb1] sm:$0xff]  ;;  %v20476_v30 = vpack.c.bf16 %v1866_v23, %v1865_v22 }
  0x92   : > { %16074 = vmatprep.subr.bf16.mxu1 %v19580_v40  ;;  %v20467_v26 = vld [vmem:[%s20344_s14 + $0xf0] sm:$0xff]  ;;  %v20470_v27 = vld [vmem:[%s20344_s14 + $0xf8] sm:$0xff]  ;;  %v20480_v32 = vpack.c.bf16 %v1868_v25, %v1867_v24  ;;  %v394_v46 = vld [vmem:[#allocation2 + $0x7] sm:$0xff] }
  0x93   : > { %16075 = vmatpush3.bf16.msra.mxu1 %v19580_v40  ;;  %v19594_v28 = vld [vmem:[#allocation6 + $0x190] sm:$0xff]   ;;  %392 = vst [vmem:[#allocation2 + $0x208] sm:$0xff] %v20467_v26  ;;  %393 = vst [vmem:[#allocation2 + $0x210] sm:$0xff] %v20470_v27  ;;  %v19596_v33 = vld [vmem:[#allocation6 + $0x198] sm:$0xff]  }
  0x94   : > { %16267 = vmatpush3.bf16.msra.mxu0 %v19579_v38  ;;  %16076 = vmatprep.subr.bf16.mxu1 %v19583_v43  ;;  %v1869_v34 = vld [vmem:[#allocation2 + $0xc9] sm:$0xff]  ;;  %v1870_v35 = vld [vmem:[#allocation2 + $0xd1] sm:$0xff]  ;;  %v19598_v38 = vld [vmem:[#allocation6 + $0x1a0] sm:$0xff]  }
  0x95   : > { %16268 = vmatprep.subr.bf16.mxu0 %v19581_v44  ;;  %v1871_v36 = vld [vmem:[#allocation2 + $0xe9] sm:$0xff]  ;;  %v1872_v37 = vld [vmem:[#allocation2 + $0xf1] sm:$0xff]  ;;  %v20488_v40 = vpack.c.bf16 %v1870_v35, %v1869_v34  ;;  %v19605_v35 = vld [vmem:[#allocation6 + $0xa0] sm:$0xff]  }
  0x96   : > { %16045 = vmatmul.mubr.bf16.gmra.mrb[4].mxu1 %v1587_v39  ;;  %v20486_v39 = vpack.c.bf16 %v20424_v56, %v20421_v55  ;;  %v20494_v42 = vpack.c.bf16 %v1872_v37, %v1871_v36  ;;  %v1874_v45 = vld [vmem:[#allocation2 + $0x111] sm:$0xff]  ;;  %v396_v55 = vld [vmem:[#allocation2 + $0x27] sm:$0xff] }
  0x97   : > { %16237 = vmatmul.mubr.bf16.gmra.mrb[4].mxu0 %v1588_v48  ;;  %16048 = vmatprep.mubr.bf16.mxu1 %v1588_v48  ;;  %v395_v47 = vld [vmem:[#allocation2 + $0xf] sm:$0xff]  ;;  %v400_v5 = vld [vmem:[#allocation2 + $0x67] sm:$0xff]  ;;  %v19603_v23 = vld [vmem:[#allocation6 + $0x98] sm:$0xff]  }
  0x98   : > { %16269 = vmatpush3.bf16.msra.mxu0 %v19581_v44  ;;  %16240 = vmatprep.mubr.bf16.mxu0 %v1589_v50  ;;  %v1873_v44 = vld [vmem:[#allocation2 + $0x109] sm:$0xff]  ;;  %v1876_v49 = vld [vmem:[#allocation2 + $0x131] sm:$0xff]  ;;  %v426_v53 = vpack.c.bf16 %v395_v47, %v394_v46 }
  0x99   : > { %16270 = vmatprep.subr.bf16.mxu0 %v19582_v51  ;;  %16077 = vmatpush3.bf16.msra.mxu1 %v19583_v43  ;;  %v19600_v43 = vld [vmem:[#allocation6 + $0x1a8] sm:$0xff]   ;;  %v1878_v59 = vld [vmem:[#allocation2 + $0x151] sm:$0xff] }
  0x9a   : > { %16078 = vmatprep.subr.bf16.mxu1 %v19586_v52  ;;  %v1875_v48 = vld [vmem:[#allocation2 + $0x129] sm:$0xff]  ;;  %v1884_v15 = vld [vmem:[#allocation2 + $0x1b1] sm:$0xff] }
  0x9b   : > { %v20506_v54 = vpack.c.bf16 %v1876_v49, %v1875_v48  ;;  %v397_v56 = vld [vmem:[#allocation2 + $0x2f] sm:$0xff]  ;;  %v402_v11 = vld [vmem:[#allocation2 + $0x87] sm:$0xff] }
  0x9c   : > { %16271 = vmatpush3.bf16.msra.mxu0 %v19582_v51  ;;  %v20502_v51 = vpack.c.bf16 %v20444_v0, %v20441_v63  ;;  %v399_v61 = vld [vmem:[#allocation2 + $0x4f] sm:$0xff]  ;;  %v20511_v0 = vld [vmem:[#allocation6 + $0x1c0] sm:$0xff]  }
  0x9d   : > { %16272 = vmatprep.subr.bf16.mxu0 %v19584_v57  ;;  %16079 = vmatpush3.bf16.msra.mxu1 %v19586_v52  ;;  %v20504_v52 = vpack.c.bf16 %v1874_v45, %v1873_v44  ;;  %v1880_v63 = vld [vmem:[#allocation2 + $0x171] sm:$0xff]  ;;  %v1885_v25 = vld [vmem:[#allocation2 + $0x1c9] sm:$0xff] }
  0x9e   : > { %16049 = vmatmul.mubr.bf16.gmra.mrb[8].mxu1 %v1589_v50  ;;  %16080 = vmatprep.subr.bf16.mxu1 %v19589_v58  ;;  %v19602_v50 = vld [vmem:[#allocation6 + $0x1b0] sm:$0xff]   ;;  %v408_v45 = vld [vmem:[#allocation2 + $0xe7] sm:$0xff] }
  0x9f   : > { %16241 = vmatmul.mubr.bf16.gmra.mrb[8].mxu0 %v1590_v60  ;;  %16052 = vmatprep.mubr.bf16.mxu1 %v1590_v60  ;;  %v398_v60 = vld [vmem:[#allocation2 + $0x47] sm:$0xff]  ;;  %v403_v12 = vld [vmem:[#allocation2 + $0x8f] sm:$0xff] }
  0xa0   : > { %16273 = vmatpush3.bf16.msra.mxu0 %v19584_v57  ;;  %16244 = vmatprep.mubr.bf16.mxu0 %v1591_v62  ;;  %v19604_v57 = vld [vmem:[#allocation6 + $0x1b8] sm:$0xff]   ;;  %v19601_v14 = vld [vmem:[#allocation6 + $0x90] sm:$0xff]   ;;  %v410_v49 = vld [vmem:[#allocation2 + $0x107] sm:$0xff] }
  0xa1   : > { %16274 = vmatprep.subr.bf16.mxu0 %v19585_v1  ;;  %16081 = vmatpush3.bf16.msra.mxu1 %v19589_v58  ;;  %v1877_v58 = vld [vmem:[#allocation2 + $0x149] sm:$0xff]  ;;  %v1888_v34 = vld [vmem:[#allocation2 + $0x1f1] sm:$0xff] }
  0xa2   : > { %16082 = vmatprep.subr.bf16.mxu1 %v19591_v2  ;;  %v405_v24 = vld [vmem:[#allocation2 + $0xaf] sm:$0xff] }
  0xa3   : > { %v409_v46 = vld [vmem:[#allocation2 + $0xef] sm:$0xff] }
  0xa4   : > { %16275 = vmatpush3.bf16.msra.mxu0 %v19585_v1  ;;  %v20513_v1 = vpack.c.bf16 %v397_v56, %v396_v55  ;;  %v1889_v47 = vld [vmem:[#allocation2 + $0x209] sm:$0xff]  ;;  %v1890_v48 = vld [vmem:[#allocation2 + $0x211] sm:$0xff]  ;;  %v2518_v55 = vpack.c.bf16 %v20470_v27, %v20467_v26  ;;  %v20553_v56 = vpack.c.bf16 %v409_v46, %v408_v45 }
  0xa5   : > { %16276 = vmatprep.subr.bf16.mxu0 %v19587_v3  ;;  %16083 = vmatpush3.bf16.msra.mxu1 %v19591_v2  ;;  %v20515_v2 = vpack.c.bf16 %v1878_v59, %v1877_v58  ;;  %v19611_v59 = vld [vmem:[#allocation6 + $0xb8] sm:$0xff]   ;;  %v941_v45 = vld [vmem:[#allocation2 + $0x9] sm:$0xff] }
  0xa6   : > { %16053 = vmatmul.mubr.bf16.gmra.mrb[12].mxu1 %v1591_v62  ;;  %16084 = vmatprep.subr.bf16.mxu1 %v19593_v6  ;;  %v1879_v62 = vld [vmem:[#allocation2 + $0x169] sm:$0xff]  ;;  %v942_v46 = vld [vmem:[#allocation2 + $0x11] sm:$0xff] }
  0xa7   : > { %16245 = vmatmul.mubr.bf16.gmra.mrb[12].mxu0 %v1592_v7  ;;  %16056 = vmatprep.mubr.bf16.mxu1 %v1592_v7  ;;  %v20519_v4 = vpack.c.bf16 %v1880_v63, %v1879_v62  ;;  %v19599_v7 = vld [vmem:[#allocation6 + $0x88] sm:$0xff]   ;;  %v2783_v27 = vld [vmem:[#allocation2 + $0x91] sm:$0xff] }
  0xa8   : > { %16277 = vmatpush3.bf16.msra.mxu0 %v19587_v3  ;;  %16280 = vmatprep.mubr.bf16.mxu0 %v20450_v8  ;;  %v20517_v3 = vpack.c.bf16 %v399_v61, %v398_v60  ;;  %v412_v60 = vld [vmem:[#allocation2 + $0x127] sm:$0xff]  ;;  %v413_v61 = vld [vmem:[#allocation2 + $0x12f] sm:$0xff] }
  0xa9   : > { %16278 = vmatprep.subr.bf16.mxu0 %v19588_v9  ;;  %16085 = vmatpush3.bf16.msra.mxu1 %v19593_v6  ;;  %v401_v6 = vld [vmem:[#allocation2 + $0x6f] sm:$0xff]  ;;  %v414_v62 = vld [vmem:[#allocation2 + $0x147] sm:$0xff] }
  0xaa   : > { %16086 = vmatprep.subr.bf16.mxu1 %v19595_v10  ;;  %v415_v63 = vld [vmem:[#allocation2 + $0x14f] sm:$0xff] }
  0xab   : > { %v2782_v26 = vld [vmem:[#allocation2 + $0x89] sm:$0xff] }
  0xac   : > { %16279 = vmatpush3.bf16.msra.mxu0 %v19588_v9  ;;  %v1881_v9 = vld [vmem:[#allocation2 + $0x189] sm:$0xff] }
  0xad   : > { %16312 = vmatprep.subr.bf16.mxu0 %v19590_v13  ;;  %16087 = vmatpush3.bf16.msra.mxu1 %v19595_v10  ;;  %v1882_v10 = vld [vmem:[#allocation2 + $0x191] sm:$0xff] }
  0xae   : > { %16057 = vmatmul.mubr.bf16.gmra.mrb[16].mxu1 %v499_v16  ;;  %16120 = vmatprep.subr.bf16.mxu1 %v20455_v17  ;;  %v20527_v16 = vpack.c.bf16 %v401_v6, %v400_v5  ;;  %v20559_v5 = vld [vmem:[#allocation6 + $0xc0] sm:$0xff]   ;;  %v20562_v6 = vpack.c.bf16 %v413_v61, %v412_v60  ;;  %v19619_v60 = vld [vmem:[#allocation6 + $0xd8] sm:$0xff]   ;;  %v2195_v61 = vld [vmem:[#allocation2 + $0x20f] sm:$0xff] }
  0xaf   : > { %16281 = vmatmul.mubr.bf16.vlgmr.msra.gmra.mrb[0].mxu0 %v20457_v18  ;;  %16060 = vmatprep.mubr.bf16.mxu1 %v500_v19  ;;  %v20529_v19 = vpack.c.bf16 %v1882_v10, %v1881_v9  ;;  %v19608_v9 = vld [vmem:[#allocation6 + $0x1c8] sm:$0xff]  }
  0xb0   : > { %16313 = vmatpush3.bf16.msra.mxu0 %v19590_v13  ;;  %16284 = vmatprep.mubr.bf16.mxu0 %v20461_v20  ;;  %v1883_v13 = vld [vmem:[#allocation2 + $0x1a9] sm:$0xff] }
  0xb1   : > { %16314 = vmatprep.subr.bf16.mxu0 %v19592_v21  ;;  %v20533_v22 = vpack.c.bf16 %v1884_v15, %v1883_v13  ;;  %v416_v10 = vld [vmem:[#allocation2 + $0x167] sm:$0xff]  ;;  %v419_v13 = vld [vmem:[#allocation2 + $0x18f] sm:$0xff] }
  0xb4   : > { %16315 = vmatpush3.bf16.msra.mxu0 %v19592_v21  ;;  %v20531_v21 = vpack.c.bf16 %v403_v12, %v402_v11  ;;  %v417_v11 = vld [vmem:[#allocation2 + $0x16f] sm:$0xff]  ;;  %v418_v12 = vld [vmem:[#allocation2 + $0x187] sm:$0xff] }
  0xb5   : > { %16316 = vmatprep.subr.bf16.mxu0 %v19594_v28  ;;  %v20572_v15 = vpack.c.bf16 %v417_v11, %v416_v10  ;;  %v19625_v10 = vld [vmem:[#allocation6 + $0xf0] sm:$0xff]  }
  0xb6   : > { %16061 = vmatmul.mubr.bf16.gmra.mrb[20].mxu1 %v501_v29  ;;  %v406_v29 = vld [vmem:[#allocation2 + $0xc7] sm:$0xff] }
  0xb7   : > { %16285 = vmatmul.mubr.bf16.gmra.mrb[4].mxu0 %v20476_v30  ;;  %16064 = vmatprep.mubr.bf16.mxu1 %v502_v31  ;;  %v407_v31 = vld [vmem:[#allocation2 + $0xcf] sm:$0xff] }
  0xb8   : > { %16288 = vmatprep.mubr.bf16.mxu0 %v20480_v32  ;;  %16317 = vmatpush3.bf16.msra.mxu0 %v19594_v28  ;;  %v1886_v28 = vld [vmem:[#allocation2 + $0x1d1] sm:$0xff] }
  0xb9   : > { %16318 = vmatprep.subr.bf16.mxu0 %v19596_v33  ;;  %v20541_v37 = vpack.c.bf16 %v1886_v28, %v1885_v25  ;;  %v421_v25 = vld [vmem:[#allocation2 + $0x1af] sm:$0xff]  ;;  %v422_v28 = vld [vmem:[#allocation2 + $0x1c7] sm:$0xff] }
  0xbc   : > { %16319 = vmatpush3.bf16.msra.mxu0 %v19596_v33  ;;  %v1887_v33 = vld [vmem:[#allocation2 + $0x1e9] sm:$0xff] }
  0xbd   : > { %16320 = vmatprep.subr.bf16.mxu0 %v19598_v38  ;;  %v20545_v44 = vpack.c.bf16 %v1888_v34, %v1887_v33  ;;  %v19616_v34 = vld [vmem:[#allocation6 + $0x1e8] sm:$0xff]  }
  0xbe   : > { %16065 = vmatmul.mubr.bf16.gmra.mrb[24].mxu1 %v20486_v39 }
  0xbf   : > { %16289 = vmatmul.mubr.bf16.gmra.mrb[8].mxu0 %v20488_v40  ;;  %16068 = vmatprep.mubr.bf16.mxu1 %v20492_v41 }
  0xc0   : > { %16292 = vmatprep.mubr.bf16.mxu0 %v20494_v42  ;;  %16321 = vmatpush3.bf16.msra.mxu0 %v19598_v38  ;;  %v20543_v38 = vpack.c.bf16 %v407_v31, %v406_v29  ;;  %v19614_v29 = vld [vmem:[#allocation6 + $0x1e0] sm:$0xff]  }
  0xc1   : > { %16322 = vmatprep.subr.bf16.mxu0 %v19600_v43 }
  0xc4   : > { %16323 = vmatpush3.bf16.msra.mxu0 %v19600_v43  ;;  %v19607_v43 = vld [vmem:[#allocation6 + $0xa8] sm:$0xff]  }
  0xc5   : > { %16324 = vmatprep.subr.bf16.mxu0 %v19602_v50 }
  0xc6   : > { %16069 = vmatmul.mubr.bf16.gmra.mrb[28].mxu1 %v20502_v51 }
  0xc7   : > { %16293 = vmatmul.mubr.bf16.gmra.mrb[12].mxu0 %v20504_v52  ;;  %16088 = vmatprep.mubr.bf16.mxu1 %v426_v53  ;;  %v19609_v53 = vld [vmem:[#allocation6 + $0xb0] sm:$0xff]  }
  0xc8   : > { %16296 = vmatprep.mubr.bf16.mxu0 %v20506_v54  ;;  %16325 = vmatpush3.bf16.msra.mxu0 %v19602_v50  ;;  %v411_v50 = vld [vmem:[#allocation2 + $0x10f] sm:$0xff] }
  0xc9   : > { %16326 = vmatprep.subr.bf16.mxu0 %v19604_v57  ;;  %v20555_v58 = vpack.c.bf16 %v411_v50, %v410_v49  ;;  %v973_v49 = vpack.c.bf16 %v942_v46, %v941_v45  ;;  %v19620_v50 = vld [vmem:[#allocation6 + $0x1f8] sm:$0xff]  }
  0xca   : > { %v19628_v45 = vld [vmem:[#allocation6 + $0x218] sm:$0xff]  }
  0xcc   : > { %16327 = vmatpush3.bf16.msra.mxu0 %v19604_v57  ;;  %v1906_v57 = vpack.c.bf16 %v1890_v48, %v1889_v47  ;;  %v19618_v47 = vld [vmem:[#allocation6 + $0x1f0] sm:$0xff]  }
  0xcd   : > { %16360 = vmatprep.subr.bf16.mxu0 %v20511_v0 }
  0xce   : > { %16089 = vmatmul.mubr.bf16.vlgmr.msra.gmra.mrb[0].mxu1 %v20513_v1 }
  0xcf   : > { %16297 = vmatmul.mubr.bf16.gmra.mrb[16].mxu0 %v20515_v2  ;;  %16121 = vmatpush3.bf16.msra.mxu1 %v20455_v17  ;;  %v404_v17 = vld [vmem:[#allocation2 + $0xa7] sm:$0xff] }
  0xd0   : > { %16092 = vmatprep.mubr.bf16.mxu1 %v20517_v3  ;;  %16300 = vmatprep.mubr.bf16.mxu0 %v20519_v4  ;;  %v20539_v36 = vpack.c.bf16 %v405_v24, %v404_v17  ;;  %v20574_v17 = vpack.c.bf16 %v419_v13, %v418_v12  ;;  %v420_v24 = vld [vmem:[#allocation2 + $0x1a7] sm:$0xff]  ;;  %v19627_v13 = vld [vmem:[#allocation6 + $0xf8] sm:$0xff]  }
  0xd1   : > { %16122 = vmatprep.subr.bf16.mxu1 %v19599_v7  ;;  %v20580_v31 = vpack.c.bf16 %v421_v25, %v420_v24  ;;  %v19624_v25 = vld [vmem:[#allocation6 + $0x208] sm:$0xff]  }
  0xd3   : > { %16123 = vmatpush3.bf16.msra.mxu1 %v19599_v7  ;;  %v20564_v7 = vpack.c.bf16 %v415_v63, %v414_v62  ;;  %v19621_v62 = vld [vmem:[#allocation6 + $0xe0] sm:$0xff]   ;;  %v19623_v63 = vld [vmem:[#allocation6 + $0xe8] sm:$0xff]  }
  0xd4   : > { %16124 = vmatprep.subr.bf16.mxu1 %v19601_v14 }
  0xd6   : > { %16093 = vmatmul.mubr.bf16.gmra.mrb[4].mxu1 %v20527_v16 }
  0xd7   : > { %16301 = vmatmul.mubr.bf16.gmra.mrb[20].mxu0 %v20529_v19  ;;  %16096 = vmatprep.mubr.bf16.mxu1 %v20531_v21 }
  0xd8   : > { %16304 = vmatprep.mubr.bf16.mxu0 %v20533_v22  ;;  %16125 = vmatpush3.bf16.msra.mxu1 %v19601_v14  ;;  %v19610_v14 = vld [vmem:[#allocation6 + $0x1d0] sm:$0xff]  }
  0xd9   : > { %16126 = vmatprep.subr.bf16.mxu1 %v19603_v23 }
  0xdc   : > { %16127 = vmatpush3.bf16.msra.mxu1 %v19603_v23  ;;  %v19612_v23 = vld [vmem:[#allocation6 + $0x1d8] sm:$0xff]  }
  0xdd   : > { %16128 = vmatprep.subr.bf16.mxu1 %v19605_v35 }
  0xde   : > { %16097 = vmatmul.mubr.bf16.gmra.mrb[8].mxu1 %v20539_v36 }
  0xdf   : > { %16305 = vmatmul.mubr.bf16.gmra.mrb[24].mxu0 %v20541_v37  ;;  %16100 = vmatprep.mubr.bf16.mxu1 %v20543_v38 }
  0xe0   : > { %16308 = vmatprep.mubr.bf16.mxu0 %v20545_v44  ;;  %16129 = vmatpush3.bf16.msra.mxu1 %v19605_v35  ;;  %v424_v35 = vld [vmem:[#allocation2 + $0x1e7] sm:$0xff] }
  0xe1   : > { %16130 = vmatprep.subr.bf16.mxu1 %v19607_v43 }
  0xe4   : > { %16131 = vmatpush3.bf16.msra.mxu1 %v19607_v43  ;;  %v425_v43 = vld [vmem:[#allocation2 + $0x1ef] sm:$0xff] }
  0xe5   : > { %16132 = vmatprep.subr.bf16.mxu1 %v19609_v53  ;;  %v20588_v48 = vpack.c.bf16 %v425_v43, %v424_v35  ;;  %v19626_v35 = vld [vmem:[#allocation6 + $0x210] sm:$0xff]  }
  0xe6   : > { %16101 = vmatmul.mubr.bf16.gmra.mrb[12].mxu1 %v20553_v56 }
  0xe7   : > { %16309 = vmatmul.mubr.bf16.gmra.mrb[28].mxu0 %v1906_v57  ;;  %16104 = vmatprep.mubr.bf16.mxu1 %v20555_v58  ;;  %v19615_v57 = vld [vmem:[#allocation6 + $0xc8] sm:$0xff]  }
  0xe8   : > { %16328 = vmatprep.mubr.bf16.mxu0 %v20517_v3  ;;  %16133 = vmatpush3.bf16.msra.mxu1 %v19609_v53  ;;  %v20592_v53 = vld [vmem:[#allocation6 + $0x200] sm:$0xff]  }
  0xe9   : > { %16134 = vmatprep.subr.bf16.mxu1 %v19611_v59 }
  0xec   : > { %16135 = vmatpush3.bf16.msra.mxu1 %v19611_v59  ;;  %v19617_v59 = vld [vmem:[#allocation6 + $0xd0] sm:$0xff]  }
  0xed   : > { %16168 = vmatprep.subr.bf16.mxu1 %v20559_v5 }
  0xee   : > { %16105 = vmatmul.mubr.bf16.gmra.mrb[16].mxu1 %v20562_v6 }
  0xef   : > { %16329 = vmatmul.mubr.bf16.vlgmr.msra.gmra.mrb[0].mxu0 %v20527_v16  ;;  %16108 = vmatprep.mubr.bf16.mxu1 %v20564_v7 }
  0xf0   : > { %16361 = vmatpush3.bf16.msra.mxu0 %v20511_v0  ;;  %16332 = vmatprep.mubr.bf16.mxu0 %v20531_v21  ;;  %v423_v0 = vld [vmem:[#allocation2 + $0x1cf] sm:$0xff] }
  0xf1   : > { %16362 = vmatprep.subr.bf16.mxu0 %v19608_v9  ;;  %v20582_v33 = vpack.c.bf16 %v423_v0, %v422_v28  ;;  %v20613_v0 = vld [vmem:[#allocation6 + $0x100] sm:$0xff]  }
  0xf4   : > { %16363 = vmatpush3.bf16.msra.mxu0 %v19608_v9  ;;  %v2473_v9 = vld [vmem:[#allocation2 + $0x50] sm:$0xff] }
  0xf5   : > { %16364 = vmatprep.subr.bf16.mxu0 %v19610_v14 }
  0xf6   : > { %16109 = vmatmul.mubr.bf16.gmra.mrb[20].mxu1 %v20572_v15 }
  0xf7   : > { %16333 = vmatmul.mubr.bf16.gmra.mrb[4].mxu0 %v20539_v36  ;;  %16112 = vmatprep.mubr.bf16.mxu1 %v20574_v17 }
  0xf8   : > { %16336 = vmatprep.mubr.bf16.mxu0 %v20543_v38  ;;  %16365 = vmatpush3.bf16.msra.mxu0 %v19610_v14  ;;  %v2475_v14 = vld [vmem:[#allocation2 + $0x70] sm:$0xff] }
  0xf9   : > { %16366 = vmatprep.subr.bf16.mxu0 %v19612_v23 }
  0xfc   : > { %16367 = vmatpush3.bf16.msra.mxu0 %v19612_v23  ;;  %v2477_v23 = vld [vmem:[#allocation2 + $0x90] sm:$0xff] }
  0xfd   : > { %16368 = vmatprep.subr.bf16.mxu0 %v19614_v29 }
  0xfe   : > { %16113 = vmatmul.mubr.bf16.gmra.mrb[24].mxu1 %v20580_v31 }
  0xff   : > { %16337 = vmatmul.mubr.bf16.gmra.mrb[8].mxu0 %v20553_v56  ;;  %16116 = vmatprep.mubr.bf16.mxu1 %v20582_v33 }
 0x100   : > { %16340 = vmatprep.mubr.bf16.mxu0 %v20555_v58  ;;  %16369 = vmatpush3.bf16.msra.mxu0 %v19614_v29  ;;  %v2479_v29 = vld [vmem:[#allocation2 + $0xb0] sm:$0xff] }
 0x101   : > { %16370 = vmatprep.subr.bf16.mxu0 %v19616_v34 }
 0x104   : > { %16371 = vmatpush3.bf16.msra.mxu0 %v19616_v34  ;;  %v2481_v34 = vld [vmem:[#allocation2 + $0xd0] sm:$0xff] }
 0x105   : > { %16372 = vmatprep.subr.bf16.mxu0 %v19618_v47 }
 0x106   : > { %16117 = vmatmul.mubr.bf16.gmra.mrb[28].mxu1 %v20588_v48 }
 0x107   : > { %16341 = vmatmul.mubr.bf16.gmra.mrb[12].mxu0 %v20562_v6  ;;  %16136 = vmatprep.mubr.bf16.mxu1 %v973_v49  ;;  %v2485_v49 = vld [vmem:[#allocation2 + $0x110] sm:$0xff] }
 0x108   : > { %16344 = vmatprep.mubr.bf16.mxu0 %v20564_v7  ;;  %16373 = vmatpush3.bf16.msra.mxu0 %v19618_v47  ;;  %v2483_v47 = vld [vmem:[#allocation2 + $0xf0] sm:$0xff] }
 0x109   : > { %16374 = vmatprep.subr.bf16.mxu0 %v19620_v50 }
 0x10c   : > { %16375 = vmatpush3.bf16.msra.mxu0 %v19620_v50  ;;  %v19629_v50 = vld [vmem:[#allocation6 + $0x220] sm:$0xff]  }
 0x10d   : > { %16408 = vmatprep.subr.bf16.mxu0 %v20592_v53 }
 0x10e   : > { %16137 = vmatmul.mubr.bf16.vlgmr.msra.gmra.mrb[0].mxu1 %v20450_v8  ;;  %v2194_v8 = vld [vmem:[#allocation2 + $0x207] sm:$0xff] }
 0x10f   : > { %16345 = vmatmul.mubr.bf16.gmra.mrb[16].mxu0 %v20572_v15  ;;  %16169 = vmatpush3.bf16.msra.mxu1 %v20559_v5  ;;  %v2472_v5 = vld [vmem:[#allocation2 + $0x48] sm:$0xff] }
 0x110   : > { %16140 = vmatprep.mubr.bf16.mxu1 %v20457_v18  ;;  %16348 = vmatprep.mubr.bf16.mxu0 %v20574_v17  ;;  %v20605_v18 = vpack.c.bf16 %v2195_v61, %v2194_v8  ;;  %v2504_v12 = vpack.c.bf16 %v2473_v9, %v2472_v5  ;;  %v2488_v8 = vld [vmem:[#allocation2 + $0x148] sm:$0xff]  ;;  %v19631_v61 = vld [vmem:[#allocation6 + $0x230] sm:$0xff]  }
 0x111   : > { %16170 = vmatprep.subr.bf16.mxu1 %v19615_v57  ;;  %v2493_v5 = vld [vmem:[#allocation2 + $0x190] sm:$0xff] }
 0x113   : > { %16171 = vmatpush3.bf16.msra.mxu1 %v19615_v57  ;;  %v19630_v57 = vld [vmem:[#allocation6 + $0x228] sm:$0xff]  }
 0x114   : > { %16172 = vmatprep.subr.bf16.mxu1 %v19617_v59 }
 0x116   : > { %16141 = vmatmul.mubr.bf16.gmra.mrb[4].mxu1 %v20461_v20  ;;  %v2196_v20 = vld [vmem:[#allocation2 + $0x227] sm:$0xff] }
 0x117   : > { %16349 = vmatmul.mubr.bf16.gmra.mrb[20].mxu0 %v20580_v31  ;;  %16144 = vmatprep.mubr.bf16.mxu1 %v20476_v30  ;;  %v2197_v30 = vld [vmem:[#allocation2 + $0x22f] sm:$0xff] }
 0x118   : > { %16352 = vmatprep.mubr.bf16.mxu0 %v20582_v33  ;;  %16173 = vmatpush3.bf16.msra.mxu1 %v19617_v59  ;;  %v2213_v11 = vpack.c.bf16 %v2197_v30, %v2196_v20  ;;  %v2491_v30 = vld [vmem:[#allocation2 + $0x170] sm:$0xff] }
 0x119   : > { %16174 = vmatprep.subr.bf16.mxu1 %v19619_v60 }
 0x11c   : > { %16175 = vmatpush3.bf16.msra.mxu1 %v19619_v60  ;;  %v2486_v60 = vld [vmem:[#allocation2 + $0x128] sm:$0xff] }
 0x11d   : > { %16176 = vmatprep.subr.bf16.mxu1 %v19621_v62 }
 0x11e   : > { %16145 = vmatmul.mubr.bf16.gmra.mrb[8].mxu1 %v20480_v32  ;;  %v2474_v32 = vld [vmem:[#allocation2 + $0x68] sm:$0xff] }
 0x11f   : > { %16353 = vmatmul.mubr.bf16.gmra.mrb[24].mxu0 %v20588_v48  ;;  %16148 = vmatprep.mubr.bf16.mxu1 %v20488_v40  ;;  %v2476_v40 = vld [vmem:[#allocation2 + $0x88] sm:$0xff]  ;;  %v2505_v24 = vpack.c.bf16 %v2475_v14, %v2474_v32  ;;  %v2812_v32 = vpack.c.bf16 %v2783_v27, %v2782_v26  ;;  %v19641_v26 = vld [vmem:[#allocation6 + $0x240] sm:$0xff]  }
 0x120   : > { %16356 = vmatprep.mubr.bf16.mxu0 %v20605_v18  ;;  %16177 = vmatpush3.bf16.msra.mxu1 %v19621_v62  ;;  %v2506_v28 = vpack.c.bf16 %v2477_v23, %v2476_v40  ;;  %v2784_v14 = vld [vmem:[#allocation2 + $0xa9] sm:$0xff]  ;;  %v2785_v40 = vld [vmem:[#allocation2 + $0xb1] sm:$0xff] }
 0x121   : > { %16178 = vmatprep.subr.bf16.mxu1 %v19623_v63  ;;  %v2787_v23 = vld [vmem:[#allocation2 + $0xd1] sm:$0xff] }
 0x124   : > { %16179 = vmatpush3.bf16.msra.mxu1 %v19623_v63  ;;  %v19632_v63 = vld [vmem:[#allocation6 + $0x238] sm:$0xff]  }
 0x125   : > { %16180 = vmatprep.subr.bf16.mxu1 %v19625_v10 }
 0x126   : > { %16149 = vmatmul.mubr.bf16.gmra.mrb[12].mxu1 %v20494_v42  ;;  %v2478_v42 = vld [vmem:[#allocation2 + $0xa8] sm:$0xff] }
 0x127   : > { %16357 = vmatmul.mubr.bf16.gmra.mrb[28].mxu0 %v2213_v11  ;;  %16152 = vmatprep.mubr.bf16.mxu1 %v20504_v52  ;;  %v2480_v52 = vld [vmem:[#allocation2 + $0xc8] sm:$0xff]  ;;  %v2507_v43 = vpack.c.bf16 %v2479_v29, %v2478_v42  ;;  %v2791_v42 = vld [vmem:[#allocation2 + $0x111] sm:$0xff] }
 0x128   : > { %16376 = vmatprep.mubr.bf16.mxu0 %v2504_v12  ;;  %16181 = vmatpush3.bf16.msra.mxu1 %v19625_v10  ;;  %v2508_v46 = vpack.c.bf16 %v2481_v34, %v2480_v52  ;;  %v2778_v11 = vld [vmem:[#allocation2 + $0x49] sm:$0xff]  ;;  %v2793_v52 = vld [vmem:[#allocation2 + $0x131] sm:$0xff] }
 0x129   : > { %16182 = vmatprep.subr.bf16.mxu1 %v19627_v13  ;;  %v2794_v34 = vld [vmem:[#allocation2 + $0x149] sm:$0xff] }
 0x12c   : > { %16183 = vmatpush3.bf16.msra.mxu1 %v19627_v13  ;;  %v19928_v13 = vld [vmem:[#allocation6 + $0x130] sm:$0xff]  }
 0x12d   : > { %18184 = vmatprep.subr.bf16.mxu1 %v20613_v0 }
 0x12e   : > { %16153 = vmatmul.mubr.bf16.gmra.mrb[16].mxu1 %v20506_v54  ;;  %v2482_v54 = vld [vmem:[#allocation2 + $0xe8] sm:$0xff] }
 0x12f   : > { %16377 = vmatmul.mubr.bf16.vlgmr.msra.gmra.mrb[0].mxu0 %v2505_v24  ;;  %16156 = vmatprep.mubr.bf16.mxu1 %v20515_v2  ;;  %v2484_v2 = vld [vmem:[#allocation2 + $0x108] sm:$0xff] }
 0x130   : > { %16409 = vmatpush3.bf16.msra.mxu0 %v20592_v53  ;;  %16380 = vmatprep.mubr.bf16.mxu0 %v2506_v28  ;;  %v2509_v53 = vpack.c.bf16 %v2483_v47, %v2482_v54  ;;  %v2510_v59 = vpack.c.bf16 %v2485_v49, %v2484_v2  ;;  %v2789_v28 = vld [vmem:[#allocation2 + $0xf1] sm:$0xff]  ;;  %v1577_v49 = vld [vmem:[#allocation2 + $0x1a8] sm:$0xff] }
 0x131   : > { %16410 = vmatprep.subr.bf16.mxu0 %v19624_v25  ;;  %v2799_v54 = vld [vmem:[#allocation2 + $0x191] sm:$0xff] }
 0x132   : > { %v2801_v2 = vld [vmem:[#allocation2 + $0x1b1] sm:$0xff] }
 0x134   : > { %16411 = vmatpush3.bf16.msra.mxu0 %v19624_v25  ;;  %v2788_v25 = vld [vmem:[#allocation2 + $0xe9] sm:$0xff] }
 0x135   : > { %16412 = vmatprep.subr.bf16.mxu0 %v19626_v35 }
 0x136   : > { %16157 = vmatmul.mubr.bf16.gmra.mrb[20].mxu1 %v20519_v4  ;;  %v2487_v4 = vld [vmem:[#allocation2 + $0x130] sm:$0xff] }
 0x137   : > { %16381 = vmatmul.mubr.bf16.gmra.mrb[4].mxu0 %v2507_v43  ;;  %16160 = vmatprep.mubr.bf16.mxu1 %v20529_v19  ;;  %v2489_v19 = vld [vmem:[#allocation2 + $0x150] sm:$0xff]  ;;  %v20623_v62 = vpack.c.bf16 %v2487_v4, %v2486_v60  ;;  %v1579_v4 = vld [vmem:[#allocation2 + $0x1c8] sm:$0xff] }
 0x138   : > { %16384 = vmatprep.mubr.bf16.mxu0 %v2508_v46  ;;  %16413 = vmatpush3.bf16.msra.mxu0 %v19626_v35  ;;  %v20625_v20 = vpack.c.bf16 %v2489_v19, %v2488_v8  ;;  %v2795_v35 = vld [vmem:[#allocation2 + $0x151] sm:$0xff]  ;;  %v2798_v46 = vld [vmem:[#allocation2 + $0x189] sm:$0xff] }
 0x139   : > { %16414 = vmatprep.subr.bf16.mxu0 %v19628_v45  ;;  %v2818_v43 = vpack.c.bf16 %v2795_v35, %v2794_v34  ;;  %v2820_v47 = vpack.c.bf16 %v2799_v54, %v2798_v46  ;;  %v1580_v8 = vld [vmem:[#allocation2 + $0x1d0] sm:$0xff] }
 0x13a   : > { %v2804_v19 = vld [vmem:[#allocation2 + $0x1e9] sm:$0xff] }
 0x13c   : > { %16415 = vmatpush3.bf16.msra.mxu0 %v19628_v45  ;;  %v2797_v45 = vld [vmem:[#allocation2 + $0x171] sm:$0xff] }
 0x13d   : > { %16416 = vmatprep.subr.bf16.mxu0 %v19629_v50 }
 0x13e   : > { %16161 = vmatmul.mubr.bf16.gmra.mrb[24].mxu1 %v20533_v22  ;;  %v2490_v22 = vld [vmem:[#allocation2 + $0x168] sm:$0xff] }
 0x13f   : > { %16385 = vmatmul.mubr.bf16.gmra.mrb[8].mxu0 %v2509_v53  ;;  %16164 = vmatprep.mubr.bf16.mxu1 %v20541_v37  ;;  %v2492_v37 = vld [vmem:[#allocation2 + $0x188] sm:$0xff]  ;;  %v20631_v9 = vpack.c.bf16 %v2491_v30, %v2490_v22  ;;  %v2803_v53 = vld [vmem:[#allocation2 + $0x1d1] sm:$0xff]  ;;  %v1598_v30 = vpack.c.bf16 %v1580_v8, %v1579_v4 }
 0x140   : > { %16388 = vmatprep.mubr.bf16.mxu0 %v2510_v59  ;;  %16417 = vmatpush3.bf16.msra.mxu0 %v19629_v50  ;;  %v20633_v10 = vpack.c.bf16 %v2493_v5, %v2492_v37  ;;  %v1578_v50 = vld [vmem:[#allocation2 + $0x1b0] sm:$0xff] }
 0x141   : > { %16418 = vmatprep.subr.bf16.mxu0 %v19630_v57  ;;  %v1597_v59 = vpack.c.bf16 %v1578_v50, %v1577_v49  ;;  %v2807_v22 = vld [vmem:[#allocation2 + $0x211] sm:$0xff] }
 0x144   : > { %16419 = vmatpush3.bf16.msra.mxu0 %v19630_v57 }
 0x145   : > { %16420 = vmatprep.subr.bf16.mxu0 %v19631_v61 }
 0x146   : > { %16165 = vmatmul.mubr.bf16.gmra.mrb[28].mxu1 %v20545_v44  ;;  %v19923_v44 = vld [vmem:[#allocation6 + $0x110] sm:$0xff]  }
 0x147   : > { %16389 = vmatmul.mubr.bf16.gmra.mrb[12].mxu0 %v20623_v62  ;;  %16184 = vmatprep.mubr.bf16.mxu1 %v20513_v1  ;;  %v19922_v1 = vld [vmem:[#allocation6 + $0x108] sm:$0xff]  }
 0x148   : > { %16392 = vmatprep.mubr.bf16.mxu0 %v20625_v20  ;;  %16421 = vmatpush3.bf16.msra.mxu0 %v19631_v61  ;;  %v2805_v61 = vld [vmem:[#allocation2 + $0x1f1] sm:$0xff] }
 0x149   : > { %16422 = vmatprep.subr.bf16.mxu0 %v19632_v63  ;;  %v2823_v37 = vpack.c.bf16 %v2805_v61, %v2804_v19  ;;  %v19642_v61 = vld [vmem:[#allocation6 + $0x248] sm:$0xff]  }
 0x14c   : > { %16423 = vmatpush3.bf16.msra.mxu0 %v19632_v63  ;;  %v1582_v63 = vld [vmem:[#allocation2 + $0x1f0] sm:$0xff] }
 0x14e   : > { %16185 = vmatmul.mubr.bf16.vlgmr.msra.gmra.mrb[0].mxu1 %v20517_v3  ;;  %v19924_v3 = vld [vmem:[#allocation6 + $0x118] sm:$0xff]  }
 0x14f   : > { %16393 = vmatmul.mubr.bf16.gmra.mrb[16].mxu0 %v20631_v9  ;;  %18192 = vmatpush3.bf16.msra.mxu1 %v20613_v0  ;;  %v2790_v0 = vld [vmem:[#allocation2 + $0x109] sm:$0xff] }
 0x150   : > { %16188 = vmatprep.mubr.bf16.mxu1 %v20527_v16  ;;  %16396 = vmatprep.mubr.bf16.mxu0 %v20633_v10  ;;  %v19925_v16 = vld [vmem:[#allocation6 + $0x120] sm:$0xff]   ;;  %v2816_v29 = vpack.c.bf16 %v2791_v42, %v2790_v0 }
 0x151   : > { %18185 = vmatprep.subr.bf16.mxu1 %v19922_v1 }
 0x153   : > { %18193 = vmatpush3.bf16.msra.mxu1 %v19922_v1  ;;  %v1583_v1 = vld [vmem:[#allocation2 + $0x208] sm:$0xff] }
 0x154   : > { %18186 = vmatprep.subr.bf16.mxu1 %v19923_v44 }
 0x156   : > { %16189 = vmatmul.mubr.bf16.gmra.mrb[4].mxu1 %v20531_v21  ;;  %v2779_v21 = vld [vmem:[#allocation2 + $0x51] sm:$0xff] }
 0x157   : > { %16397 = vmatmul.mubr.bf16.gmra.mrb[20].mxu0 %v20486_v39  ;;  %16192 = vmatprep.mubr.bf16.mxu1 %v20539_v36  ;;  %v19926_v39 = vld [vmem:[#allocation6 + $0x128] sm:$0xff]   ;;  %v2810_v12 = vpack.c.bf16 %v2779_v21, %v2778_v11  ;;  %v19633_v21 = vld [vmem:[#allocation6 + $0x280] sm:$0xff]  }
 0x158   : > { %16400 = vmatprep.mubr.bf16.mxu0 %v20492_v41  ;;  %18194 = vmatpush3.bf16.msra.mxu1 %v19923_v44  ;;  %v19927_v41 = vld [vmem:[#allocation2 + $0x8] sm:$0xff]  ;;  %v1584_v44 = vld [vmem:[#allocation2 + $0x210] sm:$0xff] }
 0x159   : > { %18187 = vmatprep.subr.bf16.mxu1 %v19924_v3  ;;  %v20650_v36 = vpack.c.bf16 %v19927_v41, %v19927_v41  ;;  %v19635_v41 = vld [vmem:[#allocation6 + $0x290] sm:$0xff]  }
 0x15c   : > { %18195 = vmatpush3.bf16.msra.mxu1 %v19924_v3  ;;  %v2808_v3 = vld [vmem:[#allocation2 + $0x229] sm:$0xff] }
 0x15d   : > { %18188 = vmatprep.subr.bf16.mxu1 %v19925_v16 }
 0x15e   : > { %16193 = vmatmul.mubr.bf16.gmra.mrb[8].mxu1 %v20543_v38  ;;  %v2781_v38 = vld [vmem:[#allocation2 + $0x71] sm:$0xff] }
 0x15f   : > { %16401 = vmatmul.mubr.bf16.gmra.mrb[24].mxu0 %v20502_v51  ;;  %16196 = vmatprep.mubr.bf16.mxu1 %v20553_v56  ;;  %v2780_v51 = vld [vmem:[#allocation2 + $0x69] sm:$0xff] }
 0x160   : > { %16404 = vmatprep.mubr.bf16.mxu0 %v2518_v55  ;;  %18196 = vmatpush3.bf16.msra.mxu1 %v19925_v16  ;;  %v19929_v55 = vld [vmem:[#allocation6 + $0x138] sm:$0xff]   ;;  %v2811_v56 = vpack.c.bf16 %v2781_v38, %v2780_v51  ;;  %v19638_v51 = vld [vmem:[#allocation6 + $0x2a8] sm:$0xff]   ;;  %v19639_v38 = vld [vmem:[#allocation6 + $0x2b0] sm:$0xff]  }
 0x161   : > { %18189 = vmatprep.subr.bf16.mxu1 %v19926_v39  ;;  %v2809_v16 = vld [vmem:[#allocation2 + $0x231] sm:$0xff] }
 0x162   : > { %v2825_v11 = vpack.c.bf16 %v2809_v16, %v2808_v3 }
 0x164   : > { %18197 = vmatpush3.bf16.msra.mxu1 %v19926_v39  ;;  %v19634_v39 = vld [vmem:[#allocation6 + $0x288] sm:$0xff]  }
 0x165   : > { %18190 = vmatprep.subr.bf16.mxu1 %v19928_v13 }
 0x166   : > { %16197 = vmatmul.mubr.bf16.gmra.mrb[12].mxu1 %v20555_v58  ;;  %v2786_v58 = vld [vmem:[#allocation2 + $0xc9] sm:$0xff] }
 0x167   : > { %16405 = vmatmul.mubr.bf16.gmra.mrb[28].mxu0 %v20650_v36  ;;  %16200 = vmatprep.mubr.bf16.mxu1 %v20562_v6  ;;  %v2813_v6 = vpack.c.bf16 %v2785_v40, %v2784_v14  ;;  %v2814_v24 = vpack.c.bf16 %v2787_v23, %v2786_v58 }
 0x168   : > { %16424 = vmatprep.mubr.bf16.mxu0 %v2810_v12  ;;  %18198 = vmatpush3.bf16.msra.mxu1 %v19928_v13  ;;  %v19636_v12 = vld [vmem:[#allocation6 + $0x298] sm:$0xff]   ;;  %v19637_v13 = vld [vmem:[#allocation6 + $0x2a0] sm:$0xff]  }
 0x169   : > { %18191 = vmatprep.subr.bf16.mxu1 %v19929_v55 }
 0x16c   : > { %18199 = vmatpush3.bf16.msra.mxu1 %v19929_v55 }
 0x16d   : > { %16456 = vmatprep.subr.bf16.mxu1 %v19633_v21 }
 0x16e   : > { %16201 = vmatmul.mubr.bf16.gmra.mrb[16].mxu1 %v20564_v7  ;;  %v2815_v7 = vpack.c.bf16 %v2789_v28, %v2788_v25 }
 0x16f   : > { %16425 = vmatmul.mubr.bf16.vlgmr.msra.gmra.mrb[0].mxu0 %v2811_v56  ;;  %16204 = vmatprep.mubr.bf16.mxu1 %v20572_v15  ;;  %v2792_v15 = vld [vmem:[#allocation2 + $0x129] sm:$0xff] }
 0x170   : > { %16428 = vmatprep.mubr.bf16.mxu0 %v2812_v32 }
 0x176   : > { %16205 = vmatmul.mubr.bf16.gmra.mrb[20].mxu1 %v20574_v17  ;;  %v2817_v17 = vpack.c.bf16 %v2793_v52, %v2792_v15  ;;  %v20679_v52 = vld [vmem:[#allocation8] ss:$0 sm:$0xff] }
 0x177   : > { %16429 = vmatmul.mubr.bf16.gmra.mrb[4].mxu0 %v2813_v6  ;;  %16208 = vmatprep.mubr.bf16.mxu1 %v20580_v31  ;;  %v2796_v31 = vld [vmem:[#allocation2 + $0x169] sm:$0xff] }
 0x178   : > { %16432 = vmatprep.mubr.bf16.mxu0 %v2814_v24 }
 0x17e   : > { %16209 = vmatmul.mubr.bf16.gmra.mrb[24].mxu1 %v20582_v33  ;;  %v2819_v33 = vpack.c.bf16 %v2797_v45, %v2796_v31 }
 0x17f   : > { %16433 = vmatmul.mubr.bf16.gmra.mrb[8].mxu0 %v2815_v7  ;;  %16212 = vmatprep.mubr.bf16.mxu1 %v20588_v48  ;;  %v2800_v48 = vld [vmem:[#allocation2 + $0x1a9] sm:$0xff] }
 0x180   : > { %16436 = vmatprep.mubr.bf16.mxu0 %v2816_v29  ;;  %v2821_v57 = vpack.c.bf16 %v2801_v2, %v2800_v48 }
 0x186   : > { %16213 = vmatmul.mubr.bf16.gmra.mrb[28].mxu1 %v20605_v18  ;;  %v2802_v18 = vld [vmem:[#allocation2 + $0x1c9] sm:$0xff] }
 0x187   : > { %16437 = vmatmul.mubr.bf16.gmra.mrb[12].mxu0 %v2817_v17  ;;  %16248 = vmatprep.mubr.bf16.mxu1 %v20623_v62  ;;  %v2822_v60 = vpack.c.bf16 %v2803_v53, %v2802_v18  ;;  %v1581_v62 = vld [vmem:[#allocation2 + $0x1e8] sm:$0xff] }
 0x188   : > { %16440 = vmatprep.mubr.bf16.mxu0 %v2818_v43  ;;  %v1599_v5 = vpack.c.bf16 %v1582_v63, %v1581_v62 }
 0x18e   : > { %16249 = vmatmul.mubr.bf16.vlgmr.msra.gmra.mrb[16].mxu1 %v20625_v20  ;;  %v2806_v20 = vld [vmem:[#allocation2 + $0x209] sm:$0xff] }
 0x18f   : > { %16441 = vmatmul.mubr.bf16.gmra.mrb[16].mxu0 %v2819_v33  ;;  %16252 = vmatprep.mubr.bf16.mxu1 %v20631_v9  ;;  %v2824_v9 = vpack.c.bf16 %v2807_v22, %v2806_v20 }
 0x190   : > { %16444 = vmatprep.mubr.bf16.mxu0 %v2820_v47  ;;  %16457 = vmatpush3.bf16.msra.mxu1 %v19633_v21 }
 0x191   : > { %16458 = vmatprep.subr.bf16.mxu1 %v19634_v39 }
 0x194   : > { %16459 = vmatpush3.bf16.msra.mxu1 %v19634_v39 }
 0x195   : > { %16460 = vmatprep.subr.bf16.mxu1 %v19635_v41 }
 0x196   : > { %16253 = vmatmul.mubr.bf16.gmra.mrb[20].mxu1 %v20633_v10  ;;  %v1600_v10 = vpack.c.bf16 %v1584_v44, %v1583_v1  ;;  %v19643_v44 = vld [vmem:[#allocation6 + $0x250] sm:$0xff]  }
 0x197   : > { %16445 = vmatmul.mubr.bf16.gmra.mrb[20].mxu0 %v2821_v57  ;;  %16256 = vmatprep.mubr.bf16.mxu1 %v1597_v59 }
 0x198   : > { %16448 = vmatprep.mubr.bf16.mxu0 %v2822_v60  ;;  %16461 = vmatpush3.bf16.msra.mxu1 %v19635_v41 }
 0x199   : > { %16462 = vmatprep.subr.bf16.mxu1 %v19636_v12 }
 0x19c   : > { %16463 = vmatpush3.bf16.msra.mxu1 %v19636_v12 }
 0x19d   : > { %16464 = vmatprep.subr.bf16.mxu1 %v19637_v13 }
 0x19e   : > { %16257 = vmatmul.mubr.bf16.gmra.mrb[24].mxu1 %v1598_v30 }
 0x19f   : > { %16449 = vmatmul.mubr.bf16.gmra.mrb[24].mxu0 %v2823_v37  ;;  %16260 = vmatprep.mubr.bf16.mxu1 %v1599_v5 }
 0x1a0   : > { %16452 = vmatprep.mubr.bf16.mxu0 %v2824_v9  ;;  %16465 = vmatpush3.bf16.msra.mxu1 %v19637_v13 }
 0x1a1   : > { %16466 = vmatprep.subr.bf16.mxu1 %v19638_v51 }
 0x1a4   : > { %16467 = vmatpush3.bf16.msra.mxu1 %v19638_v51  ;;  %v19644_v51 = vld [vmem:[#allocation6 + $0x258] sm:$0xff]  }
 0x1a5   : > { %16468 = vmatprep.subr.bf16.mxu1 %v19639_v38 }
 0x1a6   : > { %16261 = vmatmul.mubr.bf16.gmra.mrb[28].mxu1 %v1600_v10 }
 0x1a7   : > { %16453 = vmatmul.mubr.bf16.gmra.mrb[28].mxu0 %v2825_v11  ;;  %16472 = vmatprep.mubr.bf16.mxu1 %v20650_v36  ;;  %v19640_v36 = vld [vmem:[#allocation6 + $0x2b8] sm:$0xff]  }
 0x1a8   : > { %16469 = vmatpush3.bf16.msra.mxu1 %v19639_v38 }
 0x1a9   : > { %16470 = vmatprep.subr.bf16.mxu1 %v19640_v36 }
 0x1ac   : > { %16471 = vmatpush3.bf16.msra.mxu1 %v19640_v36 }
 0x1ad   : > { %16504 = vmatprep.subr.bf16.mxu1 %v19641_v26 }
 0x221   : > { %v16186_v27 = vpop.f32.mrb[0].mxu1 }
 0x222   : > { %v1394_v55 = vpop.f32.mrb[1].mxu1 }
 0x223   : > { %v16187_v56 = vpop.f32.mrb[2].mxu1 }
 0x224   : > { %v1397_v32 = vpop.f32.mrb[3].mxu1 }
 0x229   : > { %v16190_v14 = vpop.f32.mrb[4].mxu1 }
 0x22a   : > { %v1410_v40 = vpop.f32.mrb[5].mxu1 }
 0x22b   : > { %v16191_v58 = vpop.f32.mrb[6].mxu1 }
 0x22c   : > { %v1413_v23 = vpop.f32.mrb[7].mxu1 }
 0x231   : > { %v16194_v6 = vpop.f32.mrb[8].mxu1 }
 0x232   : > { %v1426_v24 = vpop.f32.mrb[9].mxu1 }
 0x233   : > { %v20667_v25 = vpop.f32.mrb[10].mxu1 }
 0x234   : > { %v20669_v28 = vpop.f32.mrb[11].mxu1 }
 0x239   : > { %v20671_v0 = vpop.f32.mrb[12].mxu1 }
 0x23a   : > { %v20673_v42 = vpop.f32.mrb[13].mxu1 }
 0x23b   : > { %v20675_v7 = vpop.f32.mrb[14].mxu1 }
 0x23c   : > { %v20677_v29 = vpop.f32.mrb[15].mxu1 }
 0x242   : > { %v16426_v15 = vpop.f32.mrb[0].mxu0 }
 0x243   : > { %v18200_v34 = vadd.f32 %v16426_v15, %v16186_v27  ;;  %v2925_v35 = vpop.f32.mrb[1].mxu0 }
 0x244   : > { %v18201_v17 = vadd.f32 %v2925_v35, %v1394_v55  ;;  %v16427_v43 = vpop.f32.mrb[2].mxu0 }
 0x245   : > { %v3093_v31 = vadd.f32 %v18200_v34, %v20679_v52  ;;  %v18202_v45 = vadd.f32 %v16427_v43, %v16187_v56  ;;  %v2928_v46 = vpop.f32.mrb[3].mxu0  ;;  %v19646_v43 = vld [vmem:[#allocation6 + $0x268] sm:$0xff]  }
 0x246   : > { %v3091_v54 = vadd.f32 %v18201_v17, %v20679_v52  ;;  %v18203_v33 = vadd.f32 %v2928_v46, %v1397_v32 }
 0x247   : > { %v3125_v47 = vmax.f32 %v3093_v31, 0.0  ;;  %v3094_v48 = vadd.f32 %v18202_v45, %v20679_v52 }
 0x248   : > { %v3123_v2 = vmax.f32 %v3091_v54, 0.0  ;;  %v3092_v49 = vadd.f32 %v18203_v33, %v20679_v52 }
 0x249   : > { %3157 = vst [vmem:[#allocation2 + $0x48] sm:$0xff] %v3125_v47  ;;  %v3126_v50 = vmax.f32 %v3094_v48, 0.0 }
 0x24a   : > { %3155 = vst [vmem:[#allocation2 + $0x28] sm:$0xff] %v3123_v2  ;;  %v3124_v18 = vmax.f32 %v3092_v49, 0.0  ;;  %v16430_v53 = vpop.f32.mrb[4].mxu0 }
 0x24b   : > { %3158 = vst [vmem:[#allocation2 + $0x50] sm:$0xff] %v3126_v50  ;;  %v18204_v57 = vadd.f32 %v16430_v53, %v16190_v14  ;;  %v2941_v59 = vpop.f32.mrb[5].mxu0  ;;  %v3286_v60 = vpack.c.bf16 %v3126_v50, %v3125_v47 }
 0x24c   : > { %3156 = vst [vmem:[#allocation2 + $0x30] sm:$0xff] %v3124_v18  ;;  %v18205_v4 = vadd.f32 %v2941_v59, %v1410_v40  ;;  %v16431_v8 = vpop.f32.mrb[6].mxu0  ;;  %v3285_v19 = vpack.c.bf16 %v3124_v18, %v3123_v2  ;;  %v19647_v2 = vld [vmem:[#allocation6 + $0x270] sm:$0xff]  }
 0x24d   : > { %v3097_v62 = vadd.f32 %v18204_v57, %v20679_v52  ;;  %v18206_v63 = vadd.f32 %v16431_v8, %v16191_v58  ;;  %v2944_v20 = vpop.f32.mrb[7].mxu0  ;;  %v19645_v58 = vld [vmem:[#allocation6 + $0x260] sm:$0xff]  }
 0x24e   : > { %v3095_v22 = vadd.f32 %v18205_v4, %v20679_v52  ;;  %v18207_v30 = vadd.f32 %v2944_v20, %v1413_v23  ;;  %16473 = vmatmul.mubr.bf16.vlgmr.msra.gmra.mrb[32].mxu1 %v3285_v19 }
 0x24f   : > { %v3129_v37 = vmax.f32 %v3097_v62, 0.0  ;;  %v3098_v5 = vadd.f32 %v18206_v63, %v20679_v52  ;;  %16476 = vmatprep.mubr.bf16.mxu1 %v3286_v60  ;;  %16505 = vmatpush3.bf16.msra.mxu1 %v19641_v26  ;;  %v19648_v62 = vld [vmem:[#allocation6 + $0x278] sm:$0xff]  }
 0x250   : > { %v3127_v9 = vmax.f32 %v3095_v22, 0.0  ;;  %v3096_v1 = vadd.f32 %v18207_v30, %v20679_v52  ;;  %16506 = vmatprep.subr.bf16.mxu1 %v19642_v61 }
 0x251   : > { %3161 = vst [vmem:[#allocation2 + $0x88] sm:$0xff] %v3129_v37  ;;  %v3130_v3 = vmax.f32 %v3098_v5, 0.0 }
 0x252   : > { %3159 = vst [vmem:[#allocation2 + $0x68] sm:$0xff] %v3127_v9  ;;  %v3128_v16 = vmax.f32 %v3096_v1, 0.0  ;;  %v16434_v10 = vpop.f32.mrb[8].mxu0 }
 0x253   : > { %3162 = vst [vmem:[#allocation2 + $0x90] sm:$0xff] %v3130_v3  ;;  %v18208_v11 = vadd.f32 %v16434_v10, %v16194_v6  ;;  %v2957_v21 = vpop.f32.mrb[9].mxu0  ;;  %v3288_v39 = vpack.c.bf16 %v3130_v3, %v3129_v37  ;;  %16507 = vmatpush3.bf16.msra.mxu1 %v19642_v61  ;;  %v20707_v3 = vld [vmem:[#allocation6 + $0x2c0] sm:$0xff]  }
 0x254   : > { %3160 = vst [vmem:[#allocation2 + $0x70] sm:$0xff] %v3128_v16  ;;  %v18209_v41 = vadd.f32 %v2957_v21, %v1426_v24  ;;  %v16435_v12 = vpop.f32.mrb[10].mxu0  ;;  %v3287_v13 = vpack.c.bf16 %v3128_v16, %v3127_v9  ;;  %16508 = vmatprep.subr.bf16.mxu1 %v19643_v44 }
 0x255   : > { %v3101_v38 = vadd.f32 %v18208_v11, %v20679_v52  ;;  %v18210_v36 = vadd.f32 %v16435_v12, %v20667_v25  ;;  %v2960_v26 = vpop.f32.mrb[11].mxu0 }
 0x256   : > { %v3099_v27 = vadd.f32 %v18209_v41, %v20679_v52  ;;  %v18211_v55 = vadd.f32 %v2960_v26, %v20669_v28  ;;  %16477 = vmatmul.mubr.bf16.gmra.mrb[36].mxu1 %v3287_v13 }
 0x257   : > { %v3133_v56 = vmax.f32 %v3101_v38, 0.0  ;;  %v3102_v32 = vadd.f32 %v18210_v36, %v20679_v52  ;;  %16480 = vmatprep.mubr.bf16.mxu1 %v3288_v39  ;;  %16509 = vmatpush3.bf16.msra.mxu1 %v19643_v44 }
 0x258   : > { %v3131_v14 = vmax.f32 %v3099_v27, 0.0  ;;  %v3100_v40 = vadd.f32 %v18211_v55, %v20679_v52  ;;  %16510 = vmatprep.subr.bf16.mxu1 %v19644_v51 }
 0x259   : > { %3165 = vst [vmem:[#allocation2 + $0xc8] sm:$0xff] %v3133_v56  ;;  %v3134_v23 = vmax.f32 %v3102_v32, 0.0 }
 0x25a   : > { %3163 = vst [vmem:[#allocation2 + $0xa8] sm:$0xff] %v3131_v14  ;;  %v3132_v6 = vmax.f32 %v3100_v40, 0.0  ;;  %v16438_v24 = vpop.f32.mrb[12].mxu0 }
 0x25b   : > { %3166 = vst [vmem:[#allocation2 + $0xd0] sm:$0xff] %v3134_v23  ;;  %v18212_v25 = vadd.f32 %v16438_v24, %v20671_v0  ;;  %v2973_v28 = vpop.f32.mrb[13].mxu0  ;;  %v3290_v15 = vpack.c.bf16 %v3134_v23, %v3133_v56  ;;  %16511 = vmatpush3.bf16.msra.mxu1 %v19644_v51 }
 0x25c   : > { %3164 = vst [vmem:[#allocation2 + $0xb0] sm:$0xff] %v3132_v6  ;;  %v18213_v34 = vadd.f32 %v2973_v28, %v20673_v42  ;;  %v16439_v35 = vpop.f32.mrb[14].mxu0  ;;  %v3289_v17 = vpack.c.bf16 %v3132_v6, %v3131_v14  ;;  %16512 = vmatprep.subr.bf16.mxu1 %v19645_v58 }
 0x25d   : > { %v3105_v31 = vadd.f32 %v18212_v25, %v20679_v52  ;;  %v18214_v45 = vadd.f32 %v16439_v35, %v20675_v7  ;;  %v2976_v46 = vpop.f32.mrb[15].mxu0 }
 0x25e   : > { %v3103_v54 = vadd.f32 %v18213_v34, %v20679_v52  ;;  %v18215_v33 = vadd.f32 %v2976_v46, %v20677_v29  ;;  %16481 = vmatmul.mubr.bf16.gmra.mrb[40].mxu1 %v3289_v17 }
 0x25f   : > { %v3137_v0 = vmax.f32 %v3105_v31, 0.0  ;;  %v3106_v47 = vadd.f32 %v18214_v45, %v20679_v52  ;;  %16484 = vmatprep.mubr.bf16.mxu1 %v3290_v15  ;;  %16513 = vmatpush3.bf16.msra.mxu1 %v19645_v58 }
 0x260   : > { %v3135_v42 = vmax.f32 %v3103_v54, 0.0  ;;  %v3104_v48 = vadd.f32 %v18215_v33, %v20679_v52  ;;  %16514 = vmatprep.subr.bf16.mxu1 %v19646_v43 }
 0x261   : > { %3169 = vst [vmem:[#allocation2 + $0x108] sm:$0xff] %v3137_v0  ;;  %v3138_v49 = vmax.f32 %v3106_v47, 0.0  ;;  %v16250_v50 = vpop.f32.mrb[16].mxu1 }
 0x262   : > { %3167 = vst [vmem:[#allocation2 + $0xe8] sm:$0xff] %v3135_v42  ;;  %v3136_v7 = vmax.f32 %v3104_v48, 0.0  ;;  %v16442_v18 = vpop.f32.mrb[16].mxu0  ;;  %v1764_v53 = vpop.f32.mrb[17].mxu1 }
 0x263   : > { %3170 = vst [vmem:[#allocation2 + $0x110] sm:$0xff] %v3138_v49  ;;  %v18216_v29 = vadd.f32 %v16442_v18, %v16250_v50  ;;  %v2989_v57 = vpop.f32.mrb[17].mxu0  ;;  %v16251_v59 = vpop.f32.mrb[18].mxu1  ;;  %v3292_v60 = vpack.c.bf16 %v3138_v49, %v3137_v0  ;;  %16515 = vmatpush3.bf16.msra.mxu1 %v19646_v43 }
 0x264   : > { %3168 = vst [vmem:[#allocation2 + $0xf0] sm:$0xff] %v3136_v7  ;;  %v18217_v4 = vadd.f32 %v2989_v57, %v1764_v53  ;;  %v16443_v8 = vpop.f32.mrb[18].mxu0  ;;  %v1767_v19 = vpop.f32.mrb[19].mxu1  ;;  %v3291_v61 = vpack.c.bf16 %v3136_v7, %v3135_v42  ;;  %16516 = vmatprep.subr.bf16.mxu1 %v19647_v2 }
 0x265   : > { %v3109_v63 = vadd.f32 %v18216_v29, %v20679_v52  ;;  %v18218_v20 = vadd.f32 %v16443_v8, %v16251_v59  ;;  %v2992_v22 = vpop.f32.mrb[19].mxu0 }
 0x266   : > { %v3107_v30 = vadd.f32 %v18217_v4, %v20679_v52  ;;  %v18219_v37 = vadd.f32 %v2992_v22, %v1767_v19  ;;  %16485 = vmatmul.mubr.bf16.gmra.mrb[44].mxu1 %v3291_v61 }
 0x267   : > { %v3141_v5 = vmax.f32 %v3109_v63, 0.0  ;;  %v3110_v9 = vadd.f32 %v18218_v20, %v20679_v52  ;;  %16488 = vmatprep.mubr.bf16.mxu1 %v3292_v60  ;;  %16517 = vmatpush3.bf16.msra.mxu1 %v19647_v2 }
 0x268   : > { %v3139_v1 = vmax.f32 %v3107_v30, 0.0  ;;  %v3108_v44 = vadd.f32 %v18219_v37, %v20679_v52  ;;  %16518 = vmatprep.subr.bf16.mxu1 %v19648_v62 }
 0x269   : > { %3173 = vst [vmem:[#allocation2 + $0x148] sm:$0xff] %v3141_v5  ;;  %v3142_v16 = vmax.f32 %v3110_v9, 0.0  ;;  %v16254_v10 = vpop.f32.mrb[20].mxu1 }
 0x26a   : > { %3171 = vst [vmem:[#allocation2 + $0x128] sm:$0xff] %v3139_v1  ;;  %v20709_v11 = vmax.f32 %v3108_v44, 0.0  ;;  %v16446_v21 = vpop.f32.mrb[20].mxu0  ;;  %v1780_v39 = vpop.f32.mrb[21].mxu1 }
 0x26b   : > { %3174 = vst [vmem:[#allocation2 + $0x150] sm:$0xff] %v3142_v16  ;;  %v18220_v41 = vadd.f32 %v16446_v21, %v16254_v10  ;;  %v3005_v12 = vpop.f32.mrb[21].mxu0  ;;  %v16255_v13 = vpop.f32.mrb[22].mxu1  ;;  %v3294_v51 = vpack.c.bf16 %v3142_v16, %v3141_v5  ;;  %16519 = vmatpush3.bf16.msra.mxu1 %v19648_v62 }
 0x26c   : > { %3172 = vst [vmem:[#allocation2 + $0x130] sm:$0xff] %v20709_v11  ;;  %v18221_v38 = vadd.f32 %v3005_v12, %v1780_v39  ;;  %v16447_v36 = vpop.f32.mrb[22].mxu0  ;;  %v1783_v26 = vpop.f32.mrb[23].mxu1  ;;  %v3293_v27 = vpack.c.bf16 %v20709_v11, %v3139_v1  ;;  %16552 = vmatprep.subr.bf16.mxu1 %v20707_v3  ;;  %v3188_v12 = vld [vmem:[#allocation2 + $0xf] sm:$0xff] }
 0x26d   : > { %v3113_v55 = vadd.f32 %v18220_v41, %v20679_v52  ;;  %v18222_v56 = vadd.f32 %v16447_v36, %v16255_v13  ;;  %v3008_v32 = vpop.f32.mrb[23].mxu0  ;;  %v3187_v41 = vld [vmem:[#allocation2 + $0x7] sm:$0xff] }
 0x26e   : > { %v3111_v14 = vadd.f32 %v18221_v38, %v20679_v52  ;;  %v18223_v40 = vadd.f32 %v3008_v32, %v1783_v26  ;;  %16489 = vmatmul.mubr.bf16.gmra.mrb[48].mxu1 %v3293_v27  ;;  %v3219_v38 = vpack.c.bf16 %v3188_v12, %v3187_v41  ;;  %v3190_v27 = vld [vmem:[#allocation2 + $0x2f] sm:$0xff]  ;;  %v3191_v32 = vld [vmem:[#allocation2 + $0x47] sm:$0xff] }
 0x26f   : > { %v3145_v58 = vmax.f32 %v3113_v55, 0.0  ;;  %v3114_v23 = vadd.f32 %v18222_v56, %v20679_v52  ;;  %16492 = vmatprep.mubr.bf16.mxu1 %v3294_v51  ;;  %v3192_v55 = vld [vmem:[#allocation2 + $0x4f] sm:$0xff]  ;;  %v3189_v56 = vld [vmem:[#allocation2 + $0x27] sm:$0xff] }
 0x270   : > { %v3143_v6 = vmax.f32 %v3111_v14, 0.0  ;;  %v3112_v24 = vadd.f32 %v18223_v40, %v20679_v52  ;;  %v19650_v14 = vld [vmem:[#allocation6 + $0x2c8] sm:$0xff]   ;;  %v20745_v40 = vpack.c.bf16 %v3192_v55, %v3191_v32 }
 0x271   : > { %3177 = vst [vmem:[#allocation2 + $0x188] sm:$0xff] %v3145_v58  ;;  %v3146_v25 = vmax.f32 %v3114_v23, 0.0  ;;  %v16258_v28 = vpop.f32.mrb[24].mxu1  ;;  %v3194_v23 = vld [vmem:[#allocation2 + $0x6f] sm:$0xff] }
 0x272   : > { %3175 = vst [vmem:[#allocation2 + $0x168] sm:$0xff] %v3143_v6  ;;  %v3144_v15 = vmax.f32 %v3112_v24, 0.0  ;;  %v16450_v34 = vpop.f32.mrb[24].mxu0  ;;  %v1796_v35 = vpop.f32.mrb[25].mxu1  ;;  %v3193_v24 = vld [vmem:[#allocation2 + $0x67] sm:$0xff] }
 0x273   : > { %3178 = vst [vmem:[#allocation2 + $0x190] sm:$0xff] %v3146_v25  ;;  %v18224_v17 = vadd.f32 %v16450_v34, %v16258_v28  ;;  %v3021_v43 = vpop.f32.mrb[25].mxu0  ;;  %v16259_v31 = vpop.f32.mrb[26].mxu1  ;;  %v20718_v45 = vpack.c.bf16 %v3146_v25, %v3145_v58  ;;  %v19651_v58 = vld [vmem:[#allocation6 + $0x2d0] sm:$0xff]   ;;  %v20750_v25 = vpack.c.bf16 %v3194_v23, %v3193_v24  ;;  %v3195_v28 = vld [vmem:[#allocation2 + $0x87] sm:$0xff] }
 0x274   : > { %3176 = vst [vmem:[#allocation2 + $0x170] sm:$0xff] %v3144_v15  ;;  %v18225_v46 = vadd.f32 %v3021_v43, %v1796_v35  ;;  %v16451_v54 = vpop.f32.mrb[26].mxu0  ;;  %v1799_v33 = vpop.f32.mrb[27].mxu1  ;;  %v20720_v0 = vpack.c.bf16 %v3144_v15, %v3143_v6  ;;  %v3196_v6 = vld [vmem:[#allocation2 + $0x8f] sm:$0xff]  ;;  %v19652_v15 = vld [vmem:[#allocation6 + $0x2d8] sm:$0xff]   ;;  %v3197_v43 = vld [vmem:[#allocation2 + $0xa7] sm:$0xff] }
 0x275   : > { %v3117_v47 = vadd.f32 %v18224_v17, %v20679_v52  ;;  %v18226_v42 = vadd.f32 %v16451_v54, %v16259_v31  ;;  %v3024_v48 = vpop.f32.mrb[27].mxu0  ;;  %v20752_v34 = vpack.c.bf16 %v3196_v6, %v3195_v28  ;;  %v3198_v35 = vld [vmem:[#allocation2 + $0xaf] sm:$0xff] }
 0x276   : > { %v3115_v2 = vadd.f32 %v18225_v46, %v20679_v52  ;;  %v18227_v49 = vadd.f32 %v3024_v48, %v1799_v33  ;;  %16493 = vmatmul.mubr.bf16.gmra.mrb[52].mxu1 %v20720_v0  ;;  %v3200_v17 = vld [vmem:[#allocation2 + $0xcf] sm:$0xff]  ;;  %v20756_v31 = vpack.c.bf16 %v3198_v35, %v3197_v43  ;;  %v3199_v46 = vld [vmem:[#allocation2 + $0xc7] sm:$0xff]  ;;  %v19660_v35 = vld [vmem:[#allocation6 + $0x318] sm:$0xff]  }
 0x277   : > { %v3149_v50 = vmax.f32 %v3117_v47, 0.0  ;;  %v3118_v7 = vadd.f32 %v18226_v42, %v20679_v52  ;;  %16496 = vmatprep.mubr.bf16.mxu1 %v20718_v45  ;;  %v19654_v54 = vld [vmem:[#allocation6 + $0x2e8] sm:$0xff]   ;;  %v20758_v33 = vpack.c.bf16 %v3200_v17, %v3199_v46  ;;  %v19655_v47 = vld [vmem:[#allocation6 + $0x2f0] sm:$0xff]   ;;  %v19661_v43 = vld [vmem:[#allocation6 + $0x320] sm:$0xff]  }
 0x278   : > { %v3147_v18 = vmax.f32 %v3115_v2, 0.0  ;;  %v3116_v53 = vadd.f32 %v18227_v49, %v20679_v52  ;;  %v3202_v42 = vld [vmem:[#allocation2 + $0xef] sm:$0xff]  ;;  %v3201_v2 = vld [vmem:[#allocation2 + $0xe7] sm:$0xff] }
 0x279   : > { %3181 = vst [vmem:[#allocation2 + $0x1c8] sm:$0xff] %v3149_v50  ;;  %v3150_v29 = vmax.f32 %v3118_v7, 0.0  ;;  %v16262_v57 = vpop.f32.mrb[28].mxu1  ;;  %v3204_v48 = vld [vmem:[#allocation2 + $0x10f] sm:$0xff]  ;;  %v20762_v49 = vpack.c.bf16 %v3202_v42, %v3201_v2  ;;  %v19656_v7 = vld [vmem:[#allocation6 + $0x2f8] sm:$0xff]  }
 0x27a   : > { %3179 = vst [vmem:[#allocation2 + $0x1a8] sm:$0xff] %v3147_v18  ;;  %v3148_v59 = vmax.f32 %v3116_v53, 0.0  ;;  %v16454_v60 = vpop.f32.mrb[28].mxu0  ;;  %v1812_v4 = vpop.f32.mrb[29].mxu1  ;;  %v19657_v53 = vld [vmem:[#allocation6 + $0x300] sm:$0xff]   ;;  %v3739_v55 = vld [vmem:[#allocation2 + $0x49] sm:$0xff] }
 0x27b   : > { %3182 = vst [vmem:[#allocation2 + $0x1d0] sm:$0xff] %v3150_v29  ;;  %v18228_v8 = vadd.f32 %v16454_v60, %v16262_v57  ;;  %v3037_v19 = vpop.f32.mrb[29].mxu0  ;;  %v16263_v61 = vpop.f32.mrb[30].mxu1  ;;  %v20728_v62 = vpack.c.bf16 %v3150_v29, %v3149_v50  ;;  %v3203_v50 = vld [vmem:[#allocation2 + $0x107] sm:$0xff]  ;;  %v3206_v29 = vld [vmem:[#allocation2 + $0x12f] sm:$0xff] }
 0x27c   : > { %3180 = vst [vmem:[#allocation2 + $0x1b0] sm:$0xff] %v3148_v59  ;;  %v18229_v63 = vadd.f32 %v3037_v19, %v1812_v4  ;;  %v16455_v20 = vpop.f32.mrb[30].mxu0  ;;  %v1815_v22 = vpop.f32.mrb[31].mxu1  ;;  %v20730_v30 = vpack.c.bf16 %v3148_v59, %v3147_v18  ;;  %v20764_v18 = vpack.c.bf16 %v3204_v48, %v3203_v50  ;;  %v3208_v57 = vld [vmem:[#allocation2 + $0x14f] sm:$0xff]  ;;  %v3205_v59 = vld [vmem:[#allocation2 + $0x127] sm:$0xff] }
 0x27d   : > { %v3121_v37 = vadd.f32 %v18228_v8, %v20679_v52  ;;  %v18230_v5 = vadd.f32 %v16455_v20, %v16263_v61  ;;  %v3040_v9 = vpop.f32.mrb[31].mxu0  ;;  %v20768_v60 = vpack.c.bf16 %v3206_v29, %v3205_v59  ;;  %v3207_v4 = vld [vmem:[#allocation2 + $0x147] sm:$0xff]  ;;  %v3210_v19 = vld [vmem:[#allocation2 + $0x16f] sm:$0xff] }
 0x27e   : > { %v3119_v1 = vadd.f32 %v18229_v63, %v20679_v52  ;;  %v18231_v44 = vadd.f32 %v3040_v9, %v1815_v22  ;;  %16497 = vmatmul.mubr.bf16.gmra.mrb[56].mxu1 %v20730_v30  ;;  %v20770_v8 = vpack.c.bf16 %v3208_v57, %v3207_v4  ;;  %v3212_v61 = vld [vmem:[#allocation2 + $0x18f] sm:$0xff]  ;;  %v3209_v63 = vld [vmem:[#allocation2 + $0x167] sm:$0xff] }
 0x27f   : > { %v3153_v16 = vmax.f32 %v3121_v37, 0.0  ;;  %v3122_v10 = vadd.f32 %v18230_v5, %v20679_v52  ;;  %16500 = vmatprep.mubr.bf16.mxu1 %v20728_v62  ;;  %v20774_v20 = vpack.c.bf16 %v3210_v19, %v3209_v63  ;;  %v3211_v22 = vld [vmem:[#allocation2 + $0x187] sm:$0xff]  ;;  %v19659_v23 = vld [vmem:[#allocation6 + $0x310] sm:$0xff]   ;;  %v19664_v19 = vld [vmem:[#allocation6 + $0x338] sm:$0xff]  }
 0x280   : > { %v3151_v21 = vmax.f32 %v3119_v1, 0.0  ;;  %v3120_v39 = vadd.f32 %v18231_v44, %v20679_v52  ;;  %v20743_v52 = vpack.c.bf16 %v3190_v27, %v3189_v56  ;;  %v20776_v37 = vpack.c.bf16 %v3212_v61, %v3211_v22  ;;  %v3738_v27 = vld [vmem:[#allocation2 + $0x31] sm:$0xff]  ;;  %v3741_v6 = vld [vmem:[#allocation2 + $0x69] sm:$0xff]  ;;  %v19665_v63 = vld [vmem:[#allocation6 + $0x340] sm:$0xff]  }
 0x281   : > { %3185 = vst [vmem:[#allocation2 + $0x208] sm:$0xff] %v3153_v16  ;;  %v3154_v13 = vmax.f32 %v3122_v10, 0.0  ;;  %v3213_v1 = vld [vmem:[#allocation2 + $0x1a7] sm:$0xff]  ;;  %v3740_v56 = vld [vmem:[#allocation2 + $0x51] sm:$0xff] }
 0x282   : > { %3183 = vst [vmem:[#allocation2 + $0x1e8] sm:$0xff] %v3151_v21  ;;  %v3152_v51 = vmax.f32 %v3120_v39, 0.0  ;;  %v3216_v9 = vld [vmem:[#allocation2 + $0x1cf] sm:$0xff] }
 0x283   : > { %3186 = vst [vmem:[#allocation2 + $0x210] sm:$0xff] %v3154_v13  ;;  %v20738_v36 = vpack.c.bf16 %v3154_v13, %v3153_v16  ;;  %v3214_v5 = vld [vmem:[#allocation2 + $0x1af] sm:$0xff]  ;;  %v3215_v16 = vld [vmem:[#allocation2 + $0x1c7] sm:$0xff] }
 0x284   : > { %3184 = vst [vmem:[#allocation2 + $0x1f0] sm:$0xff] %v3152_v51  ;;  %v20740_v26 = vpack.c.bf16 %v3152_v51, %v3151_v21  ;;  %v20780_v44 = vpack.c.bf16 %v3214_v5, %v3213_v1  ;;  %v20782_v10 = vpack.c.bf16 %v3216_v9, %v3215_v16  ;;  %v3735_v21 = vld [vmem:[#allocation2 + $0x9] sm:$0xff]  ;;  %v3736_v39 = vld [vmem:[#allocation2 + $0x11] sm:$0xff] }
 0x285   : > { %v3767_v13 = vpack.c.bf16 %v3736_v39, %v3735_v21  ;;  %v3742_v24 = vld [vmem:[#allocation2 + $0x71] sm:$0xff]  ;;  %v3743_v28 = vld [vmem:[#allocation2 + $0x89] sm:$0xff] }
 0x286   : > { %16501 = vmatmul.mubr.bf16.gmra.mrb[60].mxu1 %v20740_v26  ;;  %v3745_v46 = vld [vmem:[#allocation2 + $0xa9] sm:$0xff]  ;;  %v3748_v42 = vld [vmem:[#allocation2 + $0xd1] sm:$0xff] }
 0x287   : > { %16520 = vmatprep.mubr.bf16.mxu1 %v3219_v38  ;;  %v3737_v38 = vld [vmem:[#allocation2 + $0x29] sm:$0xff]  ;;  %v3750_v29 = vld [vmem:[#allocation2 + $0xf1] sm:$0xff] }
 0x288   : > { %v20789_v32 = vpack.c.bf16 %v3738_v27, %v3737_v38  ;;  %v19662_v2 = vld [vmem:[#allocation6 + $0x328] sm:$0xff]   ;;  %v3752_v59 = vld [vmem:[#allocation2 + $0x111] sm:$0xff] }
 0x289   : > { %v3217_v12 = vld [vmem:[#allocation2 + $0x1e7] sm:$0xff]  ;;  %v3754_v5 = vld [vmem:[#allocation2 + $0x131] sm:$0xff] }
 0x28a   : > { %v3751_v57 = vld [vmem:[#allocation2 + $0x109] sm:$0xff]  ;;  %v3756_v1 = vld [vmem:[#allocation2 + $0x151] sm:$0xff] }
 0x28b   : > { %v3218_v41 = vld [vmem:[#allocation2 + $0x1ef] sm:$0xff]  ;;  %v20809_v61 = vpack.c.bf16 %v3752_v59, %v3751_v57  ;;  %v4071_v57 = vld [vmem:[#allocation2 + $0x207] sm:$0xff] }
 0x28c   : > { %v20786_v51 = vpack.c.bf16 %v3218_v41, %v3217_v12  ;;  %v3753_v22 = vld [vmem:[#allocation2 + $0x129] sm:$0xff]  ;;  %v3758_v41 = vld [vmem:[#allocation2 + $0x171] sm:$0xff] }
 0x28d   : > { %v3755_v9 = vld [vmem:[#allocation2 + $0x149] sm:$0xff]  ;;  %v20813_v16 = vpack.c.bf16 %v3754_v5, %v3753_v22 }
 0x28e   : > { %16521 = vmatmul.mubr.bf16.vlgmr.msra.gmra.mrb[32].mxu1 %v20743_v52  ;;  %v20815_v21 = vpack.c.bf16 %v3756_v1, %v3755_v9  ;;  %v3757_v39 = vld [vmem:[#allocation2 + $0x169] sm:$0xff] }
 0x28f   : > { %16524 = vmatprep.mubr.bf16.mxu1 %v20745_v40  ;;  %16553 = vmatpush3.bf16.msra.mxu1 %v20707_v3  ;;  %v19653_v3 = vld [vmem:[#allocation6 + $0x2e0] sm:$0xff]   ;;  %v3759_v12 = vld [vmem:[#allocation2 + $0x189] sm:$0xff]  ;;  %v20819_v38 = vpack.c.bf16 %v3758_v41, %v3757_v39 }
 0x290   : > { %16554 = vmatprep.subr.bf16.mxu1 %v19650_v14  ;;  %v4350_v22 = vld [vmem:[#allocation2 + $0x50] sm:$0xff]  ;;  %v4349_v9 = vld [vmem:[#allocation2 + $0x48] sm:$0xff] }
 0x291   : > { %v4352_v5 = vld [vmem:[#allocation2 + $0x70] sm:$0xff]  ;;  %v20852_v1 = vpack.c.bf16 %v4350_v22, %v4349_v9  ;;  %v4351_v39 = vld [vmem:[#allocation2 + $0x68] sm:$0xff] }
 0x292   : > { %v19674_v41 = vld [vmem:[#allocation6 + $0x388] sm:$0xff]  }
 0x293   : > { %16555 = vmatpush3.bf16.msra.mxu1 %v19650_v14  ;;  %v19658_v14 = vld [vmem:[#allocation6 + $0x308] sm:$0xff]  }
 0x294   : > { %16556 = vmatprep.subr.bf16.mxu1 %v19651_v58 }
 0x296   : > { %16525 = vmatmul.mubr.bf16.gmra.mrb[36].mxu1 %v20750_v25 }
 0x297   : > { %16528 = vmatprep.mubr.bf16.mxu1 %v20752_v34  ;;  %16557 = vmatpush3.bf16.msra.mxu1 %v19651_v58  ;;  %v20791_v58 = vpack.c.bf16 %v3740_v56, %v3739_v55  ;;  %v3761_v55 = vld [vmem:[#allocation2 + $0x1a9] sm:$0xff]  ;;  %v3762_v56 = vld [vmem:[#allocation2 + $0x1b1] sm:$0xff] }
 0x298   : > { %16558 = vmatprep.subr.bf16.mxu1 %v19652_v15 }
 0x29b   : > { %16559 = vmatpush3.bf16.msra.mxu1 %v19652_v15  ;;  %v3744_v15 = vld [vmem:[#allocation2 + $0x91] sm:$0xff] }
 0x29c   : > { %16560 = vmatprep.subr.bf16.mxu1 %v19653_v3  ;;  %v20797_v17 = vpack.c.bf16 %v3744_v15, %v3743_v28  ;;  %v3765_v28 = vld [vmem:[#allocation2 + $0x1e9] sm:$0xff]  ;;  %v3766_v15 = vld [vmem:[#allocation2 + $0x1f1] sm:$0xff] }
 0x29e   : > { %16529 = vmatmul.mubr.bf16.gmra.mrb[40].mxu1 %v20756_v31 }
 0x29f   : > { %16532 = vmatprep.mubr.bf16.mxu1 %v20758_v33  ;;  %16561 = vmatpush3.bf16.msra.mxu1 %v19653_v3  ;;  %v20795_v3 = vpack.c.bf16 %v3742_v24, %v3741_v6  ;;  %v20825_v6 = vpack.c.bf16 %v3762_v56, %v3761_v55  ;;  %v4354_v55 = vld [vmem:[#allocation2 + $0x90] sm:$0xff] }
 0x2a0   : > { %16562 = vmatprep.subr.bf16.mxu1 %v19654_v54  ;;  %v4356_v56 = vld [vmem:[#allocation2 + $0xb0] sm:$0xff] }
 0x2a3   : > { %16563 = vmatpush3.bf16.msra.mxu1 %v19654_v54  ;;  %v3746_v54 = vld [vmem:[#allocation2 + $0xb1] sm:$0xff] }
 0x2a4   : > { %16564 = vmatprep.subr.bf16.mxu1 %v19655_v47  ;;  %v20801_v48 = vpack.c.bf16 %v3746_v54, %v3745_v46  ;;  %v19667_v46 = vld [vmem:[#allocation6 + $0x350] sm:$0xff]   ;;  %v19668_v54 = vld [vmem:[#allocation6 + $0x358] sm:$0xff]  }
 0x2a6   : > { %16533 = vmatmul.mubr.bf16.gmra.mrb[44].mxu1 %v20762_v49 }
 0x2a7   : > { %16536 = vmatprep.mubr.bf16.mxu1 %v20764_v18  ;;  %16565 = vmatpush3.bf16.msra.mxu1 %v19655_v47  ;;  %v3747_v47 = vld [vmem:[#allocation2 + $0xc9] sm:$0xff] }
 0x2a8   : > { %16566 = vmatprep.subr.bf16.mxu1 %v19656_v7  ;;  %v20803_v50 = vpack.c.bf16 %v3748_v42, %v3747_v47  ;;  %v19669_v47 = vld [vmem:[#allocation6 + $0x360] sm:$0xff]   ;;  %v19671_v42 = vld [vmem:[#allocation6 + $0x370] sm:$0xff]  }
 0x2ab   : > { %16567 = vmatpush3.bf16.msra.mxu1 %v19656_v7  ;;  %v19663_v7 = vld [vmem:[#allocation6 + $0x330] sm:$0xff]  }
 0x2ac   : > { %16600 = vmatprep.subr.bf16.mxu1 %v19657_v53 }
 0x2ae   : > { %16537 = vmatmul.mubr.bf16.gmra.mrb[48].mxu1 %v20768_v60 }
 0x2af   : > { %16540 = vmatprep.mubr.bf16.mxu1 %v20770_v8 }
 0x2b6   : > { %16541 = vmatmul.mubr.bf16.gmra.mrb[52].mxu1 %v20774_v20 }
 0x2b7   : > { %16544 = vmatprep.mubr.bf16.mxu1 %v20776_v37 }
 0x2be   : > { %16545 = vmatmul.mubr.bf16.gmra.mrb[56].mxu1 %v20780_v44 }
 0x2bf   : > { %16548 = vmatprep.mubr.bf16.mxu1 %v20782_v10 }
 0x2c6   : > { %16549 = vmatmul.mubr.bf16.gmra.mrb[60].mxu1 %v20786_v51 }
 0x2c7   : > { %16568 = vmatprep.mubr.bf16.mxu1 %v3767_v13  ;;  %v3760_v13 = vld [vmem:[#allocation2 + $0x191] sm:$0xff] }
 0x2c8   : > { %v20821_v27 = vpack.c.bf16 %v3760_v13, %v3759_v12  ;;  %v20854_v12 = vpack.c.bf16 %v4352_v5, %v4351_v39  ;;  %v19675_v13 = vld [vmem:[#allocation6 + $0x390] sm:$0xff]   ;;  %v19680_v5 = vld [vmem:[#allocation6 + $0x3b8] sm:$0xff]   ;;  %v19681_v39 = vld [vmem:[#allocation6 + $0x3c0] sm:$0xff]  }
 0x2ce   : > { %16569 = vmatmul.mubr.bf16.vlgmr.msra.gmra.mrb[32].mxu1 %v20789_v32 }
 0x2cf   : > { %16572 = vmatprep.mubr.bf16.mxu1 %v20791_v58  ;;  %16601 = vmatpush3.bf16.msra.mxu1 %v19657_v53  ;;  %v3749_v53 = vld [vmem:[#allocation2 + $0xe9] sm:$0xff] }
 0x2d0   : > { %16602 = vmatprep.subr.bf16.mxu1 %v19658_v14  ;;  %v20807_v4 = vpack.c.bf16 %v3750_v29, %v3749_v53  ;;  %v4072_v53 = vld [vmem:[#allocation2 + $0x20f] sm:$0xff] }
 0x2d1   : > { %v4348_v29 = vld [vmem:[#allocation2 + $0x30] sm:$0xff]  ;;  %v20849_v59 = vpack.c.bf16 %v4072_v53, %v4071_v57 }
 0x2d2   : > { %v4362_v57 = vld [vmem:[#allocation2 + $0x110] sm:$0xff] }
 0x2d3   : > { %16603 = vmatpush3.bf16.msra.mxu1 %v19658_v14  ;;  %v3763_v14 = vld [vmem:[#allocation2 + $0x1c9] sm:$0xff] }
 0x2d4   : > { %16604 = vmatprep.subr.bf16.mxu1 %v19659_v23 }
 0x2d6   : > { %16573 = vmatmul.mubr.bf16.gmra.mrb[36].mxu1 %v20795_v3 }
 0x2d7   : > { %16576 = vmatprep.mubr.bf16.mxu1 %v20797_v17  ;;  %16605 = vmatpush3.bf16.msra.mxu1 %v19659_v23  ;;  %v3764_v23 = vld [vmem:[#allocation2 + $0x1d1] sm:$0xff] }
 0x2d8   : > { %16606 = vmatprep.subr.bf16.mxu1 %v19660_v35  ;;  %v20827_v24 = vpack.c.bf16 %v3764_v23, %v3763_v14  ;;  %v4353_v14 = vld [vmem:[#allocation2 + $0x88] sm:$0xff] }
 0x2d9   : > { %v20858_v23 = vpack.c.bf16 %v4354_v55, %v4353_v14  ;;  %v5286_v14 = vld [vmem:[#allocation2 + $0x190] sm:$0xff] }
 0x2db   : > { %16607 = vmatpush3.bf16.msra.mxu1 %v19660_v35  ;;  %v20831_v35 = vpack.c.bf16 %v3766_v15, %v3765_v28  ;;  %v4355_v28 = vld [vmem:[#allocation2 + $0xa8] sm:$0xff]  ;;  %v19676_v15 = vld [vmem:[#allocation6 + $0x398] sm:$0xff]  }
 0x2dc   : > { %16608 = vmatprep.subr.bf16.mxu1 %v19661_v43 }
 0x2de   : > { %16577 = vmatmul.mubr.bf16.gmra.mrb[40].mxu1 %v20801_v48 }
 0x2df   : > { %16580 = vmatprep.mubr.bf16.mxu1 %v20803_v50  ;;  %16609 = vmatpush3.bf16.msra.mxu1 %v19661_v43  ;;  %v19666_v43 = vld [vmem:[#allocation6 + $0x348] sm:$0xff]  }
 0x2e0   : > { %16610 = vmatprep.subr.bf16.mxu1 %v19662_v2 }
 0x2e3   : > { %16611 = vmatpush3.bf16.msra.mxu1 %v19662_v2  ;;  %v19672_v2 = vld [vmem:[#allocation6 + $0x378] sm:$0xff]  }
 0x2e4   : > { %16612 = vmatprep.subr.bf16.mxu1 %v19663_v7 }
 0x2e6   : > { %16581 = vmatmul.mubr.bf16.gmra.mrb[44].mxu1 %v20807_v4 }
 0x2e7   : > { %16584 = vmatprep.mubr.bf16.mxu1 %v20809_v61  ;;  %16613 = vmatpush3.bf16.msra.mxu1 %v19663_v7  ;;  %v19673_v7 = vld [vmem:[#allocation6 + $0x380] sm:$0xff]  }
 0x2e8   : > { %16614 = vmatprep.subr.bf16.mxu1 %v19664_v19 }
 0x2eb   : > { %16615 = vmatpush3.bf16.msra.mxu1 %v19664_v19  ;;  %v4347_v19 = vld [vmem:[#allocation2 + $0x28] sm:$0xff] }
 0x2ec   : > { %16648 = vmatprep.subr.bf16.mxu1 %v19665_v63 }
 0x2ee   : > { %16585 = vmatmul.mubr.bf16.gmra.mrb[48].mxu1 %v20813_v16 }
 0x2ef   : > { %16588 = vmatprep.mubr.bf16.mxu1 %v20815_v21 }
 0x2f6   : > { %16589 = vmatmul.mubr.bf16.gmra.mrb[52].mxu1 %v20819_v38 }
 0x2f7   : > { %16592 = vmatprep.mubr.bf16.mxu1 %v20821_v27 }
 0x2fe   : > { %16593 = vmatmul.mubr.bf16.gmra.mrb[56].mxu1 %v20825_v6 }
 0x2ff   : > { %16596 = vmatprep.mubr.bf16.mxu1 %v20827_v24 }
 0x306   : > { %16597 = vmatmul.mubr.bf16.gmra.mrb[60].mxu1 %v20831_v35 }
 0x307   : > { %16616 = vmatprep.mubr.bf16.mxu1 %v20743_v52  ;;  %v19670_v52 = vld [vmem:[#allocation6 + $0x368] sm:$0xff]  }
 0x30e   : > { %16617 = vmatmul.mubr.bf16.vlgmr.msra.gmra.mrb[32].mxu1 %v20745_v40 }
 0x30f   : > { %16620 = vmatprep.mubr.bf16.mxu1 %v20750_v25  ;;  %16649 = vmatpush3.bf16.msra.mxu1 %v19665_v63  ;;  %v4379_v63 = vpack.c.bf16 %v4348_v29, %v4347_v19  ;;  %v19679_v29 = vld [vmem:[#allocation6 + $0x3b0] sm:$0xff]   ;;  %v20870_v19 = vld [vmem:[#allocation2 + $0x128] sm:$0xff] }
 0x310   : > { %16650 = vmatprep.subr.bf16.mxu1 %v19666_v43  ;;  %v4387_v9 = vpack.c.bf16 %v20709_v11, %v20870_v19  ;;  %v19682_v11 = vld [vmem:[#allocation6 + $0x3c8] sm:$0xff]  }
 0x313   : > { %16651 = vmatpush3.bf16.msra.mxu1 %v19666_v43  ;;  %v20860_v43 = vpack.c.bf16 %v4356_v56, %v4355_v28  ;;  %v5284_v56 = vld [vmem:[#allocation2 + $0x170] sm:$0xff] }
 0x314   : > { %16652 = vmatprep.subr.bf16.mxu1 %v19667_v46 }
 0x316   : > { %16621 = vmatmul.mubr.bf16.gmra.mrb[36].mxu1 %v20752_v34 }
 0x317   : > { %16624 = vmatprep.mubr.bf16.mxu1 %v20756_v31  ;;  %16653 = vmatpush3.bf16.msra.mxu1 %v19667_v46  ;;  %v19677_v46 = vld [vmem:[#allocation6 + $0x3a0] sm:$0xff]  }
 0x318   : > { %16654 = vmatprep.subr.bf16.mxu1 %v19668_v54 }
 0x31b   : > { %16655 = vmatpush3.bf16.msra.mxu1 %v19668_v54  ;;  %v4358_v54 = vld [vmem:[#allocation2 + $0xd0] sm:$0xff] }
 0x31c   : > { %16656 = vmatprep.subr.bf16.mxu1 %v19669_v47 }
 0x31e   : > { %16625 = vmatmul.mubr.bf16.gmra.mrb[40].mxu1 %v20758_v33 }
 0x31f   : > { %16628 = vmatprep.mubr.bf16.mxu1 %v20762_v49  ;;  %16657 = vmatpush3.bf16.msra.mxu1 %v19669_v47  ;;  %v4360_v47 = vld [vmem:[#allocation2 + $0xf0] sm:$0xff] }
 0x320   : > { %16658 = vmatprep.subr.bf16.mxu1 %v19670_v52 }
 0x323   : > { %16659 = vmatpush3.bf16.msra.mxu1 %v19670_v52  ;;  %v4357_v52 = vld [vmem:[#allocation2 + $0xc8] sm:$0xff] }
 0x324   : > { %16660 = vmatprep.subr.bf16.mxu1 %v19671_v42 }
 0x326   : > { %16629 = vmatmul.mubr.bf16.gmra.mrb[44].mxu1 %v20764_v18 }
 0x327   : > { %16632 = vmatprep.mubr.bf16.mxu1 %v20768_v60  ;;  %16661 = vmatpush3.bf16.msra.mxu1 %v19671_v42  ;;  %v20864_v42 = vpack.c.bf16 %v4358_v54, %v4357_v52  ;;  %v5290_v54 = vld [vmem:[#allocation2 + $0x1d0] sm:$0xff] }
 0x328   : > { %16662 = vmatprep.subr.bf16.mxu1 %v19672_v2 }
 0x32b   : > { %16663 = vmatpush3.bf16.msra.mxu1 %v19672_v2  ;;  %v4359_v2 = vld [vmem:[#allocation2 + $0xe8] sm:$0xff] }
 0x32c   : > { %16696 = vmatprep.subr.bf16.mxu1 %v19673_v7  ;;  %v20866_v53 = vpack.c.bf16 %v4360_v47, %v4359_v2  ;;  %v5287_v47 = vld [vmem:[#allocation2 + $0x1a8] sm:$0xff] }
 0x32e   : > { %16633 = vmatmul.mubr.bf16.gmra.mrb[48].mxu1 %v20770_v8 }
 0x32f   : > { %16636 = vmatprep.mubr.bf16.mxu1 %v20774_v20 }
 0x336   : > { %16637 = vmatmul.mubr.bf16.gmra.mrb[52].mxu1 %v20776_v37 }
 0x337   : > { %16640 = vmatprep.mubr.bf16.mxu1 %v20780_v44 }
 0x33e   : > { %16641 = vmatmul.mubr.bf16.gmra.mrb[56].mxu1 %v20782_v10 }
 0x33f   : > { %16644 = vmatprep.mubr.bf16.mxu1 %v20786_v51 }
 0x346   : > { %16645 = vmatmul.mubr.bf16.gmra.mrb[60].mxu1 %v20849_v59 }
 0x347   : > { %16664 = vmatprep.mubr.bf16.mxu1 %v4379_v63  ;;  %v4361_v63 = vld [vmem:[#allocation2 + $0x108] sm:$0xff] }
 0x348   : > { %v20872_v22 = vpack.c.bf16 %v4362_v57, %v4361_v63 }
 0x34e   : > { %16665 = vmatmul.mubr.bf16.vlgmr.msra.gmra.mrb[32].mxu1 %v20852_v1 }
 0x34f   : > { %16668 = vmatprep.mubr.bf16.mxu1 %v20854_v12  ;;  %16697 = vmatpush3.bf16.msra.mxu1 %v19673_v7  ;;  %v19678_v7 = vld [vmem:[#allocation6 + $0x3a8] sm:$0xff]  }
 0x350   : > { %16698 = vmatprep.subr.bf16.mxu1 %v19674_v41 }
 0x353   : > { %16699 = vmatpush3.bf16.msra.mxu1 %v19674_v41  ;;  %v4366_v41 = vld [vmem:[#allocation2 + $0x150] sm:$0xff] }
 0x354   : > { %16700 = vmatprep.subr.bf16.mxu1 %v19675_v13 }
 0x356   : > { %16669 = vmatmul.mubr.bf16.gmra.mrb[36].mxu1 %v20858_v23 }
 0x357   : > { %16672 = vmatprep.mubr.bf16.mxu1 %v20860_v43  ;;  %16701 = vmatpush3.bf16.msra.mxu1 %v19675_v13  ;;  %v4365_v13 = vld [vmem:[#allocation2 + $0x148] sm:$0xff] }
 0x358   : > { %16702 = vmatprep.subr.bf16.mxu1 %v19676_v15  ;;  %v20877_v55 = vpack.c.bf16 %v4366_v41, %v4365_v13  ;;  %v5574_v41 = vld [vmem:[#allocation2 + $0x71] sm:$0xff]  ;;  %v5575_v13 = vld [vmem:[#allocation2 + $0x89] sm:$0xff] }
 0x35b   : > { %16703 = vmatpush3.bf16.msra.mxu1 %v19676_v15  ;;  %v5285_v15 = vld [vmem:[#allocation2 + $0x188] sm:$0xff] }
 0x35c   : > { %16704 = vmatprep.subr.bf16.mxu1 %v19677_v46 }
 0x35e   : > { %16673 = vmatmul.mubr.bf16.gmra.mrb[40].mxu1 %v20864_v42 }
 0x35f   : > { %16676 = vmatprep.mubr.bf16.mxu1 %v20866_v53  ;;  %16705 = vmatpush3.bf16.msra.mxu1 %v19677_v46  ;;  %v5288_v46 = vld [vmem:[#allocation2 + $0x1b0] sm:$0xff] }
 0x360   : > { %16706 = vmatprep.subr.bf16.mxu1 %v19678_v7  ;;  %v5308_v52 = vpack.c.bf16 %v5288_v46, %v5287_v47 }
 0x363   : > { %16707 = vmatpush3.bf16.msra.mxu1 %v19678_v7  ;;  %v5292_v7 = vld [vmem:[#allocation2 + $0x1f0] sm:$0xff] }
 0x364   : > { %16708 = vmatprep.subr.bf16.mxu1 %v19679_v29 }
 0x366   : > { %16677 = vmatmul.mubr.bf16.gmra.mrb[44].mxu1 %v20872_v22 }
 0x367   : > { %16680 = vmatprep.mubr.bf16.mxu1 %v4387_v9  ;;  %16709 = vmatpush3.bf16.msra.mxu1 %v19679_v29  ;;  %v5291_v29 = vld [vmem:[#allocation2 + $0x1e8] sm:$0xff] }
 0x368   : > { %16710 = vmatprep.subr.bf16.mxu1 %v19680_v5  ;;  %v5310_v57 = vpack.c.bf16 %v5292_v7, %v5291_v29 }
 0x36b   : > { %16711 = vmatpush3.bf16.msra.mxu1 %v19680_v5  ;;  %v5572_v5 = vld [vmem:[#allocation2 + $0x51] sm:$0xff] }
 0x36c   : > { %16744 = vmatprep.subr.bf16.mxu1 %v19681_v39 }
 0x36e   : > { %16681 = vmatmul.mubr.bf16.gmra.mrb[48].mxu1 %v20877_v55 }
 0x36f   : > { %16684 = vmatprep.mubr.bf16.mxu1 %v20720_v0  ;;  %v19683_v0 = vld [vmem:[#allocation6 + $0x3d0] sm:$0xff]  }
 0x376   : > { %16685 = vmatmul.mubr.bf16.gmra.mrb[52].mxu1 %v20718_v45  ;;  %v19684_v45 = vld [vmem:[#allocation6 + $0x3d8] sm:$0xff]  }
 0x377   : > { %16688 = vmatprep.mubr.bf16.mxu1 %v20730_v30  ;;  %v19686_v30 = vld [vmem:[#allocation6 + $0x3e8] sm:$0xff]  }
 0x37e   : > { %16689 = vmatmul.mubr.bf16.gmra.mrb[56].mxu1 %v20728_v62  ;;  %v19685_v62 = vld [vmem:[#allocation6 + $0x3e0] sm:$0xff]  }
 0x37f   : > { %16692 = vmatprep.mubr.bf16.mxu1 %v20740_v26  ;;  %v19688_v26 = vld [vmem:[#allocation6 + $0x3f8] sm:$0xff]  }
 0x386   : > { %16693 = vmatmul.mubr.bf16.gmra.mrb[60].mxu1 %v20738_v36  ;;  %v19687_v36 = vld [vmem:[#allocation6 + $0x3f0] sm:$0xff]  }
 0x387   : > { %16712 = vmatprep.mubr.bf16.mxu1 %v20789_v32  ;;  %v19689_v32 = vld [vmem:[#allocation6 + $0x400] sm:$0xff]  }
 0x38e   : > { %16713 = vmatmul.mubr.bf16.vlgmr.msra.gmra.mrb[32].mxu1 %v20791_v58  ;;  %v19930_v58 = vld [vmem:[#allocation2 + $0x8] sm:$0xff] }
 0x38f   : > { %16716 = vmatprep.mubr.bf16.mxu1 %v20795_v3  ;;  %16745 = vmatpush3.bf16.msra.mxu1 %v19681_v39  ;;  %v20901_v3 = vpack.c.bf16 %v19930_v58, %v19930_v58  ;;  %v5573_v39 = vld [vmem:[#allocation2 + $0x69] sm:$0xff] }
 0x390   : > { %16746 = vmatprep.subr.bf16.mxu1 %v19682_v11  ;;  %v5581_v58 = vld [vmem:[#allocation2 + $0xe9] sm:$0xff] }
 0x391   : > { %16904 = vmatprep.mubr.bf16.mxu0 %v20901_v3 }
 0x393   : > { %16747 = vmatpush3.bf16.msra.mxu1 %v19682_v11  ;;  %v5604_v11 = vpack.c.bf16 %v5574_v41, %v5573_v39 }
 0x394   : > { %16748 = vmatprep.subr.bf16.mxu1 %v19683_v0 }
 0x396   : > { %16717 = vmatmul.mubr.bf16.gmra.mrb[36].mxu1 %v20797_v17  ;;  %v4683_v17 = vld [vmem:[#allocation2 + $0x209] sm:$0xff] }
 0x397   : > { %16720 = vmatprep.mubr.bf16.mxu1 %v20801_v48  ;;  %16749 = vmatpush3.bf16.msra.mxu1 %v19683_v0  ;;  %v4684_v48 = vld [vmem:[#allocation2 + $0x211] sm:$0xff] }
 0x398   : > { %16750 = vmatprep.subr.bf16.mxu1 %v19684_v45 }
 0x39b   : > { %16751 = vmatpush3.bf16.msra.mxu1 %v19684_v45  ;;  %v5577_v45 = vld [vmem:[#allocation2 + $0xa9] sm:$0xff] }
 0x39c   : > { %16752 = vmatprep.subr.bf16.mxu1 %v19685_v62 }
 0x39e   : > { %16721 = vmatmul.mubr.bf16.gmra.mrb[40].mxu1 %v20803_v50  ;;  %v20904_v50 = vpack.c.bf16 %v4684_v48, %v4683_v17  ;;  %v5582_v17 = vld [vmem:[#allocation2 + $0xf1] sm:$0xff] }
 0x39f   : > { %16724 = vmatprep.mubr.bf16.mxu1 %v20807_v4  ;;  %16753 = vmatpush3.bf16.msra.mxu1 %v19685_v62  ;;  %v19690_v4 = vld [vmem:[#allocation6 + $0x408] sm:$0xff]   ;;  %v5578_v62 = vld [vmem:[#allocation2 + $0xb1] sm:$0xff] }
 0x3a0   : > { %16754 = vmatprep.subr.bf16.mxu1 %v19686_v30  ;;  %v5584_v48 = vld [vmem:[#allocation2 + $0x111] sm:$0xff] }
 0x3a3   : > { %16755 = vmatpush3.bf16.msra.mxu1 %v19686_v30  ;;  %v5579_v30 = vld [vmem:[#allocation2 + $0xc9] sm:$0xff] }
 0x3a4   : > { %16756 = vmatprep.subr.bf16.mxu1 %v19687_v36 }
 0x3a6   : > { %16725 = vmatmul.mubr.bf16.gmra.mrb[44].mxu1 %v20809_v61  ;;  %v19691_v61 = vld [vmem:[#allocation6 + $0x410] sm:$0xff]  }
 0x3a7   : > { %16728 = vmatprep.mubr.bf16.mxu1 %v20813_v16  ;;  %16757 = vmatpush3.bf16.msra.mxu1 %v19687_v36  ;;  %v19692_v16 = vld [vmem:[#allocation6 + $0x418] sm:$0xff]  }
 0x3a8   : > { %16758 = vmatprep.subr.bf16.mxu1 %v19688_v26  ;;  %v5580_v36 = vld [vmem:[#allocation2 + $0xd1] sm:$0xff] }
 0x3ab   : > { %16759 = vmatpush3.bf16.msra.mxu1 %v19688_v26  ;;  %v5606_v26 = vpack.c.bf16 %v5578_v62, %v5577_v45  ;;  %v19715_v62 = vld [vmem:[#allocation6 + $0x490] sm:$0xff]  }
 0x3ac   : > { %16792 = vmatprep.subr.bf16.mxu1 %v19689_v32 }
 0x3ae   : > { %16729 = vmatmul.mubr.bf16.gmra.mrb[48].mxu1 %v20815_v21  ;;  %v19693_v21 = vld [vmem:[#allocation6 + $0x420] sm:$0xff]  }
 0x3af   : > { %16732 = vmatprep.mubr.bf16.mxu1 %v20819_v38  ;;  %v19700_v38 = vld [vmem:[#allocation6 + $0x458] sm:$0xff]  }
 0x3b6   : > { %16733 = vmatmul.mubr.bf16.gmra.mrb[52].mxu1 %v20821_v27  ;;  %v19710_v27 = vld [vmem:[#allocation6 + $0x4e8] sm:$0xff]  }
 0x3b7   : > { %16736 = vmatprep.mubr.bf16.mxu1 %v20825_v6  ;;  %v19701_v6 = vld [vmem:[#allocation6 + $0x460] sm:$0xff]  }
 0x3be   : > { %16737 = vmatmul.mubr.bf16.gmra.mrb[56].mxu1 %v20827_v24  ;;  %v19702_v24 = vld [vmem:[#allocation6 + $0x468] sm:$0xff]  }
 0x3bf   : > { %16740 = vmatprep.mubr.bf16.mxu1 %v20831_v35  ;;  %v19703_v35 = vld [vmem:[#allocation6 + $0x470] sm:$0xff]  }
 0x3c6   : > { %16741 = vmatmul.mubr.bf16.gmra.mrb[60].mxu1 %v20904_v50 }
 0x3c7   : > { %16760 = vmatprep.mubr.bf16.mxu1 %v20745_v40  ;;  %v19694_v40 = vld [vmem:[#allocation6 + $0x428] sm:$0xff]  }
 0x3ce   : > { %16761 = vmatmul.mubr.bf16.vlgmr.msra.gmra.mrb[32].mxu1 %v20750_v25  ;;  %v19695_v25 = vld [vmem:[#allocation6 + $0x430] sm:$0xff]  }
 0x3cf   : > { %16764 = vmatprep.mubr.bf16.mxu1 %v20752_v34  ;;  %16793 = vmatpush3.bf16.msra.mxu1 %v19689_v32  ;;  %v19696_v34 = vld [vmem:[#allocation6 + $0x438] sm:$0xff]   ;;  %v5607_v32 = vpack.c.bf16 %v5580_v36, %v5579_v30 }
 0x3d0   : > { %16794 = vmatprep.subr.bf16.mxu1 %v19690_v4 }
 0x3d3   : > { %16795 = vmatpush3.bf16.msra.mxu1 %v19690_v4  ;;  %v5608_v4 = vpack.c.bf16 %v5582_v17, %v5581_v58  ;;  %v19716_v17 = vld [vmem:[#allocation6 + $0x498] sm:$0xff]  }
 0x3d4   : > { %16796 = vmatprep.subr.bf16.mxu1 %v19691_v61 }
 0x3d6   : > { %16765 = vmatmul.mubr.bf16.gmra.mrb[36].mxu1 %v20756_v31  ;;  %v19697_v31 = vld [vmem:[#allocation6 + $0x440] sm:$0xff]  }
 0x3d7   : > { %16768 = vmatprep.mubr.bf16.mxu1 %v20758_v33  ;;  %16797 = vmatpush3.bf16.msra.mxu1 %v19691_v61  ;;  %v4989_v33 = vld [vmem:[#allocation2 + $0x227] sm:$0xff] }
 0x3d8   : > { %16798 = vmatprep.subr.bf16.mxu1 %v19692_v16 }
 0x3db   : > { %16799 = vmatpush3.bf16.msra.mxu1 %v19692_v16  ;;  %v5585_v16 = vld [vmem:[#allocation2 + $0x129] sm:$0xff] }
 0x3dc   : > { %16800 = vmatprep.subr.bf16.mxu1 %v19693_v21 }
 0x3de   : > { %16769 = vmatmul.mubr.bf16.gmra.mrb[40].mxu1 %v20762_v49  ;;  %v4990_v49 = vld [vmem:[#allocation2 + $0x22f] sm:$0xff] }
 0x3df   : > { %16772 = vmatprep.mubr.bf16.mxu1 %v20764_v18  ;;  %16801 = vmatpush3.bf16.msra.mxu1 %v19693_v21  ;;  %v5006_v18 = vpack.c.bf16 %v4990_v49, %v4989_v33  ;;  %v5586_v21 = vld [vmem:[#allocation2 + $0x131] sm:$0xff]  ;;  %v5589_v33 = vld [vmem:[#allocation2 + $0x169] sm:$0xff] }
 0x3e0   : > { %16802 = vmatprep.subr.bf16.mxu1 %v19694_v40  ;;  %v5590_v49 = vld [vmem:[#allocation2 + $0x171] sm:$0xff] }
 0x3e3   : > { %16803 = vmatpush3.bf16.msra.mxu1 %v19694_v40  ;;  %v5587_v40 = vld [vmem:[#allocation2 + $0x149] sm:$0xff] }
 0x3e4   : > { %16804 = vmatprep.subr.bf16.mxu1 %v19695_v25 }
 0x3e6   : > { %16773 = vmatmul.mubr.bf16.gmra.mrb[44].mxu1 %v20768_v60  ;;  %v19705_v60 = vld [vmem:[#allocation6 + $0x4c0] sm:$0xff]  }
 0x3e7   : > { %16776 = vmatprep.mubr.bf16.mxu1 %v20770_v8  ;;  %16805 = vmatpush3.bf16.msra.mxu1 %v19695_v25  ;;  %v19706_v8 = vld [vmem:[#allocation6 + $0x4c8] sm:$0xff]   ;;  %v5588_v25 = vld [vmem:[#allocation2 + $0x151] sm:$0xff] }
 0x3e8   : > { %16806 = vmatprep.subr.bf16.mxu1 %v19696_v34  ;;  %16888 = vmatprep.subr.bf16.mxu0 %v19705_v60 }
 0x3e9   : > { %16889 = vmatpush3.bf16.msra.mxu0 %v19705_v60  ;;  %v5592_v60 = vld [vmem:[#allocation2 + $0x191] sm:$0xff] }
 0x3ea   : > { %16890 = vmatprep.subr.bf16.mxu0 %v19706_v8 }
 0x3eb   : > { %16807 = vmatpush3.bf16.msra.mxu1 %v19696_v34  ;;  %v5610_v34 = vpack.c.bf16 %v5586_v21, %v5585_v16 }
 0x3ec   : > { %16840 = vmatprep.subr.bf16.mxu1 %v19697_v31 }
 0x3ed   : > { %16891 = vmatpush3.bf16.msra.mxu0 %v19706_v8  ;;  %v5612_v8 = vpack.c.bf16 %v5590_v49, %v5589_v33 }
 0x3ee   : > { %16777 = vmatmul.mubr.bf16.gmra.mrb[48].mxu1 %v20774_v20  ;;  %v19707_v20 = vld [vmem:[#allocation6 + $0x4d0] sm:$0xff]  }
 0x3ef   : > { %16780 = vmatprep.mubr.bf16.mxu1 %v20776_v37  ;;  %v19698_v37 = vld [vmem:[#allocation6 + $0x448] sm:$0xff]   ;;  %16892 = vmatprep.subr.bf16.mxu0 %v19707_v20 }
 0x3f1   : > { %16893 = vmatpush3.bf16.msra.mxu0 %v19707_v20 }
 0x3f6   : > { %16781 = vmatmul.mubr.bf16.gmra.mrb[52].mxu1 %v20780_v44  ;;  %v19708_v44 = vld [vmem:[#allocation6 + $0x4d8] sm:$0xff]  }
 0x3f7   : > { %16784 = vmatprep.mubr.bf16.mxu1 %v20782_v10  ;;  %v19699_v10 = vld [vmem:[#allocation6 + $0x450] sm:$0xff]   ;;  %16894 = vmatprep.subr.bf16.mxu0 %v19708_v44 }
 0x3f8   : > { %16895 = vmatpush3.bf16.msra.mxu0 %v19708_v44  ;;  %v5594_v44 = vld [vmem:[#allocation2 + $0x1b1] sm:$0xff] }
 0x3fe   : > { %16785 = vmatmul.mubr.bf16.gmra.mrb[56].mxu1 %v20786_v51  ;;  %v19709_v51 = vld [vmem:[#allocation6 + $0x4e0] sm:$0xff]  }
 0x3ff   : > { %16788 = vmatprep.mubr.bf16.mxu1 %v20849_v59  ;;  %16896 = vmatprep.subr.bf16.mxu0 %v19709_v51  ;;  %v5280_v59 = vld [vmem:[#allocation2 + $0x130] sm:$0xff] }
 0x400   : > { %16897 = vmatpush3.bf16.msra.mxu0 %v19709_v51  ;;  %v5596_v51 = vld [vmem:[#allocation2 + $0x1d1] sm:$0xff] }
 0x401   : > { %16898 = vmatprep.subr.bf16.mxu0 %v19710_v27 }
 0x404   : > { %16899 = vmatpush3.bf16.msra.mxu0 %v19710_v27 }
 0x406   : > { %16789 = vmatmul.mubr.bf16.gmra.mrb[60].mxu1 %v5006_v18  ;;  %v5591_v18 = vld [vmem:[#allocation2 + $0x189] sm:$0xff] }
 0x407   : > { %16808 = vmatprep.mubr.bf16.mxu1 %v20852_v1  ;;  %v5304_v1 = vpack.c.bf16 %v5280_v59, %v20870_v19  ;;  %v5293_v19 = vld [vmem:[#allocation2 + $0x208] sm:$0xff]  ;;  %v5613_v20 = vpack.c.bf16 %v5592_v60, %v5591_v18 }
 0x408   : > { %v5601_v59 = vld [vmem:[#allocation2 + $0x229] sm:$0xff] }
 0x40e   : > { %16809 = vmatmul.mubr.bf16.vlgmr.msra.gmra.mrb[32].mxu1 %v20854_v12  ;;  %v19704_v12 = vld [vmem:[#allocation6 + $0x478] sm:$0xff]  }
 0x40f   : > { %16812 = vmatprep.mubr.bf16.mxu1 %v20858_v23  ;;  %16841 = vmatpush3.bf16.msra.mxu1 %v19697_v31  ;;  %v5283_v23 = vld [vmem:[#allocation2 + $0x168] sm:$0xff]  ;;  %v5611_v31 = vpack.c.bf16 %v5588_v25, %v5587_v40 }
 0x410   : > { %16842 = vmatprep.subr.bf16.mxu1 %v19698_v37  ;;  %v5306_v28 = vpack.c.bf16 %v5284_v56, %v5283_v23  ;;  %v19711_v56 = vld [vmem:[#allocation6 + $0x4f0] sm:$0xff]   ;;  %v19713_v23 = vld [vmem:[#allocation6 + $0x480] sm:$0xff]  }
 0x411   : > { %16900 = vmatprep.subr.bf16.mxu0 %v19711_v56 }
 0x412   : > { %16901 = vmatpush3.bf16.msra.mxu0 %v19711_v56 }
 0x413   : > { %16843 = vmatpush3.bf16.msra.mxu1 %v19698_v37  ;;  %v5593_v37 = vld [vmem:[#allocation2 + $0x1a9] sm:$0xff] }
 0x414   : > { %16844 = vmatprep.subr.bf16.mxu1 %v19699_v10 }
 0x416   : > { %16813 = vmatmul.mubr.bf16.gmra.mrb[36].mxu1 %v20860_v43  ;;  %v5307_v43 = vpack.c.bf16 %v5286_v14, %v5285_v15  ;;  %v19712_v14 = vld [vmem:[#allocation6 + $0x4f8] sm:$0xff]  }
 0x417   : > { %16816 = vmatprep.mubr.bf16.mxu1 %v20864_v42  ;;  %16845 = vmatpush3.bf16.msra.mxu1 %v19699_v10  ;;  %v5289_v42 = vld [vmem:[#allocation2 + $0x1c8] sm:$0xff] }
 0x418   : > { %16846 = vmatprep.subr.bf16.mxu1 %v19700_v38  ;;  %v5309_v2 = vpack.c.bf16 %v5290_v54, %v5289_v42  ;;  %v5595_v10 = vld [vmem:[#allocation2 + $0x1c9] sm:$0xff]  ;;  %16902 = vmatprep.subr.bf16.mxu0 %v19712_v14 }
 0x419   : > { %v5615_v27 = vpack.c.bf16 %v5596_v51, %v5595_v10  ;;  %16903 = vmatpush3.bf16.msra.mxu0 %v19712_v14 }
 0x41a   : > { %16936 = vmatprep.subr.bf16.mxu0 %v19713_v23 }
 0x41b   : > { %16847 = vmatpush3.bf16.msra.mxu1 %v19700_v38  ;;  %v5614_v38 = vpack.c.bf16 %v5594_v44, %v5593_v37 }
 0x41c   : > { %16848 = vmatprep.subr.bf16.mxu1 %v19701_v6 }
 0x41e   : > { %16817 = vmatmul.mubr.bf16.gmra.mrb[40].mxu1 %v20866_v53  ;;  %v5294_v53 = vld [vmem:[#allocation2 + $0x210] sm:$0xff] }
 0x41f   : > { %16820 = vmatprep.mubr.bf16.mxu1 %v20872_v22  ;;  %16849 = vmatpush3.bf16.msra.mxu1 %v19701_v6  ;;  %v5311_v63 = vpack.c.bf16 %v5294_v53, %v5293_v19  ;;  %v5571_v22 = vld [vmem:[#allocation2 + $0x49] sm:$0xff] }
 0x420   : > { %16850 = vmatprep.subr.bf16.mxu1 %v19702_v24  ;;  %v5603_v9 = vpack.c.bf16 %v5572_v5, %v5571_v22  ;;  %v5597_v6 = vld [vmem:[#allocation2 + $0x1e9] sm:$0xff] }
 0x421   : > { %v19714_v22 = vld [vmem:[#allocation6 + $0x488] sm:$0xff]  }
 0x423   : > { %16851 = vmatpush3.bf16.msra.mxu1 %v19702_v24  ;;  %v5598_v24 = vld [vmem:[#allocation2 + $0x1f1] sm:$0xff] }
 0x424   : > { %16852 = vmatprep.subr.bf16.mxu1 %v19703_v35 }
 0x426   : > { %16821 = vmatmul.mubr.bf16.gmra.mrb[44].mxu1 %v5304_v1  ;;  %v5602_v1 = vld [vmem:[#allocation2 + $0x231] sm:$0xff] }
 0x427   : > { %16824 = vmatprep.mubr.bf16.mxu1 %v20877_v55  ;;  %16853 = vmatpush3.bf16.msra.mxu1 %v19703_v35  ;;  %v5576_v55 = vld [vmem:[#allocation2 + $0x91] sm:$0xff]  ;;  %v5616_v35 = vpack.c.bf16 %v5598_v24, %v5597_v6 }
 0x428   : > { %16854 = vmatprep.subr.bf16.mxu1 %v19704_v12  ;;  %v5605_v0 = vpack.c.bf16 %v5576_v55, %v5575_v13 }
 0x42b   : > { %16855 = vmatpush3.bf16.msra.mxu1 %v19704_v12  ;;  %v5618_v12 = vpack.c.bf16 %v5602_v1, %v5601_v59  ;;  %v19719_v59 = vld [vmem:[#allocation6 + $0x4b0] sm:$0xff]  }
 0x42e   : > { %16825 = vmatmul.mubr.bf16.gmra.mrb[48].mxu1 %v5306_v28  ;;  %v20933_v28 = vld [vmem:[#allocation8 + $0x1] ss:$0 sm:$0xff] }
 0x42f   : > { %16828 = vmatprep.mubr.bf16.mxu1 %v5307_v43 }
 0x436   : > { %16829 = vmatmul.mubr.bf16.gmra.mrb[52].mxu1 %v5308_v52 }
 0x437   : > { %16832 = vmatprep.mubr.bf16.mxu1 %v5309_v2 }
 0x43e   : > { %16833 = vmatmul.mubr.bf16.gmra.mrb[56].mxu1 %v5310_v57 }
 0x43f   : > { %16836 = vmatprep.mubr.bf16.mxu1 %v5311_v63 }
 0x446   : > { %16837 = vmatmul.mubr.bf16.gmra.mrb[60].mxu1 %v20901_v3  ;;  %v5583_v3 = vld [vmem:[#allocation2 + $0x109] sm:$0xff] }
 0x447   : > { %16856 = vmatprep.mubr.bf16.mxu1 %v5603_v9  ;;  %v5609_v61 = vpack.c.bf16 %v5584_v48, %v5583_v3 }
 0x44e   : > { %16857 = vmatmul.mubr.bf16.vlgmr.msra.gmra.mrb[32].mxu1 %v5604_v11 }
 0x44f   : > { %16860 = vmatprep.mubr.bf16.mxu1 %v5605_v0 }
 0x456   : > { %16861 = vmatmul.mubr.bf16.gmra.mrb[36].mxu1 %v5606_v26 }
 0x457   : > { %16864 = vmatprep.mubr.bf16.mxu1 %v5607_v32 }
 0x45e   : > { %16865 = vmatmul.mubr.bf16.gmra.mrb[40].mxu1 %v5608_v4 }
 0x45f   : > { %16868 = vmatprep.mubr.bf16.mxu1 %v5609_v61 }
 0x466   : > { %16869 = vmatmul.mubr.bf16.gmra.mrb[44].mxu1 %v5610_v34 }
 0x467   : > { %16872 = vmatprep.mubr.bf16.mxu1 %v5611_v31  ;;  %v19717_v31 = vld [vmem:[#allocation6 + $0x4a0] sm:$0xff]  }
 0x46e   : > { %16873 = vmatmul.mubr.bf16.gmra.mrb[48].mxu1 %v5612_v8 }
 0x46f   : > { %16876 = vmatprep.mubr.bf16.mxu1 %v5613_v20  ;;  %v19718_v20 = vld [vmem:[#allocation6 + $0x4a8] sm:$0xff]  }
 0x476   : > { %16877 = vmatmul.mubr.bf16.gmra.mrb[52].mxu1 %v5614_v38 }
 0x477   : > { %16880 = vmatprep.mubr.bf16.mxu1 %v5615_v27 }
 0x47e   : > { %16881 = vmatmul.mubr.bf16.gmra.mrb[56].mxu1 %v5616_v35 }
 0x47f   : > { %16884 = vmatprep.mubr.bf16.mxu1 %v20904_v50 }
 0x486   : > { %16885 = vmatmul.mubr.bf16.gmra.mrb[60].mxu1 %v5618_v12 }
 0x521   : > { %v16858_v15 = vpop.f32.mrb[32].mxu1 }
 0x522   : > { %v5887_v43 = vadd.f32 %v16858_v15, %v20933_v28  ;;  %v5718_v46 = vpop.f32.mrb[33].mxu1  ;;  %v19720_v15 = vld [vmem:[#allocation6 + $0x4b8] sm:$0xff]  }
 0x523   : > { %v5885_v50 = vadd.f32 %v20933_v28, %v5718_v46  ;;  %v16859_v54 = vpop.f32.mrb[34].mxu1 }
 0x524   : > { %v5919_v47 = vmax.f32 %v5887_v43, 0.0  ;;  %v5888_v52 = vadd.f32 %v16859_v54, %v20933_v28  ;;  %v5721_v42 = vpop.f32.mrb[35].mxu1 }
 0x525   : > { %v5917_v2 = vmax.f32 %v5885_v50, 0.0  ;;  %v5886_v7 = vadd.f32 %v20933_v28, %v5721_v42 }
 0x526   : > { %5951 = vst [vmem:[#allocation2 + $0x48] sm:$0xff] %v5919_v47  ;;  %v5920_v53 = vmax.f32 %v5888_v52, 0.0 }
 0x527   : > { %5949 = vst [vmem:[#allocation2 + $0x28] sm:$0xff] %v5917_v2  ;;  %v5918_v29 = vmax.f32 %v5886_v7, 0.0 }
 0x528   : > { %5952 = vst [vmem:[#allocation2 + $0x50] sm:$0xff] %v5920_v53  ;;  %v6080_v57 = vpack.c.bf16 %v5920_v53, %v5919_v47  ;;  %v20966_v53 = vld [vmem:[#allocation6 + $0x500] sm:$0xff]  }
 0x529   : > { %5950 = vst [vmem:[#allocation2 + $0x30] sm:$0xff] %v5918_v29  ;;  %v16862_v19 = vpop.f32.mrb[36].mxu1  ;;  %v6079_v63 = vpack.c.bf16 %v5918_v29, %v5917_v2 }
 0x52a   : > { %v5891_v5 = vadd.f32 %v16862_v19, %v20933_v28  ;;  %v5734_v9 = vpop.f32.mrb[37].mxu1 }
 0x52b   : > { %v5889_v39 = vadd.f32 %v20933_v28, %v5734_v9  ;;  %v16863_v41 = vpop.f32.mrb[38].mxu1  ;;  %16905 = vmatmul.mubr.bf16.vlgmr.msra.gmra.mrb[32].mxu0 %v6079_v63 }
 0x52c   : > { %v5923_v13 = vmax.f32 %v5891_v5, 0.0  ;;  %v5892_v55 = vadd.f32 %v16863_v41, %v20933_v28  ;;  %v5737_v11 = vpop.f32.mrb[39].mxu1  ;;  %16908 = vmatprep.mubr.bf16.mxu0 %v6080_v57  ;;  %16937 = vmatpush3.bf16.msra.mxu0 %v19713_v23 }
 0x52d   : > { %v5921_v0 = vmax.f32 %v5889_v39, 0.0  ;;  %v5890_v45 = vadd.f32 %v20933_v28, %v5737_v11  ;;  %16938 = vmatprep.subr.bf16.mxu0 %v19714_v22 }
 0x52e   : > { %5955 = vst [vmem:[#allocation2 + $0x88] sm:$0xff] %v5923_v13  ;;  %v5924_v30 = vmax.f32 %v5892_v55, 0.0 }
 0x52f   : > { %5953 = vst [vmem:[#allocation2 + $0x68] sm:$0xff] %v5921_v0  ;;  %v5922_v36 = vmax.f32 %v5890_v45, 0.0 }
 0x530   : > { %5956 = vst [vmem:[#allocation2 + $0x90] sm:$0xff] %v5924_v30  ;;  %v6082_v26 = vpack.c.bf16 %v5924_v30, %v5923_v13  ;;  %16939 = vmatpush3.bf16.msra.mxu0 %v19714_v22 }
 0x531   : > { %5954 = vst [vmem:[#allocation2 + $0x70] sm:$0xff] %v5922_v36  ;;  %v16866_v32 = vpop.f32.mrb[40].mxu1  ;;  %v6081_v58 = vpack.c.bf16 %v5922_v36, %v5921_v0  ;;  %16940 = vmatprep.subr.bf16.mxu0 %v19715_v62 }
 0x532   : > { %v5895_v3 = vadd.f32 %v16866_v32, %v20933_v28  ;;  %v5750_v48 = vpop.f32.mrb[41].mxu1 }
 0x533   : > { %v5893_v4 = vadd.f32 %v20933_v28, %v5750_v48  ;;  %v16867_v61 = vpop.f32.mrb[42].mxu1  ;;  %16909 = vmatmul.mubr.bf16.gmra.mrb[36].mxu0 %v6081_v58 }
 0x534   : > { %v5927_v16 = vmax.f32 %v5895_v3, 0.0  ;;  %v5896_v21 = vadd.f32 %v16867_v61, %v20933_v28  ;;  %v5753_v40 = vpop.f32.mrb[43].mxu1  ;;  %16912 = vmatprep.mubr.bf16.mxu0 %v6082_v26  ;;  %16941 = vmatpush3.bf16.msra.mxu0 %v19715_v62 }
 0x535   : > { %v5925_v25 = vmax.f32 %v5893_v4, 0.0  ;;  %v5894_v34 = vadd.f32 %v20933_v28, %v5753_v40  ;;  %16942 = vmatprep.subr.bf16.mxu0 %v19716_v17 }
 0x536   : > { %5959 = vst [vmem:[#allocation2 + $0xc8] sm:$0xff] %v5927_v16  ;;  %v5928_v33 = vmax.f32 %v5896_v21, 0.0 }
 0x537   : > { %5957 = vst [vmem:[#allocation2 + $0xa8] sm:$0xff] %v5925_v25  ;;  %v20947_v49 = vmax.f32 %v5894_v34, 0.0 }
 0x538   : > { %5960 = vst [vmem:[#allocation2 + $0xd0] sm:$0xff] %v5928_v33  ;;  %v6084_v18 = vpack.c.bf16 %v5928_v33, %v5927_v16  ;;  %16943 = vmatpush3.bf16.msra.mxu0 %v19716_v17 }
 0x539   : > { %5958 = vst [vmem:[#allocation2 + $0xb0] sm:$0xff] %v20947_v49  ;;  %v16870_v60 = vpop.f32.mrb[44].mxu1  ;;  %v6083_v8 = vpack.c.bf16 %v20947_v49, %v5925_v25  ;;  %16944 = vmatprep.subr.bf16.mxu0 %v19717_v31 }
 0x53a   : > { %v5899_v37 = vadd.f32 %v16870_v60, %v20933_v28  ;;  %v5766_v44 = vpop.f32.mrb[45].mxu1 }
 0x53b   : > { %v5897_v10 = vadd.f32 %v20933_v28, %v5766_v44  ;;  %v16871_v51 = vpop.f32.mrb[46].mxu1  ;;  %16913 = vmatmul.mubr.bf16.gmra.mrb[40].mxu0 %v6083_v8 }
 0x53c   : > { %v5931_v38 = vmax.f32 %v5899_v37, 0.0  ;;  %v5900_v27 = vadd.f32 %v16871_v51, %v20933_v28  ;;  %v5769_v6 = vpop.f32.mrb[47].mxu1  ;;  %16916 = vmatprep.mubr.bf16.mxu0 %v6084_v18  ;;  %16945 = vmatpush3.bf16.msra.mxu0 %v19717_v31 }
 0x53d   : > { %v5929_v24 = vmax.f32 %v5897_v10, 0.0  ;;  %v5898_v35 = vadd.f32 %v20933_v28, %v5769_v6  ;;  %16946 = vmatprep.subr.bf16.mxu0 %v19718_v20  ;;  %v5981_v6 = vld [vmem:[#allocation2 + $0x7] sm:$0xff] }
 0x53e   : > { %5963 = vst [vmem:[#allocation2 + $0x108] sm:$0xff] %v5931_v38  ;;  %v20955_v1 = vmax.f32 %v5900_v27, 0.0 }
 0x53f   : > { %5961 = vst [vmem:[#allocation2 + $0xe8] sm:$0xff] %v5929_v24  ;;  %v5930_v12 = vmax.f32 %v5898_v35, 0.0 }
 0x540   : > { %5964 = vst [vmem:[#allocation2 + $0x110] sm:$0xff] %v20955_v1  ;;  %v6086_v56 = vpack.c.bf16 %v20955_v1, %v5931_v38  ;;  %16947 = vmatpush3.bf16.msra.mxu0 %v19718_v20 }
 0x541   : > { %5962 = vst [vmem:[#allocation2 + $0xf0] sm:$0xff] %v5930_v12  ;;  %v16874_v14 = vpop.f32.mrb[48].mxu1  ;;  %v20959_v23 = vpack.c.bf16 %v5930_v12, %v5929_v24  ;;  %16948 = vmatprep.subr.bf16.mxu0 %v19719_v59  ;;  %v5982_v24 = vld [vmem:[#allocation2 + $0xf] sm:$0xff] }
 0x542   : > { %v5903_v43 = vadd.f32 %v16874_v14, %v20933_v28  ;;  %v5782_v46 = vpop.f32.mrb[49].mxu1  ;;  %v6013_v12 = vpack.c.bf16 %v5982_v24, %v5981_v6 }
 0x543   : > { %v5901_v50 = vadd.f32 %v20933_v28, %v5782_v46  ;;  %v16875_v54 = vpop.f32.mrb[50].mxu1  ;;  %16917 = vmatmul.mubr.bf16.gmra.mrb[44].mxu0 %v20959_v23  ;;  %v5983_v46 = vld [vmem:[#allocation2 + $0x27] sm:$0xff] }
 0x544   : > { %v5935_v47 = vmax.f32 %v5903_v43, 0.0  ;;  %v5904_v52 = vadd.f32 %v16875_v54, %v20933_v28  ;;  %v5785_v42 = vpop.f32.mrb[51].mxu1  ;;  %16920 = vmatprep.mubr.bf16.mxu0 %v6086_v56  ;;  %16949 = vmatpush3.bf16.msra.mxu0 %v19719_v59  ;;  %v5986_v43 = vld [vmem:[#allocation2 + $0x4f] sm:$0xff] }
 0x545   : > { %v5933_v2 = vmax.f32 %v5901_v50, 0.0  ;;  %v5902_v7 = vadd.f32 %v20933_v28, %v5785_v42  ;;  %16950 = vmatprep.subr.bf16.mxu0 %v19720_v15  ;;  %v5985_v50 = vld [vmem:[#allocation2 + $0x47] sm:$0xff]  ;;  %v5988_v42 = vld [vmem:[#allocation2 + $0x6f] sm:$0xff] }
 0x546   : > { %5967 = vst [vmem:[#allocation2 + $0x148] sm:$0xff] %v5935_v47  ;;  %v5936_v29 = vmax.f32 %v5904_v52, 0.0  ;;  %v19722_v54 = vld [vmem:[#allocation6 + $0x508] sm:$0xff]   ;;  %v19723_v52 = vld [vmem:[#allocation6 + $0x510] sm:$0xff]  }
 0x547   : > { %5965 = vst [vmem:[#allocation2 + $0x128] sm:$0xff] %v5933_v2  ;;  %v5934_v57 = vmax.f32 %v5902_v7, 0.0  ;;  %v5987_v7 = vld [vmem:[#allocation2 + $0x67] sm:$0xff] }
 0x548   : > { %5968 = vst [vmem:[#allocation2 + $0x150] sm:$0xff] %v5936_v29  ;;  %v20968_v19 = vpack.c.bf16 %v5936_v29, %v5935_v47  ;;  %16951 = vmatpush3.bf16.msra.mxu0 %v19720_v15  ;;  %v5984_v15 = vld [vmem:[#allocation2 + $0x2f] sm:$0xff]  ;;  %v21006_v47 = vpack.c.bf16 %v5986_v43, %v5985_v50  ;;  %v21011_v29 = vpack.c.bf16 %v5988_v42, %v5987_v7 }
 0x549   : > { %5966 = vst [vmem:[#allocation2 + $0x130] sm:$0xff] %v5934_v57  ;;  %v16878_v63 = vpop.f32.mrb[52].mxu1  ;;  %v20970_v22 = vpack.c.bf16 %v5934_v57, %v5933_v2  ;;  %16984 = vmatprep.subr.bf16.mxu0 %v20966_v53  ;;  %v5990_v2 = vld [vmem:[#allocation2 + $0x8f] sm:$0xff]  ;;  %v5989_v57 = vld [vmem:[#allocation2 + $0x87] sm:$0xff] }
 0x54a   : > { %v5907_v5 = vadd.f32 %v16878_v63, %v20933_v28  ;;  %v5798_v9 = vpop.f32.mrb[53].mxu1  ;;  %v19724_v63 = vld [vmem:[#allocation6 + $0x518] sm:$0xff]   ;;  %v6531_v50 = vld [vmem:[#allocation2 + $0x29] sm:$0xff] }
 0x54b   : > { %v5905_v39 = vadd.f32 %v20933_v28, %v5798_v9  ;;  %v16879_v41 = vpop.f32.mrb[54].mxu1  ;;  %16921 = vmatmul.mubr.bf16.gmra.mrb[48].mxu0 %v20970_v22  ;;  %v5992_v9 = vld [vmem:[#allocation2 + $0xaf] sm:$0xff] }
 0x54c   : > { %v5939_v13 = vmax.f32 %v5907_v5, 0.0  ;;  %v5908_v55 = vadd.f32 %v16879_v41, %v20933_v28  ;;  %v5801_v11 = vpop.f32.mrb[55].mxu1  ;;  %16924 = vmatprep.mubr.bf16.mxu0 %v20968_v19  ;;  %v21013_v5 = vpack.c.bf16 %v5990_v2, %v5989_v57  ;;  %v5991_v41 = vld [vmem:[#allocation2 + $0xa7] sm:$0xff]  ;;  %v6534_v42 = vld [vmem:[#allocation2 + $0x51] sm:$0xff] }
 0x54d   : > { %v5937_v0 = vmax.f32 %v5905_v39, 0.0  ;;  %v5906_v45 = vadd.f32 %v20933_v28, %v5801_v11  ;;  %v5994_v39 = vld [vmem:[#allocation2 + $0xcf] sm:$0xff] }
 0x54e   : > { %5971 = vst [vmem:[#allocation2 + $0x188] sm:$0xff] %v5939_v13  ;;  %v5940_v62 = vmax.f32 %v5908_v55, 0.0  ;;  %v5993_v55 = vld [vmem:[#allocation2 + $0xc7] sm:$0xff] }
 0x54f   : > { %5969 = vst [vmem:[#allocation2 + $0x168] sm:$0xff] %v5937_v0  ;;  %v5938_v30 = vmax.f32 %v5906_v45, 0.0  ;;  %v19726_v11 = vld [vmem:[#allocation6 + $0x528] sm:$0xff]   ;;  %v19727_v45 = vld [vmem:[#allocation6 + $0x530] sm:$0xff]  }
 0x550   : > { %5972 = vst [vmem:[#allocation2 + $0x190] sm:$0xff] %v5940_v62  ;;  %v20979_v36 = vpack.c.bf16 %v5940_v62, %v5939_v13  ;;  %v21017_v13 = vpack.c.bf16 %v5992_v9, %v5991_v41  ;;  %v5996_v62 = vld [vmem:[#allocation2 + $0xef] sm:$0xff] }
 0x551   : > { %5970 = vst [vmem:[#allocation2 + $0x170] sm:$0xff] %v5938_v30  ;;  %v16882_v26 = vpop.f32.mrb[56].mxu1  ;;  %v20981_v32 = vpack.c.bf16 %v5938_v30, %v5937_v0  ;;  %v21019_v0 = vpack.c.bf16 %v5994_v39, %v5993_v55  ;;  %v5998_v30 = vld [vmem:[#allocation2 + $0x10f] sm:$0xff] }
 0x552   : > { %v5911_v58 = vadd.f32 %v16882_v26, %v20933_v28  ;;  %v5814_v17 = vpop.f32.mrb[57].mxu1  ;;  %v5995_v26 = vld [vmem:[#allocation2 + $0xe7] sm:$0xff]  ;;  %v6536_v9 = vld [vmem:[#allocation2 + $0x71] sm:$0xff] }
 0x553   : > { %v5909_v3 = vadd.f32 %v20933_v28, %v5814_v17  ;;  %v16883_v48 = vpop.f32.mrb[58].mxu1  ;;  %16925 = vmatmul.mubr.bf16.gmra.mrb[52].mxu0 %v20981_v32  ;;  %v5997_v17 = vld [vmem:[#allocation2 + $0x107] sm:$0xff]  ;;  %v6538_v41 = vld [vmem:[#allocation2 + $0x91] sm:$0xff] }
 0x554   : > { %v5943_v4 = vmax.f32 %v5911_v58, 0.0  ;;  %v5912_v61 = vadd.f32 %v16883_v48, %v20933_v28  ;;  %v5817_v16 = vpop.f32.mrb[59].mxu1  ;;  %16928 = vmatprep.mubr.bf16.mxu0 %v20979_v36  ;;  %v21023_v58 = vpack.c.bf16 %v5996_v62, %v5995_v26  ;;  %v21025_v48 = vpack.c.bf16 %v5998_v30, %v5997_v17  ;;  %v19730_v7 = vld [vmem:[#allocation6 + $0x548] sm:$0xff]   ;;  %v19733_v62 = vld [vmem:[#allocation6 + $0x560] sm:$0xff]   ;;  %v6540_v26 = vld [vmem:[#allocation2 + $0xb1] sm:$0xff] }
 0x555   : > { %v5941_v21 = vmax.f32 %v5909_v3, 0.0  ;;  %v5910_v40 = vadd.f32 %v20933_v28, %v5817_v16  ;;  %v19728_v3 = vld [vmem:[#allocation6 + $0x538] sm:$0xff]   ;;  %v6002_v16 = vld [vmem:[#allocation2 + $0x14f] sm:$0xff] }
 0x556   : > { %5975 = vst [vmem:[#allocation2 + $0x1c8] sm:$0xff] %v5943_v4  ;;  %v5944_v25 = vmax.f32 %v5912_v61, 0.0  ;;  %v6000_v61 = vld [vmem:[#allocation2 + $0x12f] sm:$0xff] }
 0x557   : > { %5973 = vst [vmem:[#allocation2 + $0x1a8] sm:$0xff] %v5941_v21  ;;  %v5942_v34 = vmax.f32 %v5910_v40, 0.0  ;;  %v6537_v39 = vld [vmem:[#allocation2 + $0x89] sm:$0xff] }
 0x558   : > { %5976 = vst [vmem:[#allocation2 + $0x1d0] sm:$0xff] %v5944_v25  ;;  %v20989_v31 = vpack.c.bf16 %v5944_v25, %v5943_v4  ;;  %v19729_v4 = vld [vmem:[#allocation6 + $0x540] sm:$0xff]   ;;  %v6539_v30 = vld [vmem:[#allocation2 + $0xa9] sm:$0xff] }
 0x559   : > { %5974 = vst [vmem:[#allocation2 + $0x1b0] sm:$0xff] %v5942_v34  ;;  %v16886_v33 = vpop.f32.mrb[60].mxu1  ;;  %v20991_v18 = vpack.c.bf16 %v5942_v34, %v5941_v21  ;;  %v5999_v21 = vld [vmem:[#allocation2 + $0x127] sm:$0xff] }
 0x55a   : > { %v5915_v60 = vadd.f32 %v16886_v33, %v20933_v28  ;;  %v5830_v8 = vpop.f32.mrb[61].mxu1  ;;  %v21029_v40 = vpack.c.bf16 %v6000_v61, %v5999_v21  ;;  %v6001_v25 = vld [vmem:[#allocation2 + $0x147] sm:$0xff]  ;;  %v6004_v33 = vld [vmem:[#allocation2 + $0x16f] sm:$0xff] }
 0x55b   : > { %v5913_v20 = vadd.f32 %v20933_v28, %v5830_v8  ;;  %v16887_v37 = vpop.f32.mrb[62].mxu1  ;;  %16929 = vmatmul.mubr.bf16.gmra.mrb[56].mxu0 %v20991_v18  ;;  %v21031_v34 = vpack.c.bf16 %v6002_v16, %v6001_v25  ;;  %v6003_v8 = vld [vmem:[#allocation2 + $0x167] sm:$0xff]  ;;  %v19735_v21 = vld [vmem:[#allocation6 + $0x570] sm:$0xff]  }
 0x55c   : > { %v5947_v44 = vmax.f32 %v5915_v60, 0.0  ;;  %v5916_v10 = vadd.f32 %v16887_v37, %v20933_v28  ;;  %v5833_v51 = vpop.f32.mrb[63].mxu1  ;;  %16932 = vmatprep.mubr.bf16.mxu0 %v20989_v31  ;;  %v6006_v60 = vld [vmem:[#allocation2 + $0x18f] sm:$0xff]  ;;  %v6005_v37 = vld [vmem:[#allocation2 + $0x187] sm:$0xff] }
 0x55d   : > { %v5945_v38 = vmax.f32 %v5913_v20, 0.0  ;;  %v5914_v27 = vadd.f32 %v20933_v28, %v5833_v51  ;;  %v21004_v28 = vpack.c.bf16 %v5984_v15, %v5983_v46  ;;  %v21035_v20 = vpack.c.bf16 %v6004_v33, %v6003_v8  ;;  %v6009_v6 = vld [vmem:[#allocation2 + $0x1c7] sm:$0xff]  ;;  %v6544_v33 = vld [vmem:[#allocation2 + $0xf1] sm:$0xff] }
 0x55e   : > { %5979 = vst [vmem:[#allocation2 + $0x208] sm:$0xff] %v5947_v44  ;;  %v5948_v35 = vmax.f32 %v5916_v10, 0.0  ;;  %v6541_v17 = vld [vmem:[#allocation2 + $0xc9] sm:$0xff]  ;;  %v6546_v8 = vld [vmem:[#allocation2 + $0x111] sm:$0xff] }
 0x55f   : > { %5977 = vst [vmem:[#allocation2 + $0x1e8] sm:$0xff] %v5945_v38  ;;  %v5946_v59 = vmax.f32 %v5914_v27, 0.0  ;;  %v6010_v51 = vld [vmem:[#allocation2 + $0x1cf] sm:$0xff] }
 0x560   : > { %5980 = vst [vmem:[#allocation2 + $0x210] sm:$0xff] %v5948_v35  ;;  %v20999_v56 = vpack.c.bf16 %v5948_v35, %v5947_v44  ;;  %v21037_v44 = vpack.c.bf16 %v6006_v60, %v6005_v37  ;;  %v6008_v10 = vld [vmem:[#allocation2 + $0x1af] sm:$0xff]  ;;  %v21043_v24 = vpack.c.bf16 %v6010_v51, %v6009_v6 }
 0x561   : > { %5978 = vst [vmem:[#allocation2 + $0x1f0] sm:$0xff] %v5946_v59  ;;  %v21001_v14 = vpack.c.bf16 %v5946_v59, %v5945_v38  ;;  %v6007_v38 = vld [vmem:[#allocation2 + $0x1a7] sm:$0xff]  ;;  %v6530_v59 = vld [vmem:[#allocation2 + $0x11] sm:$0xff] }
 0x562   : > { %v21041_v27 = vpack.c.bf16 %v6008_v10, %v6007_v38  ;;  %v6529_v35 = vld [vmem:[#allocation2 + $0x9] sm:$0xff]  ;;  %v19736_v10 = vld [vmem:[#allocation6 + $0x578] sm:$0xff]   ;;  %v19737_v38 = vld [vmem:[#allocation6 + $0x580] sm:$0xff]  }
 0x563   : > { %16933 = vmatmul.mubr.bf16.gmra.mrb[60].mxu0 %v21001_v14  ;;  %v6561_v43 = vpack.c.bf16 %v6530_v59, %v6529_v35  ;;  %v19734_v61 = vld [vmem:[#allocation6 + $0x568] sm:$0xff]   ;;  %v6548_v35 = vld [vmem:[#allocation2 + $0x131] sm:$0xff] }
 0x564   : > { %16952 = vmatprep.mubr.bf16.mxu0 %v6013_v12  ;;  %v6543_v25 = vld [vmem:[#allocation2 + $0xe9] sm:$0xff] }
 0x565   : > { %v6545_v60 = vld [vmem:[#allocation2 + $0x109] sm:$0xff]  ;;  %v21068_v37 = vpack.c.bf16 %v6544_v33, %v6543_v25  ;;  %v19741_v25 = vld [vmem:[#allocation6 + $0x5a0] sm:$0xff]  }
 0x566   : > { %v6011_v15 = vld [vmem:[#allocation2 + $0x1e7] sm:$0xff]  ;;  %v21070_v51 = vpack.c.bf16 %v6546_v8, %v6545_v60  ;;  %v19743_v33 = vld [vmem:[#allocation6 + $0x5b0] sm:$0xff]   ;;  %v19744_v60 = vld [vmem:[#allocation6 + $0x5b8] sm:$0xff]  }
 0x567   : > { %v6547_v6 = vld [vmem:[#allocation2 + $0x129] sm:$0xff]  ;;  %v19745_v8 = vld [vmem:[#allocation6 + $0x5c0] sm:$0xff]  }
 0x568   : > { %v6012_v12 = vld [vmem:[#allocation2 + $0x1ef] sm:$0xff] }
 0x569   : > { %v21047_v46 = vpack.c.bf16 %v6012_v12, %v6011_v15  ;;  %v6549_v59 = vld [vmem:[#allocation2 + $0x149] sm:$0xff]  ;;  %v6550_v12 = vld [vmem:[#allocation2 + $0x151] sm:$0xff]  ;;  %v21074_v15 = vpack.c.bf16 %v6548_v35, %v6547_v6 }
 0x56a   : > { %v6865_v6 = vld [vmem:[#allocation2 + $0x207] sm:$0xff] }
 0x56b   : > { %16953 = vmatmul.mubr.bf16.vlgmr.msra.gmra.mrb[32].mxu0 %v21004_v28 }
 0x56c   : > { %16956 = vmatprep.mubr.bf16.mxu0 %v21006_v47  ;;  %16985 = vmatpush3.bf16.msra.mxu0 %v20966_v53  ;;  %v19725_v53 = vld [vmem:[#allocation6 + $0x520] sm:$0xff]  }
 0x56d   : > { %16986 = vmatprep.subr.bf16.mxu0 %v19722_v54 }
 0x570   : > { %16987 = vmatpush3.bf16.msra.mxu0 %v19722_v54  ;;  %v6532_v54 = vld [vmem:[#allocation2 + $0x31] sm:$0xff] }
 0x571   : > { %16988 = vmatprep.subr.bf16.mxu0 %v19723_v52  ;;  %v21050_v2 = vpack.c.bf16 %v6532_v54, %v6531_v50  ;;  %v6551_v50 = vld [vmem:[#allocation2 + $0x169] sm:$0xff]  ;;  %v6552_v54 = vld [vmem:[#allocation2 + $0x171] sm:$0xff] }
 0x573   : > { %16957 = vmatmul.mubr.bf16.gmra.mrb[36].mxu0 %v21011_v29 }
 0x574   : > { %16960 = vmatprep.mubr.bf16.mxu0 %v21013_v5  ;;  %16989 = vmatpush3.bf16.msra.mxu0 %v19723_v52  ;;  %v6533_v52 = vld [vmem:[#allocation2 + $0x49] sm:$0xff] }
 0x575   : > { %16990 = vmatprep.subr.bf16.mxu0 %v19724_v63  ;;  %v21052_v57 = vpack.c.bf16 %v6534_v42, %v6533_v52  ;;  %v6553_v52 = vld [vmem:[#allocation2 + $0x189] sm:$0xff]  ;;  %v6554_v42 = vld [vmem:[#allocation2 + $0x191] sm:$0xff] }
 0x578   : > { %16991 = vmatpush3.bf16.msra.mxu0 %v19724_v63  ;;  %v19731_v63 = vld [vmem:[#allocation6 + $0x550] sm:$0xff]  }
 0x579   : > { %16992 = vmatprep.subr.bf16.mxu0 %v19725_v53 }
 0x57b   : > { %16961 = vmatmul.mubr.bf16.gmra.mrb[40].mxu0 %v21017_v13 }
 0x57c   : > { %16964 = vmatprep.mubr.bf16.mxu0 %v21019_v0  ;;  %16993 = vmatpush3.bf16.msra.mxu0 %v19725_v53  ;;  %v6535_v53 = vld [vmem:[#allocation2 + $0x69] sm:$0xff] }
 0x57d   : > { %16994 = vmatprep.subr.bf16.mxu0 %v19726_v11  ;;  %v21056_v55 = vpack.c.bf16 %v6536_v9, %v6535_v53  ;;  %v6555_v53 = vld [vmem:[#allocation2 + $0x1a9] sm:$0xff]  ;;  %v6556_v9 = vld [vmem:[#allocation2 + $0x1b1] sm:$0xff] }
 0x580   : > { %16995 = vmatpush3.bf16.msra.mxu0 %v19726_v11  ;;  %v19732_v11 = vld [vmem:[#allocation6 + $0x558] sm:$0xff]  }
 0x581   : > { %16996 = vmatprep.subr.bf16.mxu0 %v19727_v45 }
 0x583   : > { %16965 = vmatmul.mubr.bf16.gmra.mrb[44].mxu0 %v21023_v58 }
 0x584   : > { %16968 = vmatprep.mubr.bf16.mxu0 %v21025_v48  ;;  %16997 = vmatpush3.bf16.msra.mxu0 %v19727_v45  ;;  %v21058_v45 = vpack.c.bf16 %v6538_v41, %v6537_v39  ;;  %v6557_v39 = vld [vmem:[#allocation2 + $0x1c9] sm:$0xff]  ;;  %v6558_v41 = vld [vmem:[#allocation2 + $0x1d1] sm:$0xff] }
 0x585   : > { %16998 = vmatprep.subr.bf16.mxu0 %v19728_v3 }
 0x588   : > { %16999 = vmatpush3.bf16.msra.mxu0 %v19728_v3  ;;  %v6542_v3 = vld [vmem:[#allocation2 + $0xd1] sm:$0xff] }
 0x589   : > { %17032 = vmatprep.subr.bf16.mxu0 %v19729_v4  ;;  %v21064_v16 = vpack.c.bf16 %v6542_v3, %v6541_v17  ;;  %v19738_v3 = vld [vmem:[#allocation6 + $0x588] sm:$0xff]  }
 0x58b   : > { %16969 = vmatmul.mubr.bf16.gmra.mrb[48].mxu0 %v21029_v40 }
 0x58c   : > { %16972 = vmatprep.mubr.bf16.mxu0 %v21031_v34 }
 0x593   : > { %16973 = vmatmul.mubr.bf16.gmra.mrb[52].mxu0 %v21035_v20 }
 0x594   : > { %16976 = vmatprep.mubr.bf16.mxu0 %v21037_v44 }
 0x59b   : > { %16977 = vmatmul.mubr.bf16.gmra.mrb[56].mxu0 %v21041_v27 }
 0x59c   : > { %16980 = vmatprep.mubr.bf16.mxu0 %v21043_v24 }
 0x5a3   : > { %16981 = vmatmul.mubr.bf16.gmra.mrb[60].mxu0 %v21047_v46 }
 0x5a4   : > { %17000 = vmatprep.mubr.bf16.mxu0 %v6561_v43  ;;  %v21076_v43 = vpack.c.bf16 %v6550_v12, %v6549_v59  ;;  %v7141_v59 = vld [vmem:[#allocation2 + $0x28] sm:$0xff] }
 0x5ab   : > { %17001 = vmatmul.mubr.bf16.vlgmr.msra.gmra.mrb[32].mxu0 %v21050_v2 }
 0x5ac   : > { %17004 = vmatprep.mubr.bf16.mxu0 %v21052_v57  ;;  %17033 = vmatpush3.bf16.msra.mxu0 %v19729_v4  ;;  %v21062_v4 = vpack.c.bf16 %v6540_v26, %v6539_v30  ;;  %v6559_v30 = vld [vmem:[#allocation2 + $0x1e9] sm:$0xff]  ;;  %v6560_v26 = vld [vmem:[#allocation2 + $0x1f1] sm:$0xff] }
 0x5ad   : > { %17034 = vmatprep.subr.bf16.mxu0 %v19730_v7  ;;  %v21092_v17 = vpack.c.bf16 %v6560_v26, %v6559_v30  ;;  %v7148_v30 = vld [vmem:[#allocation2 + $0x90] sm:$0xff]  ;;  %v21119_v26 = vld [vmem:[#allocation2 + $0xa8] sm:$0xff] }
 0x5b0   : > { %17035 = vmatpush3.bf16.msra.mxu0 %v19730_v7  ;;  %v21080_v7 = vpack.c.bf16 %v6552_v54, %v6551_v50  ;;  %v7144_v50 = vld [vmem:[#allocation2 + $0x50] sm:$0xff] }
 0x5b1   : > { %17036 = vmatprep.subr.bf16.mxu0 %v19731_v63  ;;  %v7146_v54 = vld [vmem:[#allocation2 + $0x70] sm:$0xff] }
 0x5b3   : > { %17005 = vmatmul.mubr.bf16.gmra.mrb[36].mxu0 %v21056_v55 }
 0x5b4   : > { %17008 = vmatprep.mubr.bf16.mxu0 %v21058_v45  ;;  %17037 = vmatpush3.bf16.msra.mxu0 %v19731_v63  ;;  %v21082_v63 = vpack.c.bf16 %v6554_v42, %v6553_v52  ;;  %v7143_v52 = vld [vmem:[#allocation2 + $0x48] sm:$0xff] }
 0x5b5   : > { %17038 = vmatprep.subr.bf16.mxu0 %v19732_v11  ;;  %v21113_v42 = vpack.c.bf16 %v7144_v50, %v7143_v52  ;;  %v19774_v50 = vld [vmem:[#allocation6 + $0x6a8] sm:$0xff]   ;;  %v19775_v52 = vld [vmem:[#allocation6 + $0x6b0] sm:$0xff]  }
 0x5b8   : > { %17039 = vmatpush3.bf16.msra.mxu0 %v19732_v11  ;;  %v21086_v11 = vpack.c.bf16 %v6556_v9, %v6555_v53  ;;  %v7145_v53 = vld [vmem:[#allocation2 + $0x68] sm:$0xff] }
 0x5b9   : > { %17040 = vmatprep.subr.bf16.mxu0 %v19733_v62  ;;  %v19746_v9 = vld [vmem:[#allocation6 + $0x5c8] sm:$0xff]  }
 0x5bb   : > { %17009 = vmatmul.mubr.bf16.gmra.mrb[40].mxu0 %v21062_v4 }
 0x5bc   : > { %17012 = vmatprep.mubr.bf16.mxu0 %v21064_v16  ;;  %17041 = vmatpush3.bf16.msra.mxu0 %v19733_v62  ;;  %v21088_v62 = vpack.c.bf16 %v6558_v41, %v6557_v39  ;;  %v21115_v39 = vpack.c.bf16 %v7146_v54, %v7145_v53  ;;  %v19747_v41 = vld [vmem:[#allocation6 + $0x5d0] sm:$0xff]  }
 0x5bd   : > { %17042 = vmatprep.subr.bf16.mxu0 %v19734_v61  ;;  %v8076_v53 = vld [vmem:[#allocation2 + $0x150] sm:$0xff] }
 0x5c0   : > { %17043 = vmatpush3.bf16.msra.mxu0 %v19734_v61  ;;  %v19739_v61 = vld [vmem:[#allocation6 + $0x590] sm:$0xff]  }
 0x5c1   : > { %17044 = vmatprep.subr.bf16.mxu0 %v19735_v21 }
 0x5c3   : > { %17013 = vmatmul.mubr.bf16.gmra.mrb[44].mxu0 %v21068_v37 }
 0x5c4   : > { %17016 = vmatprep.mubr.bf16.mxu0 %v21070_v51  ;;  %17045 = vmatpush3.bf16.msra.mxu0 %v19735_v21  ;;  %v19740_v21 = vld [vmem:[#allocation6 + $0x598] sm:$0xff]  }
 0x5c5   : > { %17046 = vmatprep.subr.bf16.mxu0 %v19736_v10 }
 0x5c8   : > { %17047 = vmatpush3.bf16.msra.mxu0 %v19736_v10  ;;  %v6866_v10 = vld [vmem:[#allocation2 + $0x20f] sm:$0xff] }
 0x5c9   : > { %17080 = vmatprep.subr.bf16.mxu0 %v19737_v38  ;;  %v21110_v35 = vpack.c.bf16 %v6866_v10, %v6865_v6  ;;  %v19750_v10 = vld [vmem:[#allocation6 + $0x5e8] sm:$0xff]  }
 0x5cb   : > { %17017 = vmatmul.mubr.bf16.gmra.mrb[48].mxu0 %v21074_v15 }
 0x5cc   : > { %17020 = vmatprep.mubr.bf16.mxu0 %v21076_v43 }
 0x5d3   : > { %17021 = vmatmul.mubr.bf16.gmra.mrb[52].mxu0 %v21080_v7 }
 0x5d4   : > { %17024 = vmatprep.mubr.bf16.mxu0 %v21082_v63 }
 0x5db   : > { %17025 = vmatmul.mubr.bf16.gmra.mrb[56].mxu0 %v21086_v11 }
 0x5dc   : > { %17028 = vmatprep.mubr.bf16.mxu0 %v21088_v62 }
 0x5e3   : > { %17029 = vmatmul.mubr.bf16.gmra.mrb[60].mxu0 %v21092_v17 }
 0x5e4   : > { %17048 = vmatprep.mubr.bf16.mxu0 %v21004_v28  ;;  %v19742_v28 = vld [vmem:[#allocation6 + $0x5a8] sm:$0xff]  }
 0x5eb   : > { %17049 = vmatmul.mubr.bf16.vlgmr.msra.gmra.mrb[32].mxu0 %v21006_v47 }
 0x5ec   : > { %17052 = vmatprep.mubr.bf16.mxu0 %v21011_v29  ;;  %17081 = vmatpush3.bf16.msra.mxu0 %v19737_v38  ;;  %v7142_v38 = vld [vmem:[#allocation2 + $0x30] sm:$0xff] }
 0x5ed   : > { %17082 = vmatprep.subr.bf16.mxu0 %v19738_v3  ;;  %v7173_v12 = vpack.c.bf16 %v7142_v38, %v7141_v59  ;;  %v21130_v38 = vld [vmem:[#allocation2 + $0x108] sm:$0xff]  ;;  %v19752_v59 = vld [vmem:[#allocation6 + $0x5f8] sm:$0xff]  }
 0x5ee   : > { %v7180_v6 = vpack.c.bf16 %v20955_v1, %v21130_v38  ;;  %v19754_v1 = vld [vmem:[#allocation6 + $0x608] sm:$0xff]  }
 0x5f0   : > { %17083 = vmatpush3.bf16.msra.mxu0 %v19738_v3  ;;  %v7147_v3 = vld [vmem:[#allocation2 + $0x88] sm:$0xff] }
 0x5f1   : > { %17084 = vmatprep.subr.bf16.mxu0 %v19739_v61 }
 0x5f3   : > { %17053 = vmatmul.mubr.bf16.gmra.mrb[36].mxu0 %v21013_v5 }
 0x5f4   : > { %17056 = vmatprep.mubr.bf16.mxu0 %v21017_v13  ;;  %17085 = vmatpush3.bf16.msra.mxu0 %v19739_v61  ;;  %v21121_v61 = vpack.c.bf16 %v7148_v30, %v7147_v3  ;;  %v19776_v30 = vld [vmem:[#allocation6 + $0x6b8] sm:$0xff]   ;;  %v8078_v3 = vld [vmem:[#allocation2 + $0x170] sm:$0xff] }
 0x5f5   : > { %17086 = vmatprep.subr.bf16.mxu0 %v19740_v21 }
 0x5f8   : > { %17087 = vmatpush3.bf16.msra.mxu0 %v19740_v21  ;;  %v19748_v21 = vld [vmem:[#allocation6 + $0x5d8] sm:$0xff]  }
 0x5f9   : > { %17088 = vmatprep.subr.bf16.mxu0 %v19741_v25 }
 0x5fb   : > { %17057 = vmatmul.mubr.bf16.gmra.mrb[40].mxu0 %v21019_v0 }
 0x5fc   : > { %17060 = vmatprep.mubr.bf16.mxu0 %v21023_v58  ;;  %17089 = vmatpush3.bf16.msra.mxu0 %v19741_v25  ;;  %v7177_v25 = vpack.c.bf16 %v20947_v49, %v21119_v26  ;;  %v19751_v49 = vld [vmem:[#allocation6 + $0x5f0] sm:$0xff]  }
 0x5fd   : > { %17090 = vmatprep.subr.bf16.mxu0 %v19742_v28 }
 0x600   : > { %17091 = vmatpush3.bf16.msra.mxu0 %v19742_v28  ;;  %v19749_v28 = vld [vmem:[#allocation6 + $0x5e0] sm:$0xff]  }
 0x601   : > { %17092 = vmatprep.subr.bf16.mxu0 %v19743_v33 }
 0x603   : > { %17061 = vmatmul.mubr.bf16.gmra.mrb[44].mxu0 %v21025_v48 }
 0x604   : > { %17064 = vmatprep.mubr.bf16.mxu0 %v21029_v40  ;;  %17093 = vmatpush3.bf16.msra.mxu0 %v19743_v33  ;;  %v7152_v33 = vld [vmem:[#allocation2 + $0xd0] sm:$0xff] }
 0x605   : > { %17094 = vmatprep.subr.bf16.mxu0 %v19744_v60 }
 0x608   : > { %17095 = vmatpush3.bf16.msra.mxu0 %v19744_v60  ;;  %v7151_v60 = vld [vmem:[#allocation2 + $0xc8] sm:$0xff] }
 0x609   : > { %17128 = vmatprep.subr.bf16.mxu0 %v19745_v8 }
 0x60b   : > { %17065 = vmatmul.mubr.bf16.gmra.mrb[48].mxu0 %v21031_v34 }
 0x60c   : > { %17068 = vmatprep.mubr.bf16.mxu0 %v21035_v20 }
 0x613   : > { %17069 = vmatmul.mubr.bf16.gmra.mrb[52].mxu0 %v21037_v44 }
 0x614   : > { %17072 = vmatprep.mubr.bf16.mxu0 %v21041_v27 }
 0x61b   : > { %17073 = vmatmul.mubr.bf16.gmra.mrb[56].mxu0 %v21043_v24 }
 0x61c   : > { %17076 = vmatprep.mubr.bf16.mxu0 %v21047_v46 }
 0x623   : > { %17077 = vmatmul.mubr.bf16.gmra.mrb[60].mxu0 %v21110_v35 }
 0x624   : > { %17096 = vmatprep.mubr.bf16.mxu0 %v7173_v12  ;;  %v19753_v12 = vld [vmem:[#allocation6 + $0x600] sm:$0xff]  }
 0x62b   : > { %17097 = vmatmul.mubr.bf16.vlgmr.msra.gmra.mrb[32].mxu0 %v21113_v42 }
 0x62c   : > { %17100 = vmatprep.mubr.bf16.mxu0 %v21115_v39  ;;  %17129 = vmatpush3.bf16.msra.mxu0 %v19745_v8  ;;  %v21126_v8 = vpack.c.bf16 %v7152_v33, %v7151_v60  ;;  %v8082_v60 = vld [vmem:[#allocation2 + $0x1b0] sm:$0xff] }
 0x62d   : > { %17130 = vmatprep.subr.bf16.mxu0 %v19746_v9 }
 0x630   : > { %17131 = vmatpush3.bf16.msra.mxu0 %v19746_v9  ;;  %v8073_v9 = vld [vmem:[#allocation2 + $0x128] sm:$0xff] }
 0x631   : > { %17132 = vmatprep.subr.bf16.mxu0 %v19747_v41 }
 0x633   : > { %17101 = vmatmul.mubr.bf16.gmra.mrb[36].mxu0 %v21121_v61 }
 0x634   : > { %17104 = vmatprep.mubr.bf16.mxu0 %v7177_v25  ;;  %17133 = vmatpush3.bf16.msra.mxu0 %v19747_v41  ;;  %v8075_v41 = vld [vmem:[#allocation2 + $0x148] sm:$0xff] }
 0x635   : > { %17134 = vmatprep.subr.bf16.mxu0 %v19748_v21 }
 0x638   : > { %17135 = vmatpush3.bf16.msra.mxu0 %v19748_v21  ;;  %v8077_v21 = vld [vmem:[#allocation2 + $0x168] sm:$0xff] }
 0x639   : > { %17136 = vmatprep.subr.bf16.mxu0 %v19749_v28  ;;  %v8100_v25 = vpack.c.bf16 %v8078_v3, %v8077_v21  ;;  %v19783_v3 = vld [vmem:[#allocation6 + $0x730] sm:$0xff]   ;;  %v19785_v21 = vld [vmem:[#allocation6 + $0x6c0] sm:$0xff]  }
 0x63b   : > { %17105 = vmatmul.mubr.bf16.gmra.mrb[40].mxu0 %v21126_v8 }
 0x63c   : > { %17108 = vmatprep.mubr.bf16.mxu0 %v20959_v23  ;;  %17137 = vmatpush3.bf16.msra.mxu0 %v19749_v28  ;;  %v19755_v23 = vld [vmem:[#allocation6 + $0x610] sm:$0xff]   ;;  %v8079_v28 = vld [vmem:[#allocation2 + $0x188] sm:$0xff] }
 0x63d   : > { %17138 = vmatprep.subr.bf16.mxu0 %v19750_v10 }
 0x640   : > { %17139 = vmatpush3.bf16.msra.mxu0 %v19750_v10  ;;  %v8081_v10 = vld [vmem:[#allocation2 + $0x1a8] sm:$0xff] }
 0x641   : > { %17140 = vmatprep.subr.bf16.mxu0 %v19751_v49 }
 0x643   : > { %17109 = vmatmul.mubr.bf16.gmra.mrb[44].mxu0 %v7180_v6 }
 0x644   : > { %17112 = vmatprep.mubr.bf16.mxu0 %v20970_v22  ;;  %17141 = vmatpush3.bf16.msra.mxu0 %v19751_v49  ;;  %v19757_v22 = vld [vmem:[#allocation6 + $0x620] sm:$0xff]   ;;  %v8102_v49 = vpack.c.bf16 %v8082_v60, %v8081_v10 }
 0x645   : > { %17142 = vmatprep.subr.bf16.mxu0 %v19752_v59 }
 0x648   : > { %17143 = vmatpush3.bf16.msra.mxu0 %v19752_v59  ;;  %v8086_v59 = vld [vmem:[#allocation2 + $0x1f0] sm:$0xff] }
 0x649   : > { %17176 = vmatprep.subr.bf16.mxu0 %v19753_v12 }
 0x64b   : > { %17113 = vmatmul.mubr.bf16.gmra.mrb[48].mxu0 %v20968_v19  ;;  %v19756_v19 = vld [vmem:[#allocation6 + $0x618] sm:$0xff]  }
 0x64c   : > { %17116 = vmatprep.mubr.bf16.mxu0 %v20981_v32  ;;  %v19759_v32 = vld [vmem:[#allocation6 + $0x630] sm:$0xff]  }
 0x653   : > { %17117 = vmatmul.mubr.bf16.gmra.mrb[52].mxu0 %v20979_v36  ;;  %v19758_v36 = vld [vmem:[#allocation6 + $0x628] sm:$0xff]  }
 0x654   : > { %17120 = vmatprep.mubr.bf16.mxu0 %v20991_v18  ;;  %v19761_v18 = vld [vmem:[#allocation6 + $0x640] sm:$0xff]  }
 0x65b   : > { %17121 = vmatmul.mubr.bf16.gmra.mrb[56].mxu0 %v20989_v31  ;;  %v19760_v31 = vld [vmem:[#allocation6 + $0x638] sm:$0xff]  }
 0x65c   : > { %17124 = vmatprep.mubr.bf16.mxu0 %v21001_v14 }
 0x663   : > { %17125 = vmatmul.mubr.bf16.gmra.mrb[60].mxu0 %v20999_v56  ;;  %v19931_v56 = vld [vmem:[#allocation2 + $0x8] sm:$0xff] }
 0x664   : > { %17144 = vmatprep.mubr.bf16.mxu0 %v21050_v2  ;;  %v21157_v14 = vpack.c.bf16 %v19931_v56, %v19931_v56  ;;  %v7477_v2 = vld [vmem:[#allocation2 + $0x209] sm:$0xff]  ;;  %v8368_v56 = vld [vmem:[#allocation2 + $0x71] sm:$0xff] }
 0x666   : > { %17336 = vmatprep.mubr.bf16.mxu1 %v21157_v14 }
 0x66b   : > { %17145 = vmatmul.mubr.bf16.vlgmr.msra.gmra.mrb[32].mxu0 %v21052_v57  ;;  %v7478_v57 = vld [vmem:[#allocation2 + $0x211] sm:$0xff] }
 0x66c   : > { %17148 = vmatprep.mubr.bf16.mxu0 %v21056_v55  ;;  %17177 = vmatpush3.bf16.msra.mxu0 %v19753_v12  ;;  %v21160_v55 = vpack.c.bf16 %v7478_v57, %v7477_v2  ;;  %v8088_v12 = vld [vmem:[#allocation2 + $0x210] sm:$0xff] }
 0x66d   : > { %17178 = vmatprep.subr.bf16.mxu0 %v19754_v1  ;;  %v8369_v2 = vld [vmem:[#allocation2 + $0x89] sm:$0xff]  ;;  %v8370_v57 = vld [vmem:[#allocation2 + $0x91] sm:$0xff] }
 0x670   : > { %17179 = vmatpush3.bf16.msra.mxu0 %v19754_v1  ;;  %v8085_v1 = vld [vmem:[#allocation2 + $0x1e8] sm:$0xff] }
 0x671   : > { %17180 = vmatprep.subr.bf16.mxu0 %v19755_v23 }
 0x673   : > { %17149 = vmatmul.mubr.bf16.gmra.mrb[36].mxu0 %v21058_v45  ;;  %v19762_v45 = vld [vmem:[#allocation6 + $0x648] sm:$0xff]  }
 0x674   : > { %17152 = vmatprep.mubr.bf16.mxu0 %v21062_v4  ;;  %17181 = vmatpush3.bf16.msra.mxu0 %v19755_v23  ;;  %v19763_v4 = vld [vmem:[#allocation6 + $0x650] sm:$0xff]   ;;  %v8104_v23 = vpack.c.bf16 %v8086_v59, %v8085_v1 }
 0x675   : > { %17182 = vmatprep.subr.bf16.mxu0 %v19756_v19 }
 0x678   : > { %17183 = vmatpush3.bf16.msra.mxu0 %v19756_v19  ;;  %v8087_v19 = vld [vmem:[#allocation2 + $0x208] sm:$0xff] }
 0x679   : > { %17184 = vmatprep.subr.bf16.mxu0 %v19757_v22 }
 0x67b   : > { %17153 = vmatmul.mubr.bf16.gmra.mrb[40].mxu0 %v21064_v16  ;;  %v19764_v16 = vld [vmem:[#allocation6 + $0x658] sm:$0xff]  }
 0x67c   : > { %17156 = vmatprep.mubr.bf16.mxu0 %v21068_v37  ;;  %17185 = vmatpush3.bf16.msra.mxu0 %v19757_v22  ;;  %v19765_v37 = vld [vmem:[#allocation6 + $0x660] sm:$0xff]   ;;  %v8105_v22 = vpack.c.bf16 %v8088_v12, %v8087_v19 }
 0x67d   : > { %17186 = vmatprep.subr.bf16.mxu0 %v19758_v36 }
 0x680   : > { %17187 = vmatpush3.bf16.msra.mxu0 %v19758_v36  ;;  %v8365_v36 = vld [vmem:[#allocation2 + $0x49] sm:$0xff] }
 0x681   : > { %17188 = vmatprep.subr.bf16.mxu0 %v19759_v32 }
 0x683   : > { %17157 = vmatmul.mubr.bf16.gmra.mrb[44].mxu0 %v21070_v51  ;;  %v19781_v51 = vld [vmem:[#allocation6 + $0x720] sm:$0xff]  }
 0x684   : > { %17160 = vmatprep.mubr.bf16.mxu0 %v21074_v15  ;;  %17189 = vmatpush3.bf16.msra.mxu0 %v19759_v32  ;;  %v8366_v32 = vld [vmem:[#allocation2 + $0x51] sm:$0xff] }
 0x685   : > { %17190 = vmatprep.subr.bf16.mxu0 %v19760_v31 }
 0x688   : > { %17191 = vmatpush3.bf16.msra.mxu0 %v19760_v31  ;;  %v8397_v31 = vpack.c.bf16 %v8366_v32, %v8365_v36  ;;  %v19786_v36 = vld [vmem:[#allocation6 + $0x6c8] sm:$0xff]  }
 0x689   : > { %17224 = vmatprep.subr.bf16.mxu0 %v19761_v18 }
 0x68b   : > { %17161 = vmatmul.mubr.bf16.gmra.mrb[48].mxu0 %v21076_v43  ;;  %v19772_v43 = vld [vmem:[#allocation6 + $0x698] sm:$0xff]  }
 0x68c   : > { %17164 = vmatprep.mubr.bf16.mxu0 %v21080_v7  ;;  %v19782_v7 = vld [vmem:[#allocation6 + $0x728] sm:$0xff]  }
 0x693   : > { %17165 = vmatmul.mubr.bf16.gmra.mrb[52].mxu0 %v21082_v63  ;;  %v19773_v63 = vld [vmem:[#allocation6 + $0x6a0] sm:$0xff]  }
 0x694   : > { %17168 = vmatprep.mubr.bf16.mxu0 %v21086_v11  ;;  %v8070_v11 = vld [vmem:[#allocation2 + $0xf0] sm:$0xff] }
 0x69b   : > { %17169 = vmatmul.mubr.bf16.gmra.mrb[56].mxu0 %v21088_v62  ;;  %v8072_v62 = vld [vmem:[#allocation2 + $0x110] sm:$0xff] }
 0x69c   : > { %17172 = vmatprep.mubr.bf16.mxu0 %v21092_v17  ;;  %v8069_v17 = vld [vmem:[#allocation2 + $0xe8] sm:$0xff]  ;;  %v8097_v54 = vpack.c.bf16 %v8072_v62, %v21130_v38 }
 0x69d   : > { %v8083_v38 = vld [vmem:[#allocation2 + $0x1c8] sm:$0xff] }
 0x6a3   : > { %17173 = vmatmul.mubr.bf16.gmra.mrb[60].mxu0 %v21160_v55 }
 0x6a4   : > { %17192 = vmatprep.mubr.bf16.mxu0 %v21006_v47  ;;  %v19766_v47 = vld [vmem:[#allocation6 + $0x668] sm:$0xff]  }
 0x6ab   : > { %17193 = vmatmul.mubr.bf16.vlgmr.msra.gmra.mrb[32].mxu0 %v21011_v29  ;;  %v19767_v29 = vld [vmem:[#allocation6 + $0x670] sm:$0xff]  }
 0x6ac   : > { %17196 = vmatprep.mubr.bf16.mxu0 %v21013_v5  ;;  %17225 = vmatpush3.bf16.msra.mxu0 %v19761_v18  ;;  %v19768_v5 = vld [vmem:[#allocation6 + $0x678] sm:$0xff]   ;;  %v8367_v18 = vld [vmem:[#allocation2 + $0x69] sm:$0xff] }
 0x6ad   : > { %17226 = vmatprep.subr.bf16.mxu0 %v19762_v45 }
 0x6b0   : > { %17227 = vmatpush3.bf16.msra.mxu0 %v19762_v45  ;;  %v8398_v45 = vpack.c.bf16 %v8368_v56, %v8367_v18 }
 0x6b1   : > { %17228 = vmatprep.subr.bf16.mxu0 %v19763_v4 }
 0x6b3   : > { %17197 = vmatmul.mubr.bf16.gmra.mrb[36].mxu0 %v21017_v13  ;;  %v19769_v13 = vld [vmem:[#allocation6 + $0x680] sm:$0xff]  }
 0x6b4   : > { %17200 = vmatprep.mubr.bf16.mxu0 %v21019_v0  ;;  %17229 = vmatpush3.bf16.msra.mxu0 %v19763_v4  ;;  %v7783_v0 = vld [vmem:[#allocation2 + $0x227] sm:$0xff]  ;;  %v8399_v4 = vpack.c.bf16 %v8370_v57, %v8369_v2 }
 0x6b5   : > { %17230 = vmatprep.subr.bf16.mxu0 %v19764_v16 }
 0x6b8   : > { %17231 = vmatpush3.bf16.msra.mxu0 %v19764_v16  ;;  %v8371_v16 = vld [vmem:[#allocation2 + $0xa9] sm:$0xff] }
 0x6b9   : > { %17232 = vmatprep.subr.bf16.mxu0 %v19765_v37 }
 0x6bb   : > { %17201 = vmatmul.mubr.bf16.gmra.mrb[40].mxu0 %v21023_v58  ;;  %v7784_v58 = vld [vmem:[#allocation2 + $0x22f] sm:$0xff] }
 0x6bc   : > { %17204 = vmatprep.mubr.bf16.mxu0 %v21025_v48  ;;  %17233 = vmatpush3.bf16.msra.mxu0 %v19765_v37  ;;  %v7800_v48 = vpack.c.bf16 %v7784_v58, %v7783_v0  ;;  %v8372_v37 = vld [vmem:[#allocation2 + $0xb1] sm:$0xff]  ;;  %v8375_v0 = vld [vmem:[#allocation2 + $0xe9] sm:$0xff] }
 0x6bd   : > { %17234 = vmatprep.subr.bf16.mxu0 %v19766_v47  ;;  %v8376_v58 = vld [vmem:[#allocation2 + $0xf1] sm:$0xff] }
 0x6c0   : > { %17235 = vmatpush3.bf16.msra.mxu0 %v19766_v47  ;;  %v8373_v47 = vld [vmem:[#allocation2 + $0xc9] sm:$0xff] }
 0x6c1   : > { %17236 = vmatprep.subr.bf16.mxu0 %v19767_v29 }
 0x6c3   : > { %17205 = vmatmul.mubr.bf16.gmra.mrb[44].mxu0 %v21029_v40  ;;  %v19777_v40 = vld [vmem:[#allocation6 + $0x700] sm:$0xff]  }
 0x6c4   : > { %17208 = vmatprep.mubr.bf16.mxu0 %v21031_v34  ;;  %17237 = vmatpush3.bf16.msra.mxu0 %v19767_v29  ;;  %v19778_v34 = vld [vmem:[#allocation6 + $0x708] sm:$0xff]   ;;  %v8374_v29 = vld [vmem:[#allocation2 + $0xd1] sm:$0xff] }
 0x6c5   : > { %17238 = vmatprep.subr.bf16.mxu0 %v19768_v5  ;;  %17320 = vmatprep.subr.bf16.mxu1 %v19777_v40 }
 0x6c6   : > { %17321 = vmatpush3.bf16.msra.mxu1 %v19777_v40  ;;  %v8402_v40 = vpack.c.bf16 %v8376_v58, %v8375_v0  ;;  %v19788_v58 = vld [vmem:[#allocation6 + $0x6d8] sm:$0xff]  }
 0x6c7   : > { %17322 = vmatprep.subr.bf16.mxu1 %v19778_v34 }
 0x6c8   : > { %17239 = vmatpush3.bf16.msra.mxu0 %v19768_v5  ;;  %v8400_v5 = vpack.c.bf16 %v8372_v37, %v8371_v16  ;;  %v19787_v37 = vld [vmem:[#allocation6 + $0x6d0] sm:$0xff]  }
 0x6c9   : > { %17272 = vmatprep.subr.bf16.mxu0 %v19769_v13 }
 0x6ca   : > { %17323 = vmatpush3.bf16.msra.mxu1 %v19778_v34 }
 0x6cb   : > { %17209 = vmatmul.mubr.bf16.gmra.mrb[48].mxu0 %v21035_v20  ;;  %v19779_v20 = vld [vmem:[#allocation6 + $0x710] sm:$0xff]  }
 0x6cc   : > { %17212 = vmatprep.mubr.bf16.mxu0 %v21037_v44  ;;  %v19770_v44 = vld [vmem:[#allocation6 + $0x688] sm:$0xff]   ;;  %17324 = vmatprep.subr.bf16.mxu1 %v19779_v20 }
 0x6ce   : > { %17325 = vmatpush3.bf16.msra.mxu1 %v19779_v20  ;;  %v8379_v20 = vld [vmem:[#allocation2 + $0x129] sm:$0xff] }
 0x6d3   : > { %17213 = vmatmul.mubr.bf16.gmra.mrb[52].mxu0 %v21041_v27  ;;  %v19780_v27 = vld [vmem:[#allocation6 + $0x718] sm:$0xff]  }
 0x6d4   : > { %17216 = vmatprep.mubr.bf16.mxu0 %v21043_v24  ;;  %v19771_v24 = vld [vmem:[#allocation6 + $0x690] sm:$0xff]   ;;  %17326 = vmatprep.subr.bf16.mxu1 %v19780_v27 }
 0x6d5   : > { %17327 = vmatpush3.bf16.msra.mxu1 %v19780_v27  ;;  %v8381_v27 = vld [vmem:[#allocation2 + $0x149] sm:$0xff] }
 0x6d6   : > { %17328 = vmatprep.subr.bf16.mxu1 %v19781_v51 }
 0x6d9   : > { %17329 = vmatpush3.bf16.msra.mxu1 %v19781_v51 }
 0x6da   : > { %17330 = vmatprep.subr.bf16.mxu1 %v19782_v7 }
 0x6db   : > { %17217 = vmatmul.mubr.bf16.gmra.mrb[56].mxu0 %v21047_v46  ;;  %v8066_v46 = vld [vmem:[#allocation2 + $0xb0] sm:$0xff] }
 0x6dc   : > { %17220 = vmatprep.mubr.bf16.mxu0 %v21110_v35  ;;  %v8094_v15 = vpack.c.bf16 %v8066_v46, %v21119_v26  ;;  %v8096_v35 = vpack.c.bf16 %v8070_v11, %v8069_v17  ;;  %v8099_v26 = vpack.c.bf16 %v8076_v53, %v8075_v41  ;;  %v8387_v17 = vld [vmem:[#allocation2 + $0x1a9] sm:$0xff] }
 0x6dd   : > { %17331 = vmatpush3.bf16.msra.mxu1 %v19782_v7  ;;  %v8385_v7 = vld [vmem:[#allocation2 + $0x189] sm:$0xff] }
 0x6de   : > { %v8391_v53 = vld [vmem:[#allocation2 + $0x1e9] sm:$0xff]  ;;  %17332 = vmatprep.subr.bf16.mxu1 %v19783_v3 }
 0x6df   : > { %v8395_v41 = vld [vmem:[#allocation2 + $0x229] sm:$0xff] }
 0x6e1   : > { %17333 = vmatpush3.bf16.msra.mxu1 %v19783_v3 }
 0x6e3   : > { %17221 = vmatmul.mubr.bf16.gmra.mrb[60].mxu0 %v7800_v48  ;;  %v8378_v48 = vld [vmem:[#allocation2 + $0x111] sm:$0xff] }
 0x6e4   : > { %17240 = vmatprep.mubr.bf16.mxu0 %v21113_v42  ;;  %v8074_v42 = vld [vmem:[#allocation2 + $0x130] sm:$0xff] }
 0x6eb   : > { %17241 = vmatmul.mubr.bf16.vlgmr.msra.gmra.mrb[32].mxu0 %v21115_v39  ;;  %v8098_v39 = vpack.c.bf16 %v8074_v42, %v8073_v9  ;;  %v8392_v9 = vld [vmem:[#allocation2 + $0x1f1] sm:$0xff] }
 0x6ec   : > { %17244 = vmatprep.mubr.bf16.mxu0 %v21121_v61  ;;  %17273 = vmatpush3.bf16.msra.mxu0 %v19769_v13  ;;  %v8080_v61 = vld [vmem:[#allocation2 + $0x190] sm:$0xff]  ;;  %v8401_v13 = vpack.c.bf16 %v8374_v29, %v8373_v47 }
 0x6ed   : > { %17274 = vmatprep.subr.bf16.mxu0 %v19770_v44  ;;  %v8101_v33 = vpack.c.bf16 %v8080_v61, %v8079_v28  ;;  %v19784_v61 = vld [vmem:[#allocation6 + $0x738] sm:$0xff]  }
 0x6ee   : > { %17334 = vmatprep.subr.bf16.mxu1 %v19784_v61 }
 0x6ef   : > { %17335 = vmatpush3.bf16.msra.mxu1 %v19784_v61 }
 0x6f0   : > { %17275 = vmatpush3.bf16.msra.mxu0 %v19770_v44  ;;  %v8380_v44 = vld [vmem:[#allocation2 + $0x131] sm:$0xff]  ;;  %17368 = vmatprep.subr.bf16.mxu1 %v19785_v21 }
 0x6f1   : > { %17276 = vmatprep.subr.bf16.mxu0 %v19771_v24  ;;  %v8404_v46 = vpack.c.bf16 %v8380_v44, %v8379_v20 }
 0x6f3   : > { %17245 = vmatmul.mubr.bf16.gmra.mrb[36].mxu0 %v8094_v15  ;;  %v8383_v15 = vld [vmem:[#allocation2 + $0x169] sm:$0xff] }
 0x6f4   : > { %17248 = vmatprep.mubr.bf16.mxu0 %v21126_v8  ;;  %17277 = vmatpush3.bf16.msra.mxu0 %v19771_v24  ;;  %v8084_v8 = vld [vmem:[#allocation2 + $0x1d0] sm:$0xff] }
 0x6f5   : > { %17278 = vmatprep.subr.bf16.mxu0 %v19772_v43  ;;  %v8103_v6 = vpack.c.bf16 %v8084_v8, %v8083_v38  ;;  %v8382_v24 = vld [vmem:[#allocation2 + $0x151] sm:$0xff] }
 0x6f6   : > { %v8405_v51 = vpack.c.bf16 %v8382_v24, %v8381_v27 }
 0x6f8   : > { %17279 = vmatpush3.bf16.msra.mxu0 %v19772_v43  ;;  %v8384_v43 = vld [vmem:[#allocation2 + $0x171] sm:$0xff] }
 0x6f9   : > { %17280 = vmatprep.subr.bf16.mxu0 %v19773_v63  ;;  %v8406_v11 = vpack.c.bf16 %v8384_v43, %v8383_v15 }
 0x6fb   : > { %17249 = vmatmul.mubr.bf16.gmra.mrb[40].mxu0 %v8096_v35  ;;  %v8388_v35 = vld [vmem:[#allocation2 + $0x1b1] sm:$0xff] }
 0x6fc   : > { %17252 = vmatprep.mubr.bf16.mxu0 %v8097_v54  ;;  %17281 = vmatpush3.bf16.msra.mxu0 %v19773_v63  ;;  %v8386_v63 = vld [vmem:[#allocation2 + $0x191] sm:$0xff] }
 0x6fd   : > { %17282 = vmatprep.subr.bf16.mxu0 %v19774_v50  ;;  %v8407_v62 = vpack.c.bf16 %v8386_v63, %v8385_v7  ;;  %v8390_v54 = vld [vmem:[#allocation2 + $0x1d1] sm:$0xff] }
 0x700   : > { %17283 = vmatpush3.bf16.msra.mxu0 %v19774_v50  ;;  %v8389_v50 = vld [vmem:[#allocation2 + $0x1c9] sm:$0xff] }
 0x701   : > { %17284 = vmatprep.subr.bf16.mxu0 %v19775_v52  ;;  %v8409_v42 = vpack.c.bf16 %v8390_v54, %v8389_v50 }
 0x703   : > { %17253 = vmatmul.mubr.bf16.gmra.mrb[44].mxu0 %v8098_v39  ;;  %v8410_v39 = vpack.c.bf16 %v8392_v9, %v8391_v53 }
 0x704   : > { %17256 = vmatprep.mubr.bf16.mxu0 %v8099_v26  ;;  %17285 = vmatpush3.bf16.msra.mxu0 %v19775_v52  ;;  %v8408_v52 = vpack.c.bf16 %v8388_v35, %v8387_v17 }
 0x705   : > { %17286 = vmatprep.subr.bf16.mxu0 %v19776_v30 }
 0x708   : > { %17287 = vmatpush3.bf16.msra.mxu0 %v19776_v30  ;;  %v8396_v30 = vld [vmem:[#allocation2 + $0x231] sm:$0xff] }
 0x709   : > { %v8412_v26 = vpack.c.bf16 %v8396_v30, %v8395_v41  ;;  %v19791_v41 = vld [vmem:[#allocation6 + $0x6f0] sm:$0xff]  }
 0x70b   : > { %17257 = vmatmul.mubr.bf16.gmra.mrb[48].mxu0 %v8100_v25  ;;  %v21186_v25 = vld [vmem:[#allocation8 + $0x2] ss:$0 sm:$0xff] }
 0x70c   : > { %17260 = vmatprep.mubr.bf16.mxu0 %v8101_v33 }
 0x713   : > { %17261 = vmatmul.mubr.bf16.gmra.mrb[52].mxu0 %v8102_v49 }
 0x714   : > { %17264 = vmatprep.mubr.bf16.mxu0 %v8103_v6 }
 0x71b   : > { %17265 = vmatmul.mubr.bf16.gmra.mrb[56].mxu0 %v8104_v23 }
 0x71c   : > { %17268 = vmatprep.mubr.bf16.mxu0 %v8105_v22 }
 0x723   : > { %17269 = vmatmul.mubr.bf16.gmra.mrb[60].mxu0 %v21157_v14  ;;  %v8377_v14 = vld [vmem:[#allocation2 + $0x109] sm:$0xff] }
 0x724   : > { %17288 = vmatprep.mubr.bf16.mxu0 %v8397_v31  ;;  %v8403_v34 = vpack.c.bf16 %v8378_v48, %v8377_v14 }
 0x72b   : > { %17289 = vmatmul.mubr.bf16.vlgmr.msra.gmra.mrb[32].mxu0 %v8398_v45 }
 0x72c   : > { %17292 = vmatprep.mubr.bf16.mxu0 %v8399_v4 }
 0x733   : > { %17293 = vmatmul.mubr.bf16.gmra.mrb[36].mxu0 %v8400_v5 }
 0x734   : > { %17296 = vmatprep.mubr.bf16.mxu0 %v8401_v13 }
 0x73b   : > { %17297 = vmatmul.mubr.bf16.gmra.mrb[40].mxu0 %v8402_v40 }
 0x73c   : > { %17300 = vmatprep.mubr.bf16.mxu0 %v8403_v34 }
 0x743   : > { %17301 = vmatmul.mubr.bf16.gmra.mrb[44].mxu0 %v8404_v46 }
 0x744   : > { %17304 = vmatprep.mubr.bf16.mxu0 %v8405_v51  ;;  %v19789_v51 = vld [vmem:[#allocation6 + $0x6e0] sm:$0xff]  }
 0x74b   : > { %17305 = vmatmul.mubr.bf16.gmra.mrb[48].mxu0 %v8406_v11 }
 0x74c   : > { %17308 = vmatprep.mubr.bf16.mxu0 %v8407_v62  ;;  %v19790_v62 = vld [vmem:[#allocation6 + $0x6e8] sm:$0xff]  }
 0x753   : > { %17309 = vmatmul.mubr.bf16.gmra.mrb[52].mxu0 %v8408_v52 }
 0x754   : > { %17312 = vmatprep.mubr.bf16.mxu0 %v8409_v42 }
 0x75b   : > { %17313 = vmatmul.mubr.bf16.gmra.mrb[56].mxu0 %v8410_v39 }
 0x75c   : > { %17316 = vmatprep.mubr.bf16.mxu0 %v21160_v55 }
 0x763   : > { %17317 = vmatmul.mubr.bf16.gmra.mrb[60].mxu0 %v8412_v26 }
 0x7fe   : > { %v17290_v28 = vpop.f32.mrb[32].mxu0 }
 0x7ff   : > { %v8681_v33 = vadd.f32 %v17290_v28, %v21186_v25  ;;  %v8512_v60 = vpop.f32.mrb[33].mxu0  ;;  %v19792_v28 = vld [vmem:[#allocation6 + $0x6f8] sm:$0xff]  }
 0x800   : > { %v8679_v55 = vadd.f32 %v21186_v25, %v8512_v60  ;;  %v17291_v8 = vpop.f32.mrb[34].mxu0 }
 0x801   : > { %v8713_v10 = vmax.f32 %v8681_v33, 0.0  ;;  %v8682_v49 = vadd.f32 %v17291_v8, %v21186_v25  ;;  %v8515_v38 = vpop.f32.mrb[35].mxu0 }
 0x802   : > { %v8711_v6 = vmax.f32 %v8679_v55, 0.0  ;;  %v8680_v59 = vadd.f32 %v21186_v25, %v8515_v38 }
 0x803   : > { %8745 = vst [vmem:[%s21193_s21 + $0x10] sm:$0xff] %v8713_v10  ;;  %8777 = vst [vmem:[#allocation2 + $0x48] sm:$0xff] %v8713_v10  ;;  %v8714_v12 = vmax.f32 %v8682_v49, 0.0 }
 0x804   : > { %8743 = vst [vmem:[%s21193_s21] sm:$0xff] %v8711_v6  ;;  %8775 = vst [vmem:[#allocation2 + $0x28] sm:$0xff] %v8711_v6  ;;  %v8712_v1 = vmax.f32 %v8680_v59, 0.0 }
 0x805   : > { %8746 = vst [vmem:[%s21193_s21 + $0x18] sm:$0xff] %v8714_v12  ;;  %8778 = vst [vmem:[#allocation2 + $0x50] sm:$0xff] %v8714_v12  ;;  %v8906_v23 = vpack.c.bf16 %v8714_v12, %v8713_v10  ;;  %v21232_v12 = vld [vmem:[#allocation6 + $0x740] sm:$0xff]  }
 0x806   : > { %8744 = vst [vmem:[%s21193_s21 + $0x8] sm:$0xff] %v8712_v1  ;;  %8776 = vst [vmem:[#allocation2 + $0x30] sm:$0xff] %v8712_v1  ;;  %v17294_v19 = vpop.f32.mrb[36].mxu0  ;;  %v8905_v22 = vpack.c.bf16 %v8712_v1, %v8711_v6 }
 0x807   : > { %v8685_v32 = vadd.f32 %v17294_v19, %v21186_v25  ;;  %v8528_v31 = vpop.f32.mrb[37].mxu0 }
 0x808   : > { %v8683_v18 = vadd.f32 %v21186_v25, %v8528_v31  ;;  %v17295_v56 = vpop.f32.mrb[38].mxu0  ;;  %17337 = vmatmul.mubr.bf16.vlgmr.msra.gmra.mrb[64].mxu1 %v8905_v22 }
 0x809   : > { %v8717_v2 = vmax.f32 %v8685_v32, 0.0  ;;  %v8686_v57 = vadd.f32 %v17295_v56, %v21186_v25  ;;  %v8531_v45 = vpop.f32.mrb[39].mxu0  ;;  %17340 = vmatprep.mubr.bf16.mxu1 %v8906_v23  ;;  %17369 = vmatpush3.bf16.msra.mxu1 %v19785_v21 }
 0x80a   : > { %v8715_v4 = vmax.f32 %v8683_v18, 0.0  ;;  %v8684_v16 = vadd.f32 %v21186_v25, %v8531_v45  ;;  %17370 = vmatprep.subr.bf16.mxu1 %v19786_v36 }
 0x80b   : > { %8749 = vst [vmem:[%s21193_s21 + $0x30] sm:$0xff] %v8717_v2  ;;  %8781 = vst [vmem:[#allocation2 + $0x88] sm:$0xff] %v8717_v2  ;;  %v8718_v47 = vmax.f32 %v8686_v57, 0.0 }
 0x80c   : > { %8747 = vst [vmem:[%s21193_s21 + $0x20] sm:$0xff] %v8715_v4  ;;  %8779 = vst [vmem:[#allocation2 + $0x68] sm:$0xff] %v8715_v4  ;;  %v8716_v29 = vmax.f32 %v8684_v16, 0.0 }
 0x80d   : > { %8750 = vst [vmem:[%s21193_s21 + $0x38] sm:$0xff] %v8718_v47  ;;  %8782 = vst [vmem:[#allocation2 + $0x90] sm:$0xff] %v8718_v47  ;;  %v8908_v5 = vpack.c.bf16 %v8718_v47, %v8717_v2  ;;  %17371 = vmatpush3.bf16.msra.mxu1 %v19786_v36 }
 0x80e   : > { %8748 = vst [vmem:[%s21193_s21 + $0x28] sm:$0xff] %v8716_v29  ;;  %8780 = vst [vmem:[#allocation2 + $0x70] sm:$0xff] %v8716_v29  ;;  %v17298_v13 = vpop.f32.mrb[40].mxu0  ;;  %v8907_v0 = vpack.c.bf16 %v8716_v29, %v8715_v4  ;;  %17372 = vmatprep.subr.bf16.mxu1 %v19787_v37 }
 0x80f   : > { %v8689_v14 = vadd.f32 %v17298_v13, %v21186_v25  ;;  %v8544_v48 = vpop.f32.mrb[41].mxu0 }
 0x810   : > { %v8687_v40 = vadd.f32 %v21186_v25, %v8544_v48  ;;  %v17299_v34 = vpop.f32.mrb[42].mxu0  ;;  %17341 = vmatmul.mubr.bf16.gmra.mrb[68].mxu1 %v8907_v0 }
 0x811   : > { %v8721_v20 = vmax.f32 %v8689_v14, 0.0  ;;  %v8690_v44 = vadd.f32 %v17299_v34, %v21186_v25  ;;  %v8547_v27 = vpop.f32.mrb[43].mxu0  ;;  %17344 = vmatprep.mubr.bf16.mxu1 %v8908_v5  ;;  %17373 = vmatpush3.bf16.msra.mxu1 %v19787_v37 }
 0x812   : > { %v8719_v24 = vmax.f32 %v8687_v40, 0.0  ;;  %v8688_v46 = vadd.f32 %v21186_v25, %v8547_v27  ;;  %17374 = vmatprep.subr.bf16.mxu1 %v19788_v58 }
 0x813   : > { %8753 = vst [vmem:[%s21193_s21 + $0x50] sm:$0xff] %v8721_v20  ;;  %8785 = vst [vmem:[#allocation2 + $0xc8] sm:$0xff] %v8721_v20  ;;  %v8722_v15 = vmax.f32 %v8690_v44, 0.0 }
 0x814   : > { %8751 = vst [vmem:[%s21193_s21 + $0x40] sm:$0xff] %v8719_v24  ;;  %8783 = vst [vmem:[#allocation2 + $0xa8] sm:$0xff] %v8719_v24  ;;  %v8720_v43 = vmax.f32 %v8688_v46, 0.0 }
 0x815   : > { %8754 = vst [vmem:[%s21193_s21 + $0x58] sm:$0xff] %v8722_v15  ;;  %8786 = vst [vmem:[#allocation2 + $0xd0] sm:$0xff] %v8722_v15  ;;  %v8910_v7 = vpack.c.bf16 %v8722_v15, %v8721_v20  ;;  %17375 = vmatpush3.bf16.msra.mxu1 %v19788_v58 }
 0x816   : > { %8752 = vst [vmem:[%s21193_s21 + $0x48] sm:$0xff] %v8720_v43  ;;  %8784 = vst [vmem:[#allocation2 + $0xb0] sm:$0xff] %v8720_v43  ;;  %v17302_v63 = vpop.f32.mrb[44].mxu0  ;;  %v8909_v11 = vpack.c.bf16 %v8720_v43, %v8719_v24  ;;  %17376 = vmatprep.subr.bf16.mxu1 %v19789_v51 }
 0x817   : > { %v8693_v17 = vadd.f32 %v17302_v63, %v21186_v25  ;;  %v8560_v35 = vpop.f32.mrb[45].mxu0 }
 0x818   : > { %v8691_v50 = vadd.f32 %v21186_v25, %v8560_v35  ;;  %v17303_v54 = vpop.f32.mrb[46].mxu0  ;;  %17345 = vmatmul.mubr.bf16.gmra.mrb[72].mxu1 %v8909_v11 }
 0x819   : > { %v8725_v52 = vmax.f32 %v8693_v17, 0.0  ;;  %v8694_v42 = vadd.f32 %v17303_v54, %v21186_v25  ;;  %v8563_v53 = vpop.f32.mrb[47].mxu0  ;;  %17348 = vmatprep.mubr.bf16.mxu1 %v8910_v7  ;;  %17377 = vmatpush3.bf16.msra.mxu1 %v19789_v51 }
 0x81a   : > { %v8723_v9 = vmax.f32 %v8691_v50, 0.0  ;;  %v8692_v39 = vadd.f32 %v21186_v25, %v8563_v53  ;;  %17378 = vmatprep.subr.bf16.mxu1 %v19790_v62  ;;  %v8808_v53 = vld [vmem:[#allocation2 + $0xf] sm:$0xff] }
 0x81b   : > { %8757 = vst [vmem:[%s21193_s21 + $0x70] sm:$0xff] %v8725_v52  ;;  %8789 = vst [vmem:[#allocation2 + $0x108] sm:$0xff] %v8725_v52  ;;  %v8726_v30 = vmax.f32 %v8694_v42, 0.0  ;;  %v8807_v42 = vld [vmem:[#allocation2 + $0x7] sm:$0xff] }
 0x81c   : > { %8755 = vst [vmem:[%s21193_s21 + $0x60] sm:$0xff] %v8723_v9  ;;  %8787 = vst [vmem:[#allocation2 + $0xe8] sm:$0xff] %v8723_v9  ;;  %v21221_v26 = vmax.f32 %v8692_v39, 0.0 }
 0x81d   : > { %8758 = vst [vmem:[%s21193_s21 + $0x78] sm:$0xff] %v8726_v30  ;;  %8790 = vst [vmem:[#allocation2 + $0x110] sm:$0xff] %v8726_v30  ;;  %v8912_v3 = vpack.c.bf16 %v8726_v30, %v8725_v52  ;;  %17379 = vmatpush3.bf16.msra.mxu1 %v19790_v62 }
 0x81e   : > { %8756 = vst [vmem:[%s21193_s21 + $0x68] sm:$0xff] %v21221_v26  ;;  %8788 = vst [vmem:[#allocation2 + $0xf0] sm:$0xff] %v21221_v26  ;;  %v17306_v61 = vpop.f32.mrb[48].mxu0  ;;  %v8911_v21 = vpack.c.bf16 %v21221_v26, %v8723_v9  ;;  %17380 = vmatprep.subr.bf16.mxu1 %v19791_v41 }
 0x81f   : > { %v8697_v33 = vadd.f32 %v17306_v61, %v21186_v25  ;;  %v8576_v60 = vpop.f32.mrb[49].mxu0  ;;  %v8812_v61 = vld [vmem:[#allocation2 + $0x4f] sm:$0xff] }
 0x820   : > { %v8695_v55 = vadd.f32 %v21186_v25, %v8576_v60  ;;  %v17307_v8 = vpop.f32.mrb[50].mxu0  ;;  %17349 = vmatmul.mubr.bf16.gmra.mrb[76].mxu1 %v8911_v21  ;;  %v8809_v21 = vld [vmem:[#allocation2 + $0x27] sm:$0xff] }
 0x821   : > { %v8729_v10 = vmax.f32 %v8697_v33, 0.0  ;;  %v8698_v49 = vadd.f32 %v17307_v8, %v21186_v25  ;;  %v8579_v38 = vpop.f32.mrb[51].mxu0  ;;  %17352 = vmatprep.mubr.bf16.mxu1 %v8912_v3  ;;  %17381 = vmatpush3.bf16.msra.mxu1 %v19791_v41  ;;  %v8839_v41 = vpack.c.bf16 %v8808_v53, %v8807_v42  ;;  %v8810_v3 = vld [vmem:[#allocation2 + $0x2f] sm:$0xff]  ;;  %v8811_v33 = vld [vmem:[#allocation2 + $0x47] sm:$0xff] }
 0x822   : > { %v8727_v6 = vmax.f32 %v8695_v55, 0.0  ;;  %v8696_v59 = vadd.f32 %v21186_v25, %v8579_v38  ;;  %17382 = vmatprep.subr.bf16.mxu1 %v19792_v28  ;;  %v19794_v60 = vld [vmem:[#allocation6 + $0x748] sm:$0xff]   ;;  %v21298_v55 = vpack.c.bf16 %v8812_v61, %v8811_v33  ;;  %v19795_v8 = vld [vmem:[#allocation6 + $0x750] sm:$0xff]  }
 0x823   : > { %8761 = vst [vmem:[%s21193_s21 + $0x90] sm:$0xff] %v8729_v10  ;;  %8793 = vst [vmem:[#allocation2 + $0x148] sm:$0xff] %v8729_v10  ;;  %v21235_v1 = vmax.f32 %v8698_v49, 0.0  ;;  %v8816_v49 = vld [vmem:[#allocation2 + $0x8f] sm:$0xff]  ;;  %v8813_v38 = vld [vmem:[#allocation2 + $0x67] sm:$0xff] }
 0x824   : > { %8759 = vst [vmem:[%s21193_s21 + $0x80] sm:$0xff] %v8727_v6  ;;  %8791 = vst [vmem:[#allocation2 + $0x128] sm:$0xff] %v8727_v6  ;;  %v8728_v23 = vmax.f32 %v8696_v59, 0.0  ;;  %v8815_v59 = vld [vmem:[#allocation2 + $0x87] sm:$0xff] }
 0x825   : > { %8762 = vst [vmem:[%s21193_s21 + $0x98] sm:$0xff] %v21235_v1  ;;  %8794 = vst [vmem:[#allocation2 + $0x150] sm:$0xff] %v21235_v1  ;;  %v8914_v19 = vpack.c.bf16 %v21235_v1, %v8729_v10  ;;  %17383 = vmatpush3.bf16.msra.mxu1 %v19792_v28  ;;  %v21296_v28 = vpack.c.bf16 %v8810_v3, %v8809_v21  ;;  %v8814_v10 = vld [vmem:[#allocation2 + $0x6f] sm:$0xff] }
 0x826   : > { %8760 = vst [vmem:[%s21193_s21 + $0x88] sm:$0xff] %v8728_v23  ;;  %8792 = vst [vmem:[#allocation2 + $0x130] sm:$0xff] %v8728_v23  ;;  %v17310_v22 = vpop.f32.mrb[52].mxu0  ;;  %v21243_v36 = vpack.c.bf16 %v8728_v23, %v8727_v6  ;;  %17416 = vmatprep.subr.bf16.mxu1 %v21232_v12  ;;  %v21303_v6 = vpack.c.bf16 %v8814_v10, %v8813_v38  ;;  %v19796_v23 = vld [vmem:[#allocation6 + $0x758] sm:$0xff]   ;;  %v9355_v53 = vld [vmem:[#allocation2 + $0x9] sm:$0xff] }
 0x827   : > { %v8701_v32 = vadd.f32 %v17310_v22, %v21186_v25  ;;  %v8592_v31 = vpop.f32.mrb[53].mxu0  ;;  %v8818_v22 = vld [vmem:[#allocation2 + $0xaf] sm:$0xff] }
 0x828   : > { %v8699_v18 = vadd.f32 %v21186_v25, %v8592_v31  ;;  %v17311_v56 = vpop.f32.mrb[54].mxu0  ;;  %17353 = vmatmul.mubr.bf16.gmra.mrb[80].mxu1 %v21243_v36  ;;  %v8817_v31 = vld [vmem:[#allocation2 + $0xa7] sm:$0xff]  ;;  %v9360_v10 = vld [vmem:[#allocation2 + $0x51] sm:$0xff] }
 0x829   : > { %v8733_v2 = vmax.f32 %v8701_v32, 0.0  ;;  %v8702_v57 = vadd.f32 %v17311_v56, %v21186_v25  ;;  %v8595_v45 = vpop.f32.mrb[55].mxu0  ;;  %17356 = vmatprep.mubr.bf16.mxu1 %v8914_v19  ;;  %v21305_v19 = vpack.c.bf16 %v8816_v49, %v8815_v59  ;;  %v8820_v32 = vld [vmem:[#allocation2 + $0xcf] sm:$0xff]  ;;  %v8819_v56 = vld [vmem:[#allocation2 + $0xc7] sm:$0xff] }
 0x82a   : > { %v8731_v4 = vmax.f32 %v8699_v18, 0.0  ;;  %v8700_v16 = vadd.f32 %v21186_v25, %v8595_v45  ;;  %v21309_v18 = vpack.c.bf16 %v8818_v22, %v8817_v31  ;;  %v19799_v45 = vld [vmem:[#allocation6 + $0x770] sm:$0xff]   ;;  %v19802_v38 = vld [vmem:[#allocation6 + $0x788] sm:$0xff]  }
 0x82b   : > { %8765 = vst [vmem:[%s21193_s21 + $0xb0] sm:$0xff] %v8733_v2  ;;  %8797 = vst [vmem:[#allocation2 + $0x188] sm:$0xff] %v8733_v2  ;;  %v8734_v37 = vmax.f32 %v8702_v57, 0.0  ;;  %v21311_v57 = vpack.c.bf16 %v8820_v32, %v8819_v56  ;;  %v9357_v33 = vld [vmem:[#allocation2 + $0x29] sm:$0xff]  ;;  %v9362_v22 = vld [vmem:[#allocation2 + $0x71] sm:$0xff] }
 0x82c   : > { %8763 = vst [vmem:[%s21193_s21 + $0xa0] sm:$0xff] %v8731_v4  ;;  %8795 = vst [vmem:[#allocation2 + $0x168] sm:$0xff] %v8731_v4  ;;  %v8732_v47 = vmax.f32 %v8700_v16, 0.0  ;;  %v8824_v16 = vld [vmem:[#allocation2 + $0x10f] sm:$0xff] }
 0x82d   : > { %8766 = vst [vmem:[%s21193_s21 + $0xb8] sm:$0xff] %v8734_v37  ;;  %8798 = vst [vmem:[#allocation2 + $0x190] sm:$0xff] %v8734_v37  ;;  %v21254_v29 = vpack.c.bf16 %v8734_v37, %v8733_v2  ;;  %v19798_v2 = vld [vmem:[#allocation6 + $0x768] sm:$0xff]   ;;  %v9364_v31 = vld [vmem:[#allocation2 + $0x91] sm:$0xff] }
 0x82e   : > { %8764 = vst [vmem:[%s21193_s21 + $0xa8] sm:$0xff] %v8732_v47  ;;  %8796 = vst [vmem:[#allocation2 + $0x170] sm:$0xff] %v8732_v47  ;;  %v17314_v5 = vpop.f32.mrb[56].mxu0  ;;  %v21257_v13 = vpack.c.bf16 %v8732_v47, %v8731_v4  ;;  %v8822_v4 = vld [vmem:[#allocation2 + $0xef] sm:$0xff]  ;;  %v8821_v37 = vld [vmem:[#allocation2 + $0xe7] sm:$0xff] }
 0x82f   : > { %v8705_v0 = vadd.f32 %v17314_v5, %v21186_v25  ;;  %v8608_v58 = vpop.f32.mrb[57].mxu0  ;;  %v21315_v47 = vpack.c.bf16 %v8822_v4, %v8821_v37  ;;  %v8823_v5 = vld [vmem:[#allocation2 + $0x107] sm:$0xff]  ;;  %v9366_v37 = vld [vmem:[#allocation2 + $0xb1] sm:$0xff] }
 0x830   : > { %v8703_v14 = vadd.f32 %v21186_v25, %v8608_v58  ;;  %v17315_v48 = vpop.f32.mrb[58].mxu0  ;;  %17357 = vmatmul.mubr.bf16.gmra.mrb[84].mxu1 %v21257_v13  ;;  %v21317_v58 = vpack.c.bf16 %v8824_v16, %v8823_v5  ;;  %v9363_v32 = vld [vmem:[#allocation2 + $0x89] sm:$0xff]  ;;  %v19805_v4 = vld [vmem:[#allocation6 + $0x7a0] sm:$0xff]  }
 0x831   : > { %v8737_v40 = vmax.f32 %v8705_v0, 0.0  ;;  %v8706_v34 = vadd.f32 %v17315_v48, %v21186_v25  ;;  %v8611_v20 = vpop.f32.mrb[59].mxu0  ;;  %17360 = vmatprep.mubr.bf16.mxu1 %v21254_v29  ;;  %v19800_v0 = vld [vmem:[#allocation6 + $0x778] sm:$0xff]   ;;  %v8826_v48 = vld [vmem:[#allocation2 + $0x12f] sm:$0xff] }
 0x832   : > { %v8735_v44 = vmax.f32 %v8703_v14, 0.0  ;;  %v8704_v27 = vadd.f32 %v21186_v25, %v8611_v20  ;;  %v19801_v14 = vld [vmem:[#allocation6 + $0x780] sm:$0xff]   ;;  %v9365_v16 = vld [vmem:[#allocation2 + $0xa9] sm:$0xff] }
 0x833   : > { %8769 = vst [vmem:[%s21193_s21 + $0xd0] sm:$0xff] %v8737_v40  ;;  %8801 = vst [vmem:[#allocation2 + $0x1c8] sm:$0xff] %v8737_v40  ;;  %v8738_v24 = vmax.f32 %v8706_v34, 0.0  ;;  %v8825_v34 = vld [vmem:[#allocation2 + $0x127] sm:$0xff] }
 0x834   : > { %8767 = vst [vmem:[%s21193_s21 + $0xc0] sm:$0xff] %v8735_v44  ;;  %8799 = vst [vmem:[#allocation2 + $0x1a8] sm:$0xff] %v8735_v44  ;;  %v8736_v46 = vmax.f32 %v8704_v27, 0.0  ;;  %v21321_v20 = vpack.c.bf16 %v8826_v48, %v8825_v34  ;;  %v9367_v5 = vld [vmem:[#allocation2 + $0xc9] sm:$0xff] }
 0x835   : > { %8770 = vst [vmem:[%s21193_s21 + $0xd8] sm:$0xff] %v8738_v24  ;;  %8802 = vst [vmem:[#allocation2 + $0x1d0] sm:$0xff] %v8738_v24  ;;  %v21268_v51 = vpack.c.bf16 %v8738_v24, %v8737_v40  ;;  %v8828_v40 = vld [vmem:[#allocation2 + $0x14f] sm:$0xff] }
 0x836   : > { %8768 = vst [vmem:[%s21193_s21 + $0xc8] sm:$0xff] %v8736_v46  ;;  %8800 = vst [vmem:[#allocation2 + $0x1b0] sm:$0xff] %v8736_v46  ;;  %v17318_v15 = vpop.f32.mrb[60].mxu0  ;;  %v21271_v43 = vpack.c.bf16 %v8736_v46, %v8735_v44  ;;  %v8827_v44 = vld [vmem:[#allocation2 + $0x147] sm:$0xff]  ;;  %v8830_v24 = vld [vmem:[#allocation2 + $0x16f] sm:$0xff] }
 0x837   : > { %v8709_v7 = vadd.f32 %v17318_v15, %v21186_v25  ;;  %v8624_v63 = vpop.f32.mrb[61].mxu0  ;;  %v21323_v27 = vpack.c.bf16 %v8828_v40, %v8827_v44  ;;  %v8832_v46 = vld [vmem:[#allocation2 + $0x18f] sm:$0xff]  ;;  %v8829_v15 = vld [vmem:[#allocation2 + $0x167] sm:$0xff] }
 0x838   : > { %v8707_v11 = vadd.f32 %v21186_v25, %v8624_v63  ;;  %v17319_v62 = vpop.f32.mrb[62].mxu0  ;;  %17361 = vmatmul.mubr.bf16.gmra.mrb[88].mxu1 %v21271_v43  ;;  %v8831_v63 = vld [vmem:[#allocation2 + $0x187] sm:$0xff]  ;;  %v19807_v34 = vld [vmem:[#allocation6 + $0x7b0] sm:$0xff]  }
 0x839   : > { %v21276_v17 = vmax.f32 %v8709_v7, 0.0  ;;  %v8710_v35 = vadd.f32 %v17319_v62, %v21186_v25  ;;  %v8627_v50 = vpop.f32.mrb[63].mxu0  ;;  %17364 = vmatprep.mubr.bf16.mxu1 %v21268_v51  ;;  %v21327_v7 = vpack.c.bf16 %v8830_v24, %v8829_v15  ;;  %v19806_v48 = vld [vmem:[#allocation6 + $0x7a8] sm:$0xff]   ;;  %v9370_v24 = vld [vmem:[#allocation2 + $0xf1] sm:$0xff] }
 0x83a   : > { %v8739_v54 = vmax.f32 %v8707_v11, 0.0  ;;  %v8708_v52 = vadd.f32 %v21186_v25, %v8627_v50  ;;  %v21329_v11 = vpack.c.bf16 %v8832_v46, %v8831_v63  ;;  %v9369_v44 = vld [vmem:[#allocation2 + $0xe9] sm:$0xff]  ;;  %v9372_v15 = vld [vmem:[#allocation2 + $0x111] sm:$0xff] }
 0x83b   : > { %8773 = vst [vmem:[%s21193_s21 + $0xf0] sm:$0xff] %v21276_v17  ;;  %8805 = vst [vmem:[#allocation2 + $0x208] sm:$0xff] %v21276_v17  ;;  %v21284_v9 = vmax.f32 %v8710_v35, 0.0  ;;  %v8833_v50 = vld [vmem:[#allocation2 + $0x1a7] sm:$0xff]  ;;  %v21360_v63 = vpack.c.bf16 %v9370_v24, %v9369_v44  ;;  %v19815_v24 = vld [vmem:[#allocation6 + $0x7f0] sm:$0xff]  }
 0x83c   : > { %8771 = vst [vmem:[%s21193_s21 + $0xe0] sm:$0xff] %v8739_v54  ;;  %8803 = vst [vmem:[#allocation2 + $0x1e8] sm:$0xff] %v8739_v54  ;;  %v8740_v39 = vmax.f32 %v8708_v52, 0.0  ;;  %v8836_v35 = vld [vmem:[#allocation2 + $0x1cf] sm:$0xff]  ;;  %v8835_v52 = vld [vmem:[#allocation2 + $0x1c7] sm:$0xff] }
 0x83d   : > { %8774 = vst [vmem:[%s21193_s21 + $0xf8] sm:$0xff] %v21284_v9  ;;  %8806 = vst [vmem:[#allocation2 + $0x210] sm:$0xff] %v21284_v9  ;;  %v10014_v30 = vpack.c.bf16 %v21284_v9, %v21276_v17  ;;  %v8834_v62 = vld [vmem:[#allocation2 + $0x1af] sm:$0xff]  ;;  %v21335_v42 = vpack.c.bf16 %v8836_v35, %v8835_v52  ;;  %v19813_v44 = vld [vmem:[#allocation6 + $0x7e0] sm:$0xff]  }
 0x83e   : > { %8772 = vst [vmem:[%s21193_s21 + $0xe8] sm:$0xff] %v8740_v39  ;;  %8804 = vst [vmem:[#allocation2 + $0x1f0] sm:$0xff] %v8740_v39  ;;  %v21293_v25 = vpack.c.bf16 %v8740_v39, %v8739_v54  ;;  %v21333_v54 = vpack.c.bf16 %v8834_v62, %v8833_v50  ;;  %v9356_v39 = vld [vmem:[#allocation2 + $0x11] sm:$0xff]  ;;  %v9371_v46 = vld [vmem:[#allocation2 + $0x109] sm:$0xff] }
 0x83f   : > { %v9387_v61 = vpack.c.bf16 %v9356_v39, %v9355_v53  ;;  %v19808_v62 = vld [vmem:[#allocation6 + $0x7b8] sm:$0xff]   ;;  %v21362_v35 = vpack.c.bf16 %v9372_v15, %v9371_v46  ;;  %v19809_v50 = vld [vmem:[#allocation6 + $0x7c0] sm:$0xff]   ;;  %v9373_v52 = vld [vmem:[#allocation2 + $0x129] sm:$0xff] }
 0x840   : > { %17365 = vmatmul.mubr.bf16.gmra.mrb[92].mxu1 %v21293_v25  ;;  %v9374_v53 = vld [vmem:[#allocation2 + $0x131] sm:$0xff]  ;;  %v9375_v39 = vld [vmem:[#allocation2 + $0x149] sm:$0xff]  ;;  %v19817_v15 = vld [vmem:[#allocation6 + $0x800] sm:$0xff]  }
 0x841   : > { %17384 = vmatprep.mubr.bf16.mxu1 %v8839_v41  ;;  %v19816_v46 = vld [vmem:[#allocation6 + $0x7f8] sm:$0xff]   ;;  %v19833_v9 = vld [vmem:[#allocation6 + $0x880] sm:$0xff]  }
 0x842   : > { %v19832_v17 = vld [vmem:[#allocation6 + $0x878] sm:$0xff]  }
 0x843   : > { %v8837_v3 = vld [vmem:[#allocation2 + $0x1e7] sm:$0xff] }
 0x845   : > { %v8838_v41 = vld [vmem:[#allocation2 + $0x1ef] sm:$0xff] }
 0x846   : > { %v21339_v21 = vpack.c.bf16 %v8838_v41, %v8837_v3  ;;  %v9376_v41 = vld [vmem:[#allocation2 + $0x151] sm:$0xff]  ;;  %v21366_v3 = vpack.c.bf16 %v9374_v53, %v9373_v52  ;;  %v9691_v52 = vld [vmem:[#allocation2 + $0x207] sm:$0xff] }
 0x848   : > { %17385 = vmatmul.mubr.bf16.vlgmr.msra.gmra.mrb[64].mxu1 %v21296_v28 }
 0x849   : > { %17388 = vmatprep.mubr.bf16.mxu1 %v21298_v55  ;;  %17417 = vmatpush3.bf16.msra.mxu1 %v21232_v12  ;;  %v19797_v12 = vld [vmem:[#allocation6 + $0x760] sm:$0xff]  }
 0x84a   : > { %17418 = vmatprep.subr.bf16.mxu1 %v19794_v60 }
 0x84d   : > { %17419 = vmatpush3.bf16.msra.mxu1 %v19794_v60  ;;  %v9358_v60 = vld [vmem:[#allocation2 + $0x31] sm:$0xff] }
 0x84e   : > { %17420 = vmatprep.subr.bf16.mxu1 %v19795_v8  ;;  %v21342_v49 = vpack.c.bf16 %v9358_v60, %v9357_v33  ;;  %v9377_v33 = vld [vmem:[#allocation2 + $0x169] sm:$0xff]  ;;  %v9378_v60 = vld [vmem:[#allocation2 + $0x171] sm:$0xff] }
 0x850   : > { %17389 = vmatmul.mubr.bf16.gmra.mrb[68].mxu1 %v21303_v6 }
 0x851   : > { %17392 = vmatprep.mubr.bf16.mxu1 %v21305_v19  ;;  %17421 = vmatpush3.bf16.msra.mxu1 %v19795_v8  ;;  %v9359_v8 = vld [vmem:[#allocation2 + $0x49] sm:$0xff] }
 0x852   : > { %17422 = vmatprep.subr.bf16.mxu1 %v19796_v23  ;;  %v21344_v59 = vpack.c.bf16 %v9360_v10, %v9359_v8  ;;  %v9379_v8 = vld [vmem:[#allocation2 + $0x189] sm:$0xff]  ;;  %v9380_v10 = vld [vmem:[#allocation2 + $0x191] sm:$0xff] }
 0x855   : > { %17423 = vmatpush3.bf16.msra.mxu1 %v19796_v23  ;;  %v19803_v23 = vld [vmem:[#allocation6 + $0x790] sm:$0xff]  }
 0x856   : > { %17424 = vmatprep.subr.bf16.mxu1 %v19797_v12 }
 0x858   : > { %17393 = vmatmul.mubr.bf16.gmra.mrb[72].mxu1 %v21309_v18 }
 0x859   : > { %17396 = vmatprep.mubr.bf16.mxu1 %v21311_v57  ;;  %17425 = vmatpush3.bf16.msra.mxu1 %v19797_v12  ;;  %v9361_v12 = vld [vmem:[#allocation2 + $0x69] sm:$0xff] }
 0x85a   : > { %17426 = vmatprep.subr.bf16.mxu1 %v19798_v2  ;;  %v21348_v56 = vpack.c.bf16 %v9362_v22, %v9361_v12  ;;  %v9381_v12 = vld [vmem:[#allocation2 + $0x1a9] sm:$0xff]  ;;  %v9382_v22 = vld [vmem:[#allocation2 + $0x1b1] sm:$0xff] }
 0x85d   : > { %17427 = vmatpush3.bf16.msra.mxu1 %v19798_v2  ;;  %v19804_v2 = vld [vmem:[#allocation6 + $0x798] sm:$0xff]  }
 0x85e   : > { %17428 = vmatprep.subr.bf16.mxu1 %v19799_v45 }
 0x860   : > { %17397 = vmatmul.mubr.bf16.gmra.mrb[76].mxu1 %v21315_v47 }
 0x861   : > { %17400 = vmatprep.mubr.bf16.mxu1 %v21317_v58  ;;  %17429 = vmatpush3.bf16.msra.mxu1 %v19799_v45  ;;  %v21350_v45 = vpack.c.bf16 %v9364_v31, %v9363_v32  ;;  %v9383_v32 = vld [vmem:[#allocation2 + $0x1c9] sm:$0xff]  ;;  %v9384_v31 = vld [vmem:[#allocation2 + $0x1d1] sm:$0xff] }
 0x862   : > { %17430 = vmatprep.subr.bf16.mxu1 %v19800_v0 }
 0x865   : > { %17431 = vmatpush3.bf16.msra.mxu1 %v19800_v0  ;;  %v9368_v0 = vld [vmem:[#allocation2 + $0xd1] sm:$0xff] }
 0x866   : > { %17464 = vmatprep.subr.bf16.mxu1 %v19801_v14  ;;  %v21356_v40 = vpack.c.bf16 %v9368_v0, %v9367_v5  ;;  %v19810_v0 = vld [vmem:[#allocation6 + $0x7c8] sm:$0xff]  }
 0x868   : > { %17401 = vmatmul.mubr.bf16.gmra.mrb[80].mxu1 %v21321_v20 }
 0x869   : > { %17404 = vmatprep.mubr.bf16.mxu1 %v21323_v27 }
 0x870   : > { %17405 = vmatmul.mubr.bf16.gmra.mrb[84].mxu1 %v21327_v7 }
 0x871   : > { %17408 = vmatprep.mubr.bf16.mxu1 %v21329_v11 }
 0x878   : > { %17409 = vmatmul.mubr.bf16.gmra.mrb[88].mxu1 %v21333_v54 }
 0x879   : > { %17412 = vmatprep.mubr.bf16.mxu1 %v21335_v42 }
 0x880   : > { %17413 = vmatmul.mubr.bf16.gmra.mrb[92].mxu1 %v21339_v21 }
 0x881   : > { %17432 = vmatprep.mubr.bf16.mxu1 %v9387_v61  ;;  %v21368_v61 = vpack.c.bf16 %v9376_v41, %v9375_v39  ;;  %v9967_v39 = vld [vmem:[#allocation2 + $0x28] sm:$0xff] }
 0x888   : > { %17433 = vmatmul.mubr.bf16.vlgmr.msra.gmra.mrb[64].mxu1 %v21342_v49 }
 0x889   : > { %17436 = vmatprep.mubr.bf16.mxu1 %v21344_v59  ;;  %17465 = vmatpush3.bf16.msra.mxu1 %v19801_v14  ;;  %v21354_v14 = vpack.c.bf16 %v9366_v37, %v9365_v16  ;;  %v9385_v16 = vld [vmem:[#allocation2 + $0x1e9] sm:$0xff]  ;;  %v9386_v37 = vld [vmem:[#allocation2 + $0x1f1] sm:$0xff] }
 0x88a   : > { %17466 = vmatprep.subr.bf16.mxu1 %v19802_v38  ;;  %v21384_v5 = vpack.c.bf16 %v9386_v37, %v9385_v16  ;;  %v9974_v16 = vld [vmem:[#allocation2 + $0x90] sm:$0xff] }
 0x88b   : > { %v9976_v37 = vld [vmem:[#allocation2 + $0xb0] sm:$0xff] }
 0x88d   : > { %17467 = vmatpush3.bf16.msra.mxu1 %v19802_v38  ;;  %v21372_v38 = vpack.c.bf16 %v9378_v60, %v9377_v33  ;;  %v9970_v33 = vld [vmem:[#allocation2 + $0x50] sm:$0xff] }
 0x88e   : > { %17468 = vmatprep.subr.bf16.mxu1 %v19803_v23  ;;  %v9972_v60 = vld [vmem:[#allocation2 + $0x70] sm:$0xff] }
 0x890   : > { %17437 = vmatmul.mubr.bf16.gmra.mrb[68].mxu1 %v21348_v56 }
 0x891   : > { %17440 = vmatprep.mubr.bf16.mxu1 %v21350_v45  ;;  %17469 = vmatpush3.bf16.msra.mxu1 %v19803_v23  ;;  %v21374_v23 = vpack.c.bf16 %v9380_v10, %v9379_v8  ;;  %v9969_v8 = vld [vmem:[#allocation2 + $0x48] sm:$0xff] }
 0x892   : > { %17470 = vmatprep.subr.bf16.mxu1 %v19804_v2  ;;  %v21405_v10 = vpack.c.bf16 %v9970_v33, %v9969_v8  ;;  %v9982_v33 = vld [vmem:[#allocation2 + $0x110] sm:$0xff] }
 0x895   : > { %17471 = vmatpush3.bf16.msra.mxu1 %v19804_v2  ;;  %v21378_v2 = vpack.c.bf16 %v9382_v22, %v9381_v12  ;;  %v9971_v12 = vld [vmem:[#allocation2 + $0x68] sm:$0xff] }
 0x896   : > { %17472 = vmatprep.subr.bf16.mxu1 %v19805_v4  ;;  %v19818_v22 = vld [vmem:[#allocation6 + $0x808] sm:$0xff]  }
 0x898   : > { %17441 = vmatmul.mubr.bf16.gmra.mrb[72].mxu1 %v21354_v14 }
 0x899   : > { %17444 = vmatprep.mubr.bf16.mxu1 %v21356_v40  ;;  %17473 = vmatpush3.bf16.msra.mxu1 %v19805_v4  ;;  %v21380_v4 = vpack.c.bf16 %v9384_v31, %v9383_v32  ;;  %v21407_v32 = vpack.c.bf16 %v9972_v60, %v9971_v12  ;;  %v19819_v31 = vld [vmem:[#allocation6 + $0x810] sm:$0xff]   ;;  %v9981_v60 = vld [vmem:[#allocation2 + $0x108] sm:$0xff]  ;;  %v19824_v12 = vld [vmem:[#allocation6 + $0x838] sm:$0xff]  }
 0x89a   : > { %17474 = vmatprep.subr.bf16.mxu1 %v19806_v48  ;;  %v21424_v8 = vpack.c.bf16 %v9982_v33, %v9981_v60  ;;  %v10914_v33 = vld [vmem:[#allocation2 + $0x210] sm:$0xff]  ;;  %v10911_v60 = vld [vmem:[#allocation2 + $0x1e8] sm:$0xff] }
 0x89d   : > { %17475 = vmatpush3.bf16.msra.mxu1 %v19806_v48  ;;  %v19811_v48 = vld [vmem:[#allocation6 + $0x7d0] sm:$0xff]  }
 0x89e   : > { %17476 = vmatprep.subr.bf16.mxu1 %v19807_v34 }
 0x8a0   : > { %17445 = vmatmul.mubr.bf16.gmra.mrb[76].mxu1 %v21360_v63 }
 0x8a1   : > { %17448 = vmatprep.mubr.bf16.mxu1 %v21362_v35  ;;  %17477 = vmatpush3.bf16.msra.mxu1 %v19807_v34  ;;  %v19812_v34 = vld [vmem:[#allocation6 + $0x7d8] sm:$0xff]  }
 0x8a2   : > { %17478 = vmatprep.subr.bf16.mxu1 %v19808_v62 }
 0x8a5   : > { %17479 = vmatpush3.bf16.msra.mxu1 %v19808_v62  ;;  %v9692_v62 = vld [vmem:[#allocation2 + $0x20f] sm:$0xff] }
 0x8a6   : > { %17512 = vmatprep.subr.bf16.mxu1 %v19809_v50  ;;  %v21402_v53 = vpack.c.bf16 %v9692_v62, %v9691_v52  ;;  %v9977_v62 = vld [vmem:[#allocation2 + $0xc8] sm:$0xff] }
 0x8a7   : > { %v19822_v52 = vld [vmem:[#allocation6 + $0x828] sm:$0xff]  }
 0x8a8   : > { %17449 = vmatmul.mubr.bf16.gmra.mrb[80].mxu1 %v21366_v3 }
 0x8a9   : > { %17452 = vmatprep.mubr.bf16.mxu1 %v21368_v61 }
 0x8b0   : > { %17453 = vmatmul.mubr.bf16.gmra.mrb[84].mxu1 %v21372_v38 }
 0x8b1   : > { %17456 = vmatprep.mubr.bf16.mxu1 %v21374_v23 }
 0x8b8   : > { %17457 = vmatmul.mubr.bf16.gmra.mrb[88].mxu1 %v21378_v2 }
 0x8b9   : > { %17460 = vmatprep.mubr.bf16.mxu1 %v21380_v4 }
 0x8c0   : > { %17461 = vmatmul.mubr.bf16.gmra.mrb[92].mxu1 %v21384_v5 }
 0x8c1   : > { %17480 = vmatprep.mubr.bf16.mxu1 %v21296_v28  ;;  %v19814_v28 = vld [vmem:[#allocation6 + $0x7e8] sm:$0xff]  }
 0x8c8   : > { %17481 = vmatmul.mubr.bf16.vlgmr.msra.gmra.mrb[64].mxu1 %v21298_v55 }
 0x8c9   : > { %17484 = vmatprep.mubr.bf16.mxu1 %v21303_v6  ;;  %17513 = vmatpush3.bf16.msra.mxu1 %v19809_v50  ;;  %v9968_v50 = vld [vmem:[#allocation2 + $0x30] sm:$0xff] }
 0x8ca   : > { %17514 = vmatprep.subr.bf16.mxu1 %v19810_v0  ;;  %v9999_v41 = vpack.c.bf16 %v9968_v50, %v9967_v39 }
 0x8cd   : > { %17515 = vmatpush3.bf16.msra.mxu1 %v19810_v0  ;;  %v9973_v0 = vld [vmem:[#allocation2 + $0x88] sm:$0xff] }
 0x8ce   : > { %17516 = vmatprep.subr.bf16.mxu1 %v19811_v48 }
 0x8d0   : > { %17485 = vmatmul.mubr.bf16.gmra.mrb[68].mxu1 %v21305_v19 }
 0x8d1   : > { %17488 = vmatprep.mubr.bf16.mxu1 %v21309_v18  ;;  %17517 = vmatpush3.bf16.msra.mxu1 %v19811_v48  ;;  %v21411_v48 = vpack.c.bf16 %v9974_v16, %v9973_v0  ;;  %v19848_v16 = vld [vmem:[#allocation6 + $0x8f8] sm:$0xff]   ;;  %v10904_v0 = vld [vmem:[#allocation2 + $0x170] sm:$0xff] }
 0x8d2   : > { %17518 = vmatprep.subr.bf16.mxu1 %v19812_v34 }
 0x8d5   : > { %17519 = vmatpush3.bf16.msra.mxu1 %v19812_v34  ;;  %v9975_v34 = vld [vmem:[#allocation2 + $0xa8] sm:$0xff] }
 0x8d6   : > { %17520 = vmatprep.subr.bf16.mxu1 %v19813_v44 }
 0x8d8   : > { %17489 = vmatmul.mubr.bf16.gmra.mrb[72].mxu1 %v21311_v57 }
 0x8d9   : > { %17492 = vmatprep.mubr.bf16.mxu1 %v21315_v47  ;;  %17521 = vmatpush3.bf16.msra.mxu1 %v19813_v44  ;;  %v19820_v44 = vld [vmem:[#allocation6 + $0x818] sm:$0xff]  }
 0x8da   : > { %17522 = vmatprep.subr.bf16.mxu1 %v19814_v28 }
 0x8dd   : > { %17523 = vmatpush3.bf16.msra.mxu1 %v19814_v28  ;;  %v21413_v28 = vpack.c.bf16 %v9976_v37, %v9975_v34  ;;  %v10903_v34 = vld [vmem:[#allocation2 + $0x168] sm:$0xff] }
 0x8de   : > { %17524 = vmatprep.subr.bf16.mxu1 %v19815_v24 }
 0x8e0   : > { %17493 = vmatmul.mubr.bf16.gmra.mrb[76].mxu1 %v21317_v58 }
 0x8e1   : > { %17496 = vmatprep.mubr.bf16.mxu1 %v21321_v20  ;;  %17525 = vmatpush3.bf16.msra.mxu1 %v19815_v24  ;;  %v19821_v24 = vld [vmem:[#allocation6 + $0x820] sm:$0xff]  }
 0x8e2   : > { %17526 = vmatprep.subr.bf16.mxu1 %v19816_v46 }
 0x8e5   : > { %17527 = vmatpush3.bf16.msra.mxu1 %v19816_v46  ;;  %v9978_v46 = vld [vmem:[#allocation2 + $0xd0] sm:$0xff] }
 0x8e6   : > { %17560 = vmatprep.subr.bf16.mxu1 %v19817_v15  ;;  %v21419_v50 = vpack.c.bf16 %v9978_v46, %v9977_v62  ;;  %v10908_v46 = vld [vmem:[#allocation2 + $0x1b0] sm:$0xff]  ;;  %v10907_v62 = vld [vmem:[#allocation2 + $0x1a8] sm:$0xff] }
 0x8e8   : > { %17497 = vmatmul.mubr.bf16.gmra.mrb[80].mxu1 %v21323_v27 }
 0x8e9   : > { %17500 = vmatprep.mubr.bf16.mxu1 %v21327_v7 }
 0x8f0   : > { %17501 = vmatmul.mubr.bf16.gmra.mrb[84].mxu1 %v21329_v11 }
 0x8f1   : > { %17504 = vmatprep.mubr.bf16.mxu1 %v21333_v54 }
 0x8f8   : > { %17505 = vmatmul.mubr.bf16.gmra.mrb[88].mxu1 %v21335_v42 }
 0x8f9   : > { %17508 = vmatprep.mubr.bf16.mxu1 %v21339_v21 }
 0x900   : > { %17509 = vmatmul.mubr.bf16.gmra.mrb[92].mxu1 %v21402_v53 }
 0x901   : > { %17528 = vmatprep.mubr.bf16.mxu1 %v9999_v41  ;;  %v19823_v41 = vld [vmem:[#allocation6 + $0x830] sm:$0xff]  }
 0x908   : > { %17529 = vmatmul.mubr.bf16.vlgmr.msra.gmra.mrb[64].mxu1 %v21405_v10 }
 0x909   : > { %17532 = vmatprep.mubr.bf16.mxu1 %v21407_v32  ;;  %17561 = vmatpush3.bf16.msra.mxu1 %v19817_v15  ;;  %v21417_v15 = vld [vmem:[#allocation2 + $0xe8] sm:$0xff] }
 0x90a   : > { %17562 = vmatprep.subr.bf16.mxu1 %v19818_v22  ;;  %v10005_v39 = vpack.c.bf16 %v21221_v26, %v21417_v15  ;;  %v19825_v26 = vld [vmem:[#allocation6 + $0x840] sm:$0xff]  }
 0x90d   : > { %17563 = vmatpush3.bf16.msra.mxu1 %v19818_v22  ;;  %v21428_v22 = vld [vmem:[#allocation2 + $0x148] sm:$0xff] }
 0x90e   : > { %17564 = vmatprep.subr.bf16.mxu1 %v19819_v31 }
 0x910   : > { %17533 = vmatmul.mubr.bf16.gmra.mrb[68].mxu1 %v21411_v48 }
 0x911   : > { %17536 = vmatprep.mubr.bf16.mxu1 %v21413_v28  ;;  %17565 = vmatpush3.bf16.msra.mxu1 %v19819_v31  ;;  %v10008_v31 = vpack.c.bf16 %v21235_v1, %v21428_v22  ;;  %v19827_v1 = vld [vmem:[#allocation6 + $0x850] sm:$0xff]  }
 0x912   : > { %17566 = vmatprep.subr.bf16.mxu1 %v19820_v44 }
 0x915   : > { %17567 = vmatpush3.bf16.msra.mxu1 %v19820_v44  ;;  %v10926_v44 = vpack.c.bf16 %v10904_v0, %v10903_v34  ;;  %v19855_v0 = vld [vmem:[#allocation6 + $0x970] sm:$0xff]   ;;  %v19857_v34 = vld [vmem:[#allocation6 + $0x900] sm:$0xff]  }
 0x916   : > { %17568 = vmatprep.subr.bf16.mxu1 %v19821_v24 }
 0x918   : > { %17537 = vmatmul.mubr.bf16.gmra.mrb[72].mxu1 %v21419_v50 }
 0x919   : > { %17540 = vmatprep.mubr.bf16.mxu1 %v10005_v39  ;;  %17569 = vmatpush3.bf16.msra.mxu1 %v19821_v24 }
 0x91a   : > { %17570 = vmatprep.subr.bf16.mxu1 %v19822_v52 }
 0x91d   : > { %17571 = vmatpush3.bf16.msra.mxu1 %v19822_v52  ;;  %v10909_v52 = vld [vmem:[#allocation2 + $0x1c8] sm:$0xff] }
 0x91e   : > { %17572 = vmatprep.subr.bf16.mxu1 %v19823_v41 }
 0x920   : > { %17541 = vmatmul.mubr.bf16.gmra.mrb[76].mxu1 %v21424_v8 }
 0x921   : > { %17544 = vmatprep.mubr.bf16.mxu1 %v21243_v36  ;;  %17573 = vmatpush3.bf16.msra.mxu1 %v19823_v41  ;;  %v19826_v36 = vld [vmem:[#allocation6 + $0x848] sm:$0xff]   ;;  %v10912_v41 = vld [vmem:[#allocation2 + $0x1f0] sm:$0xff] }
 0x922   : > { %17574 = vmatprep.subr.bf16.mxu1 %v19824_v12 }
 0x925   : > { %17575 = vmatpush3.bf16.msra.mxu1 %v19824_v12  ;;  %v10913_v12 = vld [vmem:[#allocation2 + $0x208] sm:$0xff] }
 0x926   : > { %17608 = vmatprep.subr.bf16.mxu1 %v19825_v26 }
 0x928   : > { %17545 = vmatmul.mubr.bf16.gmra.mrb[80].mxu1 %v10008_v31  ;;  %v11192_v31 = vld [vmem:[#allocation2 + $0x51] sm:$0xff] }
 0x929   : > { %17548 = vmatprep.mubr.bf16.mxu1 %v21257_v13  ;;  %v19829_v13 = vld [vmem:[#allocation6 + $0x860] sm:$0xff]  }
 0x930   : > { %17549 = vmatmul.mubr.bf16.gmra.mrb[84].mxu1 %v21254_v29  ;;  %v19828_v29 = vld [vmem:[#allocation6 + $0x858] sm:$0xff]  }
 0x931   : > { %17552 = vmatprep.mubr.bf16.mxu1 %v21271_v43  ;;  %v19831_v43 = vld [vmem:[#allocation6 + $0x870] sm:$0xff]  }
 0x938   : > { %17553 = vmatmul.mubr.bf16.gmra.mrb[88].mxu1 %v21268_v51  ;;  %v19830_v51 = vld [vmem:[#allocation6 + $0x868] sm:$0xff]  }
 0x939   : > { %17556 = vmatprep.mubr.bf16.mxu1 %v21293_v25 }
 0x940   : > { %17557 = vmatmul.mubr.bf16.gmra.mrb[92].mxu1 %v10014_v30  ;;  %v19932_v30 = vld [vmem:[#allocation2 + $0x8] sm:$0xff] }
 0x941   : > { %17576 = vmatprep.mubr.bf16.mxu1 %v21342_v49  ;;  %v21455_v25 = vpack.c.bf16 %v19932_v30, %v19932_v30  ;;  %v10303_v49 = vld [vmem:[#allocation2 + $0x209] sm:$0xff]  ;;  %v11198_v30 = vld [vmem:[#allocation2 + $0xb1] sm:$0xff] }
 0x943   : > { %17768 = vmatprep.mubr.bf16.mxu0 %v21455_v25 }
 0x948   : > { %17577 = vmatmul.mubr.bf16.vlgmr.msra.gmra.mrb[64].mxu1 %v21344_v59  ;;  %v10304_v59 = vld [vmem:[#allocation2 + $0x211] sm:$0xff] }
 0x949   : > { %17580 = vmatprep.mubr.bf16.mxu1 %v21348_v56  ;;  %17609 = vmatpush3.bf16.msra.mxu1 %v19825_v26  ;;  %v21458_v56 = vpack.c.bf16 %v10304_v59, %v10303_v49  ;;  %v10931_v26 = vpack.c.bf16 %v10914_v33, %v10913_v12  ;;  %v11199_v49 = vld [vmem:[#allocation2 + $0xc9] sm:$0xff]  ;;  %v11200_v59 = vld [vmem:[#allocation2 + $0xd1] sm:$0xff] }
 0x94a   : > { %17610 = vmatprep.subr.bf16.mxu1 %v19826_v36 }
 0x94d   : > { %17611 = vmatpush3.bf16.msra.mxu1 %v19826_v36 }
 0x94e   : > { %17612 = vmatprep.subr.bf16.mxu1 %v19827_v1 }
 0x950   : > { %17581 = vmatmul.mubr.bf16.gmra.mrb[68].mxu1 %v21350_v45  ;;  %v19834_v45 = vld [vmem:[#allocation6 + $0x888] sm:$0xff]  }
 0x951   : > { %17584 = vmatprep.mubr.bf16.mxu1 %v21354_v14  ;;  %17613 = vmatpush3.bf16.msra.mxu1 %v19827_v1  ;;  %v19835_v14 = vld [vmem:[#allocation6 + $0x890] sm:$0xff]  }
 0x952   : > { %17614 = vmatprep.subr.bf16.mxu1 %v19828_v29  ;;  %v11193_v1 = vld [vmem:[#allocation2 + $0x69] sm:$0xff] }
 0x955   : > { %17615 = vmatpush3.bf16.msra.mxu1 %v19828_v29  ;;  %v11194_v29 = vld [vmem:[#allocation2 + $0x71] sm:$0xff] }
 0x956   : > { %17616 = vmatprep.subr.bf16.mxu1 %v19829_v13 }
 0x958   : > { %17585 = vmatmul.mubr.bf16.gmra.mrb[72].mxu1 %v21356_v40  ;;  %v19836_v40 = vld [vmem:[#allocation6 + $0x898] sm:$0xff]  }
 0x959   : > { %17588 = vmatprep.mubr.bf16.mxu1 %v21360_v63  ;;  %17617 = vmatpush3.bf16.msra.mxu1 %v19829_v13  ;;  %v19837_v63 = vld [vmem:[#allocation6 + $0x8a0] sm:$0xff]   ;;  %v11195_v13 = vld [vmem:[#allocation2 + $0x89] sm:$0xff] }
 0x95a   : > { %17618 = vmatprep.subr.bf16.mxu1 %v19830_v51 }
 0x95d   : > { %17619 = vmatpush3.bf16.msra.mxu1 %v19830_v51  ;;  %v11196_v51 = vld [vmem:[#allocation2 + $0x91] sm:$0xff] }
 0x95e   : > { %17620 = vmatprep.subr.bf16.mxu1 %v19831_v43 }
 0x960   : > { %17589 = vmatmul.mubr.bf16.gmra.mrb[76].mxu1 %v21362_v35  ;;  %v19844_v35 = vld [vmem:[#allocation6 + $0x8d8] sm:$0xff]  }
 0x961   : > { %17592 = vmatprep.mubr.bf16.mxu1 %v21366_v3  ;;  %17621 = vmatpush3.bf16.msra.mxu1 %v19831_v43  ;;  %v19854_v3 = vld [vmem:[#allocation6 + $0x968] sm:$0xff]   ;;  %v11224_v43 = vpack.c.bf16 %v11194_v29, %v11193_v1 }
 0x962   : > { %17622 = vmatprep.subr.bf16.mxu1 %v19832_v17 }
 0x965   : > { %17623 = vmatpush3.bf16.msra.mxu1 %v19832_v17  ;;  %v11225_v17 = vpack.c.bf16 %v11196_v51, %v11195_v13 }
 0x966   : > { %17656 = vmatprep.subr.bf16.mxu1 %v19833_v9 }
 0x968   : > { %17593 = vmatmul.mubr.bf16.gmra.mrb[80].mxu1 %v21368_v61  ;;  %v19845_v61 = vld [vmem:[#allocation6 + $0x8e0] sm:$0xff]  }
 0x969   : > { %17596 = vmatprep.mubr.bf16.mxu1 %v21372_v38  ;;  %v10896_v38 = vld [vmem:[#allocation2 + $0xf0] sm:$0xff] }
 0x970   : > { %17597 = vmatmul.mubr.bf16.gmra.mrb[84].mxu1 %v21374_v23  ;;  %v10922_v23 = vpack.c.bf16 %v10896_v38, %v21417_v15  ;;  %v10910_v15 = vld [vmem:[#allocation2 + $0x1d0] sm:$0xff] }
 0x971   : > { %17600 = vmatprep.mubr.bf16.mxu1 %v21378_v2  ;;  %v19846_v2 = vld [vmem:[#allocation6 + $0x8e8] sm:$0xff]   ;;  %v10929_v39 = vpack.c.bf16 %v10910_v15, %v10909_v52 }
 0x972   : > { %v11215_v38 = vld [vmem:[#allocation2 + $0x1c9] sm:$0xff] }
 0x978   : > { %17601 = vmatmul.mubr.bf16.gmra.mrb[88].mxu1 %v21380_v4  ;;  %v19847_v4 = vld [vmem:[#allocation6 + $0x8f0] sm:$0xff]  }
 0x979   : > { %17604 = vmatprep.mubr.bf16.mxu1 %v21384_v5  ;;  %v10900_v5 = vld [vmem:[#allocation2 + $0x130] sm:$0xff] }
 0x980   : > { %17605 = vmatmul.mubr.bf16.gmra.mrb[92].mxu1 %v21458_v56 }
 0x981   : > { %17624 = vmatprep.mubr.bf16.mxu1 %v21298_v55  ;;  %v19838_v55 = vld [vmem:[#allocation6 + $0x8a8] sm:$0xff]  }
 0x988   : > { %17625 = vmatmul.mubr.bf16.vlgmr.msra.gmra.mrb[64].mxu1 %v21303_v6  ;;  %v19839_v6 = vld [vmem:[#allocation6 + $0x8b0] sm:$0xff]  }
 0x989   : > { %17628 = vmatprep.mubr.bf16.mxu1 %v21305_v19  ;;  %17657 = vmatpush3.bf16.msra.mxu1 %v19833_v9  ;;  %v19840_v19 = vld [vmem:[#allocation6 + $0x8b8] sm:$0xff]   ;;  %v11197_v9 = vld [vmem:[#allocation2 + $0xa9] sm:$0xff] }
 0x98a   : > { %17658 = vmatprep.subr.bf16.mxu1 %v19834_v45 }
 0x98d   : > { %17659 = vmatpush3.bf16.msra.mxu1 %v19834_v45  ;;  %v11226_v45 = vpack.c.bf16 %v11198_v30, %v11197_v9  ;;  %v19859_v30 = vld [vmem:[#allocation6 + $0x910] sm:$0xff]  }
 0x98e   : > { %17660 = vmatprep.subr.bf16.mxu1 %v19835_v14 }
 0x990   : > { %17629 = vmatmul.mubr.bf16.gmra.mrb[68].mxu1 %v21309_v18  ;;  %v19841_v18 = vld [vmem:[#allocation6 + $0x8c0] sm:$0xff]  }
 0x991   : > { %17632 = vmatprep.mubr.bf16.mxu1 %v21311_v57  ;;  %17661 = vmatpush3.bf16.msra.mxu1 %v19835_v14  ;;  %v10609_v57 = vld [vmem:[#allocation2 + $0x227] sm:$0xff]  ;;  %v11227_v14 = vpack.c.bf16 %v11200_v59, %v11199_v49 }
 0x992   : > { %17662 = vmatprep.subr.bf16.mxu1 %v19836_v40 }
 0x995   : > { %17663 = vmatpush3.bf16.msra.mxu1 %v19836_v40  ;;  %v11201_v40 = vld [vmem:[#allocation2 + $0xe9] sm:$0xff] }
 0x996   : > { %17664 = vmatprep.subr.bf16.mxu1 %v19837_v63 }
 0x998   : > { %17633 = vmatmul.mubr.bf16.gmra.mrb[72].mxu1 %v21315_v47  ;;  %v10610_v47 = vld [vmem:[#allocation2 + $0x22f] sm:$0xff] }
 0x999   : > { %17636 = vmatprep.mubr.bf16.mxu1 %v21317_v58  ;;  %17665 = vmatpush3.bf16.msra.mxu1 %v19837_v63  ;;  %v10626_v58 = vpack.c.bf16 %v10610_v47, %v10609_v57  ;;  %v11202_v63 = vld [vmem:[#allocation2 + $0xf1] sm:$0xff]  ;;  %v11207_v47 = vld [vmem:[#allocation2 + $0x149] sm:$0xff] }
 0x99a   : > { %17666 = vmatprep.subr.bf16.mxu1 %v19838_v55  ;;  %v11206_v57 = vld [vmem:[#allocation2 + $0x131] sm:$0xff] }
 0x99d   : > { %17667 = vmatpush3.bf16.msra.mxu1 %v19838_v55  ;;  %v11204_v55 = vld [vmem:[#allocation2 + $0x111] sm:$0xff] }
 0x99e   : > { %17668 = vmatprep.subr.bf16.mxu1 %v19839_v6 }
 0x9a0   : > { %17637 = vmatmul.mubr.bf16.gmra.mrb[76].mxu1 %v21321_v20  ;;  %v19849_v20 = vld [vmem:[#allocation6 + $0x940] sm:$0xff]  }
 0x9a1   : > { %17640 = vmatprep.mubr.bf16.mxu1 %v21323_v27  ;;  %17669 = vmatpush3.bf16.msra.mxu1 %v19839_v6  ;;  %v19850_v27 = vld [vmem:[#allocation6 + $0x948] sm:$0xff]   ;;  %v11228_v6 = vpack.c.bf16 %v11202_v63, %v11201_v40  ;;  %v19860_v63 = vld [vmem:[#allocation6 + $0x918] sm:$0xff]  }
 0x9a2   : > { %17670 = vmatprep.subr.bf16.mxu1 %v19840_v19  ;;  %17752 = vmatprep.subr.bf16.mxu0 %v19849_v20 }
 0x9a3   : > { %17753 = vmatpush3.bf16.msra.mxu0 %v19849_v20 }
 0x9a4   : > { %17754 = vmatprep.subr.bf16.mxu0 %v19850_v27 }
 0x9a5   : > { %17671 = vmatpush3.bf16.msra.mxu1 %v19840_v19 }
 0x9a6   : > { %17704 = vmatprep.subr.bf16.mxu1 %v19841_v18 }
 0x9a7   : > { %17755 = vmatpush3.bf16.msra.mxu0 %v19850_v27 }
 0x9a8   : > { %17641 = vmatmul.mubr.bf16.gmra.mrb[80].mxu1 %v21327_v7  ;;  %v19851_v7 = vld [vmem:[#allocation6 + $0x950] sm:$0xff]  }
 0x9a9   : > { %17644 = vmatprep.mubr.bf16.mxu1 %v21329_v11  ;;  %v19842_v11 = vld [vmem:[#allocation6 + $0x8c8] sm:$0xff]   ;;  %17756 = vmatprep.subr.bf16.mxu0 %v19851_v7 }
 0x9ab   : > { %17757 = vmatpush3.bf16.msra.mxu0 %v19851_v7  ;;  %v11209_v7 = vld [vmem:[#allocation2 + $0x169] sm:$0xff] }
 0x9b0   : > { %17645 = vmatmul.mubr.bf16.gmra.mrb[84].mxu1 %v21333_v54  ;;  %v19852_v54 = vld [vmem:[#allocation6 + $0x958] sm:$0xff]  }
 0x9b1   : > { %17648 = vmatprep.mubr.bf16.mxu1 %v21335_v42  ;;  %v19843_v42 = vld [vmem:[#allocation6 + $0x8d0] sm:$0xff]   ;;  %17758 = vmatprep.subr.bf16.mxu0 %v19852_v54 }
 0x9b2   : > { %17759 = vmatpush3.bf16.msra.mxu0 %v19852_v54  ;;  %v11211_v54 = vld [vmem:[#allocation2 + $0x189] sm:$0xff] }
 0x9b8   : > { %17649 = vmatmul.mubr.bf16.gmra.mrb[88].mxu1 %v21339_v21  ;;  %v19853_v21 = vld [vmem:[#allocation6 + $0x960] sm:$0xff]  }
 0x9b9   : > { %17652 = vmatprep.mubr.bf16.mxu1 %v21402_v53  ;;  %17760 = vmatprep.subr.bf16.mxu0 %v19853_v21  ;;  %v10902_v53 = vld [vmem:[#allocation2 + $0x150] sm:$0xff] }
 0x9ba   : > { %17761 = vmatpush3.bf16.msra.mxu0 %v19853_v21  ;;  %v10925_v37 = vpack.c.bf16 %v10902_v53, %v21428_v22  ;;  %v11191_v22 = vld [vmem:[#allocation2 + $0x49] sm:$0xff]  ;;  %v11218_v53 = vld [vmem:[#allocation2 + $0x1f1] sm:$0xff] }
 0x9bb   : > { %17762 = vmatprep.subr.bf16.mxu0 %v19854_v3  ;;  %v11223_v36 = vpack.c.bf16 %v11192_v31, %v11191_v22  ;;  %v19858_v22 = vld [vmem:[#allocation6 + $0x908] sm:$0xff]  }
 0x9be   : > { %17763 = vmatpush3.bf16.msra.mxu0 %v19854_v3  ;;  %v11213_v3 = vld [vmem:[#allocation2 + $0x1a9] sm:$0xff] }
 0x9bf   : > { %17764 = vmatprep.subr.bf16.mxu0 %v19855_v0 }
 0x9c0   : > { %17653 = vmatmul.mubr.bf16.gmra.mrb[92].mxu1 %v10626_v58  ;;  %v11208_v58 = vld [vmem:[#allocation2 + $0x151] sm:$0xff] }
 0x9c1   : > { %17672 = vmatprep.mubr.bf16.mxu1 %v21405_v10  ;;  %v10899_v10 = vld [vmem:[#allocation2 + $0x128] sm:$0xff]  ;;  %v11231_v27 = vpack.c.bf16 %v11208_v58, %v11207_v47 }
 0x9c2   : > { %17765 = vmatpush3.bf16.msra.mxu0 %v19855_v0 }
 0x9c8   : > { %17673 = vmatmul.mubr.bf16.vlgmr.msra.gmra.mrb[64].mxu1 %v21407_v32  ;;  %v10924_v32 = vpack.c.bf16 %v10900_v5, %v10899_v10  ;;  %v11217_v5 = vld [vmem:[#allocation2 + $0x1e9] sm:$0xff] }
 0x9c9   : > { %17676 = vmatprep.mubr.bf16.mxu1 %v21411_v48  ;;  %17705 = vmatpush3.bf16.msra.mxu1 %v19841_v18  ;;  %v10906_v48 = vld [vmem:[#allocation2 + $0x190] sm:$0xff]  ;;  %v11236_v10 = vpack.c.bf16 %v11218_v53, %v11217_v5 }
 0x9ca   : > { %17706 = vmatprep.subr.bf16.mxu1 %v19842_v11  ;;  %v11205_v18 = vld [vmem:[#allocation2 + $0x129] sm:$0xff] }
 0x9cb   : > { %v11230_v20 = vpack.c.bf16 %v11206_v57, %v11205_v18 }
 0x9cd   : > { %17707 = vmatpush3.bf16.msra.mxu1 %v19842_v11  ;;  %v11210_v11 = vld [vmem:[#allocation2 + $0x171] sm:$0xff] }
 0x9ce   : > { %17708 = vmatprep.subr.bf16.mxu1 %v19843_v42  ;;  %v11232_v21 = vpack.c.bf16 %v11210_v11, %v11209_v7 }
 0x9d0   : > { %17677 = vmatmul.mubr.bf16.gmra.mrb[68].mxu1 %v21413_v28  ;;  %v10905_v28 = vld [vmem:[#allocation2 + $0x188] sm:$0xff] }
 0x9d1   : > { %17680 = vmatprep.mubr.bf16.mxu1 %v21419_v50  ;;  %17709 = vmatpush3.bf16.msra.mxu1 %v19843_v42  ;;  %v10927_v24 = vpack.c.bf16 %v10906_v48, %v10905_v28  ;;  %v10928_v50 = vpack.c.bf16 %v10908_v46, %v10907_v62  ;;  %v11212_v42 = vld [vmem:[#allocation2 + $0x191] sm:$0xff] }
 0x9d2   : > { %17710 = vmatprep.subr.bf16.mxu1 %v19844_v35  ;;  %v19856_v48 = vld [vmem:[#allocation6 + $0x978] sm:$0xff]  }
 0x9d3   : > { %17766 = vmatprep.subr.bf16.mxu0 %v19856_v48 }
 0x9d4   : > { %17767 = vmatpush3.bf16.msra.mxu0 %v19856_v48 }
 0x9d5   : > { %17711 = vmatpush3.bf16.msra.mxu1 %v19844_v35  ;;  %v11233_v35 = vpack.c.bf16 %v11212_v42, %v11211_v54  ;;  %17800 = vmatprep.subr.bf16.mxu0 %v19857_v34 }
 0x9d6   : > { %17712 = vmatprep.subr.bf16.mxu1 %v19845_v61 }
 0x9d8   : > { %17681 = vmatmul.mubr.bf16.gmra.mrb[72].mxu1 %v10922_v23  ;;  %v11216_v23 = vld [vmem:[#allocation2 + $0x1d1] sm:$0xff] }
 0x9d9   : > { %17684 = vmatprep.mubr.bf16.mxu1 %v21424_v8  ;;  %17713 = vmatpush3.bf16.msra.mxu1 %v19845_v61  ;;  %v10930_v8 = vpack.c.bf16 %v10912_v41, %v10911_v60  ;;  %v11214_v61 = vld [vmem:[#allocation2 + $0x1b1] sm:$0xff] }
 0x9da   : > { %17714 = vmatprep.subr.bf16.mxu1 %v19846_v2 }
 0x9dd   : > { %17715 = vmatpush3.bf16.msra.mxu1 %v19846_v2  ;;  %v11234_v2 = vpack.c.bf16 %v11214_v61, %v11213_v3 }
 0x9de   : > { %17716 = vmatprep.subr.bf16.mxu1 %v19847_v4 }
 0x9e0   : > { %17685 = vmatmul.mubr.bf16.gmra.mrb[76].mxu1 %v10924_v32  ;;  %v11221_v32 = vld [vmem:[#allocation2 + $0x229] sm:$0xff] }
 0x9e1   : > { %17688 = vmatprep.mubr.bf16.mxu1 %v10925_v37  ;;  %17717 = vmatpush3.bf16.msra.mxu1 %v19847_v4  ;;  %v11235_v4 = vpack.c.bf16 %v11216_v23, %v11215_v38 }
 0x9e2   : > { %17718 = vmatprep.subr.bf16.mxu1 %v19848_v16 }
 0x9e5   : > { %17719 = vmatpush3.bf16.msra.mxu1 %v19848_v16  ;;  %v11222_v16 = vld [vmem:[#allocation2 + $0x231] sm:$0xff] }
 0x9e6   : > { %v11238_v37 = vpack.c.bf16 %v11222_v16, %v11221_v32  ;;  %v19863_v32 = vld [vmem:[#allocation6 + $0x930] sm:$0xff]  }
 0x9e8   : > { %17689 = vmatmul.mubr.bf16.gmra.mrb[80].mxu1 %v10926_v44  ;;  %v21486_v44 = vld [vmem:[#allocation8 + $0x3] ss:$0 sm:$0xff] }
 0x9e9   : > { %17692 = vmatprep.mubr.bf16.mxu1 %v10927_v24 }
 0x9f0   : > { %17693 = vmatmul.mubr.bf16.gmra.mrb[84].mxu1 %v10928_v50 }
 0x9f1   : > { %17696 = vmatprep.mubr.bf16.mxu1 %v10929_v39 }
 0x9f8   : > { %17697 = vmatmul.mubr.bf16.gmra.mrb[88].mxu1 %v10930_v8 }
 0x9f9   : > { %17700 = vmatprep.mubr.bf16.mxu1 %v10931_v26 }
 0xa00   : > { %17701 = vmatmul.mubr.bf16.gmra.mrb[92].mxu1 %v21455_v25  ;;  %v11203_v25 = vld [vmem:[#allocation2 + $0x109] sm:$0xff] }
 0xa01   : > { %17720 = vmatprep.mubr.bf16.mxu1 %v11223_v36  ;;  %v11229_v19 = vpack.c.bf16 %v11204_v55, %v11203_v25 }
 0xa08   : > { %17721 = vmatmul.mubr.bf16.vlgmr.msra.gmra.mrb[64].mxu1 %v11224_v43 }
 0xa09   : > { %17724 = vmatprep.mubr.bf16.mxu1 %v11225_v17 }
 0xa10   : > { %17725 = vmatmul.mubr.bf16.gmra.mrb[68].mxu1 %v11226_v45 }
 0xa11   : > { %17728 = vmatprep.mubr.bf16.mxu1 %v11227_v14 }
 0xa18   : > { %17729 = vmatmul.mubr.bf16.gmra.mrb[72].mxu1 %v11228_v6 }
 0xa19   : > { %17732 = vmatprep.mubr.bf16.mxu1 %v11229_v19 }
 0xa20   : > { %17733 = vmatmul.mubr.bf16.gmra.mrb[76].mxu1 %v11230_v20 }
 0xa21   : > { %17736 = vmatprep.mubr.bf16.mxu1 %v11231_v27  ;;  %v19861_v27 = vld [vmem:[#allocation6 + $0x920] sm:$0xff]  }
 0xa28   : > { %17737 = vmatmul.mubr.bf16.gmra.mrb[80].mxu1 %v11232_v21 }
 0xa29   : > { %17740 = vmatprep.mubr.bf16.mxu1 %v11233_v35  ;;  %v19862_v35 = vld [vmem:[#allocation6 + $0x928] sm:$0xff]  }
 0xa30   : > { %17741 = vmatmul.mubr.bf16.gmra.mrb[84].mxu1 %v11234_v2 }
 0xa31   : > { %17744 = vmatprep.mubr.bf16.mxu1 %v11235_v4 }
 0xa38   : > { %17745 = vmatmul.mubr.bf16.gmra.mrb[88].mxu1 %v11236_v10 }
 0xa39   : > { %17748 = vmatprep.mubr.bf16.mxu1 %v21458_v56 }
 0xa40   : > { %17749 = vmatmul.mubr.bf16.gmra.mrb[92].mxu1 %v11238_v37 }
 0xadb   : > { %v17722_v28 = vpop.f32.mrb[64].mxu1 }
 0xadc   : > { %v11507_v24 = vadd.f32 %v17722_v28, %v21486_v44  ;;  %v11338_v46 = vpop.f32.mrb[65].mxu1  ;;  %v19864_v28 = vld [vmem:[#allocation6 + $0x938] sm:$0xff]  }
 0xadd   : > { %v11505_v56 = vadd.f32 %v21486_v44, %v11338_v46  ;;  %v17723_v15 = vpop.f32.mrb[66].mxu1 }
 0xade   : > { %v11539_v62 = vmax.f32 %v11507_v24, 0.0  ;;  %v11508_v50 = vadd.f32 %v17723_v15, %v21486_v44  ;;  %v11341_v52 = vpop.f32.mrb[67].mxu1 }
 0xadf   : > { %v11537_v39 = vmax.f32 %v11505_v56, 0.0  ;;  %v11506_v41 = vadd.f32 %v21486_v44, %v11341_v52 }
 0xae0   : > { %11571 = vst [vmem:[#allocation2 + $0x48] sm:$0xff] %v11539_v62  ;;  %v11540_v33 = vmax.f32 %v11508_v50, 0.0 }
 0xae1   : > { %11569 = vst [vmem:[#allocation2 + $0x28] sm:$0xff] %v11537_v39  ;;  %v11538_v60 = vmax.f32 %v11506_v41, 0.0 }
 0xae2   : > { %11572 = vst [vmem:[#allocation2 + $0x50] sm:$0xff] %v11540_v33  ;;  %v11700_v8 = vpack.c.bf16 %v11540_v33, %v11539_v62  ;;  %v21519_v33 = vld [vmem:[#allocation6 + $0x980] sm:$0xff]  }
 0xae3   : > { %11570 = vst [vmem:[#allocation2 + $0x30] sm:$0xff] %v11538_v60  ;;  %v17726_v12 = vpop.f32.mrb[68].mxu1  ;;  %v11699_v26 = vpack.c.bf16 %v11538_v60, %v11537_v39 }
 0xae4   : > { %v11511_v31 = vadd.f32 %v17726_v12, %v21486_v44  ;;  %v11354_v36 = vpop.f32.mrb[69].mxu1 }
 0xae5   : > { %v11509_v1 = vadd.f32 %v21486_v44, %v11354_v36  ;;  %v17727_v29 = vpop.f32.mrb[70].mxu1  ;;  %17769 = vmatmul.mubr.bf16.vlgmr.msra.gmra.mrb[64].mxu0 %v11699_v26 }
 0xae6   : > { %v11543_v13 = vmax.f32 %v11511_v31, 0.0  ;;  %v11512_v51 = vadd.f32 %v17727_v29, %v21486_v44  ;;  %v11357_v43 = vpop.f32.mrb[71].mxu1  ;;  %17772 = vmatprep.mubr.bf16.mxu0 %v11700_v8  ;;  %17801 = vmatpush3.bf16.msra.mxu0 %v19857_v34 }
 0xae7   : > { %v11541_v17 = vmax.f32 %v11509_v1, 0.0  ;;  %v11510_v9 = vadd.f32 %v21486_v44, %v11357_v43  ;;  %17802 = vmatprep.subr.bf16.mxu0 %v19858_v22 }
 0xae8   : > { %11575 = vst [vmem:[#allocation2 + $0x88] sm:$0xff] %v11543_v13  ;;  %v11544_v49 = vmax.f32 %v11512_v51, 0.0 }
 0xae9   : > { %11573 = vst [vmem:[#allocation2 + $0x68] sm:$0xff] %v11541_v17  ;;  %v11542_v59 = vmax.f32 %v11510_v9, 0.0 }
 0xaea   : > { %11576 = vst [vmem:[#allocation2 + $0x90] sm:$0xff] %v11544_v49  ;;  %v11702_v45 = vpack.c.bf16 %v11544_v49, %v11543_v13  ;;  %17803 = vmatpush3.bf16.msra.mxu0 %v19858_v22 }
 0xaeb   : > { %11574 = vst [vmem:[#allocation2 + $0x70] sm:$0xff] %v11542_v59  ;;  %v17730_v14 = vpop.f32.mrb[72].mxu1  ;;  %v11701_v40 = vpack.c.bf16 %v11542_v59, %v11541_v17  ;;  %17804 = vmatprep.subr.bf16.mxu0 %v19859_v30 }
 0xaec   : > { %v11515_v25 = vadd.f32 %v17730_v14, %v21486_v44  ;;  %v11370_v55 = vpop.f32.mrb[73].mxu1 }
 0xaed   : > { %v11513_v6 = vadd.f32 %v21486_v44, %v11370_v55  ;;  %v17731_v19 = vpop.f32.mrb[74].mxu1  ;;  %17773 = vmatmul.mubr.bf16.gmra.mrb[68].mxu0 %v11701_v40 }
 0xaee   : > { %v11547_v18 = vmax.f32 %v11515_v25, 0.0  ;;  %v11516_v57 = vadd.f32 %v17731_v19, %v21486_v44  ;;  %v11373_v47 = vpop.f32.mrb[75].mxu1  ;;  %17776 = vmatprep.mubr.bf16.mxu0 %v11702_v45  ;;  %17805 = vmatpush3.bf16.msra.mxu0 %v19859_v30 }
 0xaef   : > { %v11545_v58 = vmax.f32 %v11513_v6, 0.0  ;;  %v11514_v20 = vadd.f32 %v21486_v44, %v11373_v47  ;;  %17806 = vmatprep.subr.bf16.mxu0 %v19860_v63 }
 0xaf0   : > { %11579 = vst [vmem:[#allocation2 + $0xc8] sm:$0xff] %v11547_v18  ;;  %v11548_v7 = vmax.f32 %v11516_v57, 0.0 }
 0xaf1   : > { %11577 = vst [vmem:[#allocation2 + $0xa8] sm:$0xff] %v11545_v58  ;;  %v21500_v11 = vmax.f32 %v11514_v20, 0.0 }
 0xaf2   : > { %11580 = vst [vmem:[#allocation2 + $0xd0] sm:$0xff] %v11548_v7  ;;  %v11704_v54 = vpack.c.bf16 %v11548_v7, %v11547_v18  ;;  %17807 = vmatpush3.bf16.msra.mxu0 %v19860_v63 }
 0xaf3   : > { %11578 = vst [vmem:[#allocation2 + $0xb0] sm:$0xff] %v21500_v11  ;;  %v17734_v42 = vpop.f32.mrb[76].mxu1  ;;  %v11703_v21 = vpack.c.bf16 %v21500_v11, %v11545_v58  ;;  %17808 = vmatprep.subr.bf16.mxu0 %v19861_v27 }
 0xaf4   : > { %v11519_v3 = vadd.f32 %v17734_v42, %v21486_v44  ;;  %v11386_v61 = vpop.f32.mrb[77].mxu1 }
 0xaf5   : > { %v11517_v38 = vadd.f32 %v21486_v44, %v11386_v61  ;;  %v17735_v23 = vpop.f32.mrb[78].mxu1  ;;  %17777 = vmatmul.mubr.bf16.gmra.mrb[72].mxu0 %v11703_v21 }
 0xaf6   : > { %v11551_v2 = vmax.f32 %v11519_v3, 0.0  ;;  %v11520_v4 = vadd.f32 %v17735_v23, %v21486_v44  ;;  %v11389_v5 = vpop.f32.mrb[79].mxu1  ;;  %17780 = vmatprep.mubr.bf16.mxu0 %v11704_v54  ;;  %17809 = vmatpush3.bf16.msra.mxu0 %v19861_v27 }
 0xaf7   : > { %v11549_v53 = vmax.f32 %v11517_v38, 0.0  ;;  %v11518_v10 = vadd.f32 %v21486_v44, %v11389_v5  ;;  %17810 = vmatprep.subr.bf16.mxu0 %v19862_v35  ;;  %v11601_v5 = vld [vmem:[#allocation2 + $0x7] sm:$0xff] }
 0xaf8   : > { %11583 = vst [vmem:[#allocation2 + $0x108] sm:$0xff] %v11551_v2  ;;  %v21508_v16 = vmax.f32 %v11520_v4, 0.0 }
 0xaf9   : > { %11581 = vst [vmem:[#allocation2 + $0xe8] sm:$0xff] %v11549_v53  ;;  %v11550_v37 = vmax.f32 %v11518_v10, 0.0 }
 0xafa   : > { %11584 = vst [vmem:[#allocation2 + $0x110] sm:$0xff] %v21508_v16  ;;  %v11706_v0 = vpack.c.bf16 %v21508_v16, %v11551_v2  ;;  %17811 = vmatpush3.bf16.msra.mxu0 %v19862_v35 }
 0xafb   : > { %11582 = vst [vmem:[#allocation2 + $0xf0] sm:$0xff] %v11550_v37  ;;  %v17738_v48 = vpop.f32.mrb[80].mxu1  ;;  %v21512_v34 = vpack.c.bf16 %v11550_v37, %v11549_v53  ;;  %17812 = vmatprep.subr.bf16.mxu0 %v19863_v32  ;;  %v11602_v53 = vld [vmem:[#allocation2 + $0xf] sm:$0xff] }
 0xafc   : > { %v11523_v24 = vadd.f32 %v17738_v48, %v21486_v44  ;;  %v11402_v46 = vpop.f32.mrb[81].mxu1  ;;  %v11633_v37 = vpack.c.bf16 %v11602_v53, %v11601_v5 }
 0xafd   : > { %v11521_v56 = vadd.f32 %v21486_v44, %v11402_v46  ;;  %v17739_v15 = vpop.f32.mrb[82].mxu1  ;;  %17781 = vmatmul.mubr.bf16.gmra.mrb[76].mxu0 %v21512_v34  ;;  %v11603_v46 = vld [vmem:[#allocation2 + $0x27] sm:$0xff] }
 0xafe   : > { %v11555_v62 = vmax.f32 %v11523_v24, 0.0  ;;  %v11524_v50 = vadd.f32 %v17739_v15, %v21486_v44  ;;  %v11405_v52 = vpop.f32.mrb[83].mxu1  ;;  %17784 = vmatprep.mubr.bf16.mxu0 %v11706_v0  ;;  %17813 = vmatpush3.bf16.msra.mxu0 %v19863_v32  ;;  %v11606_v24 = vld [vmem:[#allocation2 + $0x4f] sm:$0xff] }
 0xaff   : > { %v11553_v39 = vmax.f32 %v11521_v56, 0.0  ;;  %v11522_v41 = vadd.f32 %v21486_v44, %v11405_v52  ;;  %17814 = vmatprep.subr.bf16.mxu0 %v19864_v28  ;;  %v11605_v56 = vld [vmem:[#allocation2 + $0x47] sm:$0xff]  ;;  %v11608_v52 = vld [vmem:[#allocation2 + $0x6f] sm:$0xff] }
 0xb00   : > { %11587 = vst [vmem:[#allocation2 + $0x148] sm:$0xff] %v11555_v62  ;;  %v11556_v60 = vmax.f32 %v11524_v50, 0.0  ;;  %v19866_v15 = vld [vmem:[#allocation6 + $0x988] sm:$0xff]   ;;  %v19867_v50 = vld [vmem:[#allocation6 + $0x990] sm:$0xff]  }
 0xb01   : > { %11585 = vst [vmem:[#allocation2 + $0x128] sm:$0xff] %v11553_v39  ;;  %v11554_v8 = vmax.f32 %v11522_v41, 0.0  ;;  %v11607_v41 = vld [vmem:[#allocation2 + $0x67] sm:$0xff] }
 0xb02   : > { %11588 = vst [vmem:[#allocation2 + $0x150] sm:$0xff] %v11556_v60  ;;  %v21521_v12 = vpack.c.bf16 %v11556_v60, %v11555_v62  ;;  %17815 = vmatpush3.bf16.msra.mxu0 %v19864_v28  ;;  %v11604_v28 = vld [vmem:[#allocation2 + $0x2f] sm:$0xff]  ;;  %v21559_v62 = vpack.c.bf16 %v11606_v24, %v11605_v56  ;;  %v21564_v60 = vpack.c.bf16 %v11608_v52, %v11607_v41 }
 0xb03   : > { %11586 = vst [vmem:[#allocation2 + $0x130] sm:$0xff] %v11554_v8  ;;  %v17742_v26 = vpop.f32.mrb[84].mxu1  ;;  %v21523_v22 = vpack.c.bf16 %v11554_v8, %v11553_v39  ;;  %17848 = vmatprep.subr.bf16.mxu0 %v21519_v33  ;;  %v11610_v39 = vld [vmem:[#allocation2 + $0x8f] sm:$0xff]  ;;  %v11609_v8 = vld [vmem:[#allocation2 + $0x87] sm:$0xff] }
 0xb04   : > { %v11527_v31 = vadd.f32 %v17742_v26, %v21486_v44  ;;  %v11418_v36 = vpop.f32.mrb[85].mxu1  ;;  %v19868_v26 = vld [vmem:[#allocation6 + $0x998] sm:$0xff]   ;;  %v12151_v56 = vld [vmem:[#allocation2 + $0x29] sm:$0xff] }
 0xb05   : > { %v11525_v1 = vadd.f32 %v21486_v44, %v11418_v36  ;;  %v17743_v29 = vpop.f32.mrb[86].mxu1  ;;  %17785 = vmatmul.mubr.bf16.gmra.mrb[80].mxu0 %v21523_v22  ;;  %v11612_v36 = vld [vmem:[#allocation2 + $0xaf] sm:$0xff] }
 0xb06   : > { %v11559_v13 = vmax.f32 %v11527_v31, 0.0  ;;  %v11528_v51 = vadd.f32 %v17743_v29, %v21486_v44  ;;  %v11421_v43 = vpop.f32.mrb[87].mxu1  ;;  %17788 = vmatprep.mubr.bf16.mxu0 %v21521_v12  ;;  %v21566_v31 = vpack.c.bf16 %v11610_v39, %v11609_v8  ;;  %v11611_v29 = vld [vmem:[#allocation2 + $0xa7] sm:$0xff]  ;;  %v12154_v52 = vld [vmem:[#allocation2 + $0x51] sm:$0xff] }
 0xb07   : > { %v11557_v17 = vmax.f32 %v11525_v1, 0.0  ;;  %v11526_v9 = vadd.f32 %v21486_v44, %v11421_v43  ;;  %v11614_v1 = vld [vmem:[#allocation2 + $0xcf] sm:$0xff] }
 0xb08   : > { %11591 = vst [vmem:[#allocation2 + $0x188] sm:$0xff] %v11559_v13  ;;  %v11560_v30 = vmax.f32 %v11528_v51, 0.0  ;;  %v11613_v51 = vld [vmem:[#allocation2 + $0xc7] sm:$0xff] }
 0xb09   : > { %11589 = vst [vmem:[#allocation2 + $0x168] sm:$0xff] %v11557_v17  ;;  %v11558_v49 = vmax.f32 %v11526_v9, 0.0  ;;  %v19870_v43 = vld [vmem:[#allocation6 + $0x9a8] sm:$0xff]   ;;  %v19871_v9 = vld [vmem:[#allocation6 + $0x9b0] sm:$0xff]  }
 0xb0a   : > { %11592 = vst [vmem:[#allocation2 + $0x190] sm:$0xff] %v11560_v30  ;;  %v21532_v59 = vpack.c.bf16 %v11560_v30, %v11559_v13  ;;  %v21570_v13 = vpack.c.bf16 %v11612_v36, %v11611_v29  ;;  %v11616_v30 = vld [vmem:[#allocation2 + $0xef] sm:$0xff] }
 0xb0b   : > { %11590 = vst [vmem:[#allocation2 + $0x170] sm:$0xff] %v11558_v49  ;;  %v17746_v45 = vpop.f32.mrb[88].mxu1  ;;  %v21534_v14 = vpack.c.bf16 %v11558_v49, %v11557_v17  ;;  %v21572_v17 = vpack.c.bf16 %v11614_v1, %v11613_v51  ;;  %v11618_v49 = vld [vmem:[#allocation2 + $0x10f] sm:$0xff] }
 0xb0c   : > { %v11531_v40 = vadd.f32 %v17746_v45, %v21486_v44  ;;  %v11434_v63 = vpop.f32.mrb[89].mxu1  ;;  %v11615_v45 = vld [vmem:[#allocation2 + $0xe7] sm:$0xff]  ;;  %v12156_v36 = vld [vmem:[#allocation2 + $0x71] sm:$0xff] }
 0xb0d   : > { %v11529_v25 = vadd.f32 %v21486_v44, %v11434_v63  ;;  %v17747_v55 = vpop.f32.mrb[90].mxu1  ;;  %17789 = vmatmul.mubr.bf16.gmra.mrb[84].mxu0 %v21534_v14  ;;  %v11617_v63 = vld [vmem:[#allocation2 + $0x107] sm:$0xff]  ;;  %v12158_v29 = vld [vmem:[#allocation2 + $0x91] sm:$0xff] }
 0xb0e   : > { %v11563_v6 = vmax.f32 %v11531_v40, 0.0  ;;  %v11532_v19 = vadd.f32 %v17747_v55, %v21486_v44  ;;  %v11437_v18 = vpop.f32.mrb[91].mxu1  ;;  %17792 = vmatprep.mubr.bf16.mxu0 %v21532_v59  ;;  %v21576_v40 = vpack.c.bf16 %v11616_v30, %v11615_v45  ;;  %v21578_v55 = vpack.c.bf16 %v11618_v49, %v11617_v63  ;;  %v19874_v41 = vld [vmem:[#allocation6 + $0x9c8] sm:$0xff]   ;;  %v19877_v30 = vld [vmem:[#allocation6 + $0x9e0] sm:$0xff]   ;;  %v12160_v45 = vld [vmem:[#allocation2 + $0xb1] sm:$0xff] }
 0xb0f   : > { %v11561_v57 = vmax.f32 %v11529_v25, 0.0  ;;  %v11530_v47 = vadd.f32 %v21486_v44, %v11437_v18  ;;  %v19872_v25 = vld [vmem:[#allocation6 + $0x9b8] sm:$0xff]   ;;  %v11622_v18 = vld [vmem:[#allocation2 + $0x14f] sm:$0xff] }
 0xb10   : > { %11595 = vst [vmem:[#allocation2 + $0x1c8] sm:$0xff] %v11563_v6  ;;  %v11564_v58 = vmax.f32 %v11532_v19, 0.0  ;;  %v11620_v19 = vld [vmem:[#allocation2 + $0x12f] sm:$0xff] }
 0xb11   : > { %11593 = vst [vmem:[#allocation2 + $0x1a8] sm:$0xff] %v11561_v57  ;;  %v11562_v20 = vmax.f32 %v11530_v47, 0.0  ;;  %v12157_v1 = vld [vmem:[#allocation2 + $0x89] sm:$0xff] }
 0xb12   : > { %11596 = vst [vmem:[#allocation2 + $0x1d0] sm:$0xff] %v11564_v58  ;;  %v21542_v27 = vpack.c.bf16 %v11564_v58, %v11563_v6  ;;  %v19873_v6 = vld [vmem:[#allocation6 + $0x9c0] sm:$0xff]   ;;  %v12159_v49 = vld [vmem:[#allocation2 + $0xa9] sm:$0xff] }
 0xb13   : > { %11594 = vst [vmem:[#allocation2 + $0x1b0] sm:$0xff] %v11562_v20  ;;  %v17750_v7 = vpop.f32.mrb[92].mxu1  ;;  %v21544_v54 = vpack.c.bf16 %v11562_v20, %v11561_v57  ;;  %v11619_v57 = vld [vmem:[#allocation2 + $0x127] sm:$0xff] }
 0xb14   : > { %v11535_v42 = vadd.f32 %v17750_v7, %v21486_v44  ;;  %v11450_v21 = vpop.f32.mrb[93].mxu1  ;;  %v21582_v47 = vpack.c.bf16 %v11620_v19, %v11619_v57  ;;  %v11621_v58 = vld [vmem:[#allocation2 + $0x147] sm:$0xff]  ;;  %v11624_v7 = vld [vmem:[#allocation2 + $0x16f] sm:$0xff] }
 0xb15   : > { %v11533_v35 = vadd.f32 %v21486_v44, %v11450_v21  ;;  %v17751_v3 = vpop.f32.mrb[94].mxu1  ;;  %17793 = vmatmul.mubr.bf16.gmra.mrb[88].mxu0 %v21544_v54  ;;  %v21584_v20 = vpack.c.bf16 %v11622_v18, %v11621_v58  ;;  %v11623_v21 = vld [vmem:[#allocation2 + $0x167] sm:$0xff]  ;;  %v19879_v57 = vld [vmem:[#allocation6 + $0x9f0] sm:$0xff]  }
 0xb16   : > { %v11567_v61 = vmax.f32 %v11535_v42, 0.0  ;;  %v11536_v38 = vadd.f32 %v17751_v3, %v21486_v44  ;;  %v11453_v23 = vpop.f32.mrb[95].mxu1  ;;  %17796 = vmatprep.mubr.bf16.mxu0 %v21542_v27  ;;  %v11626_v42 = vld [vmem:[#allocation2 + $0x18f] sm:$0xff]  ;;  %v11625_v3 = vld [vmem:[#allocation2 + $0x187] sm:$0xff] }
 0xb17   : > { %v11565_v2 = vmax.f32 %v11533_v35, 0.0  ;;  %v11534_v4 = vadd.f32 %v21486_v44, %v11453_v23  ;;  %v21557_v44 = vpack.c.bf16 %v11604_v28, %v11603_v46  ;;  %v21588_v35 = vpack.c.bf16 %v11624_v7, %v11623_v21  ;;  %v11629_v5 = vld [vmem:[#allocation2 + $0x1c7] sm:$0xff]  ;;  %v12164_v7 = vld [vmem:[#allocation2 + $0xf1] sm:$0xff] }
 0xb18   : > { %11599 = vst [vmem:[#allocation2 + $0x208] sm:$0xff] %v11567_v61  ;;  %v11568_v10 = vmax.f32 %v11536_v38, 0.0  ;;  %v12161_v63 = vld [vmem:[#allocation2 + $0xc9] sm:$0xff]  ;;  %v12166_v21 = vld [vmem:[#allocation2 + $0x111] sm:$0xff] }
 0xb19   : > { %11597 = vst [vmem:[#allocation2 + $0x1e8] sm:$0xff] %v11565_v2  ;;  %v11566_v32 = vmax.f32 %v11534_v4, 0.0  ;;  %v11630_v23 = vld [vmem:[#allocation2 + $0x1cf] sm:$0xff] }
 0xb1a   : > { %11600 = vst [vmem:[#allocation2 + $0x210] sm:$0xff] %v11568_v10  ;;  %v21552_v0 = vpack.c.bf16 %v11568_v10, %v11567_v61  ;;  %v21590_v61 = vpack.c.bf16 %v11626_v42, %v11625_v3  ;;  %v11628_v38 = vld [vmem:[#allocation2 + $0x1af] sm:$0xff]  ;;  %v21596_v53 = vpack.c.bf16 %v11630_v23, %v11629_v5 }
 0xb1b   : > { %11598 = vst [vmem:[#allocation2 + $0x1f0] sm:$0xff] %v11566_v32  ;;  %v21554_v48 = vpack.c.bf16 %v11566_v32, %v11565_v2  ;;  %v11627_v2 = vld [vmem:[#allocation2 + $0x1a7] sm:$0xff]  ;;  %v12150_v32 = vld [vmem:[#allocation2 + $0x11] sm:$0xff] }
 0xb1c   : > { %v21594_v4 = vpack.c.bf16 %v11628_v38, %v11627_v2  ;;  %v12149_v10 = vld [vmem:[#allocation2 + $0x9] sm:$0xff]  ;;  %v19880_v38 = vld [vmem:[#allocation6 + $0x9f8] sm:$0xff]   ;;  %v19881_v2 = vld [vmem:[#allocation6 + $0xa00] sm:$0xff]  }
 0xb1d   : > { %17797 = vmatmul.mubr.bf16.gmra.mrb[92].mxu0 %v21554_v48  ;;  %v12181_v24 = vpack.c.bf16 %v12150_v32, %v12149_v10  ;;  %v19878_v19 = vld [vmem:[#allocation6 + $0x9e8] sm:$0xff]   ;;  %v12168_v10 = vld [vmem:[#allocation2 + $0x131] sm:$0xff] }
 0xb1e   : > { %17816 = vmatprep.mubr.bf16.mxu0 %v11633_v37  ;;  %v12163_v58 = vld [vmem:[#allocation2 + $0xe9] sm:$0xff] }
 0xb1f   : > { %v12165_v42 = vld [vmem:[#allocation2 + $0x109] sm:$0xff]  ;;  %v21621_v3 = vpack.c.bf16 %v12164_v7, %v12163_v58  ;;  %v19885_v58 = vld [vmem:[#allocation6 + $0xa20] sm:$0xff]  }
 0xb20   : > { %v11631_v28 = vld [vmem:[#allocation2 + $0x1e7] sm:$0xff]  ;;  %v21623_v23 = vpack.c.bf16 %v12166_v21, %v12165_v42  ;;  %v19887_v7 = vld [vmem:[#allocation6 + $0xa30] sm:$0xff]   ;;  %v19888_v42 = vld [vmem:[#allocation6 + $0xa38] sm:$0xff]  }
 0xb21   : > { %v12167_v5 = vld [vmem:[#allocation2 + $0x129] sm:$0xff]  ;;  %v19889_v21 = vld [vmem:[#allocation6 + $0xa40] sm:$0xff]  }
 0xb22   : > { %v11632_v37 = vld [vmem:[#allocation2 + $0x1ef] sm:$0xff] }
 0xb23   : > { %v21600_v46 = vpack.c.bf16 %v11632_v37, %v11631_v28  ;;  %v12169_v32 = vld [vmem:[#allocation2 + $0x149] sm:$0xff]  ;;  %v12170_v37 = vld [vmem:[#allocation2 + $0x151] sm:$0xff]  ;;  %v21627_v28 = vpack.c.bf16 %v12168_v10, %v12167_v5 }
 0xb24   : > { %v12485_v5 = vld [vmem:[#allocation2 + $0x207] sm:$0xff] }
 0xb25   : > { %17817 = vmatmul.mubr.bf16.vlgmr.msra.gmra.mrb[64].mxu0 %v21557_v44 }
 0xb26   : > { %17820 = vmatprep.mubr.bf16.mxu0 %v21559_v62  ;;  %17849 = vmatpush3.bf16.msra.mxu0 %v21519_v33  ;;  %v19869_v33 = vld [vmem:[#allocation6 + $0x9a0] sm:$0xff]  }
 0xb27   : > { %17850 = vmatprep.subr.bf16.mxu0 %v19866_v15 }
 0xb2a   : > { %17851 = vmatpush3.bf16.msra.mxu0 %v19866_v15  ;;  %v12152_v15 = vld [vmem:[#allocation2 + $0x31] sm:$0xff] }
 0xb2b   : > { %17852 = vmatprep.subr.bf16.mxu0 %v19867_v50  ;;  %v21603_v39 = vpack.c.bf16 %v12152_v15, %v12151_v56  ;;  %v12171_v56 = vld [vmem:[#allocation2 + $0x169] sm:$0xff]  ;;  %v12172_v15 = vld [vmem:[#allocation2 + $0x171] sm:$0xff] }
 0xb2d   : > { %17821 = vmatmul.mubr.bf16.gmra.mrb[68].mxu0 %v21564_v60 }
 0xb2e   : > { %17824 = vmatprep.mubr.bf16.mxu0 %v21566_v31  ;;  %17853 = vmatpush3.bf16.msra.mxu0 %v19867_v50  ;;  %v12153_v50 = vld [vmem:[#allocation2 + $0x49] sm:$0xff] }
 0xb2f   : > { %17854 = vmatprep.subr.bf16.mxu0 %v19868_v26  ;;  %v21605_v8 = vpack.c.bf16 %v12154_v52, %v12153_v50  ;;  %v12173_v50 = vld [vmem:[#allocation2 + $0x189] sm:$0xff]  ;;  %v12174_v52 = vld [vmem:[#allocation2 + $0x191] sm:$0xff] }
 0xb32   : > { %17855 = vmatpush3.bf16.msra.mxu0 %v19868_v26  ;;  %v19875_v26 = vld [vmem:[#allocation6 + $0x9d0] sm:$0xff]  }
 0xb33   : > { %17856 = vmatprep.subr.bf16.mxu0 %v19869_v33 }
 0xb35   : > { %17825 = vmatmul.mubr.bf16.gmra.mrb[72].mxu0 %v21570_v13 }
 0xb36   : > { %17828 = vmatprep.mubr.bf16.mxu0 %v21572_v17  ;;  %17857 = vmatpush3.bf16.msra.mxu0 %v19869_v33  ;;  %v12155_v33 = vld [vmem:[#allocation2 + $0x69] sm:$0xff] }
 0xb37   : > { %17858 = vmatprep.subr.bf16.mxu0 %v19870_v43  ;;  %v21609_v51 = vpack.c.bf16 %v12156_v36, %v12155_v33  ;;  %v12175_v33 = vld [vmem:[#allocation2 + $0x1a9] sm:$0xff]  ;;  %v12176_v36 = vld [vmem:[#allocation2 + $0x1b1] sm:$0xff] }
 0xb3a   : > { %17859 = vmatpush3.bf16.msra.mxu0 %v19870_v43  ;;  %v19876_v43 = vld [vmem:[#allocation6 + $0x9d8] sm:$0xff]  }
 0xb3b   : > { %17860 = vmatprep.subr.bf16.mxu0 %v19871_v9 }
 0xb3d   : > { %17829 = vmatmul.mubr.bf16.gmra.mrb[76].mxu0 %v21576_v40 }
 0xb3e   : > { %17832 = vmatprep.mubr.bf16.mxu0 %v21578_v55  ;;  %17861 = vmatpush3.bf16.msra.mxu0 %v19871_v9  ;;  %v21611_v9 = vpack.c.bf16 %v12158_v29, %v12157_v1  ;;  %v12177_v1 = vld [vmem:[#allocation2 + $0x1c9] sm:$0xff]  ;;  %v12178_v29 = vld [vmem:[#allocation2 + $0x1d1] sm:$0xff] }
 0xb3f   : > { %17862 = vmatprep.subr.bf16.mxu0 %v19872_v25 }
 0xb42   : > { %17863 = vmatpush3.bf16.msra.mxu0 %v19872_v25  ;;  %v12162_v25 = vld [vmem:[#allocation2 + $0xd1] sm:$0xff] }
 0xb43   : > { %17896 = vmatprep.subr.bf16.mxu0 %v19873_v6  ;;  %v21617_v18 = vpack.c.bf16 %v12162_v25, %v12161_v63  ;;  %v19882_v25 = vld [vmem:[#allocation6 + $0xa08] sm:$0xff]  }
 0xb45   : > { %17833 = vmatmul.mubr.bf16.gmra.mrb[80].mxu0 %v21582_v47 }
 0xb46   : > { %17836 = vmatprep.mubr.bf16.mxu0 %v21584_v20 }
 0xb4d   : > { %17837 = vmatmul.mubr.bf16.gmra.mrb[84].mxu0 %v21588_v35 }
 0xb4e   : > { %17840 = vmatprep.mubr.bf16.mxu0 %v21590_v61 }
 0xb55   : > { %17841 = vmatmul.mubr.bf16.gmra.mrb[88].mxu0 %v21594_v4 }
 0xb56   : > { %17844 = vmatprep.mubr.bf16.mxu0 %v21596_v53 }
 0xb5d   : > { %17845 = vmatmul.mubr.bf16.gmra.mrb[92].mxu0 %v21600_v46 }
 0xb5e   : > { %17864 = vmatprep.mubr.bf16.mxu0 %v12181_v24  ;;  %v21629_v24 = vpack.c.bf16 %v12170_v37, %v12169_v32  ;;  %v12761_v32 = vld [vmem:[#allocation2 + $0x28] sm:$0xff] }
 0xb65   : > { %17865 = vmatmul.mubr.bf16.vlgmr.msra.gmra.mrb[64].mxu0 %v21603_v39 }
 0xb66   : > { %17868 = vmatprep.mubr.bf16.mxu0 %v21605_v8  ;;  %17897 = vmatpush3.bf16.msra.mxu0 %v19873_v6  ;;  %v21615_v6 = vpack.c.bf16 %v12160_v45, %v12159_v49  ;;  %v12179_v49 = vld [vmem:[#allocation2 + $0x1e9] sm:$0xff]  ;;  %v12180_v45 = vld [vmem:[#allocation2 + $0x1f1] sm:$0xff] }
 0xb67   : > { %17898 = vmatprep.subr.bf16.mxu0 %v19874_v41  ;;  %v21645_v63 = vpack.c.bf16 %v12180_v45, %v12179_v49  ;;  %v12768_v49 = vld [vmem:[#allocation2 + $0x90] sm:$0xff]  ;;  %v21672_v45 = vld [vmem:[#allocation2 + $0xa8] sm:$0xff] }
 0xb6a   : > { %17899 = vmatpush3.bf16.msra.mxu0 %v19874_v41  ;;  %v21633_v41 = vpack.c.bf16 %v12172_v15, %v12171_v56  ;;  %v12764_v56 = vld [vmem:[#allocation2 + $0x50] sm:$0xff] }
 0xb6b   : > { %17900 = vmatprep.subr.bf16.mxu0 %v19875_v26  ;;  %v12766_v15 = vld [vmem:[#allocation2 + $0x70] sm:$0xff] }
 0xb6d   : > { %17869 = vmatmul.mubr.bf16.gmra.mrb[68].mxu0 %v21609_v51 }
 0xb6e   : > { %17872 = vmatprep.mubr.bf16.mxu0 %v21611_v9  ;;  %17901 = vmatpush3.bf16.msra.mxu0 %v19875_v26  ;;  %v21635_v26 = vpack.c.bf16 %v12174_v52, %v12173_v50  ;;  %v12763_v50 = vld [vmem:[#allocation2 + $0x48] sm:$0xff] }
 0xb6f   : > { %17902 = vmatprep.subr.bf16.mxu0 %v19876_v43  ;;  %v21666_v52 = vpack.c.bf16 %v12764_v56, %v12763_v50  ;;  %v19920_v56 = vld [vmem:[#allocation6 + $0xb38] sm:$0xff]   ;;  %v13698_v50 = vld [vmem:[#allocation2 + $0x170] sm:$0xff] }
 0xb72   : > { %17903 = vmatpush3.bf16.msra.mxu0 %v19876_v43  ;;  %v21639_v43 = vpack.c.bf16 %v12176_v36, %v12175_v33  ;;  %v12765_v33 = vld [vmem:[#allocation2 + $0x68] sm:$0xff] }
 0xb73   : > { %17904 = vmatprep.subr.bf16.mxu0 %v19877_v30  ;;  %v19890_v36 = vld [vmem:[#allocation6 + $0xa48] sm:$0xff]  }
 0xb75   : > { %17873 = vmatmul.mubr.bf16.gmra.mrb[72].mxu0 %v21615_v6 }
 0xb76   : > { %17876 = vmatprep.mubr.bf16.mxu0 %v21617_v18  ;;  %17905 = vmatpush3.bf16.msra.mxu0 %v19877_v30  ;;  %v21641_v30 = vpack.c.bf16 %v12178_v29, %v12177_v1  ;;  %v21668_v1 = vpack.c.bf16 %v12766_v15, %v12765_v33  ;;  %v19891_v29 = vld [vmem:[#allocation6 + $0xa50] sm:$0xff]   ;;  %v13697_v33 = vld [vmem:[#allocation2 + $0x168] sm:$0xff] }
 0xb77   : > { %17906 = vmatprep.subr.bf16.mxu0 %v19878_v19 }
 0xb7a   : > { %17907 = vmatpush3.bf16.msra.mxu0 %v19878_v19  ;;  %v19883_v19 = vld [vmem:[#allocation6 + $0xa10] sm:$0xff]  }
 0xb7b   : > { %17908 = vmatprep.subr.bf16.mxu0 %v19879_v57 }
 0xb7d   : > { %17877 = vmatmul.mubr.bf16.gmra.mrb[76].mxu0 %v21621_v3 }
 0xb7e   : > { %17880 = vmatprep.mubr.bf16.mxu0 %v21623_v23  ;;  %17909 = vmatpush3.bf16.msra.mxu0 %v19879_v57  ;;  %v19884_v57 = vld [vmem:[#allocation6 + $0xa18] sm:$0xff]  }
 0xb7f   : > { %17910 = vmatprep.subr.bf16.mxu0 %v19880_v38 }
 0xb82   : > { %17911 = vmatpush3.bf16.msra.mxu0 %v19880_v38  ;;  %v12486_v38 = vld [vmem:[#allocation2 + $0x20f] sm:$0xff] }
 0xb83   : > { %17944 = vmatprep.subr.bf16.mxu0 %v19881_v2  ;;  %v21663_v10 = vpack.c.bf16 %v12486_v38, %v12485_v5  ;;  %v19894_v38 = vld [vmem:[#allocation6 + $0xa68] sm:$0xff]  }
 0xb85   : > { %17881 = vmatmul.mubr.bf16.gmra.mrb[80].mxu0 %v21627_v28 }
 0xb86   : > { %17884 = vmatprep.mubr.bf16.mxu0 %v21629_v24 }
 0xb8d   : > { %17885 = vmatmul.mubr.bf16.gmra.mrb[84].mxu0 %v21633_v41 }
 0xb8e   : > { %17888 = vmatprep.mubr.bf16.mxu0 %v21635_v26 }
 0xb95   : > { %17889 = vmatmul.mubr.bf16.gmra.mrb[88].mxu0 %v21639_v43 }
 0xb96   : > { %17892 = vmatprep.mubr.bf16.mxu0 %v21641_v30 }
 0xb9d   : > { %17893 = vmatmul.mubr.bf16.gmra.mrb[92].mxu0 %v21645_v63 }
 0xb9e   : > { %17912 = vmatprep.mubr.bf16.mxu0 %v21557_v44  ;;  %v19886_v44 = vld [vmem:[#allocation6 + $0xa28] sm:$0xff]  }
 0xba5   : > { %17913 = vmatmul.mubr.bf16.vlgmr.msra.gmra.mrb[64].mxu0 %v21559_v62 }
 0xba6   : > { %17916 = vmatprep.mubr.bf16.mxu0 %v21564_v60  ;;  %17945 = vmatpush3.bf16.msra.mxu0 %v19881_v2  ;;  %v12762_v2 = vld [vmem:[#allocation2 + $0x30] sm:$0xff] }
 0xba7   : > { %17946 = vmatprep.subr.bf16.mxu0 %v19882_v25  ;;  %v12793_v37 = vpack.c.bf16 %v12762_v2, %v12761_v32  ;;  %v21683_v2 = vld [vmem:[#allocation2 + $0x108] sm:$0xff]  ;;  %v19896_v32 = vld [vmem:[#allocation6 + $0xa78] sm:$0xff]  }
 0xba8   : > { %v12800_v5 = vpack.c.bf16 %v21508_v16, %v21683_v2  ;;  %v19898_v16 = vld [vmem:[#allocation6 + $0xa88] sm:$0xff]  }
 0xbaa   : > { %17947 = vmatpush3.bf16.msra.mxu0 %v19882_v25  ;;  %v12767_v25 = vld [vmem:[#allocation2 + $0x88] sm:$0xff] }
 0xbab   : > { %17948 = vmatprep.subr.bf16.mxu0 %v19883_v19 }
 0xbad   : > { %17917 = vmatmul.mubr.bf16.gmra.mrb[68].mxu0 %v21566_v31 }
 0xbae   : > { %17920 = vmatprep.mubr.bf16.mxu0 %v21570_v13  ;;  %17949 = vmatpush3.bf16.msra.mxu0 %v19883_v19  ;;  %v21674_v19 = vpack.c.bf16 %v12768_v49, %v12767_v25  ;;  %v13702_v49 = vld [vmem:[#allocation2 + $0x1b0] sm:$0xff]  ;;  %v13701_v25 = vld [vmem:[#allocation2 + $0x1a8] sm:$0xff] }
 0xbaf   : > { %17950 = vmatprep.subr.bf16.mxu0 %v19884_v57 }
 0xbb2   : > { %17951 = vmatpush3.bf16.msra.mxu0 %v19884_v57  ;;  %v19892_v57 = vld [vmem:[#allocation6 + $0xa58] sm:$0xff]  }
 0xbb3   : > { %17952 = vmatprep.subr.bf16.mxu0 %v19885_v58 }
 0xbb5   : > { %17921 = vmatmul.mubr.bf16.gmra.mrb[72].mxu0 %v21572_v17 }
 0xbb6   : > { %17924 = vmatprep.mubr.bf16.mxu0 %v21576_v40  ;;  %17953 = vmatpush3.bf16.msra.mxu0 %v19885_v58  ;;  %v12797_v58 = vpack.c.bf16 %v21500_v11, %v21672_v45  ;;  %v19895_v11 = vld [vmem:[#allocation6 + $0xa70] sm:$0xff]  }
 0xbb7   : > { %17954 = vmatprep.subr.bf16.mxu0 %v19886_v44 }
 0xbba   : > { %17955 = vmatpush3.bf16.msra.mxu0 %v19886_v44  ;;  %v19893_v44 = vld [vmem:[#allocation6 + $0xa60] sm:$0xff]  }
 0xbbb   : > { %17956 = vmatprep.subr.bf16.mxu0 %v19887_v7 }
 0xbbd   : > { %17925 = vmatmul.mubr.bf16.gmra.mrb[76].mxu0 %v21578_v55 }
 0xbbe   : > { %17928 = vmatprep.mubr.bf16.mxu0 %v21582_v47  ;;  %17957 = vmatpush3.bf16.msra.mxu0 %v19887_v7  ;;  %v12772_v7 = vld [vmem:[#allocation2 + $0xd0] sm:$0xff] }
 0xbbf   : > { %17958 = vmatprep.subr.bf16.mxu0 %v19888_v42 }
 0xbc2   : > { %17959 = vmatpush3.bf16.msra.mxu0 %v19888_v42  ;;  %v12771_v42 = vld [vmem:[#allocation2 + $0xc8] sm:$0xff] }
 0xbc3   : > { %17992 = vmatprep.subr.bf16.mxu0 %v19889_v21 }
 0xbc5   : > { %17929 = vmatmul.mubr.bf16.gmra.mrb[80].mxu0 %v21584_v20 }
 0xbc6   : > { %17932 = vmatprep.mubr.bf16.mxu0 %v21588_v35 }
 0xbcd   : > { %17933 = vmatmul.mubr.bf16.gmra.mrb[84].mxu0 %v21590_v61 }
 0xbce   : > { %17936 = vmatprep.mubr.bf16.mxu0 %v21594_v4 }
 0xbd5   : > { %17937 = vmatmul.mubr.bf16.gmra.mrb[88].mxu0 %v21596_v53 }
 0xbd6   : > { %17940 = vmatprep.mubr.bf16.mxu0 %v21600_v46 }
 0xbdd   : > { %17941 = vmatmul.mubr.bf16.gmra.mrb[92].mxu0 %v21663_v10 }
 0xbde   : > { %17960 = vmatprep.mubr.bf16.mxu0 %v12793_v37  ;;  %v19897_v37 = vld [vmem:[#allocation6 + $0xa80] sm:$0xff]  }
 0xbe5   : > { %17961 = vmatmul.mubr.bf16.vlgmr.msra.gmra.mrb[64].mxu0 %v21666_v52 }
 0xbe6   : > { %17964 = vmatprep.mubr.bf16.mxu0 %v21668_v1  ;;  %17993 = vmatpush3.bf16.msra.mxu0 %v19889_v21  ;;  %v21679_v21 = vpack.c.bf16 %v12772_v7, %v12771_v42  ;;  %v13708_v7 = vld [vmem:[#allocation2 + $0x210] sm:$0xff]  ;;  %v13705_v42 = vld [vmem:[#allocation2 + $0x1e8] sm:$0xff] }
 0xbe7   : > { %17994 = vmatprep.subr.bf16.mxu0 %v19890_v36 }
 0xbea   : > { %17995 = vmatpush3.bf16.msra.mxu0 %v19890_v36  ;;  %v13720_v36 = vpack.c.bf16 %v13698_v50, %v13697_v33  ;;  %v14016_v50 = vld [vmem:[#allocation2 + $0x231] sm:$0xff] }
 0xbeb   : > { %17996 = vmatprep.subr.bf16.mxu0 %v19891_v29 }
 0xbed   : > { %17965 = vmatmul.mubr.bf16.gmra.mrb[68].mxu0 %v21674_v19 }
 0xbee   : > { %17968 = vmatprep.mubr.bf16.mxu0 %v12797_v58  ;;  %17997 = vmatpush3.bf16.msra.mxu0 %v19891_v29 }
 0xbef   : > { %17998 = vmatprep.subr.bf16.mxu0 %v19892_v57 }
 0xbf2   : > { %17999 = vmatpush3.bf16.msra.mxu0 %v19892_v57  ;;  %v13703_v57 = vld [vmem:[#allocation2 + $0x1c8] sm:$0xff] }
 0xbf3   : > { %18000 = vmatprep.subr.bf16.mxu0 %v19893_v44 }
 0xbf5   : > { %17969 = vmatmul.mubr.bf16.gmra.mrb[72].mxu0 %v21679_v21 }
 0xbf6   : > { %17972 = vmatprep.mubr.bf16.mxu0 %v21512_v34  ;;  %18001 = vmatpush3.bf16.msra.mxu0 %v19893_v44  ;;  %v19899_v34 = vld [vmem:[#allocation6 + $0xa90] sm:$0xff]  }
 0xbf7   : > { %18002 = vmatprep.subr.bf16.mxu0 %v19894_v38  ;;  %v13706_v44 = vld [vmem:[#allocation2 + $0x1f0] sm:$0xff] }
 0xbfa   : > { %18003 = vmatpush3.bf16.msra.mxu0 %v19894_v38  ;;  %v13707_v38 = vld [vmem:[#allocation2 + $0x208] sm:$0xff] }
 0xbfb   : > { %18004 = vmatprep.subr.bf16.mxu0 %v19895_v11 }
 0xbfd   : > { %17973 = vmatmul.mubr.bf16.gmra.mrb[76].mxu0 %v12800_v5 }
 0xbfe   : > { %17976 = vmatprep.mubr.bf16.mxu0 %v21523_v22  ;;  %18005 = vmatpush3.bf16.msra.mxu0 %v19895_v11  ;;  %v19901_v22 = vld [vmem:[#allocation6 + $0xaa0] sm:$0xff]   ;;  %v13725_v11 = vpack.c.bf16 %v13708_v7, %v13707_v38 }
 0xbff   : > { %18006 = vmatprep.subr.bf16.mxu0 %v19896_v32 }
 0xc02   : > { %18007 = vmatpush3.bf16.msra.mxu0 %v19896_v32  ;;  %v13985_v32 = vld [vmem:[#allocation2 + $0x49] sm:$0xff] }
 0xc03   : > { %18040 = vmatprep.subr.bf16.mxu0 %v19897_v37 }
 0xc05   : > { %17977 = vmatmul.mubr.bf16.gmra.mrb[80].mxu0 %v21521_v12  ;;  %v19900_v12 = vld [vmem:[#allocation6 + $0xa98] sm:$0xff]  }
 0xc06   : > { %17980 = vmatprep.mubr.bf16.mxu0 %v21534_v14  ;;  %v19903_v14 = vld [vmem:[#allocation6 + $0xab0] sm:$0xff]  }
 0xc0d   : > { %17981 = vmatmul.mubr.bf16.gmra.mrb[84].mxu0 %v21532_v59  ;;  %v19902_v59 = vld [vmem:[#allocation6 + $0xaa8] sm:$0xff]  }
 0xc0e   : > { %17984 = vmatprep.mubr.bf16.mxu0 %v21544_v54  ;;  %v19905_v54 = vld [vmem:[#allocation6 + $0xac0] sm:$0xff]  }
 0xc15   : > { %17985 = vmatmul.mubr.bf16.gmra.mrb[88].mxu0 %v21542_v27  ;;  %v19904_v27 = vld [vmem:[#allocation6 + $0xab8] sm:$0xff]  }
 0xc16   : > { %17988 = vmatprep.mubr.bf16.mxu0 %v21554_v48  ;;  %v13098_v48 = vld [vmem:[#allocation2 + $0x211] sm:$0xff] }
 0xc1d   : > { %17989 = vmatmul.mubr.bf16.gmra.mrb[92].mxu0 %v21552_v0  ;;  %v13097_v0 = vld [vmem:[#allocation2 + $0x209] sm:$0xff] }
 0xc1e   : > { %18008 = vmatprep.mubr.bf16.mxu0 %v21603_v39  ;;  %v21710_v39 = vpack.c.bf16 %v13098_v48, %v13097_v0  ;;  %v13992_v0 = vld [vmem:[#allocation2 + $0xb1] sm:$0xff]  ;;  %v13993_v48 = vld [vmem:[#allocation2 + $0xc9] sm:$0xff] }
 0xc25   : > { %18009 = vmatmul.mubr.bf16.vlgmr.msra.gmra.mrb[64].mxu0 %v21605_v8  ;;  %v19906_v8 = vld [vmem:[#allocation6 + $0xac8] sm:$0xff]  }
 0xc26   : > { %18012 = vmatprep.mubr.bf16.mxu0 %v21609_v51  ;;  %18041 = vmatpush3.bf16.msra.mxu0 %v19897_v37  ;;  %v19907_v51 = vld [vmem:[#allocation6 + $0xad0] sm:$0xff]  }
 0xc27   : > { %18042 = vmatprep.subr.bf16.mxu0 %v19898_v16  ;;  %v13986_v37 = vld [vmem:[#allocation2 + $0x51] sm:$0xff] }
 0xc2a   : > { %18043 = vmatpush3.bf16.msra.mxu0 %v19898_v16  ;;  %v14017_v16 = vpack.c.bf16 %v13986_v37, %v13985_v32 }
 0xc2b   : > { %18044 = vmatprep.subr.bf16.mxu0 %v19899_v34 }
 0xc2d   : > { %18013 = vmatmul.mubr.bf16.gmra.mrb[68].mxu0 %v21611_v9  ;;  %v19908_v9 = vld [vmem:[#allocation6 + $0xad8] sm:$0xff]  }
 0xc2e   : > { %18016 = vmatprep.mubr.bf16.mxu0 %v21615_v6  ;;  %18045 = vmatpush3.bf16.msra.mxu0 %v19899_v34  ;;  %v19909_v6 = vld [vmem:[#allocation6 + $0xae0] sm:$0xff]   ;;  %v13987_v34 = vld [vmem:[#allocation2 + $0x69] sm:$0xff] }
 0xc2f   : > { %18046 = vmatprep.subr.bf16.mxu0 %v19900_v12 }
 0xc32   : > { %18047 = vmatpush3.bf16.msra.mxu0 %v19900_v12  ;;  %v13988_v12 = vld [vmem:[#allocation2 + $0x71] sm:$0xff] }
 0xc33   : > { %18048 = vmatprep.subr.bf16.mxu0 %v19901_v22 }
 0xc35   : > { %18017 = vmatmul.mubr.bf16.gmra.mrb[72].mxu0 %v21617_v18  ;;  %v13692_v18 = vld [vmem:[#allocation2 + $0x110] sm:$0xff] }
 0xc36   : > { %18020 = vmatprep.mubr.bf16.mxu0 %v21621_v3  ;;  %18049 = vmatpush3.bf16.msra.mxu0 %v19901_v22  ;;  %v13689_v3 = vld [vmem:[#allocation2 + $0xe8] sm:$0xff] }
 0xc37   : > { %18050 = vmatprep.subr.bf16.mxu0 %v19902_v59  ;;  %v13989_v22 = vld [vmem:[#allocation2 + $0x89] sm:$0xff] }
 0xc3a   : > { %18051 = vmatpush3.bf16.msra.mxu0 %v19902_v59  ;;  %v13990_v59 = vld [vmem:[#allocation2 + $0x91] sm:$0xff] }
 0xc3b   : > { %18052 = vmatprep.subr.bf16.mxu0 %v19903_v14 }
 0xc3d   : > { %18021 = vmatmul.mubr.bf16.gmra.mrb[76].mxu0 %v21623_v23 }
 0xc3e   : > { %18024 = vmatprep.mubr.bf16.mxu0 %v21627_v28  ;;  %18053 = vmatpush3.bf16.msra.mxu0 %v19903_v14  ;;  %v19918_v28 = vld [vmem:[#allocation6 + $0xb28] sm:$0xff]   ;;  %v14018_v14 = vpack.c.bf16 %v13988_v12, %v13987_v34 }
 0xc3f   : > { %18054 = vmatprep.subr.bf16.mxu0 %v19904_v27 }
 0xc42   : > { %18055 = vmatpush3.bf16.msra.mxu0 %v19904_v27  ;;  %v14019_v27 = vpack.c.bf16 %v13990_v59, %v13989_v22 }
 0xc43   : > { %18088 = vmatprep.subr.bf16.mxu0 %v19905_v54 }
 0xc45   : > { %18025 = vmatmul.mubr.bf16.gmra.mrb[80].mxu0 %v21629_v24  ;;  %v13717_v24 = vpack.c.bf16 %v13692_v18, %v21683_v2  ;;  %v19933_v2 = vld [vmem:[#allocation2 + $0x8] sm:$0xff]  ;;  %v14006_v18 = vld [vmem:[#allocation2 + $0x191] sm:$0xff] }
 0xc46   : > { %18028 = vmatprep.mubr.bf16.mxu0 %v21633_v41  ;;  %v19919_v41 = vld [vmem:[#allocation6 + $0xb30] sm:$0xff]   ;;  %v13726_v5 = vpack.c.bf16 %v19933_v2, %v19933_v2 }
 0xc4d   : > { %18029 = vmatmul.mubr.bf16.gmra.mrb[84].mxu0 %v21635_v26  ;;  %v13694_v26 = vld [vmem:[#allocation2 + $0x130] sm:$0xff] }
 0xc4e   : > { %18032 = vmatprep.mubr.bf16.mxu0 %v21639_v43  ;;  %v13696_v43 = vld [vmem:[#allocation2 + $0x150] sm:$0xff] }
 0xc55   : > { %18033 = vmatmul.mubr.bf16.gmra.mrb[88].mxu0 %v21641_v30  ;;  %v13693_v30 = vld [vmem:[#allocation2 + $0x128] sm:$0xff] }
 0xc56   : > { %18036 = vmatprep.mubr.bf16.mxu0 %v21645_v63  ;;  %v13718_v63 = vpack.c.bf16 %v13694_v26, %v13693_v30  ;;  %v14010_v26 = vld [vmem:[#allocation2 + $0x1d1] sm:$0xff] }
 0xc5d   : > { %18037 = vmatmul.mubr.bf16.gmra.mrb[92].mxu0 %v21710_v39 }
 0xc5e   : > { %18056 = vmatprep.mubr.bf16.mxu0 %v21559_v62  ;;  %v19910_v62 = vld [vmem:[#allocation6 + $0xae8] sm:$0xff]  }
 0xc65   : > { %18057 = vmatmul.mubr.bf16.vlgmr.msra.gmra.mrb[64].mxu0 %v21564_v60  ;;  %v19911_v60 = vld [vmem:[#allocation6 + $0xaf0] sm:$0xff]  }
 0xc66   : > { %18060 = vmatprep.mubr.bf16.mxu0 %v21566_v31  ;;  %18089 = vmatpush3.bf16.msra.mxu0 %v19905_v54  ;;  %v19912_v31 = vld [vmem:[#allocation6 + $0xaf8] sm:$0xff]   ;;  %v13991_v54 = vld [vmem:[#allocation2 + $0xa9] sm:$0xff] }
 0xc67   : > { %18090 = vmatprep.subr.bf16.mxu0 %v19906_v8 }
 0xc6a   : > { %18091 = vmatpush3.bf16.msra.mxu0 %v19906_v8  ;;  %v13994_v8 = vld [vmem:[#allocation2 + $0xd1] sm:$0xff] }
 0xc6b   : > { %18092 = vmatprep.subr.bf16.mxu0 %v19907_v51 }
 0xc6d   : > { %18061 = vmatmul.mubr.bf16.gmra.mrb[68].mxu0 %v21570_v13  ;;  %v19913_v13 = vld [vmem:[#allocation6 + $0xb00] sm:$0xff]  }
 0xc6e   : > { %18064 = vmatprep.mubr.bf16.mxu0 %v21572_v17  ;;  %18093 = vmatpush3.bf16.msra.mxu0 %v19907_v51  ;;  %v13403_v17 = vld [vmem:[#allocation2 + $0x227] sm:$0xff]  ;;  %v14020_v51 = vpack.c.bf16 %v13992_v0, %v13991_v54 }
 0xc6f   : > { %18094 = vmatprep.subr.bf16.mxu0 %v19908_v9 }
 0xc72   : > { %18095 = vmatpush3.bf16.msra.mxu0 %v19908_v9  ;;  %v14021_v9 = vpack.c.bf16 %v13994_v8, %v13993_v48 }
 0xc73   : > { %18096 = vmatprep.subr.bf16.mxu0 %v19909_v6 }
 0xc75   : > { %18065 = vmatmul.mubr.bf16.gmra.mrb[72].mxu0 %v21576_v40  ;;  %v13404_v40 = vld [vmem:[#allocation2 + $0x22f] sm:$0xff] }
 0xc76   : > { %18068 = vmatprep.mubr.bf16.mxu0 %v21578_v55  ;;  %18097 = vmatpush3.bf16.msra.mxu0 %v19909_v6  ;;  %v13420_v55 = vpack.c.bf16 %v13404_v40, %v13403_v17  ;;  %v13995_v6 = vld [vmem:[#allocation2 + $0xe9] sm:$0xff] }
 0xc77   : > { %18098 = vmatprep.subr.bf16.mxu0 %v19910_v62  ;;  %v13999_v40 = vld [vmem:[#allocation2 + $0x129] sm:$0xff] }
 0xc7a   : > { %18099 = vmatpush3.bf16.msra.mxu0 %v19910_v62  ;;  %v13996_v62 = vld [vmem:[#allocation2 + $0xf1] sm:$0xff] }
 0xc7b   : > { %18100 = vmatprep.subr.bf16.mxu0 %v19911_v60 }
 0xc7d   : > { %18069 = vmatmul.mubr.bf16.gmra.mrb[76].mxu0 %v21582_v47  ;;  %v19914_v47 = vld [vmem:[#allocation6 + $0xb08] sm:$0xff]  }
 0xc7e   : > { %18072 = vmatprep.mubr.bf16.mxu0 %v21584_v20  ;;  %18101 = vmatpush3.bf16.msra.mxu0 %v19911_v60  ;;  %v19915_v20 = vld [vmem:[#allocation6 + $0xb10] sm:$0xff]  }
 0xc7f   : > { %18102 = vmatprep.subr.bf16.mxu0 %v19912_v31  ;;  %v13997_v60 = vld [vmem:[#allocation2 + $0x109] sm:$0xff] }
 0xc82   : > { %18103 = vmatpush3.bf16.msra.mxu0 %v19912_v31  ;;  %v13998_v31 = vld [vmem:[#allocation2 + $0x111] sm:$0xff] }
 0xc83   : > { %18136 = vmatprep.subr.bf16.mxu0 %v19913_v13  ;;  %v14023_v17 = vpack.c.bf16 %v13998_v31, %v13997_v60 }
 0xc85   : > { %18073 = vmatmul.mubr.bf16.gmra.mrb[80].mxu0 %v21588_v35  ;;  %v13686_v35 = vld [vmem:[#allocation2 + $0xb0] sm:$0xff] }
 0xc86   : > { %18076 = vmatprep.mubr.bf16.mxu0 %v21590_v61  ;;  %v13714_v61 = vpack.c.bf16 %v13686_v35, %v21672_v45  ;;  %v13704_v45 = vld [vmem:[#allocation2 + $0x1d0] sm:$0xff] }
 0xc87   : > { %v13723_v58 = vpack.c.bf16 %v13704_v45, %v13703_v57 }
 0xc8d   : > { %18077 = vmatmul.mubr.bf16.gmra.mrb[84].mxu0 %v21594_v4  ;;  %v19916_v4 = vld [vmem:[#allocation6 + $0xb18] sm:$0xff]  }
 0xc8e   : > { %18080 = vmatprep.mubr.bf16.mxu0 %v21596_v53  ;;  %v19917_v53 = vld [vmem:[#allocation6 + $0xb20] sm:$0xff]  }
 0xc95   : > { %18081 = vmatmul.mubr.bf16.gmra.mrb[88].mxu0 %v21600_v46  ;;  %v13690_v46 = vld [vmem:[#allocation2 + $0xf0] sm:$0xff] }
 0xc96   : > { %18084 = vmatprep.mubr.bf16.mxu0 %v21663_v10  ;;  %v13716_v23 = vpack.c.bf16 %v13690_v46, %v13689_v3  ;;  %v13695_v10 = vld [vmem:[#allocation2 + $0x148] sm:$0xff] }
 0xc97   : > { %v13719_v15 = vpack.c.bf16 %v13696_v43, %v13695_v10  ;;  %v14005_v46 = vld [vmem:[#allocation2 + $0x189] sm:$0xff]  ;;  %v14012_v10 = vld [vmem:[#allocation2 + $0x1f1] sm:$0xff] }
 0xc9d   : > { %18085 = vmatmul.mubr.bf16.gmra.mrb[92].mxu0 %v13420_v55  ;;  %v14000_v55 = vld [vmem:[#allocation2 + $0x131] sm:$0xff] }
 0xc9e   : > { %18104 = vmatprep.mubr.bf16.mxu0 %v21666_v52  ;;  %v13700_v52 = vld [vmem:[#allocation2 + $0x190] sm:$0xff]  ;;  %v14024_v35 = vpack.c.bf16 %v14000_v55, %v13999_v40 }
 0xca5   : > { %18105 = vmatmul.mubr.bf16.vlgmr.msra.gmra.mrb[64].mxu0 %v21668_v1  ;;  %v13699_v1 = vld [vmem:[#allocation2 + $0x188] sm:$0xff] }
 0xca6   : > { %18108 = vmatprep.mubr.bf16.mxu0 %v21674_v19  ;;  %18137 = vmatpush3.bf16.msra.mxu0 %v19913_v13  ;;  %v13721_v29 = vpack.c.bf16 %v13700_v52, %v13699_v1  ;;  %v13722_v19 = vpack.c.bf16 %v13702_v49, %v13701_v25  ;;  %v14022_v13 = vpack.c.bf16 %v13996_v62, %v13995_v6 }
 0xca7   : > { %18138 = vmatprep.subr.bf16.mxu0 %v19914_v47 }
 0xcaa   : > { %18139 = vmatpush3.bf16.msra.mxu0 %v19914_v47  ;;  %v14001_v47 = vld [vmem:[#allocation2 + $0x149] sm:$0xff] }
 0xcab   : > { %18140 = vmatprep.subr.bf16.mxu0 %v19915_v20 }
 0xcad   : > { %18109 = vmatmul.mubr.bf16.gmra.mrb[68].mxu0 %v13714_v61 }
 0xcae   : > { %18112 = vmatprep.mubr.bf16.mxu0 %v21679_v21  ;;  %18141 = vmatpush3.bf16.msra.mxu0 %v19915_v20  ;;  %v13724_v21 = vpack.c.bf16 %v13706_v44, %v13705_v42  ;;  %v14002_v20 = vld [vmem:[#allocation2 + $0x151] sm:$0xff] }
 0xcaf   : > { %18142 = vmatprep.subr.bf16.mxu0 %v19916_v4  ;;  %v14025_v61 = vpack.c.bf16 %v14002_v20, %v14001_v47 }
 0xcb2   : > { %18143 = vmatpush3.bf16.msra.mxu0 %v19916_v4  ;;  %v14003_v4 = vld [vmem:[#allocation2 + $0x169] sm:$0xff] }
 0xcb3   : > { %18144 = vmatprep.subr.bf16.mxu0 %v19917_v53 }
 0xcb5   : > { %18113 = vmatmul.mubr.bf16.gmra.mrb[72].mxu0 %v13716_v23  ;;  %v14027_v23 = vpack.c.bf16 %v14006_v18, %v14005_v46 }
 0xcb6   : > { %18116 = vmatprep.mubr.bf16.mxu0 %v13717_v24  ;;  %18145 = vmatpush3.bf16.msra.mxu0 %v19917_v53  ;;  %v14004_v53 = vld [vmem:[#allocation2 + $0x171] sm:$0xff] }
 0xcb7   : > { %18146 = vmatprep.subr.bf16.mxu0 %v19918_v28  ;;  %v14026_v3 = vpack.c.bf16 %v14004_v53, %v14003_v4  ;;  %v14008_v24 = vld [vmem:[#allocation2 + $0x1b1] sm:$0xff] }
 0xcba   : > { %18147 = vmatpush3.bf16.msra.mxu0 %v19918_v28  ;;  %v14007_v28 = vld [vmem:[#allocation2 + $0x1a9] sm:$0xff] }
 0xcbb   : > { %18148 = vmatprep.subr.bf16.mxu0 %v19919_v41  ;;  %v14028_v43 = vpack.c.bf16 %v14008_v24, %v14007_v28 }
 0xcbd   : > { %18117 = vmatmul.mubr.bf16.gmra.mrb[76].mxu0 %v13718_v63  ;;  %v14011_v63 = vld [vmem:[#allocation2 + $0x1e9] sm:$0xff] }
 0xcbe   : > { %18120 = vmatprep.mubr.bf16.mxu0 %v13719_v15  ;;  %18149 = vmatpush3.bf16.msra.mxu0 %v19919_v41  ;;  %v14009_v41 = vld [vmem:[#allocation2 + $0x1c9] sm:$0xff] }
 0xcbf   : > { %18150 = vmatprep.subr.bf16.mxu0 %v19920_v56  ;;  %v14029_v30 = vpack.c.bf16 %v14010_v26, %v14009_v41  ;;  %v14015_v15 = vld [vmem:[#allocation2 + $0x229] sm:$0xff] }
 0xcc0   : > { %v14032_v52 = vpack.c.bf16 %v14016_v50, %v14015_v15 }
 0xcc2   : > { %18151 = vmatpush3.bf16.msra.mxu0 %v19920_v56  ;;  %v14030_v56 = vpack.c.bf16 %v14012_v10, %v14011_v63 }
 0xcc5   : > { %18121 = vmatmul.mubr.bf16.gmra.mrb[80].mxu0 %v13720_v36 }
 0xcc6   : > { %18124 = vmatprep.mubr.bf16.mxu0 %v13721_v29 }
 0xccd   : > { %18125 = vmatmul.mubr.bf16.gmra.mrb[84].mxu0 %v13722_v19 }
 0xcce   : > { %18128 = vmatprep.mubr.bf16.mxu0 %v13723_v58 }
 0xcd5   : > { %18129 = vmatmul.mubr.bf16.gmra.mrb[88].mxu0 %v13724_v21 }
 0xcd6   : > { %18132 = vmatprep.mubr.bf16.mxu0 %v13725_v11 }
 0xcdd   : > { %18133 = vmatmul.mubr.bf16.gmra.mrb[92].mxu0 %v13726_v5 }
 0xcde   : > { %18152 = vmatprep.mubr.bf16.mxu0 %v14017_v16 }
 0xce5   : > { %18153 = vmatmul.mubr.bf16.vlgmr.msra.gmra.mrb[64].mxu0 %v14018_v14 }
 0xce6   : > { %18156 = vmatprep.mubr.bf16.mxu0 %v14019_v27 }
 0xced   : > { %18157 = vmatmul.mubr.bf16.gmra.mrb[68].mxu0 %v14020_v51 }
 0xcee   : > { %18160 = vmatprep.mubr.bf16.mxu0 %v14021_v9 }
 0xcf5   : > { %18161 = vmatmul.mubr.bf16.gmra.mrb[72].mxu0 %v14022_v13 }
 0xcf6   : > { %18164 = vmatprep.mubr.bf16.mxu0 %v14023_v17 }
 0xcfd   : > { %18165 = vmatmul.mubr.bf16.gmra.mrb[76].mxu0 %v14024_v35 }
 0xcfe   : > { %18168 = vmatprep.mubr.bf16.mxu0 %v14025_v61 }
 0xd05   : > { %18169 = vmatmul.mubr.bf16.gmra.mrb[80].mxu0 %v14026_v3 }
 0xd06   : > { %18172 = vmatprep.mubr.bf16.mxu0 %v14027_v23 }
 0xd0d   : > { %18173 = vmatmul.mubr.bf16.gmra.mrb[84].mxu0 %v14028_v43 }
 0xd0e   : > { %18176 = vmatprep.mubr.bf16.mxu0 %v14029_v30 }
 0xd15   : > { %18177 = vmatmul.mubr.bf16.gmra.mrb[88].mxu0 %v14030_v56 }
 0xd16   : > { %18180 = vmatprep.mubr.bf16.mxu0 %v21710_v39 }
 0xd1d   : > { %18181 = vmatmul.mubr.bf16.gmra.mrb[92].mxu0 %v14032_v52 }
 0xd1e   : > { %20033 = shalt.err (!%p20030_p2)
}
 0xd1f   : > { %s20034_s6 = scalar_lea.hbm %s21741_s7, 4096  ;;  %s20038_s14 = scalar_lea.hbm %s21900_s3, 8192 }
 0xd20   : > { %p20035_p13 = scmp.ne.s32.totalorder %s21741_s7, %s20034_s6  ;;  %p20039_p4 = scmp.lt.u32.totalorder %s21741_s7, %s21900_s3 }
 0xd21   : > { %p20040_p7 = scmp.lt.u32.totalorder %s20038_s14, %s20034_s6  ;;  %p20042_p11 = scmp.lt.u32.totalorder %s20034_s6, %s21741_s7 }
 0xd22   : > { %p20036_p6 = pnand %p20035_p13, %p21915_p0 }
 0xd23   : > { %p20041_p8 = por %p20040_p7, %p20039_p4 }
 0xd24   : > { %p20037_p10 = pneg %p20036_p6 }
 0xd25   : > { %p20043_p1 = por %p20042_p11, %p20041_p8 }
 0xd27   : > { %p20044_p3 = pnand %p20043_p1, %p20037_p10 }
 0xd29   : > { %20047 = shalt.err (!%p20044_p3)
}
 0xd2a   : > { %s20136_s25 = smov 128   ;;  %s20137_s26 = smov 8   ;;  %v21773_v39 = vld [vmem:[#allocation8 + $0x4] ss:$0 sm:$0xff] }
 0xd2b   : > { %19490 = dma.vmem_to_hbm [thread:$0]  (%p21915_p0), %s21744_s8, 4096, %s21741_s7, %s14396_s27, %s20136_s25, %s20136_s25, %s20137_s26  }
 0xd2c   : > { %s21780_s28 = scalar_lea.vmem [#allocation10], %s20340_s11  ;;  %s21846_s27 = scalar_lea.hbm %s21901_s4, %s14942_s23 }
 0xd2d   : > { %s14430_s11 = sshll.u32 %s21780_s28, 4  ;;  %s14401_s29 = scalar_lea.sflag [#allocation11], %s20337_s10  ;;  %s21848_s11 = int_to_ptr.vmem [resolvable:$true] %s14430_s11 }
 0xd2e   : > { %s20048_s30 = scalar_lea.vmem %s21848_s11, 4096  ;;  %s20138_s6 = smov [#allocation10]  }
 0xd2f   : > { %p20049_p5 = scmp.ne.s32.totalorder %s21848_s11, %s20048_s30  ;;  %s20052_s19 = sshll.u32 %s20138_s6, 4  ;;  %s20053_s19 = int_to_ptr.vmem [resolvable:$false] %s20052_s19 }
 0xd30   : > { %s20054_s9 = scalar_lea.vmem %s20053_s19, 8192  ;;  %p20055_p2 = scmp.lt.s32.totalorder %s21848_s11, %s20053_s19 }
 0xd31   : > { %p20050_p9 = pnand %p20049_p5, %p21915_p0  ;;  %p20056_p13 = scmp.lt.s32.totalorder %s20054_s9, %s20048_s30 }
 0xd33   : > { %p20051_p12 = pneg %p20050_p9  ;;  %p20057_p6 = por %p20056_p13, %p20055_p2 }
 0xd35   : > { %p20058_p10 = pnand %p20057_p6, %p20051_p12 }
 0xdb8   : > { %v18154_v33 = vpop.f32.mrb[64].mxu0 }
 0xdb9   : > { %v14301_v36 = vadd.f32 %v18154_v33, %v21773_v39  ;;  %v14132_v1 = vpop.f32.mrb[65].mxu0 }
 0xdba   : > { %v14299_v29 = vadd.f32 %v21773_v39, %v14132_v1  ;;  %v18155_v49 = vpop.f32.mrb[66].mxu0 }
 0xdbb   : > { %v14333_v45 = vmax.f32 %v14301_v36, 0.0  ;;  %v14302_v25 = vadd.f32 %v18155_v49, %v21773_v39  ;;  %v14135_v19 = vpop.f32.mrb[67].mxu0 }
 0xdbc   : > { %v14331_v57 = vmax.f32 %v14299_v29, 0.0  ;;  %v14300_v58 = vadd.f32 %v21773_v39, %v14135_v19 }
 0xdbd   : > { %14365 = vst [vmem:[%s21780_s28 + $0x10] sm:$0xff] %v14333_v45  ;;  %v14334_v44 = vmax.f32 %v14302_v25, 0.0 }
 0xdbe   : > { %14363 = vst [vmem:[%s21780_s28] sm:$0xff] %v14331_v57  ;;  %v14332_v7 = vmax.f32 %v14300_v58, 0.0 }
 0xdbf   : > { %14366 = vst [vmem:[%s21780_s28 + $0x18] sm:$0xff] %v14334_v44 }
 0xdc0   : > { %14364 = vst [vmem:[%s21780_s28 + $0x8] sm:$0xff] %v14332_v7  ;;  %v18158_v42 = vpop.f32.mrb[68].mxu0 }
 0xdc1   : > { %v14305_v21 = vadd.f32 %v18158_v42, %v21773_v39  ;;  %v14148_v38 = vpop.f32.mrb[69].mxu0 }
 0xdc2   : > { %v14303_v11 = vadd.f32 %v21773_v39, %v14148_v38  ;;  %v18159_v2 = vpop.f32.mrb[70].mxu0 }
 0xdc3   : > { %v14337_v5 = vmax.f32 %v14305_v21, 0.0  ;;  %v14306_v32 = vadd.f32 %v18159_v2, %v21773_v39  ;;  %v14151_v37 = vpop.f32.mrb[71].mxu0 }
 0xdc4   : > { %v14335_v16 = vmax.f32 %v14303_v11, 0.0  ;;  %v14304_v34 = vadd.f32 %v21773_v39, %v14151_v37 }
 0xdc5   : > { %14369 = vst [vmem:[%s21780_s28 + $0x30] sm:$0xff] %v14337_v5  ;;  %v14338_v12 = vmax.f32 %v14306_v32, 0.0 }
 0xdc6   : > { %14367 = vst [vmem:[%s21780_s28 + $0x20] sm:$0xff] %v14335_v16  ;;  %v14336_v22 = vmax.f32 %v14304_v34, 0.0 }
 0xdc7   : > { %14370 = vst [vmem:[%s21780_s28 + $0x38] sm:$0xff] %v14338_v12 }
 0xdc8   : > { %14368 = vst [vmem:[%s21780_s28 + $0x28] sm:$0xff] %v14336_v22  ;;  %v18162_v59 = vpop.f32.mrb[72].mxu0 }
 0xdc9   : > { %v14309_v14 = vadd.f32 %v18162_v59, %v21773_v39  ;;  %v14164_v27 = vpop.f32.mrb[73].mxu0 }
 0xdca   : > { %v14307_v54 = vadd.f32 %v21773_v39, %v14164_v27  ;;  %v18163_v0 = vpop.f32.mrb[74].mxu0 }
 0xdcb   : > { %v14341_v48 = vmax.f32 %v14309_v14, 0.0  ;;  %v14310_v8 = vadd.f32 %v18163_v0, %v21773_v39  ;;  %v14167_v51 = vpop.f32.mrb[75].mxu0 }
 0xdcc   : > { %v14339_v9 = vmax.f32 %v14307_v54, 0.0  ;;  %v14308_v6 = vadd.f32 %v21773_v39, %v14167_v51 }
 0xdcd   : > { %14373 = vst [vmem:[%s21780_s28 + $0x50] sm:$0xff] %v14341_v48  ;;  %v14342_v62 = vmax.f32 %v14310_v8, 0.0 }
 0xdce   : > { %14371 = vst [vmem:[%s21780_s28 + $0x40] sm:$0xff] %v14339_v9  ;;  %v14340_v60 = vmax.f32 %v14308_v6, 0.0 }
 0xdcf   : > { %14374 = vst [vmem:[%s21780_s28 + $0x58] sm:$0xff] %v14342_v62 }
 0xdd0   : > { %14372 = vst [vmem:[%s21780_s28 + $0x48] sm:$0xff] %v14340_v60  ;;  %v18166_v31 = vpop.f32.mrb[76].mxu0 }
 0xdd1   : > { %v14313_v13 = vadd.f32 %v18166_v31, %v21773_v39  ;;  %v14180_v17 = vpop.f32.mrb[77].mxu0 }
 0xdd2   : > { %v14311_v40 = vadd.f32 %v21773_v39, %v14180_v17  ;;  %v18167_v55 = vpop.f32.mrb[78].mxu0 }
 0xdd3   : > { %v14345_v47 = vmax.f32 %v14313_v13, 0.0  ;;  %v14314_v20 = vadd.f32 %v18167_v55, %v21773_v39  ;;  %v14183_v35 = vpop.f32.mrb[79].mxu0 }
 0xdd4   : > { %v14343_v61 = vmax.f32 %v14311_v40, 0.0  ;;  %v14312_v4 = vadd.f32 %v21773_v39, %v14183_v35 }
 0xdd5   : > { %14377 = vst [vmem:[%s21780_s28 + $0x70] sm:$0xff] %v14345_v47  ;;  %v14346_v53 = vmax.f32 %v14314_v20, 0.0 }
 0xdd6   : > { %14375 = vst [vmem:[%s21780_s28 + $0x60] sm:$0xff] %v14343_v61  ;;  %v14344_v46 = vmax.f32 %v14312_v4, 0.0 }
 0xdd7   : > { %14378 = vst [vmem:[%s21780_s28 + $0x78] sm:$0xff] %v14346_v53 }
 0xdd8   : > { %14376 = vst [vmem:[%s21780_s28 + $0x68] sm:$0xff] %v14344_v46  ;;  %v18170_v18 = vpop.f32.mrb[80].mxu0 }
 0xdd9   : > { %v14317_v3 = vadd.f32 %v18170_v18, %v21773_v39  ;;  %v14196_v23 = vpop.f32.mrb[81].mxu0 }
 0xdda   : > { %v14315_v28 = vadd.f32 %v21773_v39, %v14196_v23  ;;  %v18171_v24 = vpop.f32.mrb[82].mxu0 }
 0xddb   : > { %v14349_v41 = vmax.f32 %v14317_v3, 0.0  ;;  %v14318_v26 = vadd.f32 %v18171_v24, %v21773_v39  ;;  %v14199_v43 = vpop.f32.mrb[83].mxu0 }
 0xddc   : > { %v14347_v30 = vmax.f32 %v14315_v28, 0.0  ;;  %v14316_v63 = vadd.f32 %v21773_v39, %v14199_v43 }
 0xddd   : > { %14381 = vst [vmem:[%s21780_s28 + $0x90] sm:$0xff] %v14349_v41  ;;  %v14350_v10 = vmax.f32 %v14318_v26, 0.0 }
 0xdde   : > { %14379 = vst [vmem:[%s21780_s28 + $0x80] sm:$0xff] %v14347_v30  ;;  %v14348_v56 = vmax.f32 %v14316_v63, 0.0 }
 0xddf   : > { %14382 = vst [vmem:[%s21780_s28 + $0x98] sm:$0xff] %v14350_v10 }
 0xde0   : > { %14380 = vst [vmem:[%s21780_s28 + $0x88] sm:$0xff] %v14348_v56  ;;  %v18174_v15 = vpop.f32.mrb[84].mxu0 }
 0xde1   : > { %v14321_v50 = vadd.f32 %v18174_v15, %v21773_v39  ;;  %v14212_v52 = vpop.f32.mrb[85].mxu0 }
 0xde2   : > { %v14319_v33 = vadd.f32 %v21773_v39, %v14212_v52  ;;  %v18175_v36 = vpop.f32.mrb[86].mxu0 }
 0xde3   : > { %v14353_v1 = vmax.f32 %v14321_v50, 0.0  ;;  %v14322_v29 = vadd.f32 %v18175_v36, %v21773_v39  ;;  %v14215_v49 = vpop.f32.mrb[87].mxu0 }
 0xde4   : > { %v14351_v45 = vmax.f32 %v14319_v33, 0.0  ;;  %v14320_v25 = vadd.f32 %v21773_v39, %v14215_v49 }
 0xde5   : > { %14385 = vst [vmem:[%s21780_s28 + $0xb0] sm:$0xff] %v14353_v1  ;;  %v14354_v19 = vmax.f32 %v14322_v29, 0.0 }
 0xde6   : > { %14383 = vst [vmem:[%s21780_s28 + $0xa0] sm:$0xff] %v14351_v45  ;;  %v14352_v57 = vmax.f32 %v14320_v25, 0.0 }
 0xde7   : > { %14386 = vst [vmem:[%s21780_s28 + $0xb8] sm:$0xff] %v14354_v19 }
 0xde8   : > { %14384 = vst [vmem:[%s21780_s28 + $0xa8] sm:$0xff] %v14352_v57  ;;  %v18178_v58 = vpop.f32.mrb[88].mxu0 }
 0xde9   : > { %v14325_v44 = vadd.f32 %v18178_v58, %v21773_v39  ;;  %v14228_v7 = vpop.f32.mrb[89].mxu0 }
 0xdea   : > { %v14323_v42 = vadd.f32 %v21773_v39, %v14228_v7  ;;  %v18179_v21 = vpop.f32.mrb[90].mxu0 }
 0xdeb   : > { %v14357_v38 = vmax.f32 %v14325_v44, 0.0  ;;  %v14326_v11 = vadd.f32 %v18179_v21, %v21773_v39  ;;  %v14231_v2 = vpop.f32.mrb[91].mxu0 }
 0xdec   : > { %v14355_v5 = vmax.f32 %v14323_v42, 0.0  ;;  %v14324_v32 = vadd.f32 %v21773_v39, %v14231_v2 }
 0xded   : > { %14389 = vst [vmem:[%s21780_s28 + $0xd0] sm:$0xff] %v14357_v38  ;;  %v14358_v37 = vmax.f32 %v14326_v11, 0.0 }
 0xdee   : > { %14387 = vst [vmem:[%s21780_s28 + $0xc0] sm:$0xff] %v14355_v5  ;;  %v14356_v16 = vmax.f32 %v14324_v32, 0.0 }
 0xdef   : > { %14390 = vst [vmem:[%s21780_s28 + $0xd8] sm:$0xff] %v14358_v37 }
 0xdf0   : > { %14388 = vst [vmem:[%s21780_s28 + $0xc8] sm:$0xff] %v14356_v16  ;;  %v18182_v34 = vpop.f32.mrb[92].mxu0 }
 0xdf1   : > { %v14329_v12 = vadd.f32 %v18182_v34, %v21773_v39  ;;  %v14244_v22 = vpop.f32.mrb[93].mxu0 }
 0xdf2   : > { %v14327_v59 = vadd.f32 %v21773_v39, %v14244_v22  ;;  %v18183_v14 = vpop.f32.mrb[94].mxu0 }
 0xdf3   : > { %v14361_v27 = vmax.f32 %v14329_v12, 0.0  ;;  %v14330_v54 = vadd.f32 %v18183_v14, %v21773_v39  ;;  %v14247_v0 = vpop.f32.mrb[95].mxu0 }
 0xdf4   : > { %v14359_v48 = vmax.f32 %v14327_v59, 0.0  ;;  %v14328_v8 = vadd.f32 %v21773_v39, %v14247_v0 }
 0xdf5   : > { %14393 = vst [vmem:[%s21780_s28 + $0xf0] sm:$0xff] %v14361_v27  ;;  %v14362_v51 = vmax.f32 %v14330_v54, 0.0 }
 0xdf6   : > { %14391 = vst [vmem:[%s21780_s28 + $0xe0] sm:$0xff] %v14359_v48  ;;  %v14360_v9 = vmax.f32 %v14328_v8, 0.0 }
 0xdf7   : > { %14394 = vst [vmem:[%s21780_s28 + $0xf8] sm:$0xff] %v14362_v51 }
 0xdf8   : > { %14392 = vst [vmem:[%s21780_s28 + $0xe8] sm:$0xff] %v14360_v9 }
 0xdf9   : > { %20061 = shalt.err (!%p20058_p10)
}
 0xdfa   : > { %s20062_s23 = scalar_lea.hbm %s21846_s27, 4096  ;;  %s20066_s21 = scalar_lea.hbm %s21901_s4, 8192 }
 0xdfb   : > { %p20063_p4 = scmp.ne.s32.totalorder %s21846_s27, %s20062_s23  ;;  %p20067_p11 = scmp.lt.u32.totalorder %s21846_s27, %s21901_s4 }
 0xdfc   : > { %p20068_p1 = scmp.lt.u32.totalorder %s20066_s21, %s20062_s23  ;;  %p20070_p5 = scmp.lt.u32.totalorder %s20062_s23, %s21846_s27 }
 0xdfd   : > { %p20064_p7 = pnand %p20063_p4, %p21915_p0 }
 0xdfe   : > { %p20069_p3 = por %p20068_p1, %p20067_p11 }
 0xdff   : > { %p20065_p8 = pneg %p20064_p7 }
 0xe00   : > { %p20071_p9 = por %p20070_p5, %p20069_p3 }
 0xe02   : > { %p20072_p12 = pnand %p20071_p9, %p20065_p8 }
 0xe04   : > { %20075 = shalt.err (!%p20072_p12)
}
 0xe05   : > { %19491 = dma.vmem_to_hbm [thread:$0]  (%p21915_p0), %s21848_s11, 4096, %s21846_s27, %s14401_s29, %s20136_s25, %s20136_s25, %s20137_s26  }
 0xe06 PF: > { %s14445_s7 = sand.u32 1, %s20110_s15   ;;  %p21916_p2 = scmp.ne.s32.totalorder %s21906_s22, 0 }
 0xe07   : > { %p21917_p13 = scmp.ge.s32.totalorder %s20122_s18, 2  ;;  %s14446_s8 = scalar_lea.sflag [#allocation5], %s14445_s7 }
 0xe09   : > { %p19506_p6 = pnand %p21917_p13, %p21916_p2 }
 0xe0b   : > { %20101 = dma.done.wait (!%p19506_p6), %s14446_s8, 4096  }
 0xe0c   : > { %20103 = vsyncadd (!%p19506_p6), %s14446_s8, 4294963200  ;;  %s14455_s24 = scalar_lea.sflag [#allocation11], %s14445_s7 }
 0xe0d   : > { %20105 = dma.done.wait (!%p19506_p6), %s14455_s24, 4096  }
 0xe0e   : > { %20107 = vsyncadd (!%p19506_p6), %s14455_s24, 4294963200  ;;  %p22_p0 = scmp.ge.s32.totalorder %s20275_s12, 4   ;;  %s21918_s15 = smov %s20114_s16 }
 0xe0f   : > { %s21919_s16 = smov %s20118_s17  ;;  %s21920_s17 = smov %s20284_s20 }
 0xe10   : > { %s21921_s18 = smov %s20275_s12  ;;  %24 = sbr.rel (!%p22_p0) target bundleno = 8 (0x8), region = 152 }
 0xe17   :  { %14460 = vsyncpa [#allocation4], 1 }
 0xe18   :  { %14462 = vsyncpa [#allocation4 + $0x1], 1 }
 0xe19   :  { %14463 = vsyncpa [#allocation7], 1 }
 0xe1a   :  { %14464 = vsyncpa [#allocation5], 1 }
 0xe1b   :  { %14466 = vsyncpa [#allocation5 + $0x1], 1 }
 0xe1c   :  { %14467 = vsyncpa [#allocation11], 1 }
 0xe1d   :  { %14469 = vsyncpa [#allocation11 + $0x1], 1 }

</bundles_post_ra>
